<compile_context>
chip_gen: v6e
topology: v6e:2x2x1
jax: 0.10.0
libtpu: 0.0.40
codegen_flags: <defaults>
</compile_context>

<pallas_src>
import functools
import math

import jax
import jax.numpy as jnp
from jax.experimental import pallas as pl
from jax.experimental.pallas import tpu as pltpu

_LANE_B = 128  # images per grid step, mapped to the vreg lane dimension


def _hog_kernel(xp_ref, out_ref, scr_ref, *,
                orientations, transform_sqrt, h, w, cr, cc):
    # xp_ref : (H+2, W+2, LB)   zero-padded images, batch in lanes
    # out_ref: (O, Hc, Wc, LB)  pooled orientation histograms, batch in lanes
    # scr_ref: (O, Hc, Wc*cc, LB) row-pooled histograms (VMEM scratch)
    hc, wc = h // cr, w // cc
    h_used, w_used = hc * cr, wc * cc
    lb = xp_ref.shape[-1]

    xp = xp_ref[...]
    if transform_sqrt:
        # sqrt(0) == 0, so sqrt-after-pad matches torch's pad-after-sqrt.
        xp = jnp.sqrt(xp)

    # --- Fully separable Sobel (cross-correlation, padding=1) ---------------
    #   weight[0] = [[1,0,-1],[2,0,-2],[1,0,-1]],  weight[1] = weight[0].T
    # Column pass over all H+2 rows (3 sublane-shifted temps, shared):
    xl = xp[:, 0:w, :]
    xm = xp[:, 1:w + 1, :]
    xr = xp[:, 2:w + 2, :]
    d = xl - xr                        # (H+2, W, LB)
    s = xl + 2.0 * xm + xr             # (H+2, W, LB)
    # Row pass = free leading-dim slices:
    g0 = d[0:h] + 2.0 * d[1:h + 1] + d[2:h + 2]    # (H, W, LB)
    g1 = s[0:h] - s[2:h + 2]                       # (H, W, LB)

    mag = jnp.sqrt(g0 * g0 + g1 * g1)              # gxy.norm(dim=1)
    # torch: atan2(gxy[:,0], gxy[:,1]) -> arctan2(g0, g1).  The O/pi scale is
    # fused into one constant (last-ulp bin-boundary ties may differ vs torch's
    # "/ pi * O"; fine for tolerance-level comparison).
    ps = jnp.arctan2(g0, g1) * jnp.float32(orientations / math.pi)
    fl_f = jnp.floor(ps)
    is_int = ps == fl_f                            # floor == ceil pixels

    # ps lies in (-O, O] so fl_f lies in [-O, O]: one negative correction plus
    # the >= O check implements Python-style `% O` (no int cast needed —
    # comparisons below are exact on small float integers).
    fl_f = jnp.where(fl_f < 0, fl_f + orientations, fl_f)
    fl_f = jnp.where(fl_f >= orientations, fl_f - orientations, fl_f)

    # Hoisted crop to the pooled region (no-op when H, W divide evenly).
    mag = mag[:h_used, :w_used, :]
    fl_f = fl_f[:h_used, :w_used, :]
    is_int = is_int[:h_used, :w_used, :]
    zero = jnp.zeros_like(mag)

    # Per-bin floor masses (9 extra live (H,W,128) maps ~1 MiB at 16x16).
    m = [jnp.where(fl_f == jnp.float32(o), mag, zero)
         for o in range(orientations)]

    # scatter_(floor, mag) + scatter_add_(ceil, mag):
    #   bin o gets m_o (floor) plus, from the ceil scatter, m_o again when
    #   floor==ceil (integer ps) or m_{(o-1)%O} otherwise (ceil = floor+1).
    # Rows are pooled immediately (free leading-dim reshape + VPU adds) to keep
    # live data small; columns are pooled after the loop.
    for o in range(orientations):
        prev = m[(o - 1) % orientations]
        contrib = m[o] + jnp.where(is_int, m[o], prev)
        rsh = contrib.reshape(hc, cr, w_used, lb)   # last two dims untouched
        ph = rsh[:, 0]
        for r in range(1, cr):
            ph = ph + rsh[:, r]
        scr_ref[o] = ph                             # (Hc, Wc*cc, LB)

    # Column pooling via sublane-strided reads from the scratch, then a single
    # lane-dense store of the whole (O, Hc, Wc, LB) slab.
    acc = scr_ref[:, :, pl.ds(0, wc, stride=cc), :]
    for k in range(1, cc):
        acc = acc + scr_ref[:, :, pl.ds(k, wc, stride=cc), :]
    out_ref[...] = acc * jnp.float32(1.0 / (cr * cc))


def hog_forward(x, *, orientations=9, pixels_per_cell=(4, 4),
                cells_per_block=(2, 2), block_norm="L2-Hys",
                transform_sqrt=False, feature_vector=True):
    """Equivalent of HOGLayer.forward for NCHW input with C == 1."""
    # cells_per_block / block_norm are stored by the torch module but unused
    # in its forward().
    del cells_per_block, block_norm
    n, c, h, w = x.shape
    assert c == 1, "HOGLayer conv weight has a single input channel"
    cr, cc = pixels_per_cell
    hc, wc = h // cr, w // cc

    lb = _LANE_B
    n_pad = pl.cdiv(n, lb) * lb
    n_blocks = n_pad // lb

    # Layout glue: transpose to batch-last and fuse the conv zero-pad and the
    # lane padding of the batch into the same XLA producer.
    xt = jnp.transpose(x[:, 0, :, :].astype(jnp.float32), (1, 2, 0))
    xt = jnp.pad(xt, ((1, 1), (1, 1), (0, n_pad - n)))      # (H+2, W+2, n_pad)

    kernel = functools.partial(_hog_kernel, orientations=orientations,
                               transform_sqrt=transform_sqrt,
                               h=h, w=w, cr=cr, cc=cc)

    pooled = pl.pallas_call(
        kernel,
        out_shape=jax.ShapeDtypeStruct((orientations, hc, wc, n_pad),
                                       jnp.float32),
        grid_spec=pltpu.PrefetchScalarGridSpec(
            num_scalar_prefetch=0,
            grid=(n_blocks,),
            in_specs=[pl.BlockSpec((h + 2, w + 2, lb), lambda i: (0, 0, i))],
            out_specs=pl.BlockSpec((orientations, hc, wc, lb),
                                   lambda i: (0, 0, 0, i)),
            scratch_shapes=[pltpu.VMEM((orientations, hc, wc * cc, lb),
                                       jnp.float32)],
        ),
        compiler_params=pltpu.CompilerParams(
            dimension_semantics=("parallel",),
            # Explicit budget: 2x input block (~0.3 MiB) + 2x output block
            # (~0.6 MiB) + scratch (~1.2 MiB) + live temps (~3 MiB) << 32 MiB,
            # which is within every generation's physical VMEM.
            vmem_limit_bytes=32 * 1024 * 1024),
    )(xt)

    # Back to the torch layout (N, O, Hc, Wc); flatten matches pooled.view(n,-1).
    out = jnp.transpose(pooled[:, :, :, :n], (3, 0, 1, 2))
    if feature_vector:
        return out.reshape(n, -1)
    return out


if __name__ == "__main__":
    key = jax.random.PRNGKey(0)
    # Small deterministic input consistent with the module: N=2, C=1, H=W=16.
    x = jax.random.uniform(key, (2, 1, 16, 16), dtype=jnp.float32)

    out = hog_forward(x,
                      orientations=9,
                      pixels_per_cell=(4, 4),
                      cells_per_block=(2, 2),
                      block_norm="L2-Hys",
                      transform_sqrt=False,
                      feature_vector=True)
    out = jax.block_until_ready(out)
    assert out.shape == (2, 9 * 4 * 4)
    assert out.dtype == jnp.float32
    assert bool(jnp.all(jnp.isfinite(out)))
    print("KERNEL_OK")
</pallas_src>

<mosaic_0001>
module attributes {stable_mosaic.version = 11 : i64} {
  func.func @_hog_kernel(%arg0: i32, %arg1: memref<18x18x128xf32, #tpu.memory_space<vmem>>, %arg2: memref<9x4x4x128xf32, #tpu.memory_space<vmem>>, %arg3: memref<9x4x16x128xf32, #tpu.memory_space<vmem>>) attributes {dimension_semantics = [#tpu.dimension_semantics<parallel>], iteration_bounds = array<i64: 1>, scalar_prefetch = 0 : i64, scratch_operands = 1 : i64, tpu.core_type = #tpu.core_type<tc>, window_params = [{transform_indices = @transform_0, window_bounds = array<i64: 18, 18, 128>}, {transform_indices = @transform_1, window_bounds = array<i64: 9, 4, 4, 128>}]} {
    %c0 = arith.constant 0 : index
    %c0_0 = arith.constant 0 : index
    %c0_1 = arith.constant 0 : index
    %0 = vector.load %arg1[%c0, %c0_0, %c0_1] : memref<18x18x128xf32, #tpu.memory_space<vmem>>, vector<18x18x128xf32>
    %1 = vector.extract_strided_slice %0 {offsets = [0, 0, 0], sizes = [18, 16, 128], strides = [1, 1, 1]} : vector<18x18x128xf32> to vector<18x16x128xf32>
    %2 = vector.extract_strided_slice %0 {offsets = [0, 1, 0], sizes = [18, 16, 128], strides = [1, 1, 1]} : vector<18x18x128xf32> to vector<18x16x128xf32>
    %3 = vector.extract_strided_slice %0 {offsets = [0, 2, 0], sizes = [18, 16, 128], strides = [1, 1, 1]} : vector<18x18x128xf32> to vector<18x16x128xf32>
    %4 = arith.subf %1, %3 : vector<18x16x128xf32>
    %cst = arith.constant 2.000000e+00 : f32
    %5 = vector.broadcast %cst : f32 to vector<18x16x128xf32>
    %6 = arith.mulf %5, %2 : vector<18x16x128xf32>
    %7 = arith.addf %1, %6 : vector<18x16x128xf32>
    %8 = arith.addf %7, %3 : vector<18x16x128xf32>
    %9 = vector.extract_strided_slice %4 {offsets = [0, 0, 0], sizes = [16, 16, 128], strides = [1, 1, 1]} : vector<18x16x128xf32> to vector<16x16x128xf32>
    %10 = vector.extract_strided_slice %4 {offsets = [1, 0, 0], sizes = [16, 16, 128], strides = [1, 1, 1]} : vector<18x16x128xf32> to vector<16x16x128xf32>
    %cst_2 = arith.constant 2.000000e+00 : f32
    %11 = vector.broadcast %cst_2 : f32 to vector<16x16x128xf32>
    %12 = arith.mulf %11, %10 : vector<16x16x128xf32>
    %13 = arith.addf %9, %12 : vector<16x16x128xf32>
    %14 = vector.extract_strided_slice %4 {offsets = [2, 0, 0], sizes = [16, 16, 128], strides = [1, 1, 1]} : vector<18x16x128xf32> to vector<16x16x128xf32>
    %15 = arith.addf %13, %14 : vector<16x16x128xf32>
    %16 = vector.extract_strided_slice %8 {offsets = [0, 0, 0], sizes = [16, 16, 128], strides = [1, 1, 1]} : vector<18x16x128xf32> to vector<16x16x128xf32>
    %17 = vector.extract_strided_slice %8 {offsets = [2, 0, 0], sizes = [16, 16, 128], strides = [1, 1, 1]} : vector<18x16x128xf32> to vector<16x16x128xf32>
    %18 = arith.subf %16, %17 : vector<16x16x128xf32>
    %19 = arith.mulf %15, %15 : vector<16x16x128xf32>
    %20 = arith.mulf %18, %18 : vector<16x16x128xf32>
    %21 = arith.addf %19, %20 : vector<16x16x128xf32>
    %22 = math.sqrt %21 : vector<16x16x128xf32>
    %23 = math.atan2 %15, %18 : vector<16x16x128xf32>
    %cst_3 = arith.constant 2.86478901 : f32
    %24 = vector.broadcast %cst_3 : f32 to vector<16x16x128xf32>
    %25 = arith.mulf %23, %24 : vector<16x16x128xf32>
    %26 = math.floor %25 : vector<16x16x128xf32>
    %27 = arith.cmpf oeq, %25, %26 : vector<16x16x128xf32>
    %cst_4 = arith.constant 0.000000e+00 : f32
    %28 = vector.broadcast %cst_4 : f32 to vector<16x16x128xf32>
    %29 = arith.cmpf olt, %26, %28 : vector<16x16x128xf32>
    %cst_5 = arith.constant 9.000000e+00 : f32
    %30 = vector.broadcast %cst_5 : f32 to vector<16x16x128xf32>
    %31 = arith.addf %26, %30 : vector<16x16x128xf32>
    %32 = arith.select %29, %31, %26 : vector<16x16x128xi1>, vector<16x16x128xf32>
    %cst_6 = arith.constant 9.000000e+00 : f32
    %33 = vector.broadcast %cst_6 : f32 to vector<16x16x128xf32>
    %34 = arith.cmpf oge, %32, %33 : vector<16x16x128xf32>
    %cst_7 = arith.constant 9.000000e+00 : f32
    %35 = vector.broadcast %cst_7 : f32 to vector<16x16x128xf32>
    %36 = arith.subf %32, %35 : vector<16x16x128xf32>
    %37 = arith.select %34, %36, %32 : vector<16x16x128xi1>, vector<16x16x128xf32>
    %cst_8 = arith.constant 0.000000e+00 : f32
    %38 = vector.broadcast %cst_8 : f32 to vector<16x16x128xf32>
    %cst_9 = arith.constant 0.000000e+00 : f32
    %39 = vector.broadcast %cst_9 : f32 to vector<16x16x128xf32>
    %40 = arith.cmpf oeq, %37, %39 : vector<16x16x128xf32>
    %41 = arith.select %40, %22, %38 : vector<16x16x128xi1>, vector<16x16x128xf32>
    %cst_10 = arith.constant 1.000000e+00 : f32
    %42 = vector.broadcast %cst_10 : f32 to vector<16x16x128xf32>
    %43 = arith.cmpf oeq, %37, %42 : vector<16x16x128xf32>
    %44 = arith.select %43, %22, %38 : vector<16x16x128xi1>, vector<16x16x128xf32>
    %cst_11 = arith.constant 2.000000e+00 : f32
    %45 = vector.broadcast %cst_11 : f32 to vector<16x16x128xf32>
    %46 = arith.cmpf oeq, %37, %45 : vector<16x16x128xf32>
    %47 = arith.select %46, %22, %38 : vector<16x16x128xi1>, vector<16x16x128xf32>
    %cst_12 = arith.constant 3.000000e+00 : f32
    %48 = vector.broadcast %cst_12 : f32 to vector<16x16x128xf32>
    %49 = arith.cmpf oeq, %37, %48 : vector<16x16x128xf32>
    %50 = arith.select %49, %22, %38 : vector<16x16x128xi1>, vector<16x16x128xf32>
    %cst_13 = arith.constant 4.000000e+00 : f32
    %51 = vector.broadcast %cst_13 : f32 to vector<16x16x128xf32>
    %52 = arith.cmpf oeq, %37, %51 : vector<16x16x128xf32>
    %53 = arith.select %52, %22, %38 : vector<16x16x128xi1>, vector<16x16x128xf32>
    %cst_14 = arith.constant 5.000000e+00 : f32
    %54 = vector.broadcast %cst_14 : f32 to vector<16x16x128xf32>
    %55 = arith.cmpf oeq, %37, %54 : vector<16x16x128xf32>
    %56 = arith.select %55, %22, %38 : vector<16x16x128xi1>, vector<16x16x128xf32>
    %cst_15 = arith.constant 6.000000e+00 : f32
    %57 = vector.broadcast %cst_15 : f32 to vector<16x16x128xf32>
    %58 = arith.cmpf oeq, %37, %57 : vector<16x16x128xf32>
    %59 = arith.select %58, %22, %38 : vector<16x16x128xi1>, vector<16x16x128xf32>
    %cst_16 = arith.constant 7.000000e+00 : f32
    %60 = vector.broadcast %cst_16 : f32 to vector<16x16x128xf32>
    %61 = arith.cmpf oeq, %37, %60 : vector<16x16x128xf32>
    %62 = arith.select %61, %22, %38 : vector<16x16x128xi1>, vector<16x16x128xf32>
    %cst_17 = arith.constant 8.000000e+00 : f32
    %63 = vector.broadcast %cst_17 : f32 to vector<16x16x128xf32>
    %64 = arith.cmpf oeq, %37, %63 : vector<16x16x128xf32>
    %65 = arith.select %64, %22, %38 : vector<16x16x128xi1>, vector<16x16x128xf32>
    %66 = arith.select %27, %41, %65 : vector<16x16x128xi1>, vector<16x16x128xf32>
    %67 = arith.addf %41, %66 : vector<16x16x128xf32>
    %68 = vector.shape_cast %67 : vector<16x16x128xf32> to vector<4x4x16x128xf32>
    %69 = vector.extract_strided_slice %68 {offsets = [0, 0, 0, 0], sizes = [4, 1, 16, 128], strides = [1, 1, 1, 1]} : vector<4x4x16x128xf32> to vector<4x1x16x128xf32>
    %70 = vector.shape_cast %69 : vector<4x1x16x128xf32> to vector<4x16x128xf32>
    %71 = vector.extract_strided_slice %68 {offsets = [0, 1, 0, 0], sizes = [4, 1, 16, 128], strides = [1, 1, 1, 1]} : vector<4x4x16x128xf32> to vector<4x1x16x128xf32>
    %72 = vector.shape_cast %71 : vector<4x1x16x128xf32> to vector<4x16x128xf32>
    %73 = arith.addf %70, %72 : vector<4x16x128xf32>
    %74 = vector.extract_strided_slice %68 {offsets = [0, 2, 0, 0], sizes = [4, 1, 16, 128], strides = [1, 1, 1, 1]} : vector<4x4x16x128xf32> to vector<4x1x16x128xf32>
    %75 = vector.shape_cast %74 : vector<4x1x16x128xf32> to vector<4x16x128xf32>
    %76 = arith.addf %73, %75 : vector<4x16x128xf32>
    %77 = vector.extract_strided_slice %68 {offsets = [0, 3, 0, 0], sizes = [4, 1, 16, 128], strides = [1, 1, 1, 1]} : vector<4x4x16x128xf32> to vector<4x1x16x128xf32>
    %78 = vector.shape_cast %77 : vector<4x1x16x128xf32> to vector<4x16x128xf32>
    %79 = arith.addf %76, %78 : vector<4x16x128xf32>
    %c0_18 = arith.constant 0 : index
    %c0_19 = arith.constant 0 : index
    %c0_20 = arith.constant 0 : index
    %c0_21 = arith.constant 0 : index
    %80 = vector.load %arg3[%c0_18, %c0_19, %c0_20, %c0_21] : memref<9x4x16x128xf32, #tpu.memory_space<vmem>>, vector<1x4x16x128xf32>
    %81 = vector.shape_cast %80 : vector<1x4x16x128xf32> to vector<4x16x128xf32>
    %82 = vector.shape_cast %79 : vector<4x16x128xf32> to vector<1x4x16x128xf32>
    tpu.vector_store %arg3[%c0_18, %c0_19, %c0_20, %c0_21], %82 {strides = array<i32>} : memref<9x4x16x128xf32, #tpu.memory_space<vmem>>, vector<1x4x16x128xf32>,
    %83 = arith.select %27, %44, %41 : vector<16x16x128xi1>, vector<16x16x128xf32>
    %84 = arith.addf %44, %83 : vector<16x16x128xf32>
    %85 = vector.shape_cast %84 : vector<16x16x128xf32> to vector<4x4x16x128xf32>
    %86 = vector.extract_strided_slice %85 {offsets = [0, 0, 0, 0], sizes = [4, 1, 16, 128], strides = [1, 1, 1, 1]} : vector<4x4x16x128xf32> to vector<4x1x16x128xf32>
    %87 = vector.shape_cast %86 : vector<4x1x16x128xf32> to vector<4x16x128xf32>
    %88 = vector.extract_strided_slice %85 {offsets = [0, 1, 0, 0], sizes = [4, 1, 16, 128], strides = [1, 1, 1, 1]} : vector<4x4x16x128xf32> to vector<4x1x16x128xf32>
    %89 = vector.shape_cast %88 : vector<4x1x16x128xf32> to vector<4x16x128xf32>
    %90 = arith.addf %87, %89 : vector<4x16x128xf32>
    %91 = vector.extract_strided_slice %85 {offsets = [0, 2, 0, 0], sizes = [4, 1, 16, 128], strides = [1, 1, 1, 1]} : vector<4x4x16x128xf32> to vector<4x1x16x128xf32>
    %92 = vector.shape_cast %91 : vector<4x1x16x128xf32> to vector<4x16x128xf32>
    %93 = arith.addf %90, %92 : vector<4x16x128xf32>
    %94 = vector.extract_strided_slice %85 {offsets = [0, 3, 0, 0], sizes = [4, 1, 16, 128], strides = [1, 1, 1, 1]} : vector<4x4x16x128xf32> to vector<4x1x16x128xf32>
    %95 = vector.shape_cast %94 : vector<4x1x16x128xf32> to vector<4x16x128xf32>
    %96 = arith.addf %93, %95 : vector<4x16x128xf32>
    %c1 = arith.constant 1 : index
    %c0_22 = arith.constant 0 : index
    %c0_23 = arith.constant 0 : index
    %c0_24 = arith.constant 0 : index
    %97 = vector.load %arg3[%c1, %c0_22, %c0_23, %c0_24] : memref<9x4x16x128xf32, #tpu.memory_space<vmem>>, vector<1x4x16x128xf32>
    %98 = vector.shape_cast %97 : vector<1x4x16x128xf32> to vector<4x16x128xf32>
    %99 = vector.shape_cast %96 : vector<4x16x128xf32> to vector<1x4x16x128xf32>
    tpu.vector_store %arg3[%c1, %c0_22, %c0_23, %c0_24], %99 {strides = array<i32>} : memref<9x4x16x128xf32, #tpu.memory_space<vmem>>, vector<1x4x16x128xf32>,
    %100 = arith.select %27, %47, %44 : vector<16x16x128xi1>, vector<16x16x128xf32>
    %101 = arith.addf %47, %100 : vector<16x16x128xf32>
    %102 = vector.shape_cast %101 : vector<16x16x128xf32> to vector<4x4x16x128xf32>
    %103 = vector.extract_strided_slice %102 {offsets = [0, 0, 0, 0], sizes = [4, 1, 16, 128], strides = [1, 1, 1, 1]} : vector<4x4x16x128xf32> to vector<4x1x16x128xf32>
    %104 = vector.shape_cast %103 : vector<4x1x16x128xf32> to vector<4x16x128xf32>
    %105 = vector.extract_strided_slice %102 {offsets = [0, 1, 0, 0], sizes = [4, 1, 16, 128], strides = [1, 1, 1, 1]} : vector<4x4x16x128xf32> to vector<4x1x16x128xf32>
    %106 = vector.shape_cast %105 : vector<4x1x16x128xf32> to vector<4x16x128xf32>
    %107 = arith.addf %104, %106 : vector<4x16x128xf32>
    %108 = vector.extract_strided_slice %102 {offsets = [0, 2, 0, 0], sizes = [4, 1, 16, 128], strides = [1, 1, 1, 1]} : vector<4x4x16x128xf32> to vector<4x1x16x128xf32>
    %109 = vector.shape_cast %108 : vector<4x1x16x128xf32> to vector<4x16x128xf32>
    %110 = arith.addf %107, %109 : vector<4x16x128xf32>
    %111 = vector.extract_strided_slice %102 {offsets = [0, 3, 0, 0], sizes = [4, 1, 16, 128], strides = [1, 1, 1, 1]} : vector<4x4x16x128xf32> to vector<4x1x16x128xf32>
    %112 = vector.shape_cast %111 : vector<4x1x16x128xf32> to vector<4x16x128xf32>
    %113 = arith.addf %110, %112 : vector<4x16x128xf32>
    %c2 = arith.constant 2 : index
    %c0_25 = arith.constant 0 : index
    %c0_26 = arith.constant 0 : index
    %c0_27 = arith.constant 0 : index
    %114 = vector.load %arg3[%c2, %c0_25, %c0_26, %c0_27] : memref<9x4x16x128xf32, #tpu.memory_space<vmem>>, vector<1x4x16x128xf32>
    %115 = vector.shape_cast %114 : vector<1x4x16x128xf32> to vector<4x16x128xf32>
    %116 = vector.shape_cast %113 : vector<4x16x128xf32> to vector<1x4x16x128xf32>
    tpu.vector_store %arg3[%c2, %c0_25, %c0_26, %c0_27], %116 {strides = array<i32>} : memref<9x4x16x128xf32, #tpu.memory_space<vmem>>, vector<1x4x16x128xf32>,
    %117 = arith.select %27, %50, %47 : vector<16x16x128xi1>, vector<16x16x128xf32>
    %118 = arith.addf %50, %117 : vector<16x16x128xf32>
    %119 = vector.shape_cast %118 : vector<16x16x128xf32> to vector<4x4x16x128xf32>
    %120 = vector.extract_strided_slice %119 {offsets = [0, 0, 0, 0], sizes = [4, 1, 16, 128], strides = [1, 1, 1, 1]} : vector<4x4x16x128xf32> to vector<4x1x16x128xf32>
    %121 = vector.shape_cast %120 : vector<4x1x16x128xf32> to vector<4x16x128xf32>
    %122 = vector.extract_strided_slice %119 {offsets = [0, 1, 0, 0], sizes = [4, 1, 16, 128], strides = [1, 1, 1, 1]} : vector<4x4x16x128xf32> to vector<4x1x16x128xf32>
    %123 = vector.shape_cast %122 : vector<4x1x16x128xf32> to vector<4x16x128xf32>
    %124 = arith.addf %121, %123 : vector<4x16x128xf32>
    %125 = vector.extract_strided_slice %119 {offsets = [0, 2, 0, 0], sizes = [4, 1, 16, 128], strides = [1, 1, 1, 1]} : vector<4x4x16x128xf32> to vector<4x1x16x128xf32>
    %126 = vector.shape_cast %125 : vector<4x1x16x128xf32> to vector<4x16x128xf32>
    %127 = arith.addf %124, %126 : vector<4x16x128xf32>
    %128 = vector.extract_strided_slice %119 {offsets = [0, 3, 0, 0], sizes = [4, 1, 16, 128], strides = [1, 1, 1, 1]} : vector<4x4x16x128xf32> to vector<4x1x16x128xf32>
    %129 = vector.shape_cast %128 : vector<4x1x16x128xf32> to vector<4x16x128xf32>
    %130 = arith.addf %127, %129 : vector<4x16x128xf32>
    %c3 = arith.constant 3 : index
    %c0_28 = arith.constant 0 : index
    %c0_29 = arith.constant 0 : index
    %c0_30 = arith.constant 0 : index
    %131 = vector.load %arg3[%c3, %c0_28, %c0_29, %c0_30] : memref<9x4x16x128xf32, #tpu.memory_space<vmem>>, vector<1x4x16x128xf32>
    %132 = vector.shape_cast %131 : vector<1x4x16x128xf32> to vector<4x16x128xf32>
    %133 = vector.shape_cast %130 : vector<4x16x128xf32> to vector<1x4x16x128xf32>
    tpu.vector_store %arg3[%c3, %c0_28, %c0_29, %c0_30], %133 {strides = array<i32>} : memref<9x4x16x128xf32, #tpu.memory_space<vmem>>, vector<1x4x16x128xf32>,
    %134 = arith.select %27, %53, %50 : vector<16x16x128xi1>, vector<16x16x128xf32>
    %135 = arith.addf %53, %134 : vector<16x16x128xf32>
    %136 = vector.shape_cast %135 : vector<16x16x128xf32> to vector<4x4x16x128xf32>
    %137 = vector.extract_strided_slice %136 {offsets = [0, 0, 0, 0], sizes = [4, 1, 16, 128], strides = [1, 1, 1, 1]} : vector<4x4x16x128xf32> to vector<4x1x16x128xf32>
    %138 = vector.shape_cast %137 : vector<4x1x16x128xf32> to vector<4x16x128xf32>
    %139 = vector.extract_strided_slice %136 {offsets = [0, 1, 0, 0], sizes = [4, 1, 16, 128], strides = [1, 1, 1, 1]} : vector<4x4x16x128xf32> to vector<4x1x16x128xf32>
    %140 = vector.shape_cast %139 : vector<4x1x16x128xf32> to vector<4x16x128xf32>
    %141 = arith.addf %138, %140 : vector<4x16x128xf32>
    %142 = vector.extract_strided_slice %136 {offsets = [0, 2, 0, 0], sizes = [4, 1, 16, 128], strides = [1, 1, 1, 1]} : vector<4x4x16x128xf32> to vector<4x1x16x128xf32>
    %143 = vector.shape_cast %142 : vector<4x1x16x128xf32> to vector<4x16x128xf32>
    %144 = arith.addf %141, %143 : vector<4x16x128xf32>
    %145 = vector.extract_strided_slice %136 {offsets = [0, 3, 0, 0], sizes = [4, 1, 16, 128], strides = [1, 1, 1, 1]} : vector<4x4x16x128xf32> to vector<4x1x16x128xf32>
    %146 = vector.shape_cast %145 : vector<4x1x16x128xf32> to vector<4x16x128xf32>
    %147 = arith.addf %144, %146 : vector<4x16x128xf32>
    %c4 = arith.constant 4 : index
    %c0_31 = arith.constant 0 : index
    %c0_32 = arith.constant 0 : index
    %c0_33 = arith.constant 0 : index
    %148 = vector.load %arg3[%c4, %c0_31, %c0_32, %c0_33] : memref<9x4x16x128xf32, #tpu.memory_space<vmem>>, vector<1x4x16x128xf32>
    %149 = vector.shape_cast %148 : vector<1x4x16x128xf32> to vector<4x16x128xf32>
    %150 = vector.shape_cast %147 : vector<4x16x128xf32> to vector<1x4x16x128xf32>
    tpu.vector_store %arg3[%c4, %c0_31, %c0_32, %c0_33], %150 {strides = array<i32>} : memref<9x4x16x128xf32, #tpu.memory_space<vmem>>, vector<1x4x16x128xf32>,
    %151 = arith.select %27, %56, %53 : vector<16x16x128xi1>, vector<16x16x128xf32>
    %152 = arith.addf %56, %151 : vector<16x16x128xf32>
    %153 = vector.shape_cast %152 : vector<16x16x128xf32> to vector<4x4x16x128xf32>
    %154 = vector.extract_strided_slice %153 {offsets = [0, 0, 0, 0], sizes = [4, 1, 16, 128], strides = [1, 1, 1, 1]} : vector<4x4x16x128xf32> to vector<4x1x16x128xf32>
    %155 = vector.shape_cast %154 : vector<4x1x16x128xf32> to vector<4x16x128xf32>
    %156 = vector.extract_strided_slice %153 {offsets = [0, 1, 0, 0], sizes = [4, 1, 16, 128], strides = [1, 1, 1, 1]} : vector<4x4x16x128xf32> to vector<4x1x16x128xf32>
    %157 = vector.shape_cast %156 : vector<4x1x16x128xf32> to vector<4x16x128xf32>
    %158 = arith.addf %155, %157 : vector<4x16x128xf32>
    %159 = vector.extract_strided_slice %153 {offsets = [0, 2, 0, 0], sizes = [4, 1, 16, 128], strides = [1, 1, 1, 1]} : vector<4x4x16x128xf32> to vector<4x1x16x128xf32>
    %160 = vector.shape_cast %159 : vector<4x1x16x128xf32> to vector<4x16x128xf32>
    %161 = arith.addf %158, %160 : vector<4x16x128xf32>
    %162 = vector.extract_strided_slice %153 {offsets = [0, 3, 0, 0], sizes = [4, 1, 16, 128], strides = [1, 1, 1, 1]} : vector<4x4x16x128xf32> to vector<4x1x16x128xf32>
    %163 = vector.shape_cast %162 : vector<4x1x16x128xf32> to vector<4x16x128xf32>
    %164 = arith.addf %161, %163 : vector<4x16x128xf32>
    %c5 = arith.constant 5 : index
    %c0_34 = arith.constant 0 : index
    %c0_35 = arith.constant 0 : index
    %c0_36 = arith.constant 0 : index
    %165 = vector.load %arg3[%c5, %c0_34, %c0_35, %c0_36] : memref<9x4x16x128xf32, #tpu.memory_space<vmem>>, vector<1x4x16x128xf32>
    %166 = vector.shape_cast %165 : vector<1x4x16x128xf32> to vector<4x16x128xf32>
    %167 = vector.shape_cast %164 : vector<4x16x128xf32> to vector<1x4x16x128xf32>
    tpu.vector_store %arg3[%c5, %c0_34, %c0_35, %c0_36], %167 {strides = array<i32>} : memref<9x4x16x128xf32, #tpu.memory_space<vmem>>, vector<1x4x16x128xf32>,
    %168 = arith.select %27, %59, %56 : vector<16x16x128xi1>, vector<16x16x128xf32>
    %169 = arith.addf %59, %168 : vector<16x16x128xf32>
    %170 = vector.shape_cast %169 : vector<16x16x128xf32> to vector<4x4x16x128xf32>
    %171 = vector.extract_strided_slice %170 {offsets = [0, 0, 0, 0], sizes = [4, 1, 16, 128], strides = [1, 1, 1, 1]} : vector<4x4x16x128xf32> to vector<4x1x16x128xf32>
    %172 = vector.shape_cast %171 : vector<4x1x16x128xf32> to vector<4x16x128xf32>
    %173 = vector.extract_strided_slice %170 {offsets = [0, 1, 0, 0], sizes = [4, 1, 16, 128], strides = [1, 1, 1, 1]} : vector<4x4x16x128xf32> to vector<4x1x16x128xf32>
    %174 = vector.shape_cast %173 : vector<4x1x16x128xf32> to vector<4x16x128xf32>
    %175 = arith.addf %172, %174 : vector<4x16x128xf32>
    %176 = vector.extract_strided_slice %170 {offsets = [0, 2, 0, 0], sizes = [4, 1, 16, 128], strides = [1, 1, 1, 1]} : vector<4x4x16x128xf32> to vector<4x1x16x128xf32>
    %177 = vector.shape_cast %176 : vector<4x1x16x128xf32> to vector<4x16x128xf32>
    %178 = arith.addf %175, %177 : vector<4x16x128xf32>
    %179 = vector.extract_strided_slice %170 {offsets = [0, 3, 0, 0], sizes = [4, 1, 16, 128], strides = [1, 1, 1, 1]} : vector<4x4x16x128xf32> to vector<4x1x16x128xf32>
    %180 = vector.shape_cast %179 : vector<4x1x16x128xf32> to vector<4x16x128xf32>
    %181 = arith.addf %178, %180 : vector<4x16x128xf32>
    %c6 = arith.constant 6 : index
    %c0_37 = arith.constant 0 : index
    %c0_38 = arith.constant 0 : index
    %c0_39 = arith.constant 0 : index
    %182 = vector.load %arg3[%c6, %c0_37, %c0_38, %c0_39] : memref<9x4x16x128xf32, #tpu.memory_space<vmem>>, vector<1x4x16x128xf32>
    %183 = vector.shape_cast %182 : vector<1x4x16x128xf32> to vector<4x16x128xf32>
    %184 = vector.shape_cast %181 : vector<4x16x128xf32> to vector<1x4x16x128xf32>
    tpu.vector_store %arg3[%c6, %c0_37, %c0_38, %c0_39], %184 {strides = array<i32>} : memref<9x4x16x128xf32, #tpu.memory_space<vmem>>, vector<1x4x16x128xf32>,
    %185 = arith.select %27, %62, %59 : vector<16x16x128xi1>, vector<16x16x128xf32>
    %186 = arith.addf %62, %185 : vector<16x16x128xf32>
    %187 = vector.shape_cast %186 : vector<16x16x128xf32> to vector<4x4x16x128xf32>
    %188 = vector.extract_strided_slice %187 {offsets = [0, 0, 0, 0], sizes = [4, 1, 16, 128], strides = [1, 1, 1, 1]} : vector<4x4x16x128xf32> to vector<4x1x16x128xf32>
    %189 = vector.shape_cast %188 : vector<4x1x16x128xf32> to vector<4x16x128xf32>
    %190 = vector.extract_strided_slice %187 {offsets = [0, 1, 0, 0], sizes = [4, 1, 16, 128], strides = [1, 1, 1, 1]} : vector<4x4x16x128xf32> to vector<4x1x16x128xf32>
    %191 = vector.shape_cast %190 : vector<4x1x16x128xf32> to vector<4x16x128xf32>
    %192 = arith.addf %189, %191 : vector<4x16x128xf32>
    %193 = vector.extract_strided_slice %187 {offsets = [0, 2, 0, 0], sizes = [4, 1, 16, 128], strides = [1, 1, 1, 1]} : vector<4x4x16x128xf32> to vector<4x1x16x128xf32>
    %194 = vector.shape_cast %193 : vector<4x1x16x128xf32> to vector<4x16x128xf32>
    %195 = arith.addf %192, %194 : vector<4x16x128xf32>
    %196 = vector.extract_strided_slice %187 {offsets = [0, 3, 0, 0], sizes = [4, 1, 16, 128], strides = [1, 1, 1, 1]} : vector<4x4x16x128xf32> to vector<4x1x16x128xf32>
    %197 = vector.shape_cast %196 : vector<4x1x16x128xf32> to vector<4x16x128xf32>
    %198 = arith.addf %195, %197 : vector<4x16x128xf32>
    %c7 = arith.constant 7 : index
    %c0_40 = arith.constant 0 : index
    %c0_41 = arith.constant 0 : index
    %c0_42 = arith.constant 0 : index
    %199 = vector.load %arg3[%c7, %c0_40, %c0_41, %c0_42] : memref<9x4x16x128xf32, #tpu.memory_space<vmem>>, vector<1x4x16x128xf32>
    %200 = vector.shape_cast %199 : vector<1x4x16x128xf32> to vector<4x16x128xf32>
    %201 = vector.shape_cast %198 : vector<4x16x128xf32> to vector<1x4x16x128xf32>
    tpu.vector_store %arg3[%c7, %c0_40, %c0_41, %c0_42], %201 {strides = array<i32>} : memref<9x4x16x128xf32, #tpu.memory_space<vmem>>, vector<1x4x16x128xf32>,
    %202 = arith.select %27, %65, %62 : vector<16x16x128xi1>, vector<16x16x128xf32>
    %203 = arith.addf %65, %202 : vector<16x16x128xf32>
    %204 = vector.shape_cast %203 : vector<16x16x128xf32> to vector<4x4x16x128xf32>
    %205 = vector.extract_strided_slice %204 {offsets = [0, 0, 0, 0], sizes = [4, 1, 16, 128], strides = [1, 1, 1, 1]} : vector<4x4x16x128xf32> to vector<4x1x16x128xf32>
    %206 = vector.shape_cast %205 : vector<4x1x16x128xf32> to vector<4x16x128xf32>
    %207 = vector.extract_strided_slice %204 {offsets = [0, 1, 0, 0], sizes = [4, 1, 16, 128], strides = [1, 1, 1, 1]} : vector<4x4x16x128xf32> to vector<4x1x16x128xf32>
    %208 = vector.shape_cast %207 : vector<4x1x16x128xf32> to vector<4x16x128xf32>
    %209 = arith.addf %206, %208 : vector<4x16x128xf32>
    %210 = vector.extract_strided_slice %204 {offsets = [0, 2, 0, 0], sizes = [4, 1, 16, 128], strides = [1, 1, 1, 1]} : vector<4x4x16x128xf32> to vector<4x1x16x128xf32>
    %211 = vector.shape_cast %210 : vector<4x1x16x128xf32> to vector<4x16x128xf32>
    %212 = arith.addf %209, %211 : vector<4x16x128xf32>
    %213 = vector.extract_strided_slice %204 {offsets = [0, 3, 0, 0], sizes = [4, 1, 16, 128], strides = [1, 1, 1, 1]} : vector<4x4x16x128xf32> to vector<4x1x16x128xf32>
    %214 = vector.shape_cast %213 : vector<4x1x16x128xf32> to vector<4x16x128xf32>
    %215 = arith.addf %212, %214 : vector<4x16x128xf32>
    %c8 = arith.constant 8 : index
    %c0_43 = arith.constant 0 : index
    %c0_44 = arith.constant 0 : index
    %c0_45 = arith.constant 0 : index
    %216 = vector.load %arg3[%c8, %c0_43, %c0_44, %c0_45] : memref<9x4x16x128xf32, #tpu.memory_space<vmem>>, vector<1x4x16x128xf32>
    %217 = vector.shape_cast %216 : vector<1x4x16x128xf32> to vector<4x16x128xf32>
    %218 = vector.shape_cast %215 : vector<4x16x128xf32> to vector<1x4x16x128xf32>
    tpu.vector_store %arg3[%c8, %c0_43, %c0_44, %c0_45], %218 {strides = array<i32>} : memref<9x4x16x128xf32, #tpu.memory_space<vmem>>, vector<1x4x16x128xf32>,
    %c0_46 = arith.constant 0 : index
    %c0_47 = arith.constant 0 : index
    %c0_48 = arith.constant 0 : index
    %c0_49 = arith.constant 0 : index
    %219 = tpu.strided_load %arg3[%c0_46, %c0_47, %c0_48, %c0_49] {strides = array<i32: 1, 1, 4, 1>} : memref<9x4x16x128xf32, #tpu.memory_space<vmem>>, vector<9x4x4x128xf32>
    %c0_50 = arith.constant 0 : index
    %c0_51 = arith.constant 0 : index
    %c1_52 = arith.constant 1 : index
    %c0_53 = arith.constant 0 : index
    %220 = tpu.strided_load %arg3[%c0_50, %c0_51, %c1_52, %c0_53] {strides = array<i32: 1, 1, 4, 1>} : memref<9x4x16x128xf32, #tpu.memory_space<vmem>>, vector<9x4x4x128xf32>
    %221 = arith.addf %219, %220 : vector<9x4x4x128xf32>
    %c0_54 = arith.constant 0 : index
    %c0_55 = arith.constant 0 : index
    %c2_56 = arith.constant 2 : index
    %c0_57 = arith.constant 0 : index
    %222 = tpu.strided_load %arg3[%c0_54, %c0_55, %c2_56, %c0_57] {strides = array<i32: 1, 1, 4, 1>} : memref<9x4x16x128xf32, #tpu.memory_space<vmem>>, vector<9x4x4x128xf32>
    %223 = arith.addf %221, %222 : vector<9x4x4x128xf32>
    %c0_58 = arith.constant 0 : index
    %c0_59 = arith.constant 0 : index
    %c3_60 = arith.constant 3 : index
    %c0_61 = arith.constant 0 : index
    %224 = tpu.strided_load %arg3[%c0_58, %c0_59, %c3_60, %c0_61] {strides = array<i32: 1, 1, 4, 1>} : memref<9x4x16x128xf32, #tpu.memory_space<vmem>>, vector<9x4x4x128xf32>
    %225 = arith.addf %223, %224 : vector<9x4x4x128xf32>
    %cst_62 = arith.constant 6.250000e-02 : f32
    %226 = vector.broadcast %cst_62 : f32 to vector<9x4x4x128xf32>
    %227 = arith.mulf %225, %226 : vector<9x4x4x128xf32>
    %c0_63 = arith.constant 0 : index
    %c0_64 = arith.constant 0 : index
    %c0_65 = arith.constant 0 : index
    %c0_66 = arith.constant 0 : index
    %228 = vector.load %arg2[%c0_63, %c0_64, %c0_65, %c0_66] : memref<9x4x4x128xf32, #tpu.memory_space<vmem>>, vector<9x4x4x128xf32>
    tpu.vector_store %arg2[%c0_63, %c0_64, %c0_65, %c0_66], %227 {strides = array<i32>} : memref<9x4x4x128xf32, #tpu.memory_space<vmem>>, vector<9x4x4x128xf32>,
    return
  }
  func.func @transform_0(%arg0: i32) -> (i32, i32, i32) {
    %c0_i32 = arith.constant 0 : i32
    %c0_i32_0 = arith.constant 0 : i32
    %c0_i32_1 = arith.constant 0 : i32
    return %c0_i32, %c0_i32_0, %arg0 : i32, i32, i32
  }
  func.func @transform_1(%arg0: i32) -> (i32, i32, i32, i32) {
    %c0_i32 = arith.constant 0 : i32
    %c0_i32_0 = arith.constant 0 : i32
    %c0_i32_1 = arith.constant 0 : i32
    %c0_i32_2 = arith.constant 0 : i32
    return %c0_i32, %c0_i32_0, %c0_i32_1, %arg0 : i32, i32, i32, i32
  }
}

</mosaic_0001>

<bundles_post_ra>
// kernel: tpu_custom_call.1
= control target key start
LH: loop header
LB: loop body
LE: loop exit
PB: predicated region body
PF: predicated region fallthrough
CT: control target
= control target key end

     0   :  { %6 = vsyncpa [#allocation4], 0  ;;  %s11709_s0 = inlined_call_operand.hbm [shape: f32[18,18,128], index: 0, kind: input, shape index: {}]   ;;  %s11710_s1 = inlined_call_operand.hbm [shape: f32[9,4,4,128], index: 1, kind: output, shape index: {}]  }
   0x1   :  { %7 = vsyncpa [#allocation5], 0  ;;  %s4985_s6 = smov [#allocation3]  }
   0x2   :  { %s13_s7 = sshll.u32 %s4985_s6, 4  ;;  %s14_s7 = int_to_ptr.vmem [resolvable:$true] %s13_s7 }
   0x3   :  { %s4949_s8 = scalar_lea.vmem %s14_s7, 6912  ;;  %p4954_p1 = scmp.lt.s32.totalorder %s14_s7, %s14_s7 }
   0x4   :  { %p4950_p0 = scmp.ne.s32.totalorder %s14_s7, %s4949_s8  ;;  %p4955_p2 = scmp.lt.s32.totalorder %s4949_s8, %s4949_s8 }
   0x6   :  { %p4956_p3 = por %p4955_p2, %p4954_p1 }
   0x8   :  { %p4957_p4 = pnand %p4956_p3, %p4950_p0 }
   0xa   :  { %4960 = shalt.err (!%p4957_p4)
}
   0xb   :  { %s4986_s9 = smov 128   ;;  %s4987_s10 = smov 8  }
   0xc   :  { %19 = dma.hbm_to_vmem [thread:$0]  %s11709_s0, 6912, %s14_s7, [#allocation4], %s4986_s9, %s4986_s9, %s4987_s10  }
   0xd   :  { %4981 = dma.done.wait [#allocation4], 6912  }
   0xe   :  { %4982 = vsyncadd [#allocation4], 4294960384  ;;  %v5006_v0 = vld [vmem:[#allocation3 + $0x18] sm:$0xff]  ;;  %v5008_v1 = vld [vmem:[#allocation3 + $0x20] sm:$0xff]  ;;  %vm11750_vm0 = vcmask 1045504   ;;  %vm11749_vm1 = vcmask 1046528  }
   0xf   :  { %v23_v2 = vld [vmem:[#allocation3] sm:$0xff]  ;;  %v5010_v3 = vld [vmem:[#allocation3 + $0x8] sm:$0xff]  ;;  %v137_v4 = vrot.slane %v5006_v0, 2  ;;  %v11725_v5 = vrot.slane %v5008_v1, 2  ;;  %v29_v6 = vld [vmem:[#allocation3 + $0x30] sm:$0xff]  ;;  %v297_v20 = vmul.f32 2.0, %v5006_v0 }
  0x10   :  { %v5014_v7 = vld [vmem:[#allocation3 + $0x38] sm:$0xff]  ;;  %v132_v8 = vrot.slane %v23_v2, 2  ;;  %v133_v9 = vrot.slane %v5010_v3, 2  ;;  %v294_v10 = vmul.f32 2.0, %v23_v2  ;;  %v32_v11 = vld [vmem:[#allocation3 + $0x48] sm:$0xff]  ;;  %v5017_v12 = vld [vmem:[#allocation3 + $0x50] sm:$0xff] }
  0x11   :  { %v5020_v13 = vmul.f32 2.0, %v5010_v3  ;;  %v139_v14 = vsel %vm11750_vm0, %v137_v4, %v11725_v5  ;;  %v142_v15 = vrot.slane %v29_v6, 2  ;;  %v300_v16 = vmul.f32 2.0, %v29_v6  ;;  %v35_v26 = vld [vmem:[#allocation3 + $0x60] sm:$0xff]  ;;  %v5042_v30 = vld [vmem:[#allocation3 + $0x68] sm:$0xff]  ;;  %v38_v35 = vld [vmem:[#allocation3 + $0x78] sm:$0xff] }
  0x12   :  { %v5026_v17 = vmul.f32 2.0, %v5014_v7  ;;  %v134_v18 = vsel %vm11750_vm0, %v132_v8, %v133_v9  ;;  %v11724_v19 = vrot.slane %v5014_v7, 2  ;;  %v5034_v21 = vmul.f32 2.0, %v5008_v1  ;;  %v5048_v36 = vld [vmem:[#allocation3 + $0x80] sm:$0xff]  ;;  %s4990_s0 = smov [#allocation6]  }
  0x13   :  { %v303_v22 = vmul.f32 2.0, %v32_v11  ;;  %v5037_v23 = vmul.f32 2.0, %v5017_v12  ;;  %v403_v24 = vrot.slane %v294_v10, 1  ;;  %v11716_v25 = vrot.slane %v5020_v13, 1  ;;  %s4761_s13 = sshll.u32 %s4990_s0, 4  ;;  %s4762_s13 = int_to_ptr.vmem [resolvable:$true] %s4761_s13 }
  0x14   :  { %v260_v27 = vsub.f32 %v5006_v0, %v139_v14  ;;  %v413_v28 = vrot.slane %v300_v16, 1  ;;  %v11714_v29 = vrot.slane %v5026_v17, 1  ;;  %v147_v31 = vrot.slane %v32_v11, 2  ;;  %s4961_s14 = scalar_lea.vmem %s4762_s13, 2304  ;;  %p4966_p6 = scmp.lt.s32.totalorder %s4762_s13, %s4762_s13 }
  0x15   :  { %v11723_v32 = vrot.slane %v5017_v12, 2  ;;  %v152_v33 = vrot.slane %v35_v26, 2  ;;  %v405_v34 = vsel %vm11749_vm1, %v403_v24, %v11716_v25  ;;  %v144_v37 = vsel %vm11750_vm0, %v142_v15, %v11724_v19  ;;  %p4962_p5 = scmp.ne.s32.totalorder %s4762_s13, %s4961_s14  ;;  %p4967_p7 = scmp.lt.s32.totalorder %s4961_s14, %s4961_s14 }
  0x16   :  { %v258_v38 = vsub.f32 %v23_v2, %v134_v18  ;;  %v408_v39 = vrot.slane %v297_v20, 1  ;;  %v415_v40 = vsel %vm11749_vm1, %v413_v28, %v11714_v29  ;;  %v11715_v41 = vrot.slane %v5034_v21, 1 }
  0x17   :  { %v418_v42 = vrot.slane %v303_v22, 1  ;;  %v11713_v43 = vrot.slane %v5037_v23, 1  ;;  %v529_v44 = vadd.f32 %v405_v34, %v23_v2  ;;  %v306_v45 = vmul.f32 2.0, %v35_v26  ;;  %p4968_p8 = por %p4967_p7, %p4966_p6 }
  0x18   :  { %v5059_v46 = vmul.f32 2.0, %v5042_v30  ;;  %v533_v47 = vadd.f32 %v415_v40, %v29_v6  ;;  %v601_v48 = vmul.f32 2.0, %v260_v27  ;;  %v11720_v49 = vrot.slane %v5042_v30, 2 }
  0x19   :  { %v309_v50 = vmul.f32 2.0, %v38_v35  ;;  %v5063_v51 = vmul.f32 2.0, %v5048_v36  ;;  %v565_v52 = vadd.f32 %v529_v44, %v134_v18  ;;  %v262_v53 = vsub.f32 %v29_v6, %v144_v37  ;;  %p4969_p9 = pnand %p4968_p8, %p4962_p5 }
  0x1a   :  { %v569_v54 = vadd.f32 %v533_v47, %v144_v37  ;;  %v149_v55 = vsel %vm11750_vm0, %v147_v31, %v11723_v32  ;;  %v410_v56 = vsel %vm11749_vm1, %v408_v39, %v11715_v41  ;;  %v420_v57 = vsel %vm11749_vm1, %v418_v42, %v11713_v43 }
  0x1b   :  { %v633_v58 = vadd.f32 %v601_v48, %v258_v38  ;;  %v423_v59 = vrot.slane %v306_v45, 1  ;;  %v11712_v60 = vrot.slane %v5059_v46, 1  ;;  %v154_v62 = vsel %vm11750_vm0, %v152_v33, %v11720_v49 }
  0x1c   :  { %v5075_v61 = vsub.f32 %v565_v52, %v569_v54  ;;  %v428_v63 = vrot.slane %v309_v50, 1  ;;  %v11711_v2 = vrot.slane %v5063_v51, 1  ;;  %v264_v6 = vsub.f32 %v32_v11, %v149_v55 }
  0x1d   :  { %v5081_v4 = vadd.f32 %v633_v58, %v262_v53  ;;  %v531_v8 = vadd.f32 %v410_v56, %v5006_v0  ;;  %v535_v10 = vadd.f32 %v420_v57, %v32_v11  ;;  %v603_v15 = vmul.f32 2.0, %v262_v53 }
  0x1e   :  { %v425_v16 = vsel %vm11749_vm1, %v423_v59, %v11712_v60  ;;  %v5088_v18 = vand.u32 2147483647, %v5075_v61  ;;  %v5093_v22 = vsub.f32 %v35_v26, %v154_v62  ;;  %v430_v24 = vsel %vm11749_vm1, %v428_v63, %v11711_v2  ;;  %v37_v60 = vld [vmem:[#allocation3 + $0x70] sm:$0x3] }
  0x1f   :  { %v5091_v20 = vand.u32 2147483647, %v5081_v4  ;;  %v567_v28 = vadd.f32 %v531_v8, %v139_v14  ;;  %v571_v0 = vadd.f32 %v535_v10, %v149_v55  ;;  %v605_v11 = vmul.f32 2.0, %v264_v6 }
  0x20   :  { %12235 = vst [vmem:[#allocation9_spill] sm:$0xff] %v5093_v22  ;;  %v635_v31 = vadd.f32 %v603_v15, %v260_v27  ;;  %v157_v33 = vrot.slane %v38_v35, 2  ;;  %v11719_v34 = vrot.slane %v5048_v36, 2  ;;  %v537_v37 = vadd.f32 %v425_v16, %v35_v26 }
  0x21   :  { %v1052_v38 = vmax.f32 %v5088_v18, %v5091_v20  ;;  %v607_v39 = vmul.f32 2.0, %v5093_v22  ;;  %v539_v40 = vadd.f32 %v430_v24, %v38_v35  ;;  %v637_v42 = vadd.f32 %v605_v11, %v262_v53 }
  0x22   :  { %v5102_v44 = vadd.f32 %v635_v31, %v264_v6  ;;  %v5104_v45 = vsub.f32 %v567_v28, %v571_v0  ;;  %v159_v14 = vsel %vm11750_vm0, %v157_v33, %v11719_v34  ;;  %v5109_v27 = vadd.f32 %v537_v37, %v154_v62 }
  0x23   :  { %4813 = vrcp.f32 %v1052_v38  ;;  %v639_v47 = vadd.f32 %v607_v39, %v264_v6  ;;  %v5111_v26 = vadd.f32 %v539_v40, %v159_v14  ;;  %v5116_v50 = vsub.f32 %v38_v35, %v159_v14 }
  0x24   :  { %12236 = vst [vmem:[#allocation10_spill] sm:$0xff] %v5109_v27  ;;  %v5114_v48 = vsub.f32 %v569_v54, %v5109_v27  ;;  %v5119_v52 = vadd.f32 %v637_v42, %v5093_v22  ;;  %v5122_v53 = vand.u32 2147483647, %v5104_v45  ;;  %v5125_v55 = vand.u32 2147483647, %v5102_v44 }
  0x25   :  { %12237 = vst [vmem:[#allocation11_spill] sm:$0xff] %v5111_v26  ;;  %12238 = vst [vmem:[#allocation12_spill] sm:$0xff] %v5116_v50  ;;  %v5128_v56 = vsub.f32 %v571_v0, %v5111_v26  ;;  %v729_v57 = vmul.f32 %v5081_v4, %v5081_v4  ;;  %v761_v54 = vmul.f32 %v5075_v61, %v5075_v61  ;;  %vm1079_vm2 = vcmp.lt.s32.totalorder %v5075_v61, 0 }
  0x26   :  { %12239 = vst [vmem:[#allocation13_spill] sm:$0xff] %v5119_v52  ;;  %v5135_v35 = vadd.f32 %v639_v47, %v5116_v50  ;;  %v731_v58 = vmul.f32 %v5102_v44, %v5102_v44  ;;  %v763_v59 = vmul.f32 %v5104_v45, %v5104_v45  ;;  %v1146_v62 = vmax.f32 %v5122_v53, %v5125_v55 }
  0x27   :  { %12240 = vst [vmem:[#allocation14_spill] sm:$0xff] %v5128_v56  ;;  %v733_v63 = vmul.f32 %v5119_v52, %v5119_v52  ;;  %v765_v6 = vmul.f32 %v5114_v48, %v5114_v48  ;;  %v5148_v8 = vand.u32 2147483647, %v5114_v48  ;;  %v767_v15 = vmul.f32 %v5128_v56, %v5128_v56 }
  0x28   :  { %12241 = vst [vmem:[#allocation15_spill] sm:$0xff] %v5135_v35  ;;  %v735_v10 = vmul.f32 %v5135_v35, %v5135_v35  ;;  %4815 = vrcp.f32 %v1146_v62  ;;  %v5155_v16 = vand.u32 2147483647, %v5119_v52  ;;  %v5157_v24 = vadd.f32 %v761_v54, %v729_v57  ;;  %v28_v57 = vld [vmem:[#allocation3 + $0x28] sm:$0x3] }
  0x29   :  { %v5159_v28 = vadd.f32 %v763_v59, %v731_v58  ;;  %v5163_v11 = vadd.f32 %v765_v6, %v733_v63  ;;  %v1051_v31 = vmin.f32 %v5088_v18, %v5091_v20  ;;  %v5170_v37 = vand.u32 2147483647, %v5128_v56  ;;  %v25_v63 = vld [vmem:[#allocation3 + $0x10] sm:$0x3]  ;;  %v31_v6 = vld [vmem:[#allocation3 + $0x40] sm:$0x3] }
  0x2a   :  { %12242 = vst [vmem:[#allocation16_spill] sm:$0xff] %v5155_v16  ;;  %v1240_v0 = vmax.f32 %v5148_v8, %v5155_v16  ;;  %v5167_v33 = vadd.f32 %v767_v15, %v735_v10  ;;  %v5173_v38 = vand.u32 2147483647, %v5135_v35  ;;  %vm1076_vm3 = vcmp.lt.f32.partialorder %v5075_v61, 0.0 }
  0x2b   :  { %12243 = vst [vmem:[#allocation17_spill] sm:$0xff] %v5163_v11  ;;  %12245 = vst [vmem:[#allocation19_spill] sm:$0xff] %v5170_v37  ;;  %vm1173_vm4 = vcmp.lt.s32.totalorder %v5104_v45, 0  ;;  %v11717_v59 = vmov 0.0   ;;  %v11721_v15 = vmov 0.7853982   ;;  %v1145_v54 = vmin.f32 %v5122_v53, %v5125_v55 }
  0x2c   :  { %12244 = vst [vmem:[#allocation18_spill] sm:$0xff] %v5167_v33  ;;  %4817 = vrcp.f32 %v1240_v0  ;;  %12246 = vst [vmem:[#allocation20_spill] sm:$0xff] %v5173_v38  ;;  %v1334_v47 = vmax.f32 %v5170_v37, %v5173_v38  ;;  %v5191_v62 = vsel %vm1079_vm2, 3.1415927, %v11717_v59  ;;  %v5200_v0 = vsel %vm1076_vm3, 2.3561945, %v11721_v15 }
  0x2d   :  { %4819 = vrsqrt.f32 %v5157_v24  ;;  %12247 = vst [vmem:[#allocation21_spill] sm:$0xff] %v5191_v62  ;;  %12248 = vst [vmem:[#allocation22_spill] sm:$0xff] %v5200_v0  ;;  %vm11751_vm5 = vcmp.lt.f32.partialorder %v5104_v45, 0.0  ;;  %v5209_v42 = vsel %vm1173_vm4, 3.1415927, %v11717_v59  ;;  %v1333_v58 = vmin.f32 %v5170_v37, %v5173_v38 }
  0x2e   :  { %4821 = vrsqrt.f32 %v5159_v28  ;;  %12249 = vst [vmem:[#allocation23_spill] sm:$0xff] %v5209_v42  ;;  %v5214_v40 = vsel %vm11751_vm5, 2.3561945, %v11721_v15  ;;  %v135_v43 = vrot.slane %v25_v63, 2  ;;  %v140_v29 = vrot.slane %v28_v57, 2 }
  0x2f   :  { %4823 = vrsqrt.f32 %v5163_v11  ;;  %12250 = vst [vmem:[#allocation24_spill] sm:$0xff] %v5214_v40  ;;  %v145_v41 = vrot.slane %v31_v6, 2  ;;  %v155_v59 = vrot.slane %v37_v60, 2  ;;  %v296_v19 = vmul.f32 2.0, %v25_v63 }
  0x30   :  { %v4814_v39 = vpop.eup %4813  ;;  %4825 = vrsqrt.f32 %v5167_v33  ;;  %v5224_v15 = vsel %vm11750_vm0, %v133_v9, %v135_v43  ;;  %v12251_v26 = vrot.slane %v5008_v1, 2  ;;  %v12252_v22 = vrot.slane %v5014_v7, 2 }
  0x31   :  { %v5182_v14 = vmul.f32 %v4814_v39, %v1051_v31  ;;  %4827 = vrcp.f32 %v1334_v47  ;;  %v34_v31 = vld [vmem:[#allocation3 + $0x58] sm:$0x3]  ;;  %v40_v39 = vld [vmem:[#allocation3 + $0x88] sm:$0x3]  ;;  %v1239_v47 = vmin.f32 %v5148_v8, %v5155_v16  ;;  %v12254_v43 = vrot.slane %v5042_v30, 2 }
  0x32   :  { %v150_v25 = vrot.slane %v34_v31, 2  ;;  %v160_v32 = vrot.slane %v40_v39, 2  ;;  %v5231_v27 = vsel %vm11750_vm0, %v12251_v26, %v140_v29  ;;  %v5236_v50 = vsel %vm11750_vm0, %v12252_v22, %v145_v41 }
  0x33   :  { %v5195_v10 = vmul.f32 %v5182_v14, %v5182_v14  ;;  %v12255_v29 = vrot.slane %v5048_v36, 2  ;;  %v302_v42 = vmul.f32 2.0, %v31_v6  ;;  %v305_v38 = vmul.f32 2.0, %v34_v31 }
  0x34   :  { %v308_v33 = vmul.f32 2.0, %v37_v60  ;;  %v311_v56 = vmul.f32 2.0, %v40_v39  ;;  %v406_v0 = vrot.slane %v296_v19, 1  ;;  %v12261_v31 = vrot.slane %v5020_v13, 1 }
  0x35   :  { %v1056_v2 = vmul.f32 0.002785687, %v5195_v10  ;;  %v4816_v34 = vpop.eup %4815  ;;  %v5252_v26 = vsel %vm11750_vm0, %v12255_v29, %v160_v32  ;;  %v416_v16 = vrot.slane %v302_v42, 1  ;;  %v12263_v42 = vrot.slane %v5026_v17, 1 }
  0x36   :  { %v5226_v5 = vmul.f32 %v4816_v34, %v1145_v54  ;;  %v5247_v34 = vsel %vm11750_vm0, %v12254_v43, %v155_v59  ;;  %v299_v43 = vmul.f32 2.0, %v28_v57  ;;  %v426_v60 = vrot.slane %v308_v33, 1 }
  0x37   :  { %v1057_v49 = vadd.f32 -0.015866, %v1056_v2  ;;  %v12253_v2 = vrot.slane %v5017_v12, 2  ;;  %v5274_v63 = vsub.f32 %v5042_v30, %v5247_v34  ;;  %vm1073_vm6 = vcmp.gt.f32.partialorder %v5091_v20, %v5088_v18 }
  0x38   :  { %v5258_v22 = vmul.f32 %v5226_v5, %v5226_v5  ;;  %v411_v52 = vrot.slane %v299_v43, 1  ;;  %v417_v43 = vsel %vm11749_vm1, %v12263_v42, %v416_v16  ;;  %vm1083_vm7 = vcmp.ne.f32.partialorder %v5075_v61, %v5075_v61 }
  0x39   :  { %v5241_v35 = vsel %vm11750_vm0, %v12253_v2, %v150_v25  ;;  %v1058_v9 = vmul.f32 %v1057_v49, %v5195_v10  ;;  %v5262_v25 = vsub.f32 %v5008_v1, %v5231_v27  ;;  %v5266_v49 = vsub.f32 %v5014_v7, %v5236_v50  ;;  %v4818_v32 = vpop.eup %4817  ;;  %12256 = vst [vmem:[#allocation25_spill] sm:$0xff] %v5274_v63 }
  0x3a   :  { %v5270_v54 = vsub.f32 %v5017_v12, %v5241_v35  ;;  %v5278_v2 = vsub.f32 %v5048_v36, %v5252_v26  ;;  %v5280_v29 = vpop.eup %4819  ;;  %v1150_v41 = vmul.f32 0.002785687, %v5258_v22  ;;  %v5283_v40 = vmul.f32 %v4818_v32, %v1239_v47 }
  0x3b   :  { %v1059_v59 = vadd.f32 0.04247222, %v1058_v9  ;;  %v5285_v37 = vpop.eup %4821  ;;  %v407_v32 = vsel %vm11749_vm1, %v12261_v31, %v406_v0  ;;  %vm1084_vm8 = vcmp.ne.f32.partialorder %v5081_v4, %v5081_v4  ;;  %vm827_vm9 = vcmp.eq.f32.partialorder %v5157_v24, inf }
  0x3c   :  { %12257 = vst [vmem:[#allocation26_spill] sm:$0xff] %v5278_v2  ;;  %12258 = vst [vmem:[#allocation27_spill] sm:$0xff] %v5283_v40  ;;  %v5288_v11 = vpop.eup %4823  ;;  %v1151_v62 = vadd.f32 -0.015866, %v1150_v41  ;;  %v5292_v57 = vmul.f32 %v5283_v40, %v5283_v40  ;;  %vm1089_vm10 = vcmp.eq.s32.totalorder %v5088_v18, inf  ;;  %vm1090_vm11 = vcmp.eq.s32.totalorder %v5091_v20, inf }
  0x3d   :  { %v1060_v9 = vmul.f32 %v1059_v59, %v5195_v10  ;;  %12259 = vst [vmem:[#allocation28_spill] sm:$0xff] %v5288_v11  ;;  %v5294_v47 = vpop.eup %4825  ;;  %v421_v59 = vrot.slane %v305_v38, 1  ;;  %v12262_v11 = vrot.slane %v5034_v21, 1  ;;  %v12264_v38 = vrot.slane %v5037_v23, 1 }
  0x3e   :  { %12260 = vst [vmem:[#allocation29_spill] sm:$0xff] %v5294_v47  ;;  %v4828_v39 = vpop.eup %4827  ;;  %v1152_v19 = vmul.f32 %v1151_v62, %v5258_v22  ;;  %v1244_v41 = vmul.f32 0.002785687, %v5292_v57  ;;  %v12265_v62 = vrot.slane %v5059_v46, 1  ;;  %v431_v47 = vrot.slane %v311_v56, 1 }
  0x3f   :  { %v1061_v6 = vadd.f32 -0.074975304, %v1060_v9  ;;  %v412_v40 = vsel %vm11749_vm1, %v12262_v11, %v411_v52  ;;  %v5308_v13 = vmul.f32 %v4828_v39, %v1333_v58  ;;  %v422_v33 = vsel %vm11749_vm1, %v12264_v38, %v421_v59 }
  0x40   :  { %v427_v0 = vsel %vm11749_vm1, %v12265_v62, %v426_v60  ;;  %v1153_v31 = vadd.f32 0.04247222, %v1152_v19  ;;  %v1245_v21 = vadd.f32 -0.015866, %v1244_v41  ;;  %v530_v52 = vadd.f32 %v407_v32, %v5010_v3 }
  0x41   :  { %v1062_v9 = vmul.f32 %v1061_v6, %v5195_v10  ;;  %v5319_v16 = vmul.f32 %v5308_v13, %v5308_v13  ;;  %v532_v11 = vadd.f32 %v412_v40, %v5008_v1  ;;  %v534_v23 = vadd.f32 %v417_v43, %v5014_v7 }
  0x42   :  { %v1154_v58 = vmul.f32 %v1153_v31, %v5258_v22  ;;  %v1246_v46 = vmul.f32 %v1245_v21, %v5292_v57  ;;  %v12266_v6 = vrot.slane %v5063_v51, 1  ;;  %v536_v56 = vadd.f32 %v422_v33, %v5017_v12 }
  0x43   :  { %v1063_v17 = vadd.f32 0.1064488, %v1062_v9  ;;  %v1338_v60 = vmul.f32 0.002785687, %v5319_v16  ;;  %v538_v39 = vadd.f32 %v427_v0, %v5042_v30  ;;  %v566_v19 = vadd.f32 %v530_v52, %v5224_v15 }
  0x44   :  { %v432_v59 = vsel %vm11749_vm1, %v12266_v6, %v431_v47  ;;  %v1155_v40 = vadd.f32 -0.074975304, %v1154_v58  ;;  %v1247_v7 = vadd.f32 0.04247222, %v1246_v46  ;;  %v568_v41 = vadd.f32 %v532_v11, %v5231_v27 }
  0x45   :  { %v1064_v32 = vmul.f32 %v1063_v17, %v5195_v10  ;;  %v540_v1 = vadd.f32 %v432_v59, %v5048_v36  ;;  %v1339_v51 = vadd.f32 -0.015866, %v1338_v60  ;;  %v570_v47 = vadd.f32 %v534_v23, %v5236_v50 }
  0x46   :  { %v572_v12 = vadd.f32 %v536_v56, %v5241_v35  ;;  %v1156_v43 = vmul.f32 %v1155_v40, %v5258_v22  ;;  %v1248_v9 = vmul.f32 %v1247_v7, %v5292_v57  ;;  %v5340_v30 = vadd.f32 %v538_v39, %v5247_v34 }
  0x47   :  { %v1065_v42 = vadd.f32 -0.14207031, %v1064_v32  ;;  %v5343_v36 = vadd.f32 %v540_v1, %v5252_v26  ;;  %v1340_v27 = vmul.f32 %v1339_v51, %v5319_v16  ;;  %v602_v33 = vmul.f32 2.0, %v5262_v25 }
  0x48   :  { %12267 = vst [vmem:[#allocation30_spill] sm:$0xff] %v5340_v30  ;;  %v604_v50 = vmul.f32 2.0, %v5266_v49  ;;  %v1157_v62 = vadd.f32 0.1064488, %v1156_v43  ;;  %v1249_v35 = vadd.f32 -0.074975304, %v1248_v9  ;;  %v12269_v26 = vsub.f32 %v5010_v3, %v5224_v15 }
  0x49   :  { %12268 = vst [vmem:[#allocation31_spill] sm:$0xff] %v5343_v36  ;;  %v1066_v38 = vmul.f32 %v1065_v42, %v5195_v10  ;;  %v606_v0 = vmul.f32 2.0, %v5270_v54  ;;  %v608_v31 = vmul.f32 2.0, %v5274_v63  ;;  %v1341_v34 = vadd.f32 0.04247222, %v1340_v27 }
  0x4a   :  { %v634_v52 = vadd.f32 %v602_v33, %v12269_v26  ;;  %v636_v17 = vadd.f32 %v604_v50, %v5262_v25  ;;  %v1158_v11 = vmul.f32 %v1157_v62, %v5258_v22  ;;  %v1250_v23 = vmul.f32 %v1249_v35, %v5292_v57 }
  0x4b   :  { %v1067_v21 = vadd.f32 0.19993454, %v1066_v38  ;;  %v638_v58 = vadd.f32 %v606_v0, %v5266_v49  ;;  %v640_v46 = vadd.f32 %v608_v31, %v5270_v54  ;;  %v1342_v59 = vmul.f32 %v1341_v34, %v5319_v16 }
  0x4c   :  { %v5362_v56 = vadd.f32 %v634_v52, %v5266_v49  ;;  %v5365_v3 = vadd.f32 %v636_v17, %v5270_v54  ;;  %v1159_v15 = vadd.f32 -0.14207031, %v1158_v11  ;;  %v1251_v25 = vadd.f32 0.1064488, %v1250_v23 }
  0x4d   :  { %v1068_v6 = vmul.f32 %v1067_v21, %v5195_v10  ;;  %v5370_v32 = vadd.f32 %v638_v58, %v5274_v63  ;;  %v5373_v60 = vadd.f32 %v640_v46, %v5278_v2  ;;  %v1343_v1 = vadd.f32 -0.074975304, %v1342_v59 }
  0x4e   :  { %v5375_v40 = vsub.f32 %v566_v19, %v570_v47  ;;  %v5377_v49 = vsub.f32 %v568_v41, %v572_v12  ;;  %v1160_v54 = vmul.f32 %v1159_v15, %v5258_v22  ;;  %v1252_v7 = vmul.f32 %v1251_v25, %v5292_v57 }
  0x4f   :  { %v1069_v39 = vadd.f32 -0.33333147, %v1068_v6  ;;  %v5386_v42 = vsub.f32 %v570_v47, %v5340_v30  ;;  %v5389_v51 = vsub.f32 %v572_v12, %v5343_v36  ;;  %v1344_v41 = vmul.f32 %v1343_v1, %v5319_v16 }
  0x50   :  { %v730_v43 = vmul.f32 %v5362_v56, %v5362_v56  ;;  %v732_v47 = vmul.f32 %v5365_v3, %v5365_v3  ;;  %vm1081_vm12 = vcmp.eq.f32.partialorder %v5081_v4, 0.0  ;;  %v1161_v12 = vadd.f32 0.19993454, %v1160_v54 }
  0x51   :  { %v1070_v19 = vmul.f32 %v1069_v39, %v5195_v10  ;;  %v1253_v9 = vadd.f32 -0.14207031, %v1252_v7  ;;  %v734_v38 = vmul.f32 %v5370_v32, %v5370_v32  ;;  %v736_v10 = vmul.f32 %v5373_v60, %v5373_v60 }
  0x52   :  { %v1345_v33 = vadd.f32 0.1064488, %v1344_v41  ;;  %v762_v50 = vmul.f32 %v5375_v40, %v5375_v40  ;;  %v764_v62 = vmul.f32 %v5377_v49, %v5377_v49  ;;  %vm829_vm13 = vcmp.eq.f32.partialorder %v5157_v24, 0.0 }
  0x53   :  { %v1071_v27 = vmul.f32 %v1070_v19, %v5182_v14  ;;  %v1162_v35 = vmul.f32 %v1161_v12, %v5258_v22  ;;  %v1254_v0 = vmul.f32 %v1253_v9, %v5292_v57  ;;  %v766_v31 = vmul.f32 %v5386_v42, %v5386_v42  ;;  %v12274_v12 = vld [vmem:[#allocation13_spill] sm:$0xff] }
  0x54   :  { %v768_v21 = vmul.f32 %v5389_v51, %v5389_v51  ;;  %v1346_v26 = vmul.f32 %v1345_v33, %v5319_v16  ;;  %v5419_v52 = vadd.f32 %v762_v50, %v730_v43  ;;  %v5421_v17 = vadd.f32 %v764_v62, %v732_v47  ;;  %v12273_v47 = vld [vmem:[#allocation16_spill] sm:$0xff] }
  0x55   :  { %v1072_v34 = vadd.f32 %v1071_v27, %v5182_v14  ;;  %vm841_vm14 = vcmp.eq.f32.partialorder %v5159_v28, inf  ;;  %v1163_v11 = vadd.f32 -0.33333147, %v1162_v35  ;;  %v1255_v23 = vadd.f32 0.19993454, %v1254_v0  ;;  %v12276_v0 = vld [vmem:[#allocation21_spill] sm:$0xff] }
  0x56   :  { %v5424_v58 = vadd.f32 %v766_v31, %v734_v38  ;;  %v5426_v46 = vadd.f32 %v768_v21, %v736_v10  ;;  %vm1167_vm15 = vcmp.gt.f32.partialorder %v5125_v55, %v5122_v53  ;;  %vm1267_vm1 = vcmp.lt.s32.totalorder %v5114_v48, 0  ;;  %v12278_v31 = vld [vmem:[#allocation28_spill] sm:$0xff] }
  0x57   :  { %v1074_v6 = vsub.f32 1.5707964, %v1072_v34  ;;  %v1347_v14 = vadd.f32 -0.14207031, %v1346_v26  ;;  %v826_v59 = vmul.f32 %v5280_v29, %v5157_v24  ;;  %v1164_v15 = vmul.f32 %v1163_v11, %v5258_v22  ;;  %v12279_v26 = vld [vmem:[#allocation27_spill] sm:$0xff] }
  0x58   :  { %vm1184_vm5 = vcmp.eq.s32.totalorder %v5125_v55, inf  ;;  %v1256_v25 = vmul.f32 %v1255_v23, %v5292_v57  ;;  %v1188_v1 = vand.u32 2147483648, %v5102_v44  ;;  %vm11752_vm4 = vcmp.lt.f32.partialorder %v5114_v48, 0.0 }
  0x59   :  { %v1075_v39 = vsel %vm1073_vm6, %v1074_v6, %v1072_v34  ;;  %v1348_v29 = vmul.f32 %v1347_v14, %v5319_v16  ;;  %v1165_v22 = vmul.f32 %v1164_v15, %v5226_v5  ;;  %v12270_v19 = vmov 0.0   ;;  %vm5458_vm6 = vmor %vm1083_vm7, %vm1084_vm8  ;;  %v12282_v6 = vld [vmem:[#allocation22_spill] sm:$0xff] }
  0x5a   :  { %v1077_v54 = vsub.f32 3.1415927, %v1075_v39  ;;  %v1257_v7 = vadd.f32 -0.33333147, %v1256_v25  ;;  %v5450_v41 = vsel %vm1267_vm1, 3.1415927, %v12270_v19  ;;  %vm1261_vm2 = vcmp.gt.f32.partialorder %v12273_v47, %v5148_v8  ;;  %vm1091_vm7 = vmand %vm1089_vm10, %vm1090_vm11 }
  0x5b   :  { %vm1271_vm0 = vcmp.ne.f32.partialorder %v5114_v48, %v5114_v48  ;;  %vm1272_vm1 = vcmp.ne.f32.partialorder %v12274_v12, %v12274_v12  ;;  %v12275_v9 = vmov 0.7853982   ;;  %v1349_v10 = vadd.f32 0.19993454, %v1348_v29  ;;  %v12283_v15 = vld [vmem:[#allocation14_spill] sm:$0xff] }
  0x5c   :  { %v5471_v38 = vsel %vm11752_vm4, 2.3561945, %v12275_v9  ;;  %v828_v27 = vsel %vm827_vm9, %v5157_v24, %v826_v59  ;;  %v1078_v33 = vsel %vm1076_vm3, %v1077_v54, %v1075_v39  ;;  %v1166_v50 = vadd.f32 %v1165_v22, %v5226_v5  ;;  %v12277_v5 = vld [vmem:[#allocation17_spill] sm:$0xff]  ;;  %v12284_v22 = vld [vmem:[#allocation18_spill] sm:$0xff] }
  0x5d   :  { %v1258_v62 = vmul.f32 %v1257_v7, %v5292_v57  ;;  %vm1277_vm8 = vcmp.eq.s32.totalorder %v5148_v8, inf  ;;  %vm1278_vm4 = vcmp.eq.s32.totalorder %v12273_v47, inf  ;;  %v840_v35 = vmul.f32 %v5285_v37, %v5159_v28 }
  0x5e   :  { %v1082_v61 = vsel %vm1081_vm12, %v12276_v0, %v1078_v33  ;;  %vm1269_vm3 = vcmp.eq.f32.partialorder %v12274_v12, 0.0  ;;  %v1282_v18 = vand.u32 2147483648, %v12274_v12  ;;  %v1350_v20 = vmul.f32 %v1349_v10, %v5319_v16  ;;  %v12291_v0 = vld [vmem:[#allocation19_spill] sm:$0xff] }
  0x5f   :  { %v5496_v57 = vmul.f32 %v12278_v31, %v12277_v5  ;;  %v1086_v21 = vsel %vm5458_vm6, nan, %v1082_v61  ;;  %v1168_v34 = vsub.f32 1.5707964, %v1166_v50  ;;  %v1259_v37 = vmul.f32 %v1258_v62, %v12279_v26  ;;  %v12292_v61 = vld [vmem:[#allocation20_spill] sm:$0xff] }
  0x60   :  { %v12280_v11 = vand.u32 2147483648, %v5157_v24  ;;  %v1092_v14 = vsel %vm1091_vm7, %v12282_v6, %v1086_v21  ;;  %v1351_v59 = vadd.f32 -0.33333147, %v1350_v20  ;;  %vm1361_vm9 = vcmp.lt.s32.totalorder %v12283_v15, 0 }
  0x61   :  { %v1093_v25 = vand.u32 2147483647, %v1092_v14  ;;  %v1169_v39 = vsel %vm1167_vm15, %v1168_v34, %v1166_v50  ;;  %v1260_v29 = vadd.f32 %v1259_v37, %v12279_v26  ;;  %v5514_v54 = vand.u32 2147483647, %v5375_v40  ;;  %v12295_v34 = vld [vmem:[#allocation23_spill] sm:$0xff]  ;;  %v12297_v14 = vld [vmem:[#allocation24_spill] sm:$0xff] }
  0x62   :  { %v5505_v23 = vsel %vm829_vm13, %v12280_v11, %v828_v27  ;;  %v5519_v24 = vsel %vm841_vm14, %v5159_v28, %v840_v35  ;;  %vm855_vm10 = vcmp.eq.f32.partialorder %v12277_v5, inf  ;;  %v1171_v7 = vsub.f32 3.1415927, %v1169_v39  ;;  %v12285_v27 = vld [vmem:[#allocation29_spill] sm:$0xff] }
  0x63   :  { %12281 = vst [vmem:[#allocation16_spill] sm:$0xff] %v5505_v23  ;;  %v1352_v43 = vmul.f32 %v1351_v59, %v5319_v16  ;;  %v5526_v10 = vand.u32 2147483647, %v5362_v56  ;;  %v868_v33 = vmul.f32 %v12285_v27, %v12284_v22  ;;  %v12286_v50 = vand.u32 2147483648, %v5081_v4 }
  0x64   :  { %vm12287_vm13 = vcmp.ne.f32.partialorder %v5102_v44, %v5102_v44  ;;  %vm12288_vm14 = vcmp.ne.f32.partialorder %v5104_v45, %v5104_v45  ;;  %v1262_v16 = vsub.f32 1.5707964, %v1260_v29  ;;  %vm1355_vm6 = vcmp.gt.f32.partialorder %v12292_v61, %v12291_v0 }
  0x65   :  { %v1095_v62 = vor.u32 %v12286_v50, %v1093_v25  ;;  %vm5538_vm15 = vmor %vm12288_vm14, %vm12287_vm13  ;;  %vm12293_vm7 = vcmp.lt.f32.partialorder %v5104_v45, 0.0  ;;  %vm12294_vm12 = vcmp.eq.s32.totalorder %v5122_v53, inf  ;;  %v1353_v4 = vmul.f32 %v1352_v43, %v5308_v13  ;;  %v12301_v43 = vld [vmem:[#allocation15_spill] sm:$0xff] }
  0x66   :  { %v1172_v20 = vsel %vm12293_vm7, %v1171_v7, %v1169_v39  ;;  %vm1185_vm11 = vmand %vm12294_vm12, %vm1184_vm5  ;;  %v1098_v31 = vmin.f32 %v5514_v54, %v5526_v10  ;;  %v1099_v21 = vmax.f32 %v5514_v54, %v5526_v10  ;;  %vm12296_vm13 = vcmp.eq.f32.partialorder %v5102_v44, 0.0 }
  0x67   :  { %v1176_v26 = vsel %vm12296_vm13, %v12295_v34, %v1172_v20  ;;  %v1263_v45 = vsel %vm1261_vm2, %v1262_v16, %v1260_v29  ;;  %v2553_v55 = vmul.f32 2.864789, %v1095_v62  ;;  %v1354_v11 = vadd.f32 %v1353_v4, %v5308_v13 }
  0x68   :  { %v1180_v53 = vsel %vm5538_vm15, nan, %v1176_v26  ;;  %v1265_v37 = vsub.f32 3.1415927, %v1263_v45  ;;  %v1362_v6 = vsel %vm1361_vm9, 3.1415927, %v12270_v19  ;;  %vm843_vm12 = vcmp.eq.f32.partialorder %v5159_v28, 0.0  ;;  %vm5579_vm15 = vmor %vm1271_vm0, %vm1272_vm1 }
  0x69   :  { %vm857_vm14 = vcmp.eq.f32.partialorder %v12277_v5, 0.0  ;;  %vm871_vm2 = vcmp.eq.f32.partialorder %v12284_v22, 0.0  ;;  %v1186_v59 = vsel %vm1185_vm11, %v12297_v14, %v1180_v53  ;;  %vm1365_vm9 = vcmp.ne.f32.partialorder %v12283_v15, %v12283_v15  ;;  %vm1279_vm11 = vmand %vm1277_vm8, %vm1278_vm4 }
  0x6a   :  { %v2585_v25 = vfloor.f32 %v2553_v55  ;;  %4829 = vrcp.f32 %v1099_v21  ;;  %v1187_v39 = vand.u32 2147483647, %v1186_v59  ;;  %vm12300_vm7 = vcmp.lt.f32.partialorder %v5114_v48, 0.0 }
  0x6b   :  { %v1266_v29 = vsel %vm12300_vm7, %v1265_v37, %v1263_v45  ;;  %v1356_v7 = vsub.f32 1.5707964, %v1354_v11  ;;  %vm1366_vm0 = vcmp.ne.f32.partialorder %v12301_v43, %v12301_v43  ;;  %vm1371_vm1 = vcmp.eq.s32.totalorder %v12291_v0, inf }
  0x6c   :  { %v1270_v27 = vsel %vm1269_vm3, %v5450_v41, %v1266_v29  ;;  %vm2649_vm13 = vcmp.lt.f32.partialorder %v2585_v25, 0.0  ;;  %v2681_v50 = vadd.f32 9.0, %v2585_v25  ;;  %v1189_v48 = vor.u32 %v1188_v1, %v1187_v39  ;;  %vm5610_vm3 = vmor %vm1365_vm9, %vm1366_vm0 }
  0x6d   :  { %v1274_v47 = vsel %vm5579_vm15, nan, %v1270_v27  ;;  %v1357_v8 = vsel %vm1355_vm6, %v1356_v7, %v1354_v11  ;;  %vm1372_vm4 = vcmp.eq.s32.totalorder %v12292_v61, inf  ;;  %vm1363_vm8 = vcmp.eq.f32.partialorder %v12301_v43, 0.0 }
  0x6e   :  { %v1280_v62 = vsel %vm1279_vm11, %v5471_v38, %v1274_v47  ;;  %v1359_v35 = vsub.f32 3.1415927, %v1357_v8  ;;  %v2713_v41 = vsel %vm2649_vm13, %v2681_v50, %v2585_v25  ;;  %v2555_v1 = vmul.f32 2.864789, %v1189_v48  ;;  %vm1373_vm11 = vmand %vm1371_vm1, %vm1372_vm4 }
  0x6f   :  { %v1281_v16 = vand.u32 2147483647, %v1280_v62  ;;  %vm2745_vm15 = vcmp.ge.f32.partialorder %v2713_v41, 9.0  ;;  %v4773_v20 = vadd.f32 -9.0, %v2713_v41  ;;  %v856_v38 = vsel %vm855_vm10, %v12277_v5, %v5496_v57 }
  0x70   :  { %vm12304_vm6 = vcmp.eq.f32.partialorder %v12284_v22, inf  ;;  %vm12305_vm7 = vcmp.lt.f32.partialorder %v12283_v15, 0.0  ;;  %v2587_v45 = vfloor.f32 %v2555_v1  ;;  %v1376_v53 = vand.u32 2147483648, %v12301_v43 }
  0x71   :  { %v870_v61 = vsel %vm12304_vm6, %v12284_v22, %v868_v33  ;;  %v1360_v4 = vsel %vm12305_vm7, %v1359_v35, %v1357_v8  ;;  %vm12306_vm9 = vmmov %vm12305_vm7  ;;  %v1283_v34 = vor.u32 %v1282_v18, %v1281_v16  ;;  %v5630_v57 = vsel %vm2745_vm15, %v4773_v20, %v2713_v41 }
  0x72   :  { %v1370_v21 = vsel %vm12306_vm9, 2.3561945, %v12275_v9  ;;  %v1364_v26 = vsel %vm1363_vm8, %v1362_v6, %v1360_v4  ;;  %12307 = vst [vmem:[#allocation13_spill] sm:$0xff] %v5630_v57  ;;  %vm2841_vm10 = vcmp.eq.f32.partialorder %v5630_v57, 0.0  ;;  %vm3353_vm0 = vcmp.eq.f32.partialorder %v5630_v57, 8.0 }
  0x73   :  { %v1368_v33 = vsel %vm5610_vm3, nan, %v1364_v26  ;;  %v2557_v37 = vmul.f32 2.864789, %v1283_v34  ;;  %vm5637_vm13 = vcmp.eq.f32.partialorder %v2553_v55, %v2585_v25  ;;  %v12308_v0 = vmov 0 }
  0x74   :  { %v1374_v15 = vsel %vm1373_vm11, %v1370_v21, %v1368_v33  ;;  %v12309_v0 = vsel %vm5637_vm13, 4294967295, %v12308_v0  ;;  %vm2651_vm1 = vcmp.lt.f32.partialorder %v2587_v45, 0.0  ;;  %v2683_v18 = vadd.f32 9.0, %v2587_v45 }
  0x75   :  { %12310 = vst [vmem:[#allocation21_spill] sm:$0xff] %v12309_v0  ;;  %v1375_v12 = vand.u32 2147483647, %v1374_v15  ;;  %v5642_v11 = vsel %vm2841_vm10, %v5505_v23, 0.0  ;;  %v5645_v6 = vsel %vm3353_vm0, %v5505_v23, 0.0  ;;  %v12313_v14 = vand.u32 2147483648, %v5159_v28 }
  0x76   :  { %12311 = vst [vmem:[#allocation17_spill] sm:$0xff] %v5642_v11  ;;  %12312 = vst [vmem:[#allocation28_spill] sm:$0xff] %v5645_v6  ;;  %v12315_v55 = vand.u32 2147483648, %v12277_v5  ;;  %v12317_v25 = vand.u32 2147483648, %v12284_v22  ;;  %v2589_v29 = vfloor.f32 %v2557_v37  ;;  %v2715_v43 = vsel %vm2651_vm1, %v2683_v18, %v2587_v45 }
  0x77   :  { %v5652_v59 = vsel %vm843_vm12, %v12313_v14, %v5519_v24  ;;  %v1377_v7 = vor.u32 %v1376_v53, %v1375_v12  ;;  %v3417_v28 = vsel %vm5637_vm13, %v5642_v11, %v5645_v6  ;;  %4831 = vrsqrt.f32 %v5419_v52  ;;  %v4830_v24 = vpop.eup %4829 }
  0x78   :  { %12314 = vst [vmem:[#allocation27_spill] sm:$0xff] %v5652_v59  ;;  %v5658_v13 = vsel %vm857_vm14, %v12315_v55, %v856_v38  ;;  %v5664_v39 = vsel %vm871_vm2, %v12317_v25, %v870_v61  ;;  %vm2653_vm12 = vcmp.lt.f32.partialorder %v2589_v29, 0.0  ;;  %v2685_v5 = vadd.f32 9.0, %v2589_v29 }
  0x79   :  { %12316 = vst [vmem:[#allocation22_spill] sm:$0xff] %v5658_v13  ;;  %12318 = vst [vmem:[#allocation14_spill] sm:$0xff] %v5664_v39  ;;  %vm2747_vm14 = vcmp.ge.f32.partialorder %v2715_v43, 9.0  ;;  %4833 = vrsqrt.f32 %v5421_v17  ;;  %v2559_v27 = vmul.f32 2.864789, %v1377_v7  ;;  %vm5672_vm4 = vcmp.eq.f32.partialorder %v2555_v1, %v2587_v45 }
  0x7a   :  { %v12319_v22 = vmov 0  ;;  %v4775_v50 = vadd.f32 -9.0, %v2715_v43  ;;  %v5679_v48 = vmul.f32 %v4830_v24, %v1098_v31  ;;  %v2717_v47 = vsel %vm2653_vm12, %v2685_v5, %v2589_v29 }
  0x7b   :  { %v12320_v22 = vsel %vm5672_vm4, 4294967295, %v12319_v22  ;;  %v3449_v8 = vadd.f32 %v3417_v28, %v5642_v11  ;;  %vm1130_vm2 = vcmp.ne.f32.partialorder %v5375_v40, %v5375_v40  ;;  %vm1131_vm8 = vcmp.ne.f32.partialorder %v5362_v56, %v5362_v56 }
  0x7c   :  { %12321 = vst [vmem:[#allocation18_spill] sm:$0xff] %v12320_v22  ;;  %v2591_v62 = vfloor.f32 %v2559_v27  ;;  %vm2749_vm3 = vcmp.ge.f32.partialorder %v2717_v47, 9.0  ;;  %v4777_v35 = vadd.f32 -9.0, %v2717_v47  ;;  %v5686_v41 = vsel %vm2747_vm14, %v4775_v50, %v2715_v43  ;;  %vm5688_vm15 = vmor %vm1130_vm2, %vm1131_vm8 }
  0x7d   :  { %12322 = vst [vmem:[#allocation29_spill] sm:$0xff] %v5686_v41  ;;  %vm5692_vm6 = vcmp.eq.f32.partialorder %v2557_v37, %v2589_v29  ;;  %v12325_v31 = vmov 0  ;;  %vm2843_vm7 = vcmp.eq.f32.partialorder %v5686_v41, 0.0  ;;  %vm3355_vm9 = vcmp.eq.f32.partialorder %v5686_v41, 8.0 }
  0x7e   :  { %v12326_v31 = vsel %vm5692_vm6, 4294967295, %v12325_v31  ;;  %v5700_v44 = vmul.f32 %v5679_v48, %v5679_v48  ;;  %vm2655_vm11 = vcmp.lt.f32.partialorder %v2591_v62, 0.0  ;;  %v2687_v1 = vadd.f32 9.0, %v2591_v62 }
  0x7f   :  { %12327 = vst [vmem:[#allocation19_spill] sm:$0xff] %v12326_v31  ;;  %v5702_v20 = vsel %vm2749_vm3, %v4777_v35, %v2717_v47  ;;  %vm1136_vm10 = vcmp.eq.s32.totalorder %v5514_v54, inf  ;;  %v5707_v38 = vsel %vm2843_vm7, %v5652_v59, 0.0  ;;  %v5711_v61 = vsel %vm3355_vm9, %v5652_v59, 0.0 }
  0x80   :  { %12328 = vst [vmem:[#allocation20_spill] sm:$0xff] %v5702_v20  ;;  %vm2845_vm0 = vcmp.eq.f32.partialorder %v5702_v20, 0.0  ;;  %12329 = vst [vmem:[#allocation23_spill] sm:$0xff] %v5707_v38  ;;  %vm3357_vm1 = vcmp.eq.f32.partialorder %v5702_v20, 8.0  ;;  %v2719_v4 = vsel %vm2655_vm11, %v2687_v1, %v2591_v62  ;;  %v3419_v26 = vsel %vm5672_vm4, %v5707_v38, %v5711_v61 }
  0x81   :  { %12330 = vst [vmem:[#allocation24_spill] sm:$0xff] %v5711_v61  ;;  %v5714_v21 = vsel %vm2845_vm0, %v5658_v13, 0.0  ;;  %v5717_v34 = vsel %vm3357_vm1, %v5658_v13, 0.0  ;;  %vm2751_vm12 = vcmp.ge.f32.partialorder %v2719_v4, 9.0  ;;  %v4779_v45 = vadd.f32 -9.0, %v2719_v4 }
  0x82   :  { %12331 = vst [vmem:[#allocation15_spill] sm:$0xff] %v5714_v21  ;;  %12332 = vst [vmem:[#allocation32_spill] sm:$0xff] %v5717_v34  ;;  %v3421_v33 = vsel %vm5692_vm6, %v5714_v21, %v5717_v34  ;;  %v3451_v53 = vadd.f32 %v3419_v26, %v5707_v38  ;;  %vm5728_vm14 = vcmp.eq.f32.partialorder %v2559_v27, %v2591_v62  ;;  %v12333_v15 = vmov 0 }
  0x83   :  { %v12334_v15 = vsel %vm5728_vm14, 4294967295, %v12333_v15  ;;  %v3453_v37 = vadd.f32 %v3421_v33, %v5714_v21  ;;  %v1103_v12 = vmul.f32 0.002785687, %v5700_v44  ;;  %vm1137_vm2 = vcmp.eq.s32.totalorder %v5526_v10, inf }
  0x84   :  { %12335 = vst [vmem:[#allocation33_spill] sm:$0xff] %v12334_v15  ;;  %v5735_v18 = vsel %vm2751_vm12, %v4779_v45, %v2719_v4  ;;  %v3481_v14 = vadd.f32 %v3451_v53, %v3449_v8  ;;  %vm5739_vm8 = vmand %vm1136_vm10, %vm1137_vm2  ;;  %v5744_v25 = vand.u32 2147483647, %v5377_v49  ;;  %v5747_v29 = vand.u32 2147483647, %v5365_v3  ;;  %v4832_v43 = vpop.eup %4831 }
  0x85   :  { %12336 = vst [vmem:[#allocation34_spill] sm:$0xff] %v5735_v18  ;;  %vm2847_vm3 = vcmp.eq.f32.partialorder %v5735_v18, 0.0  ;;  %vm3359_vm7 = vcmp.eq.f32.partialorder %v5735_v18, 8.0  ;;  %4835 = vrsqrt.f32 %v5424_v58  ;;  %v1104_v7 = vadd.f32 -0.015866, %v1103_v12 }
  0x86   :  { %v5753_v28 = vsel %vm2847_vm3, %v5664_v39, 0.0  ;;  %v5756_v24 = vsel %vm3359_vm7, %v5664_v39, 0.0  ;;  %v3489_v5 = vadd.f32 %v3481_v14, %v3453_v37  ;;  %v1192_v27 = vmin.f32 %v5744_v25, %v5747_v29  ;;  %v4834_v50 = vpop.eup %4833 }
  0x87   :  { %12339 = vst [vmem:[#allocation35_spill] sm:$0xff] %v5753_v28  ;;  %12340 = vst [vmem:[#allocation36_spill] sm:$0xff] %v5756_v24  ;;  %v3423_v47 = vsel %vm5728_vm14, %v5753_v28, %v5756_v24  ;;  %v1105_v8 = vmul.f32 %v1104_v7, %v5700_v44  ;;  %v1193_v62 = vmax.f32 %v5744_v25, %v5747_v29  ;;  %4837 = vrsqrt.f32 %v5426_v46 }
  0x88   :  { %v3455_v35 = vadd.f32 %v3423_v47, %v5753_v28  ;;  %vm1224_vm11 = vcmp.ne.f32.partialorder %v5377_v49, %v5377_v49  ;;  %vm1225_vm10 = vcmp.ne.f32.partialorder %v5365_v3, %v5365_v3  ;;  %vm1230_vm1 = vcmp.eq.s32.totalorder %v5744_v25, inf }
  0x89   :  { %v1106_v1 = vadd.f32 0.04247222, %v1105_v8  ;;  %4839 = vrcp.f32 %v1193_v62  ;;  %vm5775_vm0 = vmor %vm1224_vm11, %vm1225_vm10  ;;  %vm1231_vm12 = vcmp.eq.s32.totalorder %v5747_v29, inf  ;;  %v5787_v53 = vand.u32 2147483647, %v5386_v42 }
  0x8a   :  { %v3497_v4 = vadd.f32 %v3489_v5, %v3455_v35  ;;  %vm5782_vm2 = vmand %vm1230_vm1, %vm1231_vm12  ;;  %v5790_v37 = vand.u32 2147483647, %v5370_v32  ;;  %vm1318_vm3 = vcmp.ne.f32.partialorder %v5386_v42, %v5386_v42  ;;  %vm1319_vm11 = vcmp.ne.f32.partialorder %v5370_v32, %v5370_v32 }
  0x8b   :  { %v1107_v45 = vmul.f32 %v1106_v1, %v5700_v44  ;;  %vm1324_vm10 = vcmp.eq.s32.totalorder %v5787_v53, inf  ;;  %vm5804_vm1 = vmor %vm1318_vm3, %vm1319_vm11  ;;  %v5814_v62 = vand.u32 2147483647, %v5389_v51  ;;  %v5817_v35 = vand.u32 2147483647, %v5373_v60 }
  0x8c   :  { %3505 = vst [vmem:[#allocation2] sm:$0xff] %v3497_v4  ;;  %v1286_v14 = vmin.f32 %v5787_v53, %v5790_v37  ;;  %v1287_v7 = vmax.f32 %v5787_v53, %v5790_v37  ;;  %vm1325_vm12 = vcmp.eq.s32.totalorder %v5790_v37, inf  ;;  %vm1412_vm7 = vcmp.ne.f32.partialorder %v5389_v51, %v5389_v51 }
  0x8d   :  { %v1108_v12 = vadd.f32 -0.074975304, %v1107_v45  ;;  %vm5809_vm9 = vmand %vm1324_vm10, %vm1325_vm12  ;;  %v1380_v45 = vmin.f32 %v5814_v62, %v5817_v35  ;;  %vm1413_vm11 = vcmp.ne.f32.partialorder %v5373_v60, %v5373_v60  ;;  %vm1418_vm12 = vcmp.eq.s32.totalorder %v5814_v62, inf }
  0x8e   :  { %4841 = vrcp.f32 %v1287_v7  ;;  %vm5830_vm10 = vmor %vm1412_vm7, %vm1413_vm11  ;;  %vm1419_vm5 = vcmp.eq.s32.totalorder %v5817_v35, inf  ;;  %vm834_vm3 = vcmp.eq.f32.partialorder %v5419_v52, inf  ;;  %vm848_vm7 = vcmp.eq.f32.partialorder %v5421_v17, inf }
  0x8f   :  { %v1109_v5 = vmul.f32 %v1108_v12, %v5700_v44  ;;  %v1381_v12 = vmax.f32 %v5814_v62, %v5817_v35  ;;  %vm5836_vm14 = vmand %vm1418_vm12, %vm1419_vm5  ;;  %v847_v31 = vmul.f32 %v4834_v50, %v5421_v17  ;;  %vm862_vm11 = vcmp.eq.f32.partialorder %v5424_v58, inf }
  0x90   :  { %vm876_vm6 = vcmp.eq.f32.partialorder %v5426_v46, inf  ;;  %vm1126_vm12 = vcmp.lt.s32.totalorder %v5375_v40, 0  ;;  %vm1123_vm5 = vcmp.lt.f32.partialorder %v5375_v40, 0.0 }
  0x91   :  { %v1110_v1 = vadd.f32 0.1064488, %v1109_v5  ;;  %4843 = vrcp.f32 %v1381_v12  ;;  %v833_v12 = vmul.f32 %v4832_v43, %v5419_v52  ;;  %v879_v43 = vand.u32 2147483648, %v5426_v46 }
  0x92   :  { %v4836_v4 = vpop.eup %4835 }
  0x93   :  { %v1111_v7 = vmul.f32 %v1110_v1, %v5700_v44  ;;  %v837_v1 = vand.u32 2147483648, %v5419_v52  ;;  %v835_v50 = vsel %vm834_vm3, %v5419_v52, %v833_v12  ;;  %v1127_v12 = vsel %vm1126_vm12, 3.1415927, %v12270_v19 }
  0x94   :  { %v4838_v34 = vpop.eup %4837  ;;  %vm12353_vm3 = vcmp.eq.f32.partialorder %v5419_v52, 0.0  ;;  %vm1128_vm12 = vcmp.eq.f32.partialorder %v5362_v56, 0.0 }
  0x95   :  { %v1112_v61 = vadd.f32 -0.14207031, %v1111_v7  ;;  %v861_v7 = vmul.f32 %v4836_v4, %v5424_v58  ;;  %v875_v21 = vmul.f32 %v4838_v34, %v5426_v46  ;;  %v849_v4 = vsel %vm848_vm7, %v5421_v17, %v847_v31 }
  0x96   :  { %v4840_v6 = vpop.eup %4839  ;;  %vm12357_vm7 = vcmp.eq.f32.partialorder %v5424_v58, 0.0 }
  0x97   :  { %v1113_v15 = vmul.f32 %v1112_v61, %v5700_v44  ;;  %v5845_v28 = vmul.f32 %v4840_v6, %v1192_v27  ;;  %v851_v6 = vand.u32 2147483648, %v5421_v17  ;;  %v865_v61 = vand.u32 2147483648, %v5424_v58 }
  0x98   :  { %v863_v0 = vsel %vm862_vm11, %v5424_v58, %v861_v7  ;;  %v877_v11 = vsel %vm876_vm6, %v5426_v46, %v875_v21  ;;  %v5886_v7 = vsel %vm12353_vm3, %v837_v1, %v835_v50  ;;  %vm12355_vm6 = vcmp.eq.f32.partialorder %v5421_v17, 0.0 }
  0x99   :  { %v1114_v22 = vadd.f32 0.19993454, %v1113_v15  ;;  %v5855_v38 = vmul.f32 %v5845_v28, %v5845_v28  ;;  %12354 = vst [vmem:[#allocation37_spill] sm:$0xff] %v5886_v7  ;;  %v5890_v21 = vsel %vm12355_vm6, %v851_v6, %v849_v4  ;;  %vm12359_vm11 = vcmp.eq.f32.partialorder %v5426_v46, 0.0 }
  0x9a   :  { %12356 = vst [vmem:[#allocation38_spill] sm:$0xff] %v5890_v21  ;;  %vm1220_vm3 = vcmp.lt.s32.totalorder %v5377_v49, 0  ;;  %v1135_v58 = vsel %vm1123_vm5, 2.3561945, %v12275_v9  ;;  %vm1314_vm6 = vcmp.lt.s32.totalorder %v5386_v42, 0 }
  0x9b   :  { %v1115_v27 = vmul.f32 %v1114_v22, %v5700_v44  ;;  %v1197_v34 = vmul.f32 0.002785687, %v5855_v38  ;;  %v4842_v15 = vpop.eup %4841  ;;  %v5917_v6 = vsel %vm1220_vm3, 3.1415927, %v12270_v19  ;;  %vm1408_vm3 = vcmp.lt.s32.totalorder %v5389_v51, 0 }
  0x9c   :  { %v5874_v22 = vmul.f32 %v4842_v15, %v1286_v14  ;;  %v5894_v14 = vsel %vm12357_vm7, %v865_v61, %v863_v0  ;;  %vm11785_vm7 = vcmp.lt.f32.partialorder %v5377_v49, 0.0  ;;  %v5933_v15 = vsel %vm1314_vm6, 3.1415927, %v12270_v19 }
  0x9d   :  { %v1116_v39 = vadd.f32 -0.33333147, %v1115_v27  ;;  %v1198_v13 = vadd.f32 -0.015866, %v1197_v34  ;;  %12358 = vst [vmem:[#allocation39_spill] sm:$0xff] %v5894_v14  ;;  %vm1405_vm6 = vcmp.lt.f32.partialorder %v5389_v51, 0.0 }
  0x9e   :  { %v5882_v31 = vmul.f32 %v5874_v22, %v5874_v22  ;;  %v5922_v61 = vsel %vm11785_vm7, 2.3561945, %v12275_v9  ;;  %vm12362_vm7 = vcmp.gt.f32.partialorder %v5526_v10, %v5514_v54  ;;  %v5952_v41 = vsel %vm1408_vm3, 3.1415927, %v12270_v19 }
  0x9f   :  { %v1117_v59 = vmul.f32 %v1116_v39, %v5700_v44  ;;  %v1199_v23 = vmul.f32 %v1198_v13, %v5855_v38  ;;  %v5898_v39 = vsel %vm12359_vm11, %v879_v43, %v877_v11  ;;  %v4844_v13 = vpop.eup %4843  ;;  %vm1311_vm11 = vcmp.lt.f32.partialorder %v5386_v42, 0.0 }
  0xa0   :  { %12360 = vst [vmem:[#allocation40_spill] sm:$0xff] %v5898_v39  ;;  %v1291_v17 = vmul.f32 0.002785687, %v5882_v31  ;;  %v5909_v46 = vmul.f32 %v4844_v13, %v1380_v45  ;;  %v5929_v45 = vld [vmem:[#allocation3 + $0x98] sm:$0xff]  ;;  %v5939_v4 = vsel %vm1311_vm11, 2.3561945, %v12275_v9 }
  0xa1   :  { %v1118_v44 = vmul.f32 %v1117_v59, %v5679_v48  ;;  %v1200_v52 = vadd.f32 0.04247222, %v1199_v23  ;;  %v5914_v59 = vld [vmem:[#allocation3 + $0x90] sm:$0xff]  ;;  %12361 = vst [vmem:[#allocation41_spill] sm:$0xff] %v5929_v45  ;;  %v5955_v54 = vmul.f32 2.0, %v5929_v45  ;;  %v12368_v30 = vrot.slane %v5929_v45, 2 }
  0xa2   :  { %v1292_v23 = vadd.f32 -0.015866, %v1291_v17  ;;  %v312_v0 = vmul.f32 2.0, %v5914_v59  ;;  %vm1222_vm3 = vcmp.eq.f32.partialorder %v5365_v3, 0.0 }
  0xa3   :  { %v1119_v11 = vadd.f32 %v1118_v44, %v5679_v48  ;;  %v1201_v1 = vmul.f32 %v1200_v52, %v5855_v38  ;;  %v5927_v48 = vmul.f32 %v5909_v46, %v5909_v46  ;;  %12363 = vst [vmem:[#allocation42_spill] sm:$0xff] %v5955_v54 }
  0xa4   :  { %v1293_v34 = vmul.f32 %v1292_v23, %v5882_v31 }
  0xa5   :  { %v1121_v43 = vsub.f32 1.5707964, %v1119_v11  ;;  %v1202_v27 = vadd.f32 -0.074975304, %v1201_v1  ;;  %v1385_v13 = vmul.f32 0.002785687, %v5927_v48 }
  0xa6   :  { %v1294_v17 = vadd.f32 0.04247222, %v1293_v34  ;;  %v5967_v1 = vld [vmem:[#allocation3 + $0xb0] sm:$0xff] }
  0xa7   :  { %v1122_v44 = vsel %vm12362_vm7, %v1121_v43, %v1119_v11  ;;  %v1203_v52 = vmul.f32 %v1202_v27, %v5855_v38  ;;  %v1386_v50 = vadd.f32 -0.015866, %v1385_v13  ;;  %v5960_v43 = vld [vmem:[#allocation3 + $0xa8] sm:$0xff]  ;;  %v162_v27 = vrot.slane %v5914_v59, 2  ;;  %12364 = vst [vmem:[#allocation43_spill] sm:$0xff] %v5967_v1 }
  0xa8   :  { %v1124_v23 = vsub.f32 3.1415927, %v1122_v44  ;;  %v1295_v20 = vmul.f32 %v1294_v17, %v5882_v31  ;;  %v167_v57 = vrot.slane %v5960_v43, 2 }
  0xa9   :  { %v1204_v18 = vadd.f32 0.1064488, %v1203_v52  ;;  %v1387_v11 = vmul.f32 %v1386_v50, %v5927_v48 }
  0xaa   :  { %v1125_v10 = vsel %vm1123_vm5, %v1124_v23, %v1122_v44  ;;  %v1296_v17 = vadd.f32 -0.074975304, %v1295_v20  ;;  %v433_v23 = vrot.slane %v312_v0, 1  ;;  %v5978_v20 = vld [vmem:[#allocation3 + $0xc8] sm:$0xff] }
  0xab   :  { %v1129_v13 = vsel %vm1128_vm12, %v1127_v12, %v1125_v10  ;;  %v1205_v52 = vmul.f32 %v1204_v18, %v5855_v38  ;;  %v1388_v50 = vadd.f32 0.04247222, %v1387_v11  ;;  %v5976_v10 = vld [vmem:[#allocation3 + $0xc0] sm:$0xff]  ;;  %12365 = vst [vmem:[#allocation44_spill] sm:$0xff] %v5978_v20  ;;  %v5980_v18 = vld [vmem:[#allocation3 + $0xd8] sm:$0xff] }
  0xac   :  { %v1133_v40 = vsel %vm5688_vm15, nan, %v1129_v13  ;;  %v1297_v12 = vmul.f32 %v1296_v17, %v5882_v31  ;;  %v5984_v13 = vld [vmem:[#allocation3 + $0xe0] sm:$0xff]  ;;  %v172_v0 = vrot.slane %v5976_v10, 2  ;;  %v5992_v17 = vsel %vm1405_vm6, 2.3561945, %v12275_v9 }
  0xad   :  { %v1139_v34 = vsel %vm5739_vm8, %v1135_v58, %v1133_v40  ;;  %v1206_v36 = vadd.f32 -0.14207031, %v1205_v52  ;;  %v1389_v11 = vmul.f32 %v1388_v50, %v5927_v48  ;;  %12366 = vst [vmem:[#allocation45_spill] sm:$0xff] %v5984_v13  ;;  %vm12369_vm15 = vcmask 1045504  }
  0xae   :  { %v1140_v16 = vand.u32 2147483647, %v1139_v34  ;;  %v1298_v52 = vadd.f32 0.1064488, %v1297_v12  ;;  %v12367_v34 = vand.u32 2147483648, %v5362_v56  ;;  %v164_v63 = vsel %vm12369_vm15, %v162_v27, %v12368_v30  ;;  %vm12373_vm5 = vmmov %vm12369_vm15 }
  0xaf   :  { %v1207_v58 = vmul.f32 %v1206_v36, %v5855_v38  ;;  %v1390_v50 = vadd.f32 -0.074975304, %v1389_v11  ;;  %v177_v55 = vrot.slane %v5980_v18, 2  ;;  %v12370_v9 = vrot.slane %v5955_v54, 1  ;;  %vm12375_vm12 = vmmov %vm12373_vm5 }
  0xb0   :  { %v1142_v44 = vor.u32 %v12367_v34, %v1140_v16  ;;  %v1299_v36 = vmul.f32 %v1298_v52, %v5882_v31  ;;  %vm12371_vm8 = vcmask 1046528   ;;  %v12372_v56 = vrot.slane %v5967_v1, 2  ;;  %vm12380_vm7 = vmmov %vm12373_vm5 }
  0xb1   :  { %v1208_v2 = vadd.f32 0.19993454, %v1207_v58  ;;  %v435_v19 = vsel %vm12371_vm8, %v433_v23, %v12370_v9  ;;  %v1391_v40 = vmul.f32 %v1390_v50, %v5927_v48  ;;  %v12374_v30 = vrot.slane %v5978_v20, 2  ;;  %vm12382_vm15 = vmmov %vm12371_vm8 }
  0xb2   :  { %v6010_v16 = vsel %vm12373_vm5, %v167_v57, %v12372_v56  ;;  %v315_v11 = vmul.f32 2.0, %v5960_v43  ;;  %v1300_v52 = vadd.f32 -0.14207031, %v1299_v36  ;;  %v6020_v34 = vmul.f32 2.0, %v5967_v1  ;;  %vm12384_vm5 = vmmov %vm12371_vm8 }
  0xb3   :  { %v6015_v27 = vsel %vm12375_vm12, %v172_v0, %v12374_v30  ;;  %v1209_v58 = vmul.f32 %v1208_v2, %v5855_v38  ;;  %v318_v9 = vmul.f32 2.0, %v5976_v10  ;;  %v1392_v23 = vadd.f32 0.1064488, %v1391_v40  ;;  %v12378_v2 = vld [vmem:[#allocation12_spill] sm:$0xff] }
  0xb4   :  { %v6024_v50 = vmul.f32 2.0, %v5978_v20  ;;  %v321_v57 = vmul.f32 2.0, %v5980_v18  ;;  %v541_v56 = vadd.f32 %v435_v19, %v5914_v59  ;;  %v1301_v30 = vmul.f32 %v1300_v52, %v5882_v31 }
  0xb5   :  { %v1210_v0 = vadd.f32 -0.33333147, %v1209_v58  ;;  %v6030_v12 = vmul.f32 2.0, %v5984_v13  ;;  %v609_v36 = vmul.f32 2.0, %v12378_v2  ;;  %v1393_v1 = vmul.f32 %v1392_v23, %v5927_v48 }
  0xb6   :  { %12376 = vst [vmem:[#allocation46_spill] sm:$0xff] %v6024_v50  ;;  %v6034_v45 = vmul.f32 2.864789, %v1142_v44  ;;  %v12379_v40 = vrot.slane %v5984_v13, 2  ;;  %v438_v54 = vrot.slane %v315_v11, 1  ;;  %v11813_v52 = vrot.slane %v6020_v34, 1 }
  0xb7   :  { %12377 = vst [vmem:[#allocation47_spill] sm:$0xff] %v6030_v12  ;;  %v1211_v19 = vmul.f32 %v1210_v0, %v5855_v38  ;;  %v1302_v58 = vadd.f32 0.19993454, %v1301_v30  ;;  %v443_v39 = vrot.slane %v318_v9, 1  ;;  %v1394_v14 = vadd.f32 -0.14207031, %v1393_v1 }
  0xb8   :  { %v6039_v20 = vsel %vm12380_vm7, %v177_v55, %v12379_v40  ;;  %v11814_v21 = vrot.slane %v6024_v50, 1  ;;  %v448_v23 = vrot.slane %v321_v57, 1  ;;  %v6045_v44 = vadd.f32 %v541_v56, %v164_v63  ;;  %v12381_v40 = vld [vmem:[#allocation9_spill] sm:$0xff] }
  0xb9   :  { %v1212_v13 = vmul.f32 %v1211_v19, %v5845_v28  ;;  %v1303_v55 = vmul.f32 %v1302_v58, %v5882_v31  ;;  %v11815_v11 = vrot.slane %v6030_v12, 1  ;;  %v641_v38 = vadd.f32 %v609_v36, %v12381_v40 }
  0xba   :  { %v1395_v0 = vmul.f32 %v1394_v14, %v5927_v48  ;;  %v6053_v9 = vfloor.f32 %v6034_v45  ;;  %v270_v1 = vsub.f32 %v5914_v59, %v164_v63  ;;  %v272_v57 = vsub.f32 %v5960_v43, %v6010_v16 }
  0xbb   :  { %v1213_v56 = vadd.f32 %v1212_v13, %v5845_v28  ;;  %v1304_v30 = vadd.f32 -0.33333147, %v1303_v55  ;;  %v6061_v19 = vsub.f32 %v5976_v10, %v6015_v27  ;;  %v6065_v36 = vsub.f32 %v5980_v18, %v6039_v20  ;;  %v12383_v28 = vld [vmem:[#allocation10_spill] sm:$0xff] }
  0xbc   :  { %v1396_v14 = vadd.f32 0.19993454, %v1395_v0  ;;  %v440_v58 = vsel %vm12382_vm15, %v438_v54, %v11813_v52  ;;  %v445_v63 = vsel %vm12371_vm8, %v443_v39, %v11814_v21  ;;  %v6075_v59 = vsub.f32 %v12383_v28, %v6045_v44 }
  0xbd   :  { %v1215_v13 = vsub.f32 1.5707964, %v1213_v56  ;;  %v1305_v55 = vmul.f32 %v1304_v30, %v5882_v31  ;;  %v450_v40 = vsel %vm12384_vm5, %v448_v23, %v11815_v11  ;;  %v6081_v0 = vadd.f32 %v641_v38, %v270_v1 }
  0xbe   :  { %vm1316_vm12 = vcmp.eq.f32.partialorder %v5370_v32, 0.0  ;;  %v1397_v54 = vmul.f32 %v1396_v14, %v5927_v48  ;;  %v2682_v52 = vadd.f32 9.0, %v6053_v9  ;;  %v611_v39 = vmul.f32 2.0, %v270_v1 }
  0xbf   :  { %v613_v21 = vmul.f32 2.0, %v272_v57  ;;  %vm12385_vm7 = vcmp.gt.f32.partialorder %v5747_v29, %v5744_v25  ;;  %v1306_v31 = vmul.f32 %v1305_v55, %v5874_v22  ;;  %vm2650_vm15 = vcmp.lt.f32.partialorder %v6053_v9, 0.0 }
  0xc0   :  { %v1216_v28 = vsel %vm12385_vm7, %v1215_v13, %v1213_v56  ;;  %v615_v23 = vmul.f32 2.0, %v6061_v19  ;;  %v1398_v30 = vadd.f32 -0.33333147, %v1397_v54  ;;  %v543_v11 = vadd.f32 %v440_v58, %v5960_v43 }
  0xc1   :  { %v1218_v38 = vsub.f32 3.1415927, %v1216_v28  ;;  %v6094_v14 = vand.u32 2147483647, %v6075_v59  ;;  %v1307_v12 = vadd.f32 %v1306_v31, %v5874_v22  ;;  %v545_v50 = vadd.f32 %v445_v63, %v5976_v10 }
  0xc2   :  { %v547_v25 = vadd.f32 %v450_v40, %v5980_v18  ;;  %v6100_v29 = vand.u32 2147483647, %v6081_v0  ;;  %vm12386_vm8 = vcmp.lt.f32.partialorder %v5377_v49, 0.0  ;;  %v1399_v13 = vmul.f32 %v1398_v30, %v5927_v48 }
  0xc3   :  { %v1219_v56 = vsel %vm12386_vm8, %v1218_v38, %v1216_v28  ;;  %v2714_v55 = vsel %vm2650_vm15, %v2682_v52, %v6053_v9  ;;  %v643_v43 = vadd.f32 %v611_v39, %v12378_v2  ;;  %v1309_v58 = vsub.f32 1.5707964, %v1307_v12 }
  0xc4   :  { %v1223_v22 = vsel %vm1222_vm3, %v5917_v6, %v1219_v56  ;;  %vm1410_vm5 = vcmp.eq.f32.partialorder %v5373_v60, 0.0  ;;  %v645_v10 = vadd.f32 %v613_v21, %v270_v1  ;;  %v1428_v18 = vmax.f32 %v6094_v14, %v6100_v29 }
  0xc5   :  { %v1227_v49 = vsel %vm5775_vm0, nan, %v1223_v22  ;;  %v1400_v48 = vmul.f32 %v1399_v13, %v5909_v46  ;;  %v579_v52 = vadd.f32 %v543_v11, %v6010_v16  ;;  %v647_v63 = vadd.f32 %v615_v23, %v272_v57 }
  0xc6   :  { %v1233_v2 = vsel %vm5782_vm2, %v5922_v61, %v1227_v49  ;;  %vm12387_vm3 = vcmp.gt.f32.partialorder %v5790_v37, %v5787_v53  ;;  %vm2746_vm7 = vcmp.ge.f32.partialorder %v2714_v55, 9.0  ;;  %v4774_v21 = vadd.f32 -9.0, %v2714_v55 }
  0xc7   :  { %v1310_v6 = vsel %vm12387_vm3, %v1309_v58, %v1307_v12  ;;  %v1234_v1 = vand.u32 2147483647, %v1233_v2  ;;  %v1401_v26 = vadd.f32 %v1400_v48, %v5909_v46  ;;  %4845 = vrcp.f32 %v1428_v18 }
  0xc8   :  { %v1312_v40 = vsub.f32 3.1415927, %v1310_v6  ;;  %v6125_v54 = vadd.f32 %v545_v50, %v6015_v27  ;;  %v6128_v16 = vadd.f32 %v547_v25, %v6039_v20  ;;  %v6130_v11 = vadd.f32 %v643_v43, %v272_v57  ;;  %v12390_v50 = vld [vmem:[#allocation11_spill] sm:$0xff] }
  0xc9   :  { %v6133_v33 = vadd.f32 %v645_v10, %v6061_v19  ;;  %v12388_v53 = vand.u32 2147483648, %v5365_v3  ;;  %v1403_v12 = vsub.f32 1.5707964, %v1401_v26  ;;  %v6140_v46 = vadd.f32 %v647_v63, %v6065_v36 }
  0xca   :  { %v1313_v61 = vsel %vm1311_vm11, %v1312_v40, %v1310_v6  ;;  %v6145_v27 = vsel %vm2746_vm7, %v4774_v21, %v2714_v55  ;;  %v6148_v57 = vsub.f32 %v12390_v50, %v579_v52  ;;  %v6152_v3 = vsub.f32 %v6045_v44, %v6125_v54 }
  0xcb   :  { %v1236_v37 = vor.u32 %v12388_v53, %v1234_v1  ;;  %v1317_v20 = vsel %vm1316_vm12, %v5933_v15, %v1313_v61  ;;  %12389 = vst [vmem:[#allocation12_spill] sm:$0xff] %v6145_v27  ;;  %vm12391_vm0 = vcmp.gt.f32.partialorder %v5817_v35, %v5814_v62  ;;  %v6160_v31 = vsub.f32 %v579_v52, %v6128_v16  ;;  %v12403_v61 = vld [vmem:[#allocation38_spill] sm:$0xff] }
  0xcc   :  { %v1321_v42 = vsel %vm5804_vm1, nan, %v1317_v20  ;;  %v1404_v39 = vsel %vm12391_vm0, %v1403_v12, %v1401_v26  ;;  %v737_v44 = vmul.f32 %v6081_v0, %v6081_v0  ;;  %v739_v47 = vmul.f32 %v6130_v11, %v6130_v11 }
  0xcd   :  { %v2556_v28 = vmul.f32 2.864789, %v1236_v37  ;;  %v1327_v15 = vsel %vm5809_vm9, %v5939_v4, %v1321_v42  ;;  %v1406_v23 = vsub.f32 3.1415927, %v1404_v39  ;;  %vm2842_vm2 = vcmp.eq.f32.partialorder %v6145_v27, 0.0 }
  0xce   :  { %v1328_v38 = vand.u32 2147483647, %v1327_v15  ;;  %v6172_v62 = vmul.f32 %v6133_v33, %v6133_v33  ;;  %vm3354_vm9 = vcmp.eq.f32.partialorder %v6145_v27, 8.0  ;;  %v6178_v8 = vand.u32 2147483647, %v6148_v57 }
  0xcf   :  { %v2588_v30 = vfloor.f32 %v2556_v28  ;;  %v1407_v35 = vsel %vm1405_vm6, %v1406_v23, %v1404_v39  ;;  %v6181_v4 = vand.u32 2147483647, %v6130_v11  ;;  %v12392_v25 = vand.u32 2147483648, %v5370_v32 }
  0xd0   :  { %v1411_v13 = vsel %vm1410_vm5, %v5952_v41, %v1407_v35  ;;  %v6190_v51 = vmul.f32 %v6140_v46, %v6140_v46  ;;  %vm6196_vm11 = vcmp.eq.f32.partialorder %v6034_v45, %v6053_v9  ;;  %v12393_v43 = vmov 0 }
  0xd1   :  { %v1330_v56 = vor.u32 %v12392_v25, %v1328_v38  ;;  %vm2652_vm1 = vcmp.lt.f32.partialorder %v2588_v30, 0.0  ;;  %v1415_v55 = vsel %vm5830_vm10, nan, %v1411_v13  ;;  %v12394_v43 = vsel %vm6196_vm11, 4294967295, %v12393_v43 }
  0xd2   :  { %12395 = vst [vmem:[#allocation9_spill] sm:$0xff] %v12394_v43  ;;  %v2684_v32 = vadd.f32 9.0, %v2588_v30  ;;  %v1522_v22 = vmax.f32 %v6178_v8, %v6181_v4  ;;  %v1421_v41 = vsel %vm5836_vm14, %v5992_v17, %v1415_v55  ;;  %v6208_v5 = vsel %vm2842_vm2, %v5886_v7, 0.0  ;;  %v12410_v55 = vld [vmem:[#allocation39_spill] sm:$0xff]  ;;  %v52_v43 = vld [vmem:[#allocation3 + $0xe8] sm:$0x3] }
  0xd3   :  { %v2558_v58 = vmul.f32 2.864789, %v1330_v56  ;;  %12396 = vst [vmem:[#allocation10_spill] sm:$0xff] %v6208_v5  ;;  %v6211_v10 = vsel %vm3354_vm9, %v5886_v7, 0.0  ;;  %v1422_v45 = vand.u32 2147483647, %v1421_v41  ;;  %v1427_v18 = vmin.f32 %v6094_v14, %v6100_v29 }
  0xd4   :  { %12397 = vst [vmem:[#allocation11_spill] sm:$0xff] %v6211_v10  ;;  %v2716_v9 = vsel %vm2652_vm1, %v2684_v32, %v2588_v30  ;;  %4847 = vrcp.f32 %v1522_v22  ;;  %v769_v24 = vmul.f32 %v6075_v59, %v6075_v59  ;;  %v4846_v17 = vpop.eup %4845  ;;  %v12398_v52 = vand.u32 2147483648, %v5373_v60  ;;  %v12435_v7 = vld [vmem:[#allocation26_spill] sm:$0xff] }
  0xd5   :  { %v2590_v49 = vfloor.f32 %v2558_v58  ;;  %vm2748_vm10 = vcmp.ge.f32.partialorder %v2716_v9, 9.0  ;;  %v4776_v48 = vadd.f32 -9.0, %v2716_v9  ;;  %v3418_v2 = vsel %vm6196_vm11, %v6208_v5, %v6211_v10 }
  0xd6   :  { %v1424_v63 = vor.u32 %v12398_v52, %v1422_v45  ;;  %v771_v6 = vmul.f32 %v6148_v57, %v6148_v57  ;;  %v773_v21 = vmul.f32 %v6152_v3, %v6152_v3  ;;  %vm6227_vm14 = vcmp.eq.f32.partialorder %v2556_v28, %v2588_v30 }
  0xd7   :  { %v12399_v1 = vmov 0  ;;  %vm2654_vm6 = vcmp.lt.f32.partialorder %v2590_v49, 0.0  ;;  %v2686_v40 = vadd.f32 9.0, %v2590_v49  ;;  %v6231_v26 = vsel %vm2748_vm10, %v4776_v48, %v2716_v9 }
  0xd8   :  { %v12400_v1 = vsel %vm6227_vm14, 4294967295, %v12399_v1  ;;  %12402 = vst [vmem:[#allocation49_spill] sm:$0xff] %v6231_v26  ;;  %v2560_v60 = vmul.f32 2.864789, %v1424_v63  ;;  %vm2844_vm12 = vcmp.eq.f32.partialorder %v6231_v26, 0.0  ;;  %vm3356_vm15 = vcmp.eq.f32.partialorder %v6231_v26, 8.0 }
  0xd9   :  { %12401 = vst [vmem:[#allocation48_spill] sm:$0xff] %v12400_v1  ;;  %v6235_v53 = vmul.f32 %v4846_v17, %v1427_v18  ;;  %v2718_v37 = vsel %vm2654_vm6, %v2686_v40, %v2590_v49  ;;  %v6238_v12 = vsel %vm2844_vm12, %v12403_v61, 0.0  ;;  %v6241_v20 = vsel %vm3356_vm15, %v12403_v61, 0.0 }
  0xda   :  { %12404 = vst [vmem:[#allocation50_spill] sm:$0xff] %v6238_v12  ;;  %12405 = vst [vmem:[#allocation51_spill] sm:$0xff] %v6241_v20  ;;  %v3450_v50 = vadd.f32 %v3418_v2, %v6208_v5  ;;  %v2592_v42 = vfloor.f32 %v2560_v60  ;;  %vm2750_vm8 = vcmp.ge.f32.partialorder %v2718_v37, 9.0  ;;  %v4778_v39 = vadd.f32 -9.0, %v2718_v37 }
  0xdb   :  { %v3420_v28 = vsel %vm6227_vm14, %v6238_v12, %v6241_v20  ;;  %v6249_v23 = vadd.f32 %v769_v24, %v737_v44  ;;  %v6251_v38 = vadd.f32 %v771_v6, %v739_v47  ;;  %v6255_v30 = vmul.f32 %v6235_v53, %v6235_v53  ;;  %v12417_v6 = vld [vmem:[#allocation40_spill] sm:$0xff] }
  0xdc   :  { %v3452_v15 = vadd.f32 %v3420_v28, %v6238_v12  ;;  %vm6257_vm5 = vcmp.eq.f32.partialorder %v2558_v58, %v2590_v49  ;;  %v12406_v35 = vmov 0  ;;  %vm2656_vm3 = vcmp.lt.f32.partialorder %v2592_v42, 0.0  ;;  %v46_v12 = vld [vmem:[#allocation3 + $0xb8] sm:$0x3] }
  0xdd   :  { %v12407_v35 = vsel %vm6257_vm5, 4294967295, %v12406_v35  ;;  %v2688_v25 = vadd.f32 9.0, %v2592_v42  ;;  %v6261_v56 = vsel %vm2750_vm8, %v4778_v39, %v2718_v37  ;;  %v1432_v44 = vmul.f32 0.002785687, %v6255_v30 }
  0xde   :  { %12408 = vst [vmem:[#allocation52_spill] sm:$0xff] %v12407_v35  ;;  %12409 = vst [vmem:[#allocation53_spill] sm:$0xff] %v6261_v56  ;;  %vm2846_vm7 = vcmp.eq.f32.partialorder %v6261_v56, 0.0  ;;  %vm3358_vm0 = vcmp.eq.f32.partialorder %v6261_v56, 8.0  ;;  %v1521_v47 = vmin.f32 %v6178_v8, %v6181_v4  ;;  %v3482_v41 = vadd.f32 %v3452_v15, %v3450_v50 }
  0xdf   :  { %v2720_v13 = vsel %vm2656_vm3, %v2688_v25, %v2592_v42  ;;  %v6269_v32 = vsel %vm2846_vm7, %v12410_v55, 0.0  ;;  %v6272_v22 = vsel %vm3358_vm0, %v12410_v55, 0.0  ;;  %v1433_v9 = vadd.f32 -0.015866, %v1432_v44 }
  0xe0   :  { %12411 = vst [vmem:[#allocation54_spill] sm:$0xff] %v6269_v32  ;;  %12412 = vst [vmem:[#allocation55_spill] sm:$0xff] %v6272_v22  ;;  %vm2752_vm2 = vcmp.ge.f32.partialorder %v2720_v13, 9.0  ;;  %v4780_v58 = vadd.f32 -9.0, %v2720_v13  ;;  %v3422_v45 = vsel %vm6257_vm5, %v6269_v32, %v6272_v22  ;;  %v6280_v49 = vadd.f32 %v773_v21, %v6172_v62 }
  0xe1   :  { %v3454_v18 = vadd.f32 %v3422_v45, %v6269_v32  ;;  %v6283_v48 = vand.u32 2147483647, %v6152_v3  ;;  %v6286_v24 = vand.u32 2147483647, %v6133_v33  ;;  %v4848_v17 = vpop.eup %4847  ;;  %vm6288_vm9 = vcmp.eq.f32.partialorder %v2560_v60, %v2592_v42 }
  0xe2   :  { %v12413_v52 = vmov 0  ;;  %v6292_v63 = vsel %vm2752_vm2, %v4780_v58, %v2720_v13  ;;  %4849 = vrsqrt.f32 %v6249_v23  ;;  %v1434_v2 = vmul.f32 %v1433_v9, %v6255_v30 }
  0xe3   :  { %v12414_v52 = vsel %vm6288_vm9, 4294967295, %v12413_v52  ;;  %12416 = vst [vmem:[#allocation57_spill] sm:$0xff] %v6292_v63  ;;  %vm2848_vm1 = vcmp.eq.f32.partialorder %v6292_v63, 0.0  ;;  %vm3360_vm10 = vcmp.eq.f32.partialorder %v6292_v63, 8.0  ;;  %4851 = vrsqrt.f32 %v6251_v38 }
  0xe4   :  { %12415 = vst [vmem:[#allocation56_spill] sm:$0xff] %v12414_v52  ;;  %v6299_v62 = vmul.f32 %v4848_v17, %v1521_v47  ;;  %v6302_v21 = vsel %vm2848_vm1, %v12417_v6, 0.0  ;;  %v6305_v40 = vsel %vm3360_vm10, %v12417_v6, 0.0  ;;  %v3490_v60 = vadd.f32 %v3482_v41, %v3454_v18 }
  0xe5   :  { %12418 = vst [vmem:[#allocation58_spill] sm:$0xff] %v6302_v21  ;;  %12419 = vst [vmem:[#allocation59_spill] sm:$0xff] %v6305_v40  ;;  %v1435_v37 = vadd.f32 0.04247222, %v1434_v2  ;;  %v3424_v50 = vsel %vm6288_vm9, %v6302_v21, %v6305_v40  ;;  %v775_v42 = vmul.f32 %v6160_v31, %v6160_v31  ;;  %v1616_v28 = vmax.f32 %v6283_v48, %v6286_v24 }
  0xe6   :  { %v6315_v39 = vmul.f32 %v6299_v62, %v6299_v62  ;;  %v3456_v15 = vadd.f32 %v3424_v50, %v6302_v21  ;;  %v6327_v45 = vand.u32 2147483647, %v6160_v31  ;;  %v6331_v18 = vand.u32 2147483647, %v6140_v46  ;;  %v6409_v21 = vld [vmem:[#allocation3 + $0xa0] sm:$0x3] }
  0xe7   :  { %v1436_v25 = vmul.f32 %v1435_v37, %v6255_v30  ;;  %4853 = vrcp.f32 %v1616_v28  ;;  %v6324_v41 = vadd.f32 %v775_v42, %v6190_v51  ;;  %vm883_vm6 = vcmp.eq.f32.partialorder %v6249_v23, inf }
  0xe8   :  { %v1526_v44 = vmul.f32 0.002785687, %v6315_v39  ;;  %v3498_v47 = vadd.f32 %v3490_v60, %v3456_v15  ;;  %4855 = vrsqrt.f32 %v6280_v49  ;;  %v1710_v60 = vmax.f32 %v6327_v45, %v6331_v18 }
  0xe9   :  { %v1437_v13 = vadd.f32 -0.074975304, %v1436_v25  ;;  %4857 = vrsqrt.f32 %v6324_v41  ;;  %vm885_vm12 = vcmp.eq.f32.partialorder %v6249_v23, 0.0  ;;  %vm897_vm15 = vcmp.eq.f32.partialorder %v6251_v38, inf }
  0xea   :  { %v1527_v58 = vadd.f32 -0.015866, %v1526_v44  ;;  %3506 = vst [vmem:[#allocation2 + $0x8] sm:$0xff] %v3498_v47  ;;  %4859 = vrcp.f32 %v1710_v60  ;;  %v1615_v44 = vmin.f32 %v6283_v48, %v6286_v24  ;;  %vm899_vm8 = vcmp.eq.f32.partialorder %v6251_v38, 0.0 }
  0xeb   :  { %v1438_v9 = vmul.f32 %v1437_v13, %v6255_v30  ;;  %vm911_vm3 = vcmp.eq.f32.partialorder %v6280_v49, inf  ;;  %vm913_vm7 = vcmp.eq.f32.partialorder %v6280_v49, 0.0  ;;  %vm1455_vm0 = vcmp.lt.s32.totalorder %v6075_v59, 0 }
  0xec   :  { %v1528_v17 = vmul.f32 %v1527_v58, %v6315_v39  ;;  %v886_v58 = vand.u32 2147483648, %v6249_v23  ;;  %vm1452_vm2 = vcmp.lt.f32.partialorder %v6075_v59, 0.0  ;;  %v1709_v40 = vmin.f32 %v6327_v45, %v6331_v18 }
  0xed   :  { %v1439_v2 = vadd.f32 0.1064488, %v1438_v9  ;;  %v12420_v22 = vmov 0.0   ;;  %vm1459_vm1 = vcmp.ne.f32.partialorder %v6075_v59, %v6075_v59  ;;  %vm1449_vm10 = vcmp.gt.f32.partialorder %v6100_v29, %v6094_v14 }
  0xee   :  { %v1529_v51 = vadd.f32 0.04247222, %v1528_v17  ;;  %v180_v55 = vrot.slane %v52_v43, 2  ;;  %v317_v61 = vmul.f32 2.0, %v46_v12 }
  0xef   :  { %v1440_v37 = vmul.f32 %v1439_v2, %v6255_v30  ;;  %v4850_v50 = vpop.eup %4849 }
  0xf0   :  { %v1530_v42 = vmul.f32 %v1529_v51, %v6315_v39  ;;  %v4852_v28 = vpop.eup %4851  ;;  %v882_v13 = vmul.f32 %v4850_v50, %v6249_v23 }
  0xf1   :  { %v1441_v15 = vadd.f32 -0.14207031, %v1440_v37  ;;  %v896_v2 = vmul.f32 %v4852_v28, %v6251_v38  ;;  %v900_v37 = vand.u32 2147483648, %v6251_v38 }
  0xf2   :  { %v1531_v25 = vadd.f32 -0.074975304, %v1530_v42  ;;  %v884_v28 = vsel %vm883_vm6, %v6249_v23, %v882_v13  ;;  %v6374_v13 = vsel %vm1455_vm0, 3.1415927, %v12420_v22  ;;  %vm1460_vm6 = vcmp.ne.f32.partialorder %v6081_v0, %v6081_v0 }
  0xf3   :  { %v1442_v47 = vmul.f32 %v1441_v15, %v6255_v30  ;;  %v914_v15 = vand.u32 2147483648, %v6280_v49  ;;  %v6381_v52 = vsel %vm885_vm12, %v886_v58, %v884_v28  ;;  %vm1549_vm12 = vcmp.lt.s32.totalorder %v6148_v57, 0 }
  0xf4   :  { %v1532_v9 = vmul.f32 %v1531_v25, %v6315_v39  ;;  %v4854_v17 = vpop.eup %4853  ;;  %12421 = vst [vmem:[#allocation60_spill] sm:$0xff] %v6381_v52  ;;  %vm1560_vm0 = vcmp.eq.s32.totalorder %v6181_v4, inf }
  0xf5   :  { %v1443_v60 = vadd.f32 0.19993454, %v1442_v47  ;;  %v4856_v51 = vpop.eup %4855  ;;  %v6352_v42 = vmul.f32 %v4854_v17, %v1615_v44 }
  0xf6   :  { %v1533_v50 = vadd.f32 0.1064488, %v1532_v9  ;;  %v898_v9 = vsel %vm897_vm15, %v6251_v38, %v896_v2  ;;  %v910_v17 = vmul.f32 %v4856_v51, %v6280_v49  ;;  %v4858_v10 = vpop.eup %4857  ;;  %vm11829_vm15 = vcmp.lt.f32.partialorder %v6148_v57, 0.0 }
  0xf7   :  { %v1444_v25 = vmul.f32 %v1443_v60, %v6255_v30  ;;  %v6365_v44 = vmul.f32 %v6352_v42, %v6352_v42  ;;  %v4860_v51 = vpop.eup %4859 }
  0xf8   :  { %v1534_v47 = vmul.f32 %v1533_v50, %v6315_v39  ;;  %v912_v28 = vsel %vm911_vm3, %v6280_v49, %v910_v17  ;;  %v6404_v38 = vmul.f32 %v4860_v51, %v1709_v40  ;;  %vm1551_vm3 = vcmp.eq.f32.partialorder %v6130_v11, 0.0 }
  0xf9   :  { %v1445_v60 = vadd.f32 -0.33333147, %v1444_v25  ;;  %v1620_v20 = vmul.f32 0.002785687, %v6365_v44  ;;  %v6390_v25 = vsel %vm899_vm8, %v900_v37, %v898_v9  ;;  %vm1640_vm8 = vcmp.lt.f32.partialorder %v6152_v3, 0.0 }
  0xfa   :  { %v1535_v50 = vadd.f32 -0.14207031, %v1534_v47  ;;  %12422 = vst [vmem:[#allocation61_spill] sm:$0xff] %v6390_v25  ;;  %v12423_v47 = vmov 0.7853982   ;;  %v6418_v40 = vmul.f32 %v6404_v38, %v6404_v38 }
  0xfb   :  { %v1446_v2 = vmul.f32 %v1445_v60, %v6255_v30  ;;  %v6396_v23 = vsel %vm1452_vm2, 2.3561945, %v12423_v47  ;;  %v1621_v58 = vadd.f32 -0.015866, %v1620_v20  ;;  %v6412_v20 = vmul.f32 %v4858_v10, %v6324_v41 }
  0xfc   :  { %v1536_v30 = vmul.f32 %v1535_v50, %v6315_v39  ;;  %v6436_v49 = vsel %vm11829_vm15, 2.3561945, %v12423_v47 }
  0xfd   :  { %v1447_v60 = vmul.f32 %v1446_v2, %v6235_v53  ;;  %v1622_v9 = vmul.f32 %v1621_v58, %v6365_v44  ;;  %v6422_v2 = vsel %vm913_vm7, %v914_v15, %v912_v28  ;;  %vm1643_vm7 = vcmp.lt.s32.totalorder %v6152_v3, 0 }
  0xfe   :  { %v1537_v37 = vadd.f32 0.19993454, %v1536_v30  ;;  %12424 = vst [vmem:[#allocation62_spill] sm:$0xff] %v6422_v2  ;;  %v6426_v30 = vsel %vm1549_vm12, 3.1415927, %v12420_v22  ;;  %vm6459_vm12 = vmor %vm1459_vm1, %vm1460_vm6  ;;  %vm12427_vm1 = vcmp.eq.s32.totalorder %v6100_v29, inf }
  0xff   :  { %v1448_v17 = vadd.f32 %v1447_v60, %v6235_v53  ;;  %v1623_v58 = vadd.f32 0.04247222, %v1622_v9  ;;  %v1714_v53 = vmul.f32 0.002785687, %v6418_v40  ;;  %v314_v60 = vmul.f32 2.0, %v6409_v21 }
 0x100   :  { %v1538_v51 = vmul.f32 %v1537_v37, %v6315_v39  ;;  %vm12428_vm6 = vcmp.eq.s32.totalorder %v6094_v14, inf }
 0x101   :  { %v1450_v10 = vsub.f32 1.5707964, %v1448_v17  ;;  %v1624_v15 = vmul.f32 %v1623_v58, %v6365_v44  ;;  %v1715_v9 = vadd.f32 -0.015866, %v1714_v53  ;;  %v436_v53 = vrot.slane %v314_v60, 1  ;;  %vm1467_vm15 = vmand %vm12428_vm6, %vm12427_vm1 }
 0x102   :  { %v1539_v50 = vadd.f32 -0.33333147, %v1538_v51  ;;  %vm12439_vm1 = vcmp.ne.f32.partialorder %v6130_v11, %v6130_v11  ;;  %vm12440_vm6 = vcmp.ne.f32.partialorder %v6148_v57, %v6148_v57 }
 0x103   :  { %v1451_v28 = vsel %vm1449_vm10, %v1450_v10, %v1448_v17  ;;  %v1625_v35 = vadd.f32 -0.074975304, %v1624_v15  ;;  %vm1737_vm10 = vcmp.lt.s32.totalorder %v6160_v31, 0  ;;  %v1716_v10 = vmul.f32 %v1715_v9, %v6418_v40 }
 0x104   :  { %v1453_v51 = vsub.f32 3.1415927, %v1451_v28  ;;  %v1540_v58 = vmul.f32 %v1539_v50, %v6315_v39  ;;  %v6465_v39 = vsel %vm1643_vm7, 3.1415927, %v12420_v22  ;;  %v6470_v50 = vsel %vm1640_vm8, 2.3561945, %v12423_v47 }
 0x105   :  { %v1626_v32 = vmul.f32 %v1625_v35, %v6365_v44  ;;  %vm12429_vm7 = vcmp.eq.f32.partialorder %v6081_v0, 0.0  ;;  %v1717_v9 = vadd.f32 0.04247222, %v1716_v10  ;;  %v6489_v59 = vsel %vm1737_vm10, 3.1415927, %v12420_v22 }
 0x106   :  { %v1454_v15 = vsel %vm1452_vm2, %v1453_v51, %v1451_v28  ;;  %v1541_v37 = vmul.f32 %v1540_v58, %v6299_v62  ;;  %vm11846_vm2 = vcmp.lt.f32.partialorder %v6160_v31, 0.0  ;;  %v49_v58 = vld [vmem:[#allocation3 + $0xd0] sm:$0x3]  ;;  %v165_v10 = vrot.slane %v6409_v21, 2 }
 0x107   :  { %v1458_v60 = vsel %vm12429_vm7, %v6374_v13, %v1454_v15  ;;  %v1627_v35 = vadd.f32 0.1064488, %v1626_v32  ;;  %v6497_v28 = vsel %vm11846_vm2, 2.3561945, %v12423_v47  ;;  %v1718_v51 = vmul.f32 %v1717_v9, %v6418_v40  ;;  %v12430_v15 = vld [vmem:[#allocation42_spill] sm:$0xff]  ;;  %vm6523_vm7 = vmor %vm12440_vm6, %vm12439_vm1 }
 0x108   :  { %v1462_v14 = vsel %vm6459_vm12, nan, %v1458_v60  ;;  %v1542_v29 = vadd.f32 %v1541_v37, %v6299_v62  ;;  %v12431_v1 = vrot.slane %v12430_v15, 1  ;;  %vm12432_vm10 = vcmask 1046528  }
 0x109   :  { %v1468_v13 = vsel %vm1467_vm15, %v6396_v23, %v1462_v14  ;;  %v1628_v32 = vmul.f32 %v1627_v35, %v6365_v44  ;;  %v170_v62 = vrot.slane %v46_v12, 2  ;;  %v1719_v37 = vadd.f32 -0.074975304, %v1718_v51  ;;  %v12434_v14 = vld [vmem:[#allocation41_spill] sm:$0xff]  ;;  %v12443_v12 = vld [vmem:[#allocation43_spill] sm:$0xff] }
 0x10a   :  { %v437_v17 = vsel %vm12432_vm10, %v12431_v1, %v436_v53  ;;  %v1469_v60 = vand.u32 2147483647, %v1468_v13  ;;  %v1544_v5 = vsub.f32 1.5707964, %v1542_v29  ;;  %v175_v6 = vrot.slane %v49_v58, 2 }
 0x10b   :  { %vm12433_vm15 = vcmp.gt.f32.partialorder %v6181_v4, %v6178_v8  ;;  %v1629_v9 = vadd.f32 -0.14207031, %v1628_v32  ;;  %v542_v21 = vadd.f32 %v437_v17, %v12434_v14  ;;  %v610_v15 = vmul.f32 2.0, %v12435_v7 }
 0x10c   :  { %v1545_v23 = vsel %vm12433_vm15, %v1544_v5, %v1542_v29  ;;  %v12436_v1 = vand.u32 2147483648, %v6081_v0  ;;  %v1720_v35 = vmul.f32 %v1719_v37, %v6418_v40  ;;  %v12437_v51 = vrot.slane %v12434_v14, 2 }
 0x10d   :  { %v1547_v13 = vsub.f32 3.1415927, %v1545_v23  ;;  %vm12438_vm12 = vcmask 1045504   ;;  %v1630_v0 = vmul.f32 %v1629_v9, %v6365_v44  ;;  %v12444_v29 = vrot.slane %v12443_v12, 2 }
 0x10e   :  { %v1471_v53 = vor.u32 %v12436_v1, %v1469_v60  ;;  %v166_v63 = vsel %vm12438_vm12, %v12437_v51, %v165_v10  ;;  %vm12445_vm10 = vmmov %vm12438_vm12  ;;  %v320_v60 = vmul.f32 2.0, %v49_v58  ;;  %v323_v32 = vmul.f32 2.0, %v52_v43  ;;  %v12448_v1 = vld [vmem:[#allocation44_spill] sm:$0xff] }
 0x10f   :  { %v171_v17 = vsel %vm12445_vm10, %v12444_v29, %v170_v62  ;;  %vm12446_vm15 = vcmp.lt.f32.partialorder %v6148_v57, 0.0  ;;  %vm12447_vm12 = vcmp.eq.s32.totalorder %v6178_v8, inf  ;;  %v1721_v37 = vadd.f32 0.1064488, %v1720_v35  ;;  %vm12450_vm1 = vmmov %vm12445_vm10  ;;  %v12451_v57 = vld [vmem:[#allocation25_spill] sm:$0xff] }
 0x110   :  { %v1548_v10 = vsel %vm12446_vm15, %v1547_v13, %v1545_v23  ;;  %vm1561_vm2 = vmand %vm12447_vm12, %vm1560_vm0  ;;  %v12449_v51 = vrot.slane %v12448_v1, 2  ;;  %v441_v9 = vrot.slane %v317_v61, 1  ;;  %v1631_v43 = vadd.f32 0.19993454, %v1630_v0 }
 0x111   :  { %v1552_v58 = vsel %vm1551_vm3, %v6426_v30, %v1548_v10  ;;  %v6545_v62 = vadd.f32 %v542_v21, %v166_v63  ;;  %v642_v23 = vadd.f32 %v610_v15, %v12451_v57  ;;  %v1722_v4 = vmul.f32 %v1721_v37, %v6418_v40  ;;  %v12452_v15 = vld [vmem:[#allocation45_spill] sm:$0xff]  ;;  %vm12454_vm3 = vmmov %vm12450_vm1 }
 0x112   :  { %v6540_v56 = vsel %vm12450_vm1, %v12449_v51, %v175_v6  ;;  %v1556_v8 = vsel %vm6523_vm7, nan, %v1552_v58  ;;  %v6551_v13 = vmul.f32 2.864789, %v1471_v53  ;;  %v271_v6 = vsub.f32 %v12434_v14, %v166_v63 }
 0x113   :  { %v1562_v61 = vsel %vm1561_vm2, %v6436_v49, %v1556_v8  ;;  %v1632_v35 = vmul.f32 %v1631_v43, %v6365_v44  ;;  %v446_v29 = vrot.slane %v320_v60, 1  ;;  %v451_v30 = vrot.slane %v323_v32, 1  ;;  %v12457_v60 = vld [vmem:[#allocation30_spill] sm:$0xff]  ;;  %v12463_v8 = vld [vmem:[#allocation47_spill] sm:$0xff] }
 0x114   :  { %v1563_v0 = vand.u32 2147483647, %v1562_v61  ;;  %vm1637_vm0 = vcmp.gt.f32.partialorder %v6286_v24, %v6283_v48  ;;  %v1723_v21 = vadd.f32 -0.14207031, %v1722_v4  ;;  %v12453_v5 = vrot.slane %v12452_v15, 2 }
 0x115   :  { %v273_v53 = vsub.f32 %v12443_v12, %v171_v17  ;;  %v1633_v37 = vadd.f32 -0.33333147, %v1632_v35  ;;  %v12455_v63 = vrot.slane %v6020_v34, 1  ;;  %vm12456_vm6 = vcmask 1046528  }
 0x116   :  { %v181_v10 = vsel %vm12454_vm3, %v12453_v5, %v180_v55  ;;  %v6565_v14 = vadd.f32 %v642_v23, %v271_v6  ;;  %v6569_v32 = vsub.f32 %v12457_v60, %v6545_v62  ;;  %v12458_v51 = vand.u32 2147483648, %v6130_v11  ;;  %v12460_v11 = vld [vmem:[#allocation46_spill] sm:$0xff]  ;;  %vm12462_vm12 = vmmov %vm12456_vm6 }
 0x117   :  { %v442_v49 = vsel %vm12456_vm6, %v12455_v63, %v441_v9  ;;  %vm1647_vm2 = vcmp.ne.f32.partialorder %v6152_v3, %v6152_v3  ;;  %vm1648_vm7 = vcmp.ne.f32.partialorder %v6133_v33, %v6133_v33  ;;  %v1724_v55 = vmul.f32 %v1723_v21, %v6418_v40  ;;  %vm12465_vm1 = vmmov %vm12456_vm6 }
 0x118   :  { %v1565_v58 = vor.u32 %v12458_v51, %v1563_v0  ;;  %v6579_v34 = vfloor.f32 %v6551_v13  ;;  %v6583_v9 = vsub.f32 %v12448_v1, %v6540_v56  ;;  %v1634_v43 = vmul.f32 %v1633_v37, %v6365_v44 }
 0x119   :  { %v12461_v57 = vrot.slane %v12460_v11, 1  ;;  %v12464_v4 = vrot.slane %v12463_v8, 1  ;;  %v612_v35 = vmul.f32 2.0, %v271_v6  ;;  %v1725_v0 = vadd.f32 0.19993454, %v1724_v55 }
 0x11a   :  { %12459 = vst [vmem:[#allocation42_spill] sm:$0xff] %v6583_v9  ;;  %v6595_v21 = vmul.f32 2.864789, %v1565_v58  ;;  %v544_v44 = vadd.f32 %v442_v49, %v12443_v12  ;;  %v614_v5 = vmul.f32 2.0, %v273_v53  ;;  %v1635_v37 = vmul.f32 %v1634_v43, %v6352_v42 }
 0x11b   :  { %v447_v23 = vsel %vm12462_vm12, %v12461_v57, %v446_v29  ;;  %v452_v61 = vsel %vm12465_vm1, %v12464_v4, %v451_v30  ;;  %v616_v63 = vmul.f32 2.0, %v6583_v9  ;;  %v6601_v60 = vand.u32 2147483647, %v6569_v32 }
 0x11c   :  { %v6604_v29 = vand.u32 2147483647, %v6565_v14  ;;  %v1726_v30 = vmul.f32 %v1725_v0, %v6418_v40  ;;  %v6608_v51 = vfloor.f32 %v6595_v21  ;;  %v2689_v58 = vadd.f32 9.0, %v6579_v34 }
 0x11d   :  { %v546_v12 = vadd.f32 %v447_v23, %v12448_v1  ;;  %v1636_v49 = vadd.f32 %v1635_v37, %v6352_v42  ;;  %vm2657_vm12 = vcmp.lt.f32.partialorder %v6579_v34, 0.0  ;;  %v548_v55 = vadd.f32 %v452_v61, %v12452_v15 }
 0x11e   :  { %v644_v43 = vadd.f32 %v612_v35, %v12435_v7  ;;  %v1727_v11 = vadd.f32 -0.33333147, %v1726_v30  ;;  %v2691_v57 = vadd.f32 9.0, %v6608_v51  ;;  %v580_v8 = vadd.f32 %v544_v44, %v171_v17  ;;  %v12471_v30 = vld [vmem:[#allocation31_spill] sm:$0xff] }
 0x11f   :  { %v646_v4 = vadd.f32 %v614_v5, %v271_v6  ;;  %v1638_v0 = vsub.f32 1.5707964, %v1636_v49  ;;  %vm1742_vm3 = vcmp.ne.f32.partialorder %v6140_v46, %v6140_v46  ;;  %vm2659_vm6 = vcmp.lt.f32.partialorder %v6608_v51, 0.0 }
 0x120   :  { %v648_v42 = vadd.f32 %v616_v63, %v273_v53  ;;  %v1475_v1 = vmax.f32 %v6601_v60, %v6604_v29  ;;  %v1728_v7 = vmul.f32 %v1727_v11, %v6418_v40  ;;  %vm1747_vm10 = vcmp.eq.s32.totalorder %v6327_v45, inf }
 0x121   :  { %vm1748_vm15 = vcmp.eq.s32.totalorder %v6331_v18, inf  ;;  %v1752_v17 = vand.u32 2147483648, %v6140_v46  ;;  %v2721_v6 = vsel %vm2657_vm12, %v2689_v58, %v6579_v34  ;;  %v6634_v23 = vsub.f32 %v12452_v15, %v181_v10 }
 0x122   :  { %v1639_v61 = vsel %vm1637_vm0, %v1638_v0, %v1636_v49  ;;  %v6641_v40 = vadd.f32 %v546_v12, %v6540_v56  ;;  %v6643_v35 = vadd.f32 %v548_v55, %v181_v10  ;;  %v6645_v44 = vadd.f32 %v644_v43, %v273_v53  ;;  %vm6660_vm0 = vmor %vm1647_vm2, %vm1648_vm7 }
 0x123   :  { %12466 = vst [vmem:[#allocation41_spill] sm:$0xff] %v6634_v23  ;;  %v1641_v5 = vsub.f32 3.1415927, %v1639_v61  ;;  %v1729_v37 = vmul.f32 %v1728_v7, %v6404_v38  ;;  %v2723_v15 = vsel %vm2659_vm6, %v2691_v57, %v6608_v51  ;;  %v6652_v63 = vadd.f32 %v646_v4, %v6583_v9 }
 0x124   :  { %12467 = vst [vmem:[#allocation26_spill] sm:$0xff] %v6641_v40  ;;  %12468 = vst [vmem:[#allocation43_spill] sm:$0xff] %v6643_v35  ;;  %v4781_v10 = vadd.f32 -9.0, %v2721_v6  ;;  %v6665_v53 = vadd.f32 %v648_v42, %v6634_v23  ;;  %v6668_v58 = vsub.f32 %v12471_v30, %v580_v8  ;;  %4861 = vrcp.f32 %v1475_v1 }
 0x125   :  { %v1642_v12 = vsel %vm1640_vm8, %v1641_v5, %v1639_v61  ;;  %vm12472_vm6 = vcmp.eq.s32.totalorder %v6286_v24, inf  ;;  %vm12473_vm12 = vcmp.eq.s32.totalorder %v6283_v48, inf  ;;  %v1730_v49 = vadd.f32 %v1729_v37, %v6404_v38 }
 0x126   :  { %vm1655_vm1 = vmand %vm12473_vm12, %vm12472_vm6  ;;  %vm2753_vm2 = vcmp.ge.f32.partialorder %v2721_v6, 9.0  ;;  %v738_v55 = vmul.f32 %v6565_v14, %v6565_v14  ;;  %vm12474_vm7 = vcmp.eq.f32.partialorder %v6133_v33, 0.0  ;;  %v4783_v11 = vadd.f32 -9.0, %v2723_v15 }
 0x127   :  { %v1646_v43 = vsel %vm12474_vm7, %v6465_v39, %v1642_v12  ;;  %v740_v3 = vmul.f32 %v6645_v44, %v6645_v44  ;;  %v770_v24 = vmul.f32 %v6569_v32, %v6569_v32  ;;  %v1732_v57 = vsub.f32 1.5707964, %v1730_v49  ;;  %vm1749_vm7 = vmand %vm1747_vm10, %vm1748_vm15 }
 0x128   :  { %v1650_v48 = vsel %vm6660_vm0, nan, %v1646_v43  ;;  %vm2755_vm8 = vcmp.ge.f32.partialorder %v2723_v15, 9.0  ;;  %v772_v38 = vmul.f32 %v6668_v58, %v6668_v58  ;;  %v6691_v0 = vsel %vm2753_vm2, %v4781_v10, %v2721_v6 }
 0x129   :  { %v1656_v4 = vsel %vm1655_vm1, %v6470_v50, %v1650_v48  ;;  %12475 = vst [vmem:[#allocation44_spill] sm:$0xff] %v6691_v0  ;;  %v6695_v39 = vsub.f32 %v6545_v62, %v6641_v40  ;;  %v6698_v42 = vsub.f32 %v580_v8, %v6643_v35  ;;  %vm12476_vm0 = vcmp.gt.f32.partialorder %v6331_v18, %v6327_v45  ;;  %v7020_v35 = vld [vmem:[#allocation3 + $0x138] sm:$0xff] }
 0x12a   :  { %v1657_v1 = vand.u32 2147483647, %v1656_v4  ;;  %v1733_v7 = vsel %vm12476_vm0, %v1732_v57, %v1730_v49  ;;  %v742_v61 = vmul.f32 %v6652_v63, %v6652_v63  ;;  %v6707_v50 = vmul.f32 %v6665_v53, %v6665_v53 }
 0x12b   :  { %v1735_v6 = vsub.f32 3.1415927, %v1733_v7  ;;  %v6709_v5 = vsel %vm2755_vm8, %v4783_v11, %v2723_v15  ;;  %v774_v62 = vmul.f32 %v6695_v39, %v6695_v39  ;;  %v6713_v8 = vadd.f32 %v770_v24, %v738_v55 }
 0x12c   :  { %12477 = vst [vmem:[#allocation25_spill] sm:$0xff] %v6709_v5  ;;  %v12478_v37 = vand.u32 2147483648, %v6133_v33  ;;  %vm12479_vm1 = vcmp.ne.f32.partialorder %v6160_v31, %v6160_v31  ;;  %vm2849_vm12 = vcmp.eq.f32.partialorder %v6691_v0, 0.0  ;;  %v6728_v15 = vadd.f32 %v772_v38, %v740_v3 }
 0x12d   :  { %vm6723_vm6 = vmor %vm12479_vm1, %vm1742_vm3  ;;  %v6731_v30 = vand.u32 2147483647, %v6668_v58  ;;  %vm12482_vm2 = vcmp.lt.f32.partialorder %v6160_v31, 0.0  ;;  %vm6741_vm3 = vcmp.eq.f32.partialorder %v6551_v13, %v6579_v34  ;;  %v12483_v12 = vmov 0 }
 0x12e   :  { %v1659_v56 = vor.u32 %v12478_v37, %v1657_v1  ;;  %v1736_v33 = vsel %vm12482_vm2, %v1735_v6, %v1733_v7  ;;  %v12484_v12 = vsel %vm6741_vm3, 4294967295, %v12483_v12  ;;  %vm3361_vm8 = vcmp.eq.f32.partialorder %v6691_v0, 8.0  ;;  %v7022_v0 = vld [vmem:[#allocation3 + $0x140] sm:$0xff] }
 0x12f   :  { %12485 = vst [vmem:[#allocation45_spill] sm:$0xff] %v12484_v12  ;;  %v6747_v49 = vand.u32 2147483647, %v6645_v44  ;;  %vm12486_vm0 = vcmp.eq.f32.partialorder %v6140_v46, 0.0  ;;  %vm2851_vm1 = vcmp.eq.f32.partialorder %v6709_v5, 0.0  ;;  %vm3363_vm10 = vcmp.eq.f32.partialorder %v6709_v5, 8.0 }
 0x130   :  { %v1740_v31 = vsel %vm12486_vm0, %v6489_v59, %v1736_v33  ;;  %v2565_v55 = vmul.f32 2.864789, %v1659_v56  ;;  %vm925_vm15 = vcmp.eq.f32.partialorder %v6324_v41, inf  ;;  %v6758_v18 = vsel %vm2849_vm12, %v6381_v52, 0.0  ;;  %v7006_v5 = vld [vmem:[#allocation3 + $0x128] sm:$0xff] }
 0x131   :  { %v1744_v45 = vsel %vm6723_vm6, nan, %v1740_v31  ;;  %12487 = vst [vmem:[#allocation30_spill] sm:$0xff] %v6758_v18  ;;  %v1474_v13 = vmin.f32 %v6601_v60, %v6604_v29  ;;  %v1569_v34 = vmax.f32 %v6731_v30, %v6747_v49  ;;  %vm6767_vm2 = vcmp.eq.f32.partialorder %v6595_v21, %v6608_v51  ;;  %v4862_v38 = vpop.eup %4861  ;;  %12515 = vst [vmem:[#allocation79_spill] sm:$0xff] %v7006_v5 }
 0x132   :  { %v1750_v59 = vsel %vm1749_vm7, %v6497_v28, %v1744_v45  ;;  %v2597_v43 = vfloor.f32 %v2565_v55  ;;  %v12488_v11 = vmov 0  ;;  %v6772_v3 = vsel %vm3361_vm8, %v6381_v52, 0.0 }
 0x133   :  { %v12489_v11 = vsel %vm6767_vm2, 4294967295, %v12488_v11  ;;  %12491 = vst [vmem:[#allocation47_spill] sm:$0xff] %v6772_v3  ;;  %v1751_v24 = vand.u32 2147483647, %v1750_v59  ;;  %v6775_v48 = vsel %vm2851_vm1, %v6390_v25, 0.0  ;;  %v6778_v57 = vsel %vm3363_vm10, %v6390_v25, 0.0 }
 0x134   :  { %12490 = vst [vmem:[#allocation46_spill] sm:$0xff] %v12489_v11  ;;  %12492 = vst [vmem:[#allocation31_spill] sm:$0xff] %v6775_v48  ;;  %4863 = vrcp.f32 %v1569_v34  ;;  %vm927_vm6 = vcmp.eq.f32.partialorder %v6324_v41, 0.0  ;;  %vm2661_vm12 = vcmp.lt.f32.partialorder %v2597_v43, 0.0  ;;  %v2693_v28 = vadd.f32 9.0, %v2597_v43  ;;  %v6997_v25 = vld [vmem:[#allocation3 + $0x110] sm:$0xff] }
 0x135   :  { %12493 = vst [vmem:[#allocation63_spill] sm:$0xff] %v6778_v57  ;;  %v6781_v21 = vadd.f32 %v774_v62, %v742_v61  ;;  %4865 = vrsqrt.f32 %v6713_v8  ;;  %v1753_v51 = vor.u32 %v1752_v17, %v1751_v24  ;;  %v3425_v4 = vsel %vm6741_vm3, %v6758_v18, %v6772_v3  ;;  %12514 = vst [vmem:[#allocation78_spill] sm:$0xff] %v6997_v25 }
 0x136   :  { %v6790_v1 = vmul.f32 %v4862_v38, %v1474_v13  ;;  %v6793_v7 = vand.u32 2147483647, %v6695_v39  ;;  %v2725_v6 = vsel %vm2661_vm12, %v2693_v28, %v2597_v43  ;;  %v3427_v61 = vsel %vm6767_vm2, %v6775_v48, %v6778_v57 }
 0x137   :  { %4867 = vrsqrt.f32 %v6728_v15  ;;  %v6801_v46 = vand.u32 2147483647, %v6652_v63  ;;  %v2567_v17 = vmul.f32 2.864789, %v1753_v51  ;;  %vm2757_vm7 = vcmp.ge.f32.partialorder %v2725_v6, 9.0 }
 0x138   :  { %v4785_v62 = vadd.f32 -9.0, %v2725_v6  ;;  %v6805_v37 = vmul.f32 %v6790_v1, %v6790_v1  ;;  %v3457_v56 = vadd.f32 %v3425_v4, %v6758_v18  ;;  %v776_v10 = vmul.f32 %v6698_v42, %v6698_v42 }
 0x139   :  { %4869 = vrsqrt.f32 %v6781_v21  ;;  %v1663_v33 = vmax.f32 %v6793_v7, %v6801_v46  ;;  %v2599_v31 = vfloor.f32 %v2567_v17  ;;  %v3459_v13 = vadd.f32 %v3427_v61, %v6775_v48 }
 0x13a   :  { %v6813_v45 = vsel %vm2757_vm7, %v4785_v62, %v2725_v6  ;;  %v1479_v34 = vmul.f32 0.002785687, %v6805_v37  ;;  %vm6817_vm8 = vcmp.eq.f32.partialorder %v2565_v55, %v2597_v43  ;;  %v12495_v59 = vmov 0 }
 0x13b   :  { %12494 = vst [vmem:[#allocation64_spill] sm:$0xff] %v6813_v45  ;;  %v12496_v59 = vsel %vm6817_vm8, 4294967295, %v12495_v59  ;;  %vm2853_vm0 = vcmp.eq.f32.partialorder %v6813_v45, 0.0  ;;  %vm3365_vm1 = vcmp.eq.f32.partialorder %v6813_v45, 8.0  ;;  %4871 = vrcp.f32 %v1663_v33  ;;  %v7004_v45 = vld [vmem:[#allocation3 + $0x120] sm:$0xff] }
 0x13c   :  { %12497 = vst [vmem:[#allocation65_spill] sm:$0xff] %v12496_v59  ;;  %v928_v24 = vand.u32 2147483648, %v6324_v41  ;;  %vm2663_vm10 = vcmp.lt.f32.partialorder %v2599_v31, 0.0  ;;  %v2695_v38 = vadd.f32 9.0, %v2599_v31  ;;  %v6825_v28 = vsel %vm2853_vm0, %v6422_v2, 0.0 }
 0x13d   :  { %12498 = vst [vmem:[#allocation66_spill] sm:$0xff] %v6825_v28  ;;  %v926_v55 = vsel %vm925_vm15, %v6324_v41, %v6412_v20  ;;  %v6832_v43 = vsel %vm3365_vm1, %v6422_v2, 0.0  ;;  %v6835_v51 = vadd.f32 %v776_v10, %v6707_v50  ;;  %v1480_v4 = vadd.f32 -0.015866, %v1479_v34 }
 0x13e   :  { %12499 = vst [vmem:[#allocation67_spill] sm:$0xff] %v6832_v43  ;;  %v2727_v6 = vsel %vm2663_vm10, %v2695_v38, %v2599_v31  ;;  %v3429_v61 = vsel %vm6817_vm8, %v6825_v28, %v6832_v43  ;;  %v3483_v62 = vadd.f32 %v3459_v13, %v3457_v56  ;;  %v1568_v33 = vmin.f32 %v6731_v30, %v6747_v49 }
 0x13f   :  { %vm2759_vm12 = vcmp.ge.f32.partialorder %v2727_v6, 9.0  ;;  %v4787_v57 = vadd.f32 -9.0, %v2727_v6  ;;  %v3461_v20 = vadd.f32 %v3429_v61, %v6825_v28  ;;  %v1481_v3 = vmul.f32 %v1480_v4, %v6805_v37 }
 0x140   :  { %v6847_v50 = vsel %vm927_vm6, %v928_v24, %v926_v55  ;;  %v6850_v10 = vand.u32 2147483647, %v6698_v42  ;;  %v6853_v34 = vand.u32 2147483647, %v6665_v53  ;;  %vm6855_vm15 = vcmp.eq.f32.partialorder %v2567_v17, %v2599_v31 }
 0x141   :  { %12500 = vst [vmem:[#allocation68_spill] sm:$0xff] %v6847_v50  ;;  %v4864_v56 = vpop.eup %4863  ;;  %v12501_v13 = vmov 0  ;;  %v6859_v38 = vsel %vm2759_vm12, %v4787_v57, %v2727_v6  ;;  %4873 = vrsqrt.f32 %v6835_v51  ;;  %v1482_v4 = vadd.f32 0.04247222, %v1481_v3 }
 0x142   :  { %v12502_v13 = vsel %vm6855_vm15, 4294967295, %v12501_v13  ;;  %12504 = vst [vmem:[#allocation70_spill] sm:$0xff] %v6859_v38  ;;  %v4866_v61 = vpop.eup %4865  ;;  %vm2855_vm6 = vcmp.eq.f32.partialorder %v6859_v38, 0.0  ;;  %vm3367_vm7 = vcmp.eq.f32.partialorder %v6859_v38, 8.0  ;;  %v3491_v41 = vadd.f32 %v3483_v62, %v3461_v20 }
 0x143   :  { %12503 = vst [vmem:[#allocation69_spill] sm:$0xff] %v12502_v13  ;;  %v6864_v24 = vmul.f32 %v4864_v56, %v1568_v33  ;;  %v6867_v55 = vsel %vm2855_vm6, %v6847_v50, 0.0  ;;  %v6870_v17 = vsel %vm3367_vm7, %v6847_v50, 0.0  ;;  %v1483_v57 = vmul.f32 %v1482_v4, %v6805_v37  ;;  %v6994_v50 = vld [vmem:[#allocation3 + $0x108] sm:$0xff] }
 0x144   :  { %12505 = vst [vmem:[#allocation71_spill] sm:$0xff] %v6867_v55  ;;  %12506 = vst [vmem:[#allocation72_spill] sm:$0xff] %v6870_v17  ;;  %v1757_v31 = vmax.f32 %v6850_v10, %v6853_v34  ;;  %v4868_v3 = vpop.eup %4867  ;;  %v3431_v6 = vsel %vm6855_vm15, %v6867_v55, %v6870_v17  ;;  %v1662_v56 = vmin.f32 %v6793_v7, %v6801_v46  ;;  %vm890_vm0 = vcmp.eq.f32.partialorder %v6713_v8, inf }
 0x145   :  { %v6881_v62 = vmul.f32 %v6864_v24, %v6864_v24  ;;  %v3463_v33 = vadd.f32 %v3431_v6, %v6867_v55  ;;  %v1484_v20 = vadd.f32 -0.074975304, %v1483_v57  ;;  %v889_v17 = vmul.f32 %v4866_v61, %v6713_v8 }
 0x146   :  { %4875 = vrcp.f32 %v1757_v31  ;;  %v4870_v4 = vpop.eup %4869  ;;  %v903_v57 = vmul.f32 %v4868_v3, %v6728_v15  ;;  %vm904_vm10 = vcmp.eq.f32.partialorder %v6728_v15, inf  ;;  %vm918_vm12 = vcmp.eq.f32.partialorder %v6781_v21, inf }
 0x147   :  { %v1573_v43 = vmul.f32 0.002785687, %v6881_v62  ;;  %v3499_v59 = vadd.f32 %v3491_v41, %v3463_v33  ;;  %v1485_v28 = vmul.f32 %v1484_v20, %v6805_v37  ;;  %v917_v6 = vmul.f32 %v4870_v4, %v6781_v21 }
 0x148   :  { %v4872_v11 = vpop.eup %4871  ;;  %v893_v41 = vand.u32 2147483648, %v6713_v8  ;;  %vm920_vm7 = vcmp.eq.f32.partialorder %v6781_v21, 0.0  ;;  %vm11870_vm6 = vcmp.lt.f32.partialorder %v6569_v32, 0.0  ;;  %vm1502_vm1 = vcmp.lt.s32.totalorder %v6569_v32, 0 }
 0x149   :  { %v1574_v13 = vadd.f32 -0.015866, %v1573_v43  ;;  %3507 = vst [vmem:[#allocation2 + $0x10] sm:$0xff] %v3499_v59  ;;  %v1486_v31 = vadd.f32 0.1064488, %v1485_v28  ;;  %v6893_v55 = vmul.f32 %v4872_v11, %v1662_v56  ;;  %v907_v43 = vand.u32 2147483648, %v6728_v15 }
 0x14a   :  { %v891_v11 = vsel %vm890_vm0, %v6713_v8, %v889_v17  ;;  %v921_v28 = vand.u32 2147483648, %v6781_v21  ;;  %v919_v20 = vsel %vm918_vm12, %v6781_v21, %v917_v6  ;;  %vm1596_vm0 = vcmp.lt.s32.totalorder %v6668_v58, 0 }
 0x14b   :  { %v1575_v61 = vmul.f32 %v1574_v13, %v6881_v62  ;;  %v1487_v59 = vmul.f32 %v1486_v31, %v6805_v37  ;;  %v6904_v3 = vmul.f32 %v6893_v55, %v6893_v55  ;;  %v905_v13 = vsel %vm904_vm10, %v6728_v15, %v903_v57 }
 0x14c   :  { %v1756_v57 = vmin.f32 %v6850_v10, %v6853_v34  ;;  %vm12507_vm10 = vcmp.eq.f32.partialorder %v6713_v8, 0.0  ;;  %vm12509_vm12 = vcmp.eq.f32.partialorder %v6728_v15, 0.0  ;;  %v6937_v18 = vsel %vm1502_vm1, 3.1415927, %v12420_v22 }
 0x14d   :  { %v1576_v33 = vadd.f32 0.04247222, %v1575_v61  ;;  %v1488_v56 = vadd.f32 -0.14207031, %v1487_v59  ;;  %v1667_v4 = vmul.f32 0.002785687, %v6904_v3  ;;  %v6923_v6 = vsel %vm12507_vm10, %v893_v41, %v891_v11 }
 0x14e   :  { %v4874_v31 = vpop.eup %4873  ;;  %12508 = vst [vmem:[#allocation73_spill] sm:$0xff] %v6923_v6  ;;  %v6927_v61 = vsel %vm12509_vm12, %v907_v43, %v905_v13  ;;  %v6931_v59 = vsel %vm920_vm7, %v921_v28, %v919_v20  ;;  %v6943_v15 = vsel %vm11870_vm6, 2.3561945, %v12423_v47  ;;  %vm11869_vm7 = vcmp.lt.f32.partialorder %v6668_v58, 0.0 }
 0x14f   :  { %v1577_v48 = vmul.f32 %v1576_v33, %v6881_v62  ;;  %v1489_v17 = vmul.f32 %v1488_v56, %v6805_v37  ;;  %v1668_v12 = vadd.f32 -0.015866, %v1667_v4  ;;  %12510 = vst [vmem:[#allocation74_spill] sm:$0xff] %v6927_v61  ;;  %12511 = vst [vmem:[#allocation75_spill] sm:$0xff] %v6931_v59  ;;  %v6934_v56 = vmul.f32 %v4874_v31, %v6835_v51 }
 0x150   :  { %vm1690_vm1 = vcmp.lt.s32.totalorder %v6695_v39, 0  ;;  %vm1496_vm10 = vcmp.gt.f32.partialorder %v6604_v29, %v6601_v60  ;;  %v6960_v20 = vsel %vm11869_vm7, 2.3561945, %v12423_v47  ;;  %vm1784_vm7 = vcmp.lt.s32.totalorder %v6698_v42, 0 }
 0x151   :  { %v1578_v33 = vadd.f32 -0.074975304, %v1577_v48  ;;  %12512 = vst [vmem:[#allocation76_spill] sm:$0xff] %v6934_v56  ;;  %v1490_v4 = vadd.f32 0.19993454, %v1489_v17  ;;  %v1669_v8 = vmul.f32 %v1668_v12, %v6904_v3  ;;  %v192_v26 = vrot.slane %v7004_v45, 2 }
 0x152   :  { %v6948_v48 = vsel %vm1596_vm0, 3.1415927, %v12420_v22  ;;  %vm11887_vm0 = vcmp.lt.f32.partialorder %v6695_v39, 0.0  ;;  %v12518_v23 = vrot.slane %v6997_v25, 2  ;;  %v197_v56 = vrot.slane %v7020_v35, 2 }
 0x153   :  { %v4876_v41 = vpop.eup %4875  ;;  %v1579_v21 = vmul.f32 %v1578_v33, %v6881_v62  ;;  %v1491_v43 = vmul.f32 %v1490_v4, %v6805_v37  ;;  %v1670_v11 = vadd.f32 0.04247222, %v1669_v8  ;;  %v6969_v4 = vld [vmem:[#allocation3 + $0xf0] sm:$0xff]  ;;  %v6971_v8 = vld [vmem:[#allocation3 + $0xf8] sm:$0xff]  ;;  %vm12526_vm12 = vcmp.lt.f32.partialorder %v6569_v32, 0.0 }
 0x154   :  { %v6952_v28 = vmul.f32 %v4876_v41, %v1756_v57  ;;  %12513 = vst [vmem:[#allocation77_spill] sm:$0xff] %v6971_v8  ;;  %vm1607_vm6 = vcmp.eq.s32.totalorder %v6747_v49, inf  ;;  %vm12529_vm8 = vcmp.eq.f32.partialorder %v6565_v14, 0.0  ;;  %vm1786_vm2 = vcmp.eq.f32.partialorder %v6665_v53, 0.0 }
 0x155   :  { %v1580_v13 = vadd.f32 0.1064488, %v1579_v21  ;;  %v1492_v17 = vadd.f32 -0.33333147, %v1491_v43  ;;  %v1671_v33 = vmul.f32 %v1670_v11, %v6904_v3  ;;  %v6981_v21 = vsel %vm1690_vm1, 3.1415927, %v12420_v22 }
 0x156   :  { %v6967_v57 = vmul.f32 %v6952_v28, %v6952_v28  ;;  %v6986_v43 = vsel %vm11887_vm0, 2.3561945, %v12423_v47  ;;  %v182_v11 = vrot.slane %v6969_v4, 2  ;;  %vm11899_vm0 = vcmp.lt.f32.partialorder %v6698_v42, 0.0 }
 0x157   :  { %v1581_v41 = vmul.f32 %v1580_v13, %v6881_v62  ;;  %v1493_v31 = vmul.f32 %v1492_v17, %v6805_v37  ;;  %v1672_v12 = vadd.f32 -0.074975304, %v1671_v33  ;;  %v187_v17 = vrot.slane %v6994_v50, 2 }
 0x158   :  { %v1761_v13 = vmul.f32 0.002785687, %v6967_v57  ;;  %v7027_v40 = vsel %vm11899_vm0, 2.3561945, %v12423_v47  ;;  %vm12517_vm1 = vcmask 1045504   ;;  %v12520_v47 = vrot.slane %v7006_v5, 2 }
 0x159   :  { %v1582_v2 = vadd.f32 -0.14207031, %v1581_v41  ;;  %v1494_v52 = vmul.f32 %v1493_v31, %v6790_v1  ;;  %v1673_v33 = vmul.f32 %v1672_v12, %v6904_v3  ;;  %vm12521_vm0 = vmmov %vm12517_vm1 }
 0x15a   :  { %v1762_v38 = vadd.f32 -0.015866, %v1761_v13  ;;  %v7018_v13 = vsel %vm1784_vm7, 3.1415927, %v12420_v22  ;;  %vm12519_vm7 = vmmov %vm12517_vm1 }
 0x15b   :  { %v1583_v41 = vmul.f32 %v1582_v2, %v6881_v62  ;;  %v1495_v27 = vadd.f32 %v1494_v52, %v6790_v1  ;;  %v1674_v31 = vadd.f32 0.1064488, %v1673_v33  ;;  %v12516_v1 = vrot.slane %v6971_v8, 2 }
 0x15c   :  { %v1763_v12 = vmul.f32 %v1762_v38, %v6967_v57  ;;  %v7045_v52 = vsel %vm12521_vm0, %v192_v26, %v12520_v47  ;;  %vm12523_vm0 = vcmp.ne.f32.partialorder %v6569_v32, %v6569_v32 }
 0x15d   :  { %v1584_v2 = vadd.f32 0.19993454, %v1583_v41  ;;  %v7033_v38 = vsel %vm12517_vm1, %v182_v11, %v12516_v1  ;;  %v1497_v33 = vsub.f32 1.5707964, %v1495_v27  ;;  %v1675_v37 = vmul.f32 %v1674_v31, %v6904_v3 }
 0x15e   :  { %v1764_v9 = vadd.f32 0.04247222, %v1763_v12  ;;  %v7039_v41 = vsel %vm12519_vm7, %v187_v17, %v12518_v23  ;;  %v7057_v12 = vsub.f32 %v6969_v4, %v7033_v38  ;;  %v7061_v1 = vmul.f32 2.0, %v6971_v8 }
 0x15f   :  { %v1585_v22 = vmul.f32 %v1584_v2, %v6881_v62  ;;  %v1498_v31 = vsel %vm1496_vm10, %v1497_v33, %v1495_v27  ;;  %v1676_v23 = vadd.f32 -0.14207031, %v1675_v37  ;;  %v324_v2 = vmul.f32 2.0, %v6969_v4 }
 0x160   :  { %v1765_v17 = vmul.f32 %v1764_v9, %v6967_v57  ;;  %v1500_v26 = vsub.f32 3.1415927, %v1498_v31  ;;  %vm12522_vm10 = vcmp.ne.f32.partialorder %v6565_v14, %v6565_v14  ;;  %v327_v37 = vmul.f32 2.0, %v6994_v50 }
 0x161   :  { %v1586_v47 = vadd.f32 -0.33333147, %v1585_v22  ;;  %vm7069_vm7 = vmor %vm12523_vm0, %vm12522_vm10  ;;  %v1677_v22 = vmul.f32 %v1676_v23, %v6904_v3  ;;  %v7080_v33 = vmul.f32 2.0, %v6997_v25  ;;  %vm12527_vm10 = vcmp.eq.s32.totalorder %v6604_v29, inf }
 0x162   :  { %v1766_v9 = vadd.f32 -0.074975304, %v1765_v17  ;;  %v1501_v11 = vsel %vm12526_vm12, %v1500_v26, %v1498_v31  ;;  %vm12528_vm0 = vcmp.eq.s32.totalorder %v6601_v60, inf  ;;  %vm1606_vm1 = vcmp.eq.s32.totalorder %v6731_v30, inf }
 0x163   :  { %vm1514_vm15 = vmand %vm12528_vm0, %vm12527_vm10  ;;  %v1587_v8 = vmul.f32 %v1586_v47, %v6881_v62  ;;  %v330_v23 = vmul.f32 2.0, %v7004_v45  ;;  %v7093_v17 = vmul.f32 2.0, %v7006_v5  ;;  %v1505_v32 = vsel %vm12529_vm8, %v6937_v18, %v1501_v11 }
 0x164   :  { %v1678_v29 = vadd.f32 0.19993454, %v1677_v22  ;;  %v1767_v60 = vmul.f32 %v1766_v9, %v6967_v57  ;;  %v333_v62 = vmul.f32 2.0, %v7020_v35  ;;  %v1509_v31 = vsel %vm7069_vm7, nan, %v1505_v32 }
 0x165   :  { %v1588_v26 = vmul.f32 %v1587_v8, %v6864_v24  ;;  %v453_v47 = vrot.slane %v324_v2, 1  ;;  %v1515_v25 = vsel %vm1514_vm15, %v6943_v15, %v1509_v31  ;;  %v7108_v11 = vmul.f32 2.0, %v7022_v0 }
 0x166   :  { %v1679_v59 = vmul.f32 %v1678_v29, %v6904_v3  ;;  %v1768_v18 = vadd.f32 0.1064488, %v1767_v60  ;;  %v1516_v22 = vand.u32 2147483647, %v1515_v25  ;;  %v458_v27 = vrot.slane %v327_v37, 1 }
 0x167   :  { %v1589_v9 = vadd.f32 %v1588_v26, %v6864_v24  ;;  %v11917_v8 = vrot.slane %v7080_v33, 1  ;;  %v463_v5 = vrot.slane %v330_v23, 1  ;;  %v11911_v15 = vrot.slane %v7093_v17, 1 }
 0x168   :  { %v1680_v2 = vadd.f32 -0.33333147, %v1679_v59  ;;  %v1769_v32 = vmul.f32 %v1768_v18, %v6967_v57  ;;  %v12530_v29 = vand.u32 2147483648, %v6565_v14  ;;  %vm1695_vm7 = vcmp.ne.f32.partialorder %v6652_v63, %v6652_v63 }
 0x169   :  { %v1591_v31 = vsub.f32 1.5707964, %v1589_v9  ;;  %v12531_v25 = vrot.slane %v7022_v0, 2  ;;  %vm12532_vm10 = vcmask 1045504   ;;  %v12533_v59 = vrot.slane %v7061_v1, 1 }
 0x16a   :  { %v1518_v60 = vor.u32 %v12530_v29, %v1516_v22  ;;  %vm12534_vm0 = vcmask 1046528   ;;  %v1681_v23 = vmul.f32 %v1680_v2, %v6904_v3  ;;  %v1770_v14 = vadd.f32 -0.14207031, %v1769_v32 }
 0x16b   :  { %v7125_v24 = vsel %vm12532_vm10, %v197_v56, %v12531_v25  ;;  %v455_v37 = vsel %vm12534_vm0, %v453_v47, %v12533_v59  ;;  %v468_v26 = vrot.slane %v333_v62, 1  ;;  %v11916_v18 = vrot.slane %v7108_v11, 1 }
 0x16c   :  { %vm12535_vm15 = vcmp.gt.f32.partialorder %v6747_v49, %v6731_v30  ;;  %v7138_v56 = vmul.f32 2.864789, %v1518_v60  ;;  %v7142_v47 = vsub.f32 %v6994_v50, %v7039_v41  ;;  %v460_v3 = vsel %vm12534_vm0, %v458_v27, %v11917_v8 }
 0x16d   :  { %v1592_v22 = vsel %vm12535_vm15, %v1591_v31, %v1589_v9  ;;  %v1682_v62 = vmul.f32 %v1681_v23, %v6893_v55  ;;  %v1771_v32 = vmul.f32 %v1770_v14, %v6967_v57  ;;  %vm12536_vm15 = vmmov %vm12534_vm0  ;;  %vm12537_vm10 = vcmp.ne.f32.partialorder %v6645_v44, %v6645_v44 }
 0x16e   :  { %v1594_v2 = vsub.f32 3.1415927, %v1592_v22  ;;  %v465_v9 = vsel %vm12536_vm15, %v463_v5, %v11911_v15  ;;  %vm12538_vm8 = vcmp.ne.f32.partialorder %v6668_v58, %v6668_v58  ;;  %v7163_v27 = vfloor.f32 %v7138_v56 }
 0x16f   :  { %vm7158_vm12 = vmor %vm12538_vm8, %vm12537_vm10  ;;  %v7167_v60 = vsub.f32 %v7004_v45, %v7045_v52  ;;  %v7171_v5 = vsub.f32 %v7020_v35, %v7125_v24  ;;  %v549_v31 = vadd.f32 %v455_v37, %v6969_v4  ;;  %vm12543_vm0 = vcmp.lt.f32.partialorder %v6668_v58, 0.0 }
 0x170   :  { %v1595_v25 = vsel %vm12543_vm0, %v1594_v2, %v1592_v22  ;;  %vm1608_vm8 = vmand %vm1606_vm1, %vm1607_vm6  ;;  %v1683_v59 = vadd.f32 %v1682_v62, %v6893_v55  ;;  %v1772_v23 = vadd.f32 0.19993454, %v1771_v32  ;;  %v551_v4 = vadd.f32 %v460_v3, %v6994_v50 }
 0x171   :  { %12541 = vst [vmem:[#allocation80_spill] sm:$0xff] %v7167_v60  ;;  %12542 = vst [vmem:[#allocation81_spill] sm:$0xff] %v7171_v5  ;;  %v553_v58 = vadd.f32 %v465_v9, %v7004_v45  ;;  %v617_v49 = vmul.f32 2.0, %v6065_v36  ;;  %v2690_v22 = vadd.f32 9.0, %v7163_v27  ;;  %vm2658_vm1 = vcmp.lt.f32.partialorder %v7163_v27, 0.0 }
 0x172   :  { %vm12544_vm10 = vmmov %vm12536_vm15  ;;  %vm12545_vm15 = vcmp.eq.f32.partialorder %v6645_v44, 0.0  ;;  %v1685_v37 = vsub.f32 1.5707964, %v1683_v59  ;;  %v1773_v55 = vmul.f32 %v1772_v23, %v6967_v57  ;;  %v619_v50 = vmul.f32 2.0, %v7057_v12 }
 0x173   :  { %v470_v14 = vsel %vm12544_vm10, %v468_v26, %v11916_v18  ;;  %v1599_v15 = vsel %vm12545_vm15, %v6948_v48, %v1595_v25  ;;  %v621_v45 = vmul.f32 2.0, %v7142_v47  ;;  %v623_v2 = vmul.f32 2.0, %v7167_v60 }
 0x174   :  { %v1603_v30 = vsel %vm7158_vm12, nan, %v1599_v15  ;;  %vm12546_vm12 = vcmp.gt.f32.partialorder %v6801_v46, %v6793_v7  ;;  %v1774_v3 = vadd.f32 -0.33333147, %v1773_v55  ;;  %v585_v32 = vadd.f32 %v549_v31, %v7033_v38 }
 0x175   :  { %v1609_v26 = vsel %vm1608_vm8, %v6960_v20, %v1603_v30  ;;  %v1686_v15 = vsel %vm12546_vm12, %v1685_v37, %v1683_v59  ;;  %v555_v20 = vadd.f32 %v470_v14, %v7020_v35  ;;  %v649_v9 = vadd.f32 %v617_v49, %v6061_v19 }
 0x176   :  { %v1610_v48 = vand.u32 2147483647, %v1609_v26  ;;  %v1688_v62 = vsub.f32 3.1415927, %v1686_v15  ;;  %v12547_v29 = vand.u32 2147483648, %v6645_v44  ;;  %vm12548_vm10 = vcmp.ne.f32.partialorder %v6695_v39, %v6695_v39 }
 0x177   :  { %vm7219_vm15 = vmor %vm12548_vm10, %vm1695_vm7  ;;  %v1775_v23 = vmul.f32 %v1774_v3, %v6967_v57  ;;  %vm1794_vm12 = vcmp.eq.s32.totalorder %v6850_v10, inf  ;;  %vm1795_vm0 = vcmp.eq.s32.totalorder %v6853_v34, inf  ;;  %v2722_v19 = vsel %vm2658_vm1, %v2690_v22, %v7163_v27 }
 0x178   :  { %v1612_v25 = vor.u32 %v12547_v29, %v1610_v48  ;;  %v587_v35 = vadd.f32 %v551_v4, %v7039_v41  ;;  %vm12551_vm8 = vcmp.lt.f32.partialorder %v6695_v39, 0.0  ;;  %vm12552_vm7 = vcmp.eq.s32.totalorder %v6801_v46, inf }
 0x179   :  { %v1689_v44 = vsel %vm12551_vm8, %v1688_v62, %v1686_v15  ;;  %vm12553_vm10 = vcmp.eq.s32.totalorder %v6793_v7, inf  ;;  %v7238_v57 = vadd.f32 %v553_v58, %v7045_v52  ;;  %v651_v38 = vadd.f32 %v619_v50, %v6065_v36 }
 0x17a   :  { %vm1702_vm6 = vmand %vm12553_vm10, %vm12552_vm7  ;;  %v653_v31 = vadd.f32 %v621_v45, %v7057_v12  ;;  %vm12555_vm1 = vcmp.eq.f32.partialorder %v6652_v63, 0.0  ;;  %v1776_v39 = vmul.f32 %v1775_v23, %v6952_v28  ;;  %v2564_v14 = vmul.f32 2.864789, %v1612_v25 }
 0x17b   :  { %12554 = vst [vmem:[#allocation82_spill] sm:$0xff] %v7238_v57  ;;  %v1693_v41 = vsel %vm12555_vm1, %v6981_v21, %v1689_v44  ;;  %v655_v46 = vadd.f32 %v623_v2, %v7142_v47  ;;  %v4782_v4 = vadd.f32 -9.0, %v2722_v19  ;;  %v7250_v52 = vadd.f32 %v649_v9, %v7057_v12 }
 0x17c   :  { %v1697_v7 = vsel %vm7219_vm15, nan, %v1693_v41  ;;  %v7253_v36 = vsub.f32 %v6125_v54, %v585_v32  ;;  %v1777_v49 = vadd.f32 %v1776_v39, %v6952_v28  ;;  %v2596_v21 = vfloor.f32 %v2564_v14 }
 0x17d   :  { %v1703_v58 = vsel %vm1702_vm6, %v6986_v43, %v1697_v7  ;;  %vm2754_vm8 = vcmp.ge.f32.partialorder %v2722_v19, 9.0  ;;  %v7258_v37 = vadd.f32 %v555_v20, %v7125_v24  ;;  %v7261_v55 = vadd.f32 %v651_v38, %v7142_v47 }
 0x17e   :  { %v1704_v30 = vand.u32 2147483647, %v1703_v58  ;;  %v7264_v22 = vadd.f32 %v653_v31, %v7167_v60  ;;  %v1779_v12 = vsub.f32 1.5707964, %v1777_v49  ;;  %vm2660_vm15 = vcmp.lt.f32.partialorder %v2596_v21, 0.0 }
 0x17f   :  { %12556 = vst [vmem:[#allocation83_spill] sm:$0xff] %v7258_v37  ;;  %v2692_v54 = vadd.f32 9.0, %v2596_v21  ;;  %v7267_v26 = vadd.f32 %v655_v46, %v7171_v5  ;;  %v12557_v28 = vand.u32 2147483648, %v6652_v63  ;;  %v7271_v50 = vsel %vm2754_vm8, %v4782_v4, %v2722_v19 }
 0x180   :  { %12558 = vst [vmem:[#allocation84_spill] sm:$0xff] %v7271_v50  ;;  %v7274_v24 = vsub.f32 %v6128_v16, %v587_v35  ;;  %v7277_v47 = vsub.f32 %v585_v32, %v7238_v57  ;;  %vm12559_vm6 = vcmp.gt.f32.partialorder %v6853_v34, %v6850_v10  ;;  %v7283_v15 = vand.u32 2147483647, %v7253_v36 }
 0x181   :  { %v1706_v43 = vor.u32 %v12557_v28, %v1704_v30  ;;  %v1780_v45 = vsel %vm12559_vm6, %v1779_v12, %v1777_v49  ;;  %v2724_v48 = vsel %vm2660_vm15, %v2692_v54, %v2596_v21  ;;  %v7286_v3 = vand.u32 2147483647, %v7250_v52 }
 0x182   :  { %v1782_v63 = vsub.f32 3.1415927, %v1780_v45  ;;  %vm2756_vm7 = vcmp.ge.f32.partialorder %v2724_v48, 9.0  ;;  %v4784_v62 = vadd.f32 -9.0, %v2724_v48  ;;  %vm12560_vm10 = vcmp.ne.f32.partialorder %v6665_v53, %v6665_v53 }
 0x183   :  { %v2566_v2 = vmul.f32 2.864789, %v1706_v43  ;;  %vm12561_vm1 = vcmp.ne.f32.partialorder %v6698_v42, %v6698_v42  ;;  %v7300_v20 = vsub.f32 %v587_v35, %v7258_v37  ;;  %v745_v32 = vmul.f32 %v7250_v52, %v7250_v52  ;;  %v12582_v43 = vld [vmem:[#allocation75_spill] sm:$0xff]  ;;  %v12607_v37 = vld [vmem:[#allocation42_spill] sm:$0xff] }
 0x184   :  { %vm7294_vm8 = vmor %vm12561_vm1, %vm12560_vm10  ;;  %v747_v9 = vmul.f32 %v7261_v55, %v7261_v55  ;;  %vm12564_vm6 = vcmp.lt.f32.partialorder %v6698_v42, 0.0  ;;  %v7312_v59 = vsel %vm2756_vm7, %v4784_v62, %v2724_v48  ;;  %vm3362_vm1 = vcmp.eq.f32.partialorder %v7271_v50, 8.0 }
 0x185   :  { %v1783_v29 = vsel %vm12564_vm6, %v1782_v63, %v1780_v45  ;;  %vm1796_vm10 = vmand %vm1794_vm12, %vm1795_vm0  ;;  %v2598_v25 = vfloor.f32 %v2566_v2  ;;  %12565 = vst [vmem:[#allocation85_spill] sm:$0xff] %v7312_v59  ;;  %vm7320_vm15 = vcmp.eq.f32.partialorder %v7138_v56, %v7163_v27  ;;  %v12566_v19 = vmov 0 }
 0x186   :  { %v1787_v23 = vsel %vm1786_vm2, %v7018_v13, %v1783_v29  ;;  %v12567_v19 = vsel %vm7320_vm15, 4294967295, %v12566_v19  ;;  %vm2852_vm6 = vcmp.eq.f32.partialorder %v7312_v59, 0.0  ;;  %vm3364_vm3 = vcmp.eq.f32.partialorder %v7312_v59, 8.0 }
 0x187   :  { %12568 = vst [vmem:[#allocation86_spill] sm:$0xff] %v12567_v19  ;;  %vm932_vm0 = vcmp.eq.f32.partialorder %v6835_v51, inf  ;;  %v1791_v42 = vsel %vm7294_vm8, nan, %v1787_v23  ;;  %vm2662_vm12 = vcmp.lt.f32.partialorder %v2598_v25, 0.0  ;;  %v2694_v10 = vadd.f32 9.0, %v2598_v25 }
 0x188   :  { %v1804_v34 = vmax.f32 %v7283_v15, %v7286_v3  ;;  %v1797_v13 = vsel %vm1796_vm10, %v7027_v40, %v1791_v42  ;;  %vm7332_vm2 = vcmp.eq.f32.partialorder %v2564_v14, %v2596_v21  ;;  %v12569_v56 = vmov 0 }
 0x189   :  { %v12570_v56 = vsel %vm7332_vm2, 4294967295, %v12569_v56  ;;  %vm12572_vm7 = vcmp.eq.f32.partialorder %v7271_v50, 0.0  ;;  %v7342_v35 = vsel %vm3362_vm1, %v6923_v6, 0.0  ;;  %v1798_v44 = vand.u32 2147483647, %v1797_v13 }
 0x18a   :  { %12571 = vst [vmem:[#allocation87_spill] sm:$0xff] %v12570_v56  ;;  %v7339_v27 = vsel %vm12572_vm7, %v6923_v6, 0.0  ;;  %12574 = vst [vmem:[#allocation89_spill] sm:$0xff] %v7342_v35  ;;  %v2726_v38 = vsel %vm2662_vm12, %v2694_v10, %v2598_v25  ;;  %v7345_v31 = vsel %vm2852_vm6, %v6927_v61, 0.0  ;;  %v7348_v41 = vsel %vm3364_vm3, %v6927_v61, 0.0  ;;  %v12585_v10 = vld [vmem:[#allocation76_spill] sm:$0xff] }
 0x18b   :  { %12573 = vst [vmem:[#allocation88_spill] sm:$0xff] %v7339_v27  ;;  %12575 = vst [vmem:[#allocation90_spill] sm:$0xff] %v7345_v31  ;;  %vm2758_vm8 = vcmp.ge.f32.partialorder %v2726_v38, 9.0  ;;  %v4786_v40 = vadd.f32 -9.0, %v2726_v38  ;;  %v749_v39 = vmul.f32 %v7264_v22, %v7264_v22  ;;  %v777_v14 = vmul.f32 %v7253_v36, %v7253_v36 }
 0x18c   :  { %12576 = vst [vmem:[#allocation91_spill] sm:$0xff] %v7348_v41  ;;  %v12577_v46 = vand.u32 2147483648, %v6665_v53  ;;  %v751_v4 = vmul.f32 %v7267_v26, %v7267_v26  ;;  %v779_v58 = vmul.f32 %v7274_v24, %v7274_v24  ;;  %4877 = vrcp.f32 %v1804_v34 }
 0x18d   :  { %v7360_v49 = vsel %vm2758_vm8, %v4786_v40, %v2726_v38  ;;  %v3426_v21 = vsel %vm7320_vm15, %v7339_v27, %v7342_v35  ;;  %v3428_v53 = vsel %vm7332_vm2, %v7345_v31, %v7348_v41  ;;  %v781_v30 = vmul.f32 %v7277_v47, %v7277_v47 }
 0x18e   :  { %v1800_v7 = vor.u32 %v12577_v46, %v1798_v44  ;;  %12578 = vst [vmem:[#allocation92_spill] sm:$0xff] %v7360_v49  ;;  %vm2854_vm3 = vcmp.eq.f32.partialorder %v7360_v49, 0.0  ;;  %vm3366_vm10 = vcmp.eq.f32.partialorder %v7360_v49, 8.0  ;;  %v783_v54 = vmul.f32 %v7300_v20, %v7300_v20  ;;  %v7613_v49 = vld [vmem:[#allocation3 + $0x148] sm:$0x3] }
 0x18f   :  { %vm7376_vm1 = vcmp.eq.f32.partialorder %v2566_v2, %v2598_v25  ;;  %v12579_v28 = vmov 0  ;;  %v7381_v45 = vsel %vm2854_vm3, %v12582_v43, 0.0  ;;  %v7384_v48 = vsel %vm3366_vm10, %v12582_v43, 0.0 }
 0x190   :  { %v2568_v12 = vmul.f32 2.864789, %v1800_v7  ;;  %v12580_v28 = vsel %vm7376_vm1, 4294967295, %v12579_v28  ;;  %12583 = vst [vmem:[#allocation94_spill] sm:$0xff] %v7381_v45  ;;  %12584 = vst [vmem:[#allocation95_spill] sm:$0xff] %v7384_v48  ;;  %v7386_v63 = vadd.f32 %v777_v14, %v745_v32  ;;  %v3458_v16 = vadd.f32 %v3426_v21, %v7339_v27 }
 0x191   :  { %12581 = vst [vmem:[#allocation93_spill] sm:$0xff] %v12580_v28  ;;  %v3460_v29 = vadd.f32 %v3428_v53, %v7345_v31  ;;  %v7390_v23 = vadd.f32 %v779_v58, %v747_v9  ;;  %vm934_vm6 = vcmp.eq.f32.partialorder %v6835_v51, 0.0  ;;  %v935_v2 = vand.u32 2147483648, %v6835_v51 }
 0x192   :  { %v2600_v62 = vfloor.f32 %v2568_v12  ;;  %v3430_v42 = vsel %vm7376_vm1, %v7381_v45, %v7384_v48  ;;  %v7398_v32 = vadd.f32 %v781_v30, %v749_v39  ;;  %v933_v34 = vsel %vm932_vm0, %v6835_v51, %v12585_v10 }
 0x193   :  { %4879 = vrsqrt.f32 %v7386_v63  ;;  %v7406_v9 = vand.u32 2147483647, %v7274_v24  ;;  %v7409_v13 = vand.u32 2147483647, %v7261_v55  ;;  %v3484_v38 = vadd.f32 %v3460_v29, %v3458_v16 }
 0x194   :  { %vm2664_vm12 = vcmp.lt.f32.partialorder %v2600_v62, 0.0  ;;  %v2696_v25 = vadd.f32 9.0, %v2600_v62  ;;  %v7411_v40 = vadd.f32 %v783_v54, %v751_v4  ;;  %4881 = vrsqrt.f32 %v7390_v23 }
 0x195   :  { %v3462_v14 = vadd.f32 %v3430_v42, %v7381_v45  ;;  %v1898_v46 = vmax.f32 %v7406_v9, %v7409_v13  ;;  %v7419_v7 = vsel %vm934_vm6, %v935_v2, %v933_v34  ;;  %4883 = vrsqrt.f32 %v7398_v32 }
 0x196   :  { %v2728_v44 = vsel %vm2664_vm12, %v2696_v25, %v2600_v62  ;;  %12586 = vst [vmem:[#allocation76_spill] sm:$0xff] %v7419_v7  ;;  %v1803_v58 = vmin.f32 %v7283_v15, %v7286_v3  ;;  %vm7424_vm0 = vcmp.eq.f32.partialorder %v2568_v12, %v2600_v62  ;;  %v12587_v4 = vmov 0 }
 0x197   :  { %vm2760_vm7 = vcmp.ge.f32.partialorder %v2728_v44, 9.0  ;;  %v4788_v39 = vadd.f32 -9.0, %v2728_v44  ;;  %v12588_v4 = vsel %vm7424_vm0, 4294967295, %v12587_v4  ;;  %4885 = vrcp.f32 %v1898_v46 }
 0x198   :  { %12589 = vst [vmem:[#allocation96_spill] sm:$0xff] %v12588_v4  ;;  %4887 = vrsqrt.f32 %v7411_v40  ;;  %v7434_v51 = vand.u32 2147483647, %v7277_v47  ;;  %v3492_v54 = vadd.f32 %v3484_v38, %v3462_v14  ;;  %v7443_v62 = vand.u32 2147483647, %v7264_v22 }
 0x199   :  { %v7428_v21 = vsel %vm2760_vm7, %v4788_v39, %v2728_v44  ;;  %v4878_v53 = vpop.eup %4877  ;;  %v7460_v44 = vand.u32 2147483647, %v7300_v20  ;;  %v7463_v38 = vand.u32 2147483647, %v7267_v26  ;;  %vm939_vm10 = vcmp.eq.f32.partialorder %v7386_v63, inf }
 0x19a   :  { %12590 = vst [vmem:[#allocation97_spill] sm:$0xff] %v7428_v21  ;;  %vm2856_vm8 = vcmp.eq.f32.partialorder %v7428_v21, 0.0  ;;  %vm3368_vm3 = vcmp.eq.f32.partialorder %v7428_v21, 8.0  ;;  %v7449_v29 = vmul.f32 %v4878_v53, %v1803_v58  ;;  %v1992_v25 = vmax.f32 %v7434_v51, %v7443_v62 }
 0x19b   :  { %v7437_v30 = vsel %vm2856_vm8, %v7419_v7, 0.0  ;;  %v7440_v12 = vsel %vm3368_vm3, %v7419_v7, 0.0  ;;  %v1897_v58 = vmin.f32 %v7406_v9, %v7409_v13  ;;  %v2086_v53 = vmax.f32 %v7460_v44, %v7463_v38 }
 0x19c   :  { %12591 = vst [vmem:[#allocation98_spill] sm:$0xff] %v7437_v30  ;;  %12592 = vst [vmem:[#allocation99_spill] sm:$0xff] %v7440_v12  ;;  %v3432_v16 = vsel %vm7424_vm0, %v7437_v30, %v7440_v12  ;;  %v7456_v42 = vmul.f32 %v7449_v29, %v7449_v29  ;;  %4889 = vrcp.f32 %v1992_v25  ;;  %vm953_vm12 = vcmp.eq.f32.partialorder %v7390_v23, inf }
 0x19d   :  { %v3464_v2 = vadd.f32 %v3432_v16, %v7437_v30  ;;  %4891 = vrcp.f32 %v2086_v53  ;;  %vm967_vm8 = vcmp.eq.f32.partialorder %v7398_v32, inf  ;;  %vm981_vm3 = vcmp.eq.f32.partialorder %v7411_v40, inf }
 0x19e   :  { %v1808_v34 = vmul.f32 0.002785687, %v7456_v42  ;;  %vm969_vm7 = vcmp.eq.f32.partialorder %v7398_v32, 0.0  ;;  %v970_v35 = vand.u32 2147483648, %v7398_v32  ;;  %vm983_vm6 = vcmp.eq.f32.partialorder %v7411_v40, 0.0 }
 0x19f   :  { %v3500_v10 = vadd.f32 %v3492_v54, %v3464_v2  ;;  %vm12619_vm1 = vcmp.eq.f32.partialorder %v7250_v52, 0.0  ;;  %vm12667_vm2 = vcmp.eq.f32.partialorder %v7267_v26, 0.0 }
 0x1a0   :  { %v4880_v39 = vpop.eup %4879  ;;  %v1809_v14 = vadd.f32 -0.015866, %v1808_v34  ;;  %v942_v34 = vand.u32 2147483648, %v7386_v63 }
 0x1a1   :  { %3508 = vst [vmem:[#allocation2 + $0x18] sm:$0xff] %v3500_v10  ;;  %v4882_v46 = vpop.eup %4881  ;;  %v938_v12 = vmul.f32 %v4880_v39, %v7386_v63 }
 0x1a2   :  { %v1810_v54 = vmul.f32 %v1809_v14, %v7456_v42  ;;  %v4884_v16 = vpop.eup %4883  ;;  %v952_v53 = vmul.f32 %v4882_v46, %v7390_v23 }
 0x1a4   :  { %v4886_v2 = vpop.eup %4885  ;;  %v1811_v25 = vadd.f32 0.04247222, %v1810_v54  ;;  %v966_v54 = vmul.f32 %v4884_v16, %v7398_v32  ;;  %v7496_v16 = vld [vmem:[#allocation3 + $0x100] sm:$0x3]  ;;  %v954_v28 = vsel %vm953_vm12, %v7390_v23, %v952_v53  ;;  %vm11942_vm12 = vcmp.lt.f32.partialorder %v7253_v36, 0.0 }
 0x1a5   :  { %v4888_v18 = vpop.eup %4887  ;;  %v7471_v10 = vmul.f32 %v4886_v2, %v1897_v58  ;;  %v1991_v58 = vmin.f32 %v7434_v51, %v7443_v62  ;;  %v185_v7 = vrot.slane %v7496_v16, 2 }
 0x1a6   :  { %v1812_v8 = vmul.f32 %v1811_v25, %v7456_v42  ;;  %v980_v2 = vmul.f32 %v4888_v18, %v7411_v40  ;;  %v956_v25 = vand.u32 2147483648, %v7390_v23  ;;  %v984_v18 = vand.u32 2147483648, %v7411_v40 }
 0x1a7   :  { %v7481_v14 = vmul.f32 %v7471_v10, %v7471_v10  ;;  %v968_v45 = vsel %vm967_vm8, %v7398_v32, %v966_v54  ;;  %vm12595_vm8 = vcmp.eq.f32.partialorder %v7390_v23, 0.0 }
 0x1a8   :  { %v1813_v48 = vadd.f32 -0.074975304, %v1812_v8  ;;  %v940_v8 = vsel %vm939_vm10, %v7386_v63, %v938_v12  ;;  %v982_v56 = vsel %vm981_vm3, %v7411_v40, %v980_v2  ;;  %v2085_v12 = vmin.f32 %v7460_v44, %v7463_v38 }
 0x1a9   :  { %v1902_v39 = vmul.f32 0.002785687, %v7481_v14  ;;  %v4890_v41 = vpop.eup %4889  ;;  %vm12593_vm10 = vcmp.eq.f32.partialorder %v7386_v63, 0.0  ;;  %vm1831_vm3 = vcmp.lt.s32.totalorder %v7253_v36, 0  ;;  %v7535_v63 = vsel %vm983_vm6, %v984_v18, %v982_v56 }
 0x1aa   :  { %v1814_v46 = vmul.f32 %v1813_v48, %v7456_v42  ;;  %v7502_v30 = vmul.f32 %v4890_v41, %v1991_v58  ;;  %v326_v41 = vmul.f32 2.0, %v7496_v16  ;;  %v7519_v58 = vsel %vm12593_vm10, %v942_v34, %v940_v8  ;;  %12598 = vst [vmem:[#allocation103_spill] sm:$0xff] %v7535_v63 }
 0x1ab   :  { %v1903_v4 = vadd.f32 -0.015866, %v1902_v39  ;;  %12594 = vst [vmem:[#allocation100_spill] sm:$0xff] %v7519_v58  ;;  %v4892_v39 = vpop.eup %4891  ;;  %vm1925_vm10 = vcmp.lt.s32.totalorder %v7274_v24, 0  ;;  %vm11938_vm6 = vcmp.lt.f32.partialorder %v7274_v24, 0.0 }
 0x1ac   :  { %v1815_v48 = vadd.f32 0.1064488, %v1814_v46  ;;  %v7512_v19 = vmul.f32 %v7502_v30, %v7502_v30  ;;  %v7531_v46 = vsel %vm969_vm7, %v970_v35, %v968_v45  ;;  %v12600_v35 = vmov 0.7853982  }
 0x1ad   :  { %v1904_v31 = vmul.f32 %v1903_v4, %v7481_v14  ;;  %v7525_v4 = vsel %vm12595_vm8, %v956_v25, %v954_v28  ;;  %12597 = vst [vmem:[#allocation102_spill] sm:$0xff] %v7531_v46  ;;  %v7539_v25 = vmul.f32 %v4892_v39, %v2085_v12  ;;  %v7548_v45 = vsel %vm11942_vm12, 2.3561945, %v12600_v35 }
 0x1ae   :  { %v1816_v53 = vmul.f32 %v1815_v48, %v7456_v42  ;;  %12596 = vst [vmem:[#allocation101_spill] sm:$0xff] %v7525_v4  ;;  %v1996_v2 = vmul.f32 0.002785687, %v7512_v19  ;;  %v12599_v48 = vmov 0.0   ;;  %vm2019_vm7 = vcmp.lt.s32.totalorder %v7277_v47, 0 }
 0x1af   :  { %v1905_v54 = vadd.f32 0.04247222, %v1904_v31  ;;  %v456_v31 = vrot.slane %v326_v41, 1  ;;  %v7543_v27 = vsel %vm1831_vm3, 3.1415927, %v12599_v48  ;;  %v7557_v18 = vmul.f32 %v7539_v25, %v7539_v25 }
 0x1b0   :  { %v1817_v34 = vadd.f32 -0.14207031, %v1816_v53  ;;  %v1997_v23 = vadd.f32 -0.015866, %v1996_v2  ;;  %v7552_v32 = vsel %vm1925_vm10, 3.1415927, %v12599_v48 }
 0x1b1   :  { %v1906_v28 = vmul.f32 %v1905_v54, %v7481_v14  ;;  %v7563_v53 = vsel %vm11938_vm6, 2.3561945, %v12600_v35  ;;  %v2090_v39 = vmul.f32 0.002785687, %v7557_v18  ;;  %vm12602_vm8 = vcmask 1046528  }
 0x1b2   :  { %v1818_v8 = vmul.f32 %v1817_v34, %v7456_v42  ;;  %v1998_v40 = vmul.f32 %v1997_v23, %v7512_v19  ;;  %v12601_v34 = vrot.slane %v7061_v1, 1  ;;  %vm11945_vm3 = vcmp.lt.f32.partialorder %v7277_v47, 0.0 }
 0x1b3   :  { %v1907_v56 = vadd.f32 -0.074975304, %v1906_v28  ;;  %vm2113_vm10 = vcmp.lt.s32.totalorder %v7300_v20, 0  ;;  %vm1825_vm6 = vcmp.gt.f32.partialorder %v7286_v3, %v7283_v15  ;;  %v7592_v16 = vsel %vm11945_vm3, 2.3561945, %v12600_v35 }
 0x1b4   :  { %v1819_v12 = vadd.f32 0.19993454, %v1818_v8  ;;  %v1999_v2 = vadd.f32 0.04247222, %v1998_v40  ;;  %v457_v28 = vsel %vm12602_vm8, %v12601_v34, %v456_v31  ;;  %v2091_v40 = vadd.f32 -0.015866, %v2090_v39 }
 0x1b5   :  { %v1908_v54 = vmul.f32 %v1907_v56, %v7481_v14  ;;  %v7580_v31 = vsel %vm2019_vm7, 3.1415927, %v12599_v48  ;;  %v12604_v8 = vld [vmem:[#allocation41_spill] sm:$0xff]  ;;  %vm11964_vm12 = vcmp.lt.f32.partialorder %v7300_v20, 0.0  ;;  %vm12606_vm7 = vcmask 1045504  }
 0x1b6   :  { %v1820_v23 = vmul.f32 %v1819_v12, %v7456_v42  ;;  %v2000_v56 = vmul.f32 %v1999_v2, %v7512_v19  ;;  %v12603_v12 = vld [vmem:[#allocation77_spill] sm:$0xff]  ;;  %v618_v43 = vmul.f32 2.0, %v12604_v8  ;;  %v2092_v39 = vmul.f32 %v2091_v40, %v7557_v18 }
 0x1b7   :  { %v1909_v41 = vadd.f32 0.1064488, %v1908_v54  ;;  %v550_v34 = vadd.f32 %v457_v28, %v12603_v12 }
 0x1b8   :  { %v1821_v1 = vadd.f32 -0.33333147, %v1820_v23  ;;  %v2001_v2 = vadd.f32 -0.074975304, %v2000_v56  ;;  %v58_v23 = vld [vmem:[#allocation3 + $0x118] sm:$0x3]  ;;  %v650_v57 = vadd.f32 %v618_v43, %v12607_v37 }
 0x1b9   :  { %v1910_v54 = vmul.f32 %v1909_v41, %v7481_v14  ;;  %v7603_v41 = vsel %vm2113_vm10, 3.1415927, %v12599_v48  ;;  %v2093_v6 = vadd.f32 0.04247222, %v2092_v39  ;;  %v329_v59 = vmul.f32 2.0, %v58_v23 }
 0x1ba   :  { %v1822_v28 = vmul.f32 %v1821_v1, %v7456_v42  ;;  %v2002_v40 = vmul.f32 %v2001_v2, %v7512_v19  ;;  %v7607_v42 = vld [vmem:[#allocation3 + $0x130] sm:$0x3]  ;;  %v12605_v1 = vrot.slane %v12603_v12, 2  ;;  %v7623_v39 = vsel %vm11964_vm12, 2.3561945, %v12600_v35  ;;  %v12608_v35 = vld [vmem:[#allocation26_spill] sm:$0xff] }
 0x1bb   :  { %v1911_v56 = vadd.f32 -0.14207031, %v1910_v54  ;;  %v2094_v2 = vmul.f32 %v2093_v6, %v7557_v18  ;;  %vm12611_vm12 = vcmp.ne.f32.partialorder %v7250_v52, %v7250_v52  ;;  %vm1935_vm10 = vcmp.eq.s32.totalorder %v7406_v9, inf }
 0x1bc   :  { %v186_v21 = vsel %vm12606_vm7, %v12605_v1, %v185_v7  ;;  %v1823_v61 = vmul.f32 %v1822_v28, %v7449_v29  ;;  %v2003_v60 = vadd.f32 0.1064488, %v2002_v40  ;;  %v190_v28 = vrot.slane %v58_v23, 2 }
 0x1bd   :  { %v7615_v50 = vadd.f32 %v550_v34, %v186_v21  ;;  %v1912_v54 = vmul.f32 %v1911_v56, %v7481_v14  ;;  %v7627_v1 = vsub.f32 %v12603_v12, %v186_v21  ;;  %v332_v34 = vmul.f32 2.0, %v7607_v42 }
 0x1be   :  { %v1824_v7 = vadd.f32 %v1823_v61, %v7449_v29  ;;  %v2004_v37 = vmul.f32 %v2003_v60, %v7512_v19  ;;  %v2095_v43 = vadd.f32 -0.074975304, %v2094_v2  ;;  %v335_v56 = vmul.f32 2.0, %v7613_v49 }
 0x1bf   :  { %v1913_v5 = vadd.f32 0.19993454, %v1912_v54  ;;  %v461_v40 = vrot.slane %v329_v59, 1  ;;  %v7633_v48 = vadd.f32 %v650_v57, %v7627_v1  ;;  %v7637_v61 = vsub.f32 %v12608_v35, %v7615_v50  ;;  %v12609_v57 = vld [vmem:[#allocation78_spill] sm:$0xff] }
 0x1c0   :  { %v1826_v6 = vsub.f32 1.5707964, %v1824_v7  ;;  %v2005_v29 = vadd.f32 -0.14207031, %v2004_v37  ;;  %v2096_v12 = vmul.f32 %v2095_v43, %v7557_v18  ;;  %v195_v23 = vrot.slane %v7607_v42, 2 }
 0x1c1   :  { %v1914_v21 = vmul.f32 %v1913_v5, %v7481_v14  ;;  %v12610_v59 = vrot.slane %v12609_v57, 2  ;;  %v200_v35 = vrot.slane %v7613_v49, 2  ;;  %v466_v2 = vrot.slane %v332_v34, 1 }
 0x1c2   :  { %v1827_v60 = vsel %vm1825_vm6, %v1826_v6, %v1824_v7  ;;  %v2006_v43 = vmul.f32 %v2005_v29, %v7512_v19  ;;  %v2097_v63 = vadd.f32 0.1064488, %v2096_v12  ;;  %vm12612_vm6 = vcmp.ne.f32.partialorder %v7253_v36, %v7253_v36 }
 0x1c3   :  { %v191_v54 = vsel %vm12606_vm7, %v12610_v59, %v190_v28  ;;  %v1829_v5 = vsub.f32 3.1415927, %v1827_v60  ;;  %v1915_v37 = vadd.f32 -0.33333147, %v1914_v21  ;;  %vm7658_vm3 = vmor %vm12612_vm6, %vm12611_vm12  ;;  %v12615_v49 = vrot.slane %v7080_v33, 1 }
 0x1c4   :  { %v471_v28 = vrot.slane %v335_v56, 1  ;;  %v7670_v34 = vand.u32 2147483647, %v7637_v61  ;;  %v7673_v6 = vand.u32 2147483647, %v7633_v48  ;;  %vm12616_vm12 = vcmp.lt.f32.partialorder %v7253_v36, 0.0 }
 0x1c5   :  { %v462_v7 = vsel %vm12602_vm8, %v12615_v49, %v461_v40  ;;  %v1830_v21 = vsel %vm12616_vm12, %v1829_v5, %v1827_v60  ;;  %vm12617_vm6 = vcmp.eq.s32.totalorder %v7286_v3, inf  ;;  %vm12618_vm7 = vcmp.eq.s32.totalorder %v7283_v15, inf }
 0x1c6   :  { %vm1843_vm0 = vmand %vm12618_vm7, %vm12617_vm6  ;;  %v1916_v29 = vmul.f32 %v1915_v37, %v7481_v14  ;;  %vm1936_vm8 = vcmp.eq.s32.totalorder %v7409_v13, inf  ;;  %v2007_v33 = vadd.f32 0.19993454, %v2006_v43  ;;  %v2098_v56 = vmul.f32 %v2097_v63, %v7557_v18 }
 0x1c7   :  { %v1834_v40 = vsel %vm12619_vm1, %v7543_v27, %v1830_v21  ;;  %vm1927_vm12 = vcmp.eq.f32.partialorder %v7261_v55, 0.0  ;;  %v7690_v36 = vsub.f32 %v12609_v57, %v191_v54  ;;  %v12620_v15 = vrot.slane %v7093_v17, 1  ;;  %vm7769_vm1 = vmand %vm1935_vm10, %vm1936_vm8 }
 0x1c8   :  { %vm12621_vm7 = vcmask 1046528   ;;  %v1851_v14 = vmax.f32 %v7670_v34, %v7673_v6  ;;  %v1838_v12 = vsel %vm7658_vm3, nan, %v1834_v40  ;;  %v1917_v63 = vmul.f32 %v1916_v29, %v7471_v10 }
 0x1c9   :  { %v467_v3 = vsel %vm12621_vm7, %v12620_v15, %v466_v2  ;;  %v2008_v60 = vmul.f32 %v2007_v33, %v7512_v19  ;;  %v2099_v27 = vadd.f32 -0.14207031, %v2098_v56  ;;  %v1844_v59 = vsel %vm1843_vm0, %v7548_v45, %v1838_v12  ;;  %vm12623_vm6 = vmmov %vm12621_vm7  ;;  %v12624_v45 = vld [vmem:[#allocation79_spill] sm:$0xff] }
 0x1ca   :  { %v12622_v17 = vrot.slane %v7108_v11, 1  ;;  %v552_v5 = vadd.f32 %v462_v7, %v12609_v57  ;;  %4893 = vrcp.f32 %v1851_v14  ;;  %v1845_v37 = vand.u32 2147483647, %v1844_v59 }
 0x1cb   :  { %v1918_v43 = vadd.f32 %v1917_v63, %v7471_v10  ;;  %v2009_v42 = vadd.f32 -0.33333147, %v2008_v60  ;;  %v2100_v49 = vmul.f32 %v2099_v27, %v7557_v18  ;;  %v12625_v21 = vrot.slane %v12624_v45, 2 }
 0x1cc   :  { %v472_v2 = vsel %vm12623_vm6, %v12622_v17, %v471_v28  ;;  %vm12626_vm7 = vcmask 1045504   ;;  %v12627_v28 = vrot.slane %v7022_v0, 2  ;;  %v554_v7 = vadd.f32 %v467_v3, %v12624_v45 }
 0x1cd   :  { %v196_v11 = vsel %vm12626_vm7, %v12625_v21, %v195_v23  ;;  %vm12628_vm6 = vmmov %vm12626_vm7  ;;  %v620_v10 = vmul.f32 2.0, %v7627_v1  ;;  %v12629_v29 = vand.u32 2147483648, %v7250_v52  ;;  %v1920_v56 = vsub.f32 1.5707964, %v1918_v43 }
 0x1ce   :  { %v201_v57 = vsel %vm12628_vm6, %v12627_v28, %v200_v35  ;;  %v2010_v40 = vmul.f32 %v2009_v42, %v7512_v19  ;;  %v2101_v15 = vadd.f32 0.19993454, %v2100_v49  ;;  %v2128_v23 = vand.u32 2147483648, %v7267_v26 }
 0x1cf   :  { %v1847_v33 = vor.u32 %v12629_v29, %v1845_v37  ;;  %v556_v35 = vadd.f32 %v472_v2, %v7022_v0  ;;  %v7730_v3 = vadd.f32 %v552_v5, %v191_v54  ;;  %v622_v14 = vmul.f32 2.0, %v7690_v36 }
 0x1d0   :  { %vm12630_vm6 = vcmp.gt.f32.partialorder %v7409_v13, %v7406_v9  ;;  %v2011_v19 = vmul.f32 %v2010_v40, %v7502_v30  ;;  %v2102_v12 = vmul.f32 %v2101_v15, %v7557_v18  ;;  %v7743_v27 = vsub.f32 %v12624_v45, %v196_v11  ;;  %v12642_v45 = vld [vmem:[#allocation43_spill] sm:$0xff] }
 0x1d1   :  { %v1921_v52 = vsel %vm12630_vm6, %v1920_v56, %v1918_v43  ;;  %v7738_v63 = vmul.f32 2.864789, %v1847_v33  ;;  %v7746_v54 = vsub.f32 %v7022_v0, %v201_v57  ;;  %v7748_v59 = vadd.f32 %v554_v7, %v196_v11 }
 0x1d2   :  { %v1923_v60 = vsub.f32 3.1415927, %v1921_v52  ;;  %12631 = vst [vmem:[#allocation77_spill] sm:$0xff] %v7743_v27  ;;  %vm12634_vm6 = vcmp.ne.f32.partialorder %v7261_v55, %v7261_v55  ;;  %vm12635_vm3 = vcmp.ne.f32.partialorder %v7274_v24, %v7274_v24  ;;  %v2012_v2 = vadd.f32 %v2011_v19, %v7502_v30 }
 0x1d3   :  { %12632 = vst [vmem:[#allocation41_spill] sm:$0xff] %v7746_v54  ;;  %12633 = vst [vmem:[#allocation42_spill] sm:$0xff] %v7748_v59  ;;  %v2103_v5 = vadd.f32 -0.33333147, %v2102_v12  ;;  %v2601_v37 = vfloor.f32 %v7738_v63  ;;  %v652_v0 = vadd.f32 %v620_v10, %v12604_v8  ;;  %vm12638_vm7 = vcmp.lt.f32.partialorder %v7274_v24, 0.0 }
 0x1d4   :  { %vm7756_vm0 = vmor %vm12635_vm3, %vm12634_vm6  ;;  %v1924_v43 = vsel %vm12638_vm7, %v1923_v60, %v1921_v52  ;;  %vm2118_vm6 = vcmp.ne.f32.partialorder %v7267_v26, %v7267_v26  ;;  %v7777_v30 = vadd.f32 %v556_v35, %v201_v57  ;;  %v624_v8 = vmul.f32 2.0, %v7743_v27 }
 0x1d5   :  { %v654_v24 = vadd.f32 %v622_v14, %v7627_v1  ;;  %v1928_v9 = vsel %vm1927_vm12, %v7552_v32, %v1924_v43  ;;  %v2014_v13 = vsub.f32 1.5707964, %v2012_v2  ;;  %v2104_v49 = vmul.f32 %v2103_v5, %v7557_v18 }
 0x1d6   :  { %12641 = vst [vmem:[#allocation26_spill] sm:$0xff] %v7777_v30  ;;  %v7789_v21 = vsub.f32 %v12642_v45, %v7730_v3  ;;  %v1932_v11 = vsel %vm7756_vm0, nan, %v1928_v9  ;;  %vm2665_vm3 = vcmp.lt.f32.partialorder %v2601_v37, 0.0  ;;  %v2697_v1 = vadd.f32 9.0, %v2601_v37 }
 0x1d7   :  { %v1850_v32 = vmin.f32 %v7670_v34, %v7673_v6  ;;  %v1938_v18 = vsel %vm7769_vm1, %v7563_v53, %v1932_v11  ;;  %vm12643_vm12 = vcmp.gt.f32.partialorder %v7443_v62, %v7434_v51  ;;  %v2105_v57 = vmul.f32 %v2104_v49, %v7539_v25  ;;  %v4894_v40 = vpop.eup %4893 }
 0x1d8   :  { %v2015_v28 = vsel %vm12643_vm12, %v2014_v13, %v2012_v2  ;;  %v7804_v7 = vadd.f32 %v652_v0, %v7690_v36  ;;  %v1939_v10 = vand.u32 2147483647, %v1938_v18  ;;  %v2729_v33 = vsel %vm2665_vm3, %v2697_v1, %v2601_v37 }
 0x1d9   :  { %v2017_v29 = vsub.f32 3.1415927, %v2015_v28  ;;  %v7807_v56 = vadd.f32 %v624_v8, %v7690_v36  ;;  %vm12644_vm0 = vcmp.ne.f32.partialorder %v7264_v22, %v7264_v22  ;;  %vm12645_vm1 = vcmp.ne.f32.partialorder %v7277_v47, %v7277_v47 }
 0x1da   :  { %vm7815_vm7 = vmor %vm12645_vm1, %vm12644_vm0  ;;  %v2106_v15 = vadd.f32 %v2105_v57, %v7539_v25  ;;  %vm2761_vm12 = vcmp.ge.f32.partialorder %v2729_v33, 9.0  ;;  %v4789_v35 = vadd.f32 -9.0, %v2729_v33  ;;  %v7821_v14 = vadd.f32 %v654_v24, %v7743_v27 }
 0x1db   :  { %v12648_v36 = vand.u32 2147483648, %v7261_v55  ;;  %vm12649_vm3 = vcmp.lt.f32.partialorder %v7277_v47, 0.0  ;;  %vm12650_vm10 = vcmp.eq.s32.totalorder %v7443_v62, inf  ;;  %vm12651_vm0 = vcmp.eq.s32.totalorder %v7434_v51, inf }
 0x1dc   :  { %v2018_v19 = vsel %vm12649_vm3, %v2017_v29, %v2015_v28  ;;  %vm2031_vm1 = vmand %vm12651_vm0, %vm12650_vm10  ;;  %v7831_v12 = vmul.f32 %v4894_v40, %v1850_v32  ;;  %v7834_v25 = vand.u32 2147483647, %v7789_v21  ;;  %vm12652_vm8 = vcmp.eq.f32.partialorder %v7264_v22, 0.0 }
 0x1dd   :  { %v1941_v52 = vor.u32 %v12648_v36, %v1939_v10  ;;  %v2022_v60 = vsel %vm12652_vm8, %v7580_v31, %v2018_v19  ;;  %v2108_v17 = vsub.f32 1.5707964, %v2106_v15  ;;  %v7839_v55 = vsel %vm2761_vm12, %v4789_v35, %v2729_v33 }
 0x1de   :  { %12653 = vst [vmem:[#allocation78_spill] sm:$0xff] %v7839_v55  ;;  %v7842_v47 = vand.u32 2147483647, %v7804_v7  ;;  %v2026_v62 = vsel %vm7815_vm7, nan, %v2022_v60  ;;  %vm2857_vm10 = vcmp.eq.f32.partialorder %v7839_v55, 0.0  ;;  %v7849_v2 = vsub.f32 %v7615_v50, %v7748_v59 }
 0x1df   :  { %v2571_v51 = vmul.f32 2.864789, %v1941_v52  ;;  %v2032_v5 = vsel %vm2031_vm1, %v7592_v16, %v2026_v62  ;;  %vm12654_vm8 = vcmp.gt.f32.partialorder %v7463_v38, %v7460_v44  ;;  %vm3369_vm12 = vcmp.eq.f32.partialorder %v7839_v55, 8.0 }
 0x1e0   :  { %v2109_v31 = vsel %vm12654_vm8, %v2108_v17, %v2106_v15  ;;  %v746_v0 = vmul.f32 %v7633_v48, %v7633_v48  ;;  %v2033_v43 = vand.u32 2147483647, %v2032_v5  ;;  %v778_v24 = vmul.f32 %v7637_v61, %v7637_v61 }
 0x1e1   :  { %v2111_v42 = vsub.f32 3.1415927, %v2109_v31  ;;  %v2603_v8 = vfloor.f32 %v2571_v51  ;;  %vm12655_vm7 = vcmp.ne.f32.partialorder %v7300_v20, %v7300_v20  ;;  %vm7871_vm0 = vcmp.eq.f32.partialorder %v7738_v63, %v2601_v37 }
 0x1e2   :  { %vm7866_vm3 = vmor %vm12655_vm7, %vm2118_vm6  ;;  %v12658_v16 = vmov 0  ;;  %v7876_v9 = vsel %vm2857_vm10, %v7519_v58, 0.0  ;;  %v7880_v13 = vmul.f32 %v7831_v12, %v7831_v12  ;;  %v1945_v49 = vmax.f32 %v7834_v25, %v7842_v47 }
 0x1e3   :  { %v12659_v16 = vsel %vm7871_vm0, 4294967295, %v12658_v16  ;;  %12661 = vst [vmem:[#allocation43_spill] sm:$0xff] %v7876_v9  ;;  %v12662_v45 = vand.u32 2147483648, %v7264_v22  ;;  %vm12663_vm6 = vcmp.lt.f32.partialorder %v7300_v20, 0.0  ;;  %vm12664_vm1 = vcmp.eq.s32.totalorder %v7463_v38, inf }
 0x1e4   :  { %12660 = vst [vmem:[#allocation79_spill] sm:$0xff] %v12659_v16  ;;  %v2112_v1 = vsel %vm12663_vm6, %v2111_v42, %v2109_v31  ;;  %vm12665_vm8 = vcmp.eq.s32.totalorder %v7460_v44, inf  ;;  %vm2667_vm10 = vcmp.lt.f32.partialorder %v2603_v8, 0.0  ;;  %v7893_v63 = vsel %vm3369_vm12, %v7519_v58, 0.0 }
 0x1e5   :  { %v2035_v11 = vor.u32 %v12662_v45, %v2033_v43  ;;  %vm2125_vm7 = vmand %vm12665_vm8, %vm12664_vm1  ;;  %12666 = vst [vmem:[#allocation104_spill] sm:$0xff] %v7893_v63  ;;  %v2116_v37 = vsel %vm12667_vm2, %v7603_v41, %v2112_v1  ;;  %v2699_v32 = vadd.f32 9.0, %v2603_v8  ;;  %v1855_v22 = vmul.f32 0.002785687, %v7880_v13 }
 0x1e6   :  { %4895 = vrcp.f32 %v1945_v49  ;;  %v2120_v20 = vsel %vm7866_vm3, nan, %v2116_v37  ;;  %v748_v44 = vmul.f32 %v7804_v7, %v7804_v7  ;;  %v780_v38 = vmul.f32 %v7789_v21, %v7789_v21 }
 0x1e7   :  { %v2573_v18 = vmul.f32 2.864789, %v2035_v11  ;;  %v2126_v28 = vsel %vm2125_vm7, %v7623_v39, %v2120_v20  ;;  %v2731_v57 = vsel %vm2667_vm10, %v2699_v32, %v2603_v8  ;;  %v3433_v41 = vsel %vm7871_vm0, %v7876_v9, %v7893_v63  ;;  %v8127_v63 = vld [vmem:[#allocation3 + $0x158] sm:$0xff] }
 0x1e8   :  { %v1856_v10 = vadd.f32 -0.015866, %v1855_v22  ;;  %v2127_v29 = vand.u32 2147483647, %v2126_v28  ;;  %vm2763_vm2 = vcmp.ge.f32.partialorder %v2731_v57, 9.0  ;;  %v4791_v40 = vadd.f32 -9.0, %v2731_v57 }
 0x1e9   :  { %v2605_v33 = vfloor.f32 %v2573_v18  ;;  %v750_v53 = vmul.f32 %v7821_v14, %v7821_v14  ;;  %v782_v15 = vmul.f32 %v7849_v2, %v7849_v2  ;;  %v7914_v35 = vadd.f32 %v778_v24, %v746_v0 }
 0x1ea   :  { %v1857_v39 = vmul.f32 %v1856_v10, %v7880_v13  ;;  %v2129_v36 = vor.u32 %v2128_v23, %v2127_v29  ;;  %v7919_v19 = vadd.f32 %v780_v38, %v748_v44  ;;  %vm7921_vm3 = vcmp.eq.f32.partialorder %v2571_v51, %v2603_v8 }
 0x1eb   :  { %vm2669_vm12 = vcmp.lt.f32.partialorder %v2605_v33, 0.0  ;;  %v2701_v52 = vadd.f32 9.0, %v2605_v33  ;;  %v12668_v60 = vmov 0  ;;  %v7925_v17 = vsel %vm2763_vm2, %v4791_v40, %v2731_v57 }
 0x1ec   :  { %v12669_v60 = vsel %vm7921_vm3, 4294967295, %v12668_v60  ;;  %12671 = vst [vmem:[#allocation106_spill] sm:$0xff] %v7925_v17  ;;  %v3465_v62 = vadd.f32 %v3433_v41, %v7876_v9  ;;  %v1858_v5 = vadd.f32 0.04247222, %v1857_v39  ;;  %v2575_v31 = vmul.f32 2.864789, %v2129_v36 }
 0x1ed   :  { %12670 = vst [vmem:[#allocation105_spill] sm:$0xff] %v12669_v60  ;;  %v2733_v0 = vsel %vm2669_vm12, %v2701_v52, %v2605_v33  ;;  %vm2859_vm6 = vcmp.eq.f32.partialorder %v7925_v17, 0.0  ;;  %vm3371_vm1 = vcmp.eq.f32.partialorder %v7925_v17, 8.0  ;;  %v7940_v8 = vadd.f32 %v782_v15, %v750_v53  ;;  %v8190_v60 = vld [vmem:[#allocation3 + $0x188] sm:$0xff] }
 0x1ee   :  { %vm2765_vm8 = vcmp.ge.f32.partialorder %v2733_v0, 9.0  ;;  %v4793_v26 = vadd.f32 -9.0, %v2733_v0  ;;  %v7931_v23 = vsel %vm2859_vm6, %v7525_v4, 0.0  ;;  %v7934_v51 = vsel %vm3371_vm1, %v7525_v4, 0.0 }
 0x1ef   :  { %12672 = vst [vmem:[#allocation107_spill] sm:$0xff] %v7931_v23  ;;  %12673 = vst [vmem:[#allocation108_spill] sm:$0xff] %v7934_v51  ;;  %v2607_v43 = vfloor.f32 %v2575_v31  ;;  %v3435_v42 = vsel %vm7921_vm3, %v7931_v23, %v7934_v51  ;;  %v1859_v24 = vmul.f32 %v1858_v5, %v7880_v13  ;;  %4897 = vrsqrt.f32 %v7914_v35  ;;  %v12684_v5 = vld [vmem:[#allocation103_spill] sm:$0xff] }
 0x1f0   :  { %v7943_v50 = vsel %vm2765_vm8, %v4793_v26, %v2733_v0  ;;  %v3467_v49 = vadd.f32 %v3435_v42, %v7931_v23  ;;  %v1944_v45 = vmin.f32 %v7834_v25, %v7842_v47  ;;  %vm7949_vm7 = vcmp.eq.f32.partialorder %v2573_v18, %v2605_v33  ;;  %v8192_v23 = vld [vmem:[#allocation3 + $0x198] sm:$0xff] }
 0x1f1   :  { %12674 = vst [vmem:[#allocation109_spill] sm:$0xff] %v7943_v50  ;;  %v12675_v11 = vmov 0  ;;  %vm2671_vm10 = vcmp.lt.f32.partialorder %v2607_v43, 0.0  ;;  %v2703_v1 = vadd.f32 9.0, %v2607_v43  ;;  %vm2861_vm2 = vcmp.eq.f32.partialorder %v7943_v50, 0.0 }
 0x1f2   :  { %v12676_v11 = vsel %vm7949_vm7, 4294967295, %v12675_v11  ;;  %v7955_v37 = vsel %vm2861_vm2, %v7531_v46, 0.0  ;;  %vm3373_vm12 = vcmp.eq.f32.partialorder %v7943_v50, 8.0  ;;  %v3485_v32 = vadd.f32 %v3467_v49, %v3465_v62 }
 0x1f3   :  { %12677 = vst [vmem:[#allocation110_spill] sm:$0xff] %v12676_v11  ;;  %12678 = vst [vmem:[#allocation111_spill] sm:$0xff] %v7955_v37  ;;  %v1860_v22 = vadd.f32 -0.074975304, %v1859_v24  ;;  %v4896_v20 = vpop.eup %4895  ;;  %v2735_v44 = vsel %vm2671_vm10, %v2703_v1, %v2607_v43  ;;  %v7959_v38 = vsel %vm3373_vm12, %v7531_v46, 0.0  ;;  %4899 = vrsqrt.f32 %v7919_v19  ;;  %v8171_v11 = vld [vmem:[#allocation3 + $0x180] sm:$0xff] }
 0x1f4   :  { %12679 = vst [vmem:[#allocation112_spill] sm:$0xff] %v7959_v38  ;;  %v7962_v18 = vand.u32 2147483647, %v7849_v2  ;;  %v7965_v28 = vand.u32 2147483647, %v7821_v14  ;;  %vm2767_vm6 = vcmp.ge.f32.partialorder %v2735_v44, 9.0  ;;  %v3437_v41 = vsel %vm7949_vm7, %v7955_v37, %v7959_v38 }
 0x1f5   :  { %v4795_v57 = vadd.f32 -9.0, %v2735_v44  ;;  %v1861_v10 = vmul.f32 %v1860_v22, %v7880_v13  ;;  %v3469_v29 = vadd.f32 %v3437_v41, %v7955_v37  ;;  %v7974_v33 = vmul.f32 %v4896_v20, %v1944_v45  ;;  %v8198_v46 = vld [vmem:[#allocation3 + $0x1a0] sm:$0xff] }
 0x1f6   :  { %v2039_v40 = vmax.f32 %v7962_v18, %v7965_v28  ;;  %vm7978_vm1 = vcmp.eq.f32.partialorder %v2575_v31, %v2607_v43  ;;  %v12680_v53 = vmov 0  ;;  %v7986_v39 = vadd.f32 %v7807_v56, %v7746_v54 }
 0x1f7   :  { %v12681_v53 = vsel %vm7978_vm1, 4294967295, %v12680_v53  ;;  %v7982_v15 = vsel %vm2767_vm6, %v4795_v57, %v2735_v44  ;;  %v1862_v36 = vadd.f32 0.1064488, %v1861_v10  ;;  %v3493_v52 = vadd.f32 %v3485_v32, %v3469_v29 }
 0x1f8   :  { %12682 = vst [vmem:[#allocation113_spill] sm:$0xff] %v12681_v53  ;;  %12683 = vst [vmem:[#allocation114_spill] sm:$0xff] %v7982_v15  ;;  %vm2863_vm8 = vcmp.eq.f32.partialorder %v7982_v15, 0.0  ;;  %vm3375_vm10 = vcmp.eq.f32.partialorder %v7982_v15, 8.0  ;;  %v7992_v62 = vmul.f32 %v7974_v33, %v7974_v33  ;;  %4901 = vrcp.f32 %v2039_v40  ;;  %v8160_v53 = vld [vmem:[#allocation3 + $0x170] sm:$0xff] }
 0x1f9   :  { %v7995_v31 = vsel %vm2863_vm8, %v12684_v5, 0.0  ;;  %v7998_v0 = vsel %vm3375_vm10, %v12684_v5, 0.0  ;;  %v1863_v26 = vmul.f32 %v1862_v36, %v7880_v13  ;;  %v8007_v43 = vsub.f32 %v7730_v3, %v7777_v30 }
 0x1fa   :  { %12685 = vst [vmem:[#allocation115_spill] sm:$0xff] %v7995_v31  ;;  %12686 = vst [vmem:[#allocation116_spill] sm:$0xff] %v7998_v0  ;;  %v3439_v56 = vsel %vm7978_vm1, %v7995_v31, %v7998_v0  ;;  %4903 = vrsqrt.f32 %v7940_v8  ;;  %v1949_v42 = vmul.f32 0.002785687, %v7992_v62  ;;  %v752_v32 = vmul.f32 %v7986_v39, %v7986_v39 }
 0x1fb   :  { %v3471_v24 = vadd.f32 %v3439_v56, %v7995_v31  ;;  %v1864_v49 = vadd.f32 -0.14207031, %v1863_v26  ;;  %v784_v44 = vmul.f32 %v8007_v43, %v8007_v43  ;;  %v8019_v57 = vand.u32 2147483647, %v8007_v43 }
 0x1fc   :  { %v1950_v45 = vadd.f32 -0.015866, %v1949_v42  ;;  %v4898_v20 = vpop.eup %4897  ;;  %v8022_v41 = vand.u32 2147483647, %v7986_v39  ;;  %vm946_vm2 = vcmp.eq.f32.partialorder %v7914_v35, inf  ;;  %vm1878_vm10 = vcmp.lt.s32.totalorder %v7637_v61, 0 }
 0x1fd   :  { %v3501_v1 = vadd.f32 %v3493_v52, %v3471_v24  ;;  %v1865_v22 = vmul.f32 %v1864_v49, %v7880_v13  ;;  %v8027_v52 = vadd.f32 %v784_v44, %v752_v32  ;;  %v2038_v24 = vmin.f32 %v7962_v18, %v7965_v28 }
 0x1fe   :  { %v1951_v3 = vmul.f32 %v1950_v45, %v7992_v62  ;;  %v2133_v40 = vmax.f32 %v8019_v57, %v8022_v41  ;;  %v949_v49 = vand.u32 2147483648, %v7914_v35  ;;  %v963_v32 = vand.u32 2147483648, %v7919_v19 }
 0x1ff   :  { %3509 = vst [vmem:[#allocation2 + $0x20] sm:$0xff] %v3501_v1  ;;  %v1866_v10 = vadd.f32 0.19993454, %v1865_v22  ;;  %v945_v1 = vmul.f32 %v4898_v20, %v7914_v35  ;;  %vm11975_vm8 = vcmp.lt.f32.partialorder %v7637_v61, 0.0  ;;  %vm12688_vm6 = vcmp.eq.f32.partialorder %v7919_v19, inf }
 0x200   :  { %v1952_v29 = vadd.f32 0.04247222, %v1951_v3  ;;  %4905 = vrcp.f32 %v2133_v40  ;;  %v4900_v56 = vpop.eup %4899  ;;  %vm12690_vm12 = vcmp.eq.f32.partialorder %v7914_v35, 0.0  ;;  %vm12694_vm1 = vcmp.gt.f32.partialorder %v7673_v6, %v7670_v34 }
 0x201   :  { %v1867_v36 = vmul.f32 %v1866_v10, %v7880_v13  ;;  %v959_v3 = vmul.f32 %v4900_v56, %v7919_v19  ;;  %4907 = vrsqrt.f32 %v8027_v52  ;;  %vm12701_vm3 = vcmp.eq.s32.totalorder %v7670_v34, inf }
 0x202   :  { %v1953_v26 = vmul.f32 %v1952_v29, %v7992_v62  ;;  %v8196_v16 = vmul.f32 2.0, %v8127_v63  ;;  %v12706_v4 = vrot.slane %v8160_v53, 2 }
 0x203   :  { %v1868_v42 = vadd.f32 -0.33333147, %v1867_v36 }
 0x204   :  { %v1954_v45 = vadd.f32 -0.074975304, %v1953_v26 }
 0x205   :  { %v1869_v22 = vmul.f32 %v1868_v42, %v7880_v13  ;;  %v4902_v44 = vpop.eup %4901  ;;  %v12687_v13 = vmov 0.0   ;;  %v947_v42 = vsel %vm946_vm2, %v7914_v35, %v945_v1  ;;  %vm12700_vm2 = vcmp.lt.f32.partialorder %v7637_v61, 0.0 }
 0x206   :  { %v1955_v29 = vmul.f32 %v1954_v45, %v7992_v62  ;;  %v8048_v36 = vmul.f32 %v4902_v44, %v2038_v24  ;;  %v1879_v26 = vsel %vm1878_vm10, 3.1415927, %v12687_v13  ;;  %v8078_v0 = vsel %vm12690_vm12, %v949_v49, %v947_v42 }
 0x207   :  { %v4904_v40 = vpop.eup %4903  ;;  %v1870_v20 = vmul.f32 %v1869_v22, %v7831_v12  ;;  %v961_v22 = vsel %vm12688_vm6, %v7919_v19, %v959_v3  ;;  %12691 = vst [vmem:[#allocation117_spill] sm:$0xff] %v8078_v0  ;;  %vm1972_vm6 = vcmp.lt.s32.totalorder %v7789_v21, 0  ;;  %vm1889_vm10 = vcmp.eq.s32.totalorder %v7673_v6, inf }
 0x208   :  { %v1956_v56 = vadd.f32 0.1064488, %v1955_v29  ;;  %v8062_v24 = vmul.f32 %v8048_v36, %v8048_v36  ;;  %v973_v44 = vmul.f32 %v4904_v40, %v7940_v8  ;;  %v12689_v29 = vmov 0.7853982   ;;  %vm1890_vm0 = vmand %vm12701_vm3, %vm1889_vm10 }
 0x209   :  { %v1871_v45 = vadd.f32 %v1870_v20, %v7831_v12  ;;  %v1887_v10 = vsel %vm11975_vm8, 2.3561945, %v12689_v29  ;;  %v2132_v40 = vmin.f32 %v8019_v57, %v8022_v41  ;;  %vm12692_vm8 = vcmp.eq.f32.partialorder %v7919_v19, 0.0 }
 0x20a   :  { %v1957_v1 = vmul.f32 %v1956_v56, %v7992_v62  ;;  %v2043_v20 = vmul.f32 0.002785687, %v8062_v24  ;;  %v8085_v56 = vsel %vm12692_vm8, %v963_v32, %v961_v22  ;;  %vm12695_vm12 = vcmp.eq.f32.partialorder %v7940_v8, inf }
 0x20b   :  { %v1873_v12 = vsub.f32 1.5707964, %v1871_v45  ;;  %12693 = vst [vmem:[#allocation118_spill] sm:$0xff] %v8085_v56  ;;  %v8094_v35 = vsel %vm12695_vm12, %v7940_v8, %v973_v44  ;;  %vm12696_vm8 = vcmp.ne.f32.partialorder %v7633_v48, %v7633_v48  ;;  %v1893_v32 = vand.u32 2147483648, %v7633_v48 }
 0x20c   :  { %v1958_v3 = vadd.f32 -0.14207031, %v1957_v1  ;;  %v2044_v51 = vadd.f32 -0.015866, %v2043_v20  ;;  %vm1969_vm12 = vcmp.lt.f32.partialorder %v7789_v21, 0.0  ;;  %vm12703_vm3 = vcmp.lt.s32.totalorder %v7849_v2, 0 }
 0x20d   :  { %v1874_v38 = vsel %vm12694_vm1, %v1873_v12, %v1871_v45  ;;  %v4906_v19 = vpop.eup %4905  ;;  %vm12697_vm1 = vcmp.ne.f32.partialorder %v7637_v61, %v7637_v61  ;;  %v8111_v45 = vsel %vm1972_vm6, 3.1415927, %v12687_v13  ;;  %v8121_v12 = vsel %vm1969_vm12, 2.3561945, %v12689_v29 }
 0x20e   :  { %v1876_v49 = vsub.f32 3.1415927, %v1874_v38  ;;  %v1959_v42 = vmul.f32 %v1958_v3, %v7992_v62  ;;  %vm8104_vm7 = vmor %vm12697_vm1, %vm12696_vm8  ;;  %v2045_v22 = vmul.f32 %v2044_v51, %v8062_v24  ;;  %v8123_v20 = vmul.f32 %v4906_v19, %v2132_v40  ;;  %v8125_v3 = vld [vmem:[#allocation3 + $0x150] sm:$0xff]  ;;  %v8150_v19 = vld [vmem:[#allocation3 + $0x168] sm:$0xff] }
 0x20f   :  { %vm12702_vm6 = vcmp.eq.f32.partialorder %v7633_v48, 0.0  ;;  %v8135_v34 = vsel %vm12703_vm3, 3.1415927, %v12687_v13  ;;  %vm2160_vm10 = vcmp.lt.s32.totalorder %v8007_v43, 0  ;;  %vm1977_vm8 = vcmp.ne.f32.partialorder %v7804_v7, %v7804_v7 }
 0x210   :  { %v1877_v44 = vsel %vm12700_vm2, %v1876_v49, %v1874_v38  ;;  %v1960_v1 = vadd.f32 0.19993454, %v1959_v42  ;;  %v2046_v61 = vadd.f32 0.04247222, %v2045_v22  ;;  %vm11994_vm2 = vcmp.lt.f32.partialorder %v7849_v2, 0.0 }
 0x211   :  { %v1881_v51 = vsel %vm12702_vm6, %v1879_v26, %v1877_v44  ;;  %v8143_v49 = vsel %vm11994_vm2, 2.3561945, %v12689_v29  ;;  %v8147_v48 = vmul.f32 %v8123_v20, %v8123_v20  ;;  %v202_v22 = vrot.slane %v8125_v3, 2  ;;  %v8154_v44 = vpop.eup %4907 }
 0x212   :  { %v1885_v38 = vsel %vm8104_vm7, nan, %v1881_v51  ;;  %v1961_v40 = vmul.f32 %v1960_v1, %v7992_v62  ;;  %v2047_v42 = vmul.f32 %v2046_v61, %v8062_v24  ;;  %vm1966_vm7 = vcmp.gt.f32.partialorder %v7842_v47, %v7834_v25 }
 0x213   :  { %v1891_v26 = vsel %vm1890_vm0, %v1887_v10, %v1885_v38  ;;  %v2137_v51 = vmul.f32 0.002785687, %v8147_v48  ;;  %vm1976_vm0 = vcmp.ne.f32.partialorder %v7789_v21, %v7789_v21  ;;  %vm1982_vm1 = vcmp.eq.s32.totalorder %v7834_v25, inf }
 0x214   :  { %v1962_v1 = vadd.f32 -0.33333147, %v1961_v40  ;;  %v1892_v10 = vand.u32 2147483647, %v1891_v26  ;;  %v2048_v38 = vadd.f32 -0.074975304, %v2047_v42 }
 0x215   :  { %vm1983_vm6 = vcmp.eq.s32.totalorder %v7842_v47, inf  ;;  %v2138_v31 = vadd.f32 -0.015866, %v2137_v51  ;;  %v207_v26 = vrot.slane %v8150_v19, 2  ;;  %vm1974_vm3 = vcmp.eq.f32.partialorder %v7804_v7, 0.0 }
 0x216   :  { %v1963_v6 = vmul.f32 %v1962_v1, %v7992_v62  ;;  %v2049_v61 = vmul.f32 %v2048_v38, %v8062_v24  ;;  %v8180_v42 = vsel %vm2160_vm10, 3.1415927, %v12687_v13  ;;  %v12704_v62 = vrot.slane %v8127_v63, 2 }
 0x217   :  { %vm12705_vm2 = vcmask 1045504   ;;  %v212_v51 = vrot.slane %v8171_v11, 2  ;;  %v2139_v37 = vmul.f32 %v2138_v31, %v8147_v48  ;;  %v336_v38 = vmul.f32 2.0, %v8125_v3 }
 0x218   :  { %v8185_v1 = vsel %vm12705_vm2, %v202_v22, %v12704_v62  ;;  %v1964_v40 = vmul.f32 %v1963_v6, %v7974_v33  ;;  %v1894_v9 = vor.u32 %v1893_v32, %v1892_v10  ;;  %v2050_v5 = vadd.f32 0.1064488, %v2049_v61  ;;  %vm12710_vm10 = vmmov %vm12705_vm2 }
 0x219   :  { %v2140_v31 = vadd.f32 0.04247222, %v2139_v37  ;;  %v8206_v58 = vsel %vm12705_vm2, %v207_v26, %v12706_v4  ;;  %v339_v32 = vmul.f32 2.0, %v8150_v19  ;;  %v8212_v10 = vmul.f32 2.0, %v8160_v53 }
 0x21a   :  { %v1965_v6 = vadd.f32 %v1964_v40, %v7974_v33  ;;  %v2051_v50 = vmul.f32 %v2050_v5, %v8062_v24  ;;  %v342_v61 = vmul.f32 2.0, %v8171_v11  ;;  %v473_v37 = vrot.slane %v336_v38, 1 }
 0x21b   :  { %v2141_v33 = vmul.f32 %v2140_v31, %v8147_v48  ;;  %v8217_v4 = vmul.f32 2.864789, %v1894_v9  ;;  %v8221_v26 = vsub.f32 %v8125_v3, %v8185_v1  ;;  %v8224_v5 = vmul.f32 2.0, %v8190_v60 }
 0x21c   :  { %v1967_v62 = vsub.f32 1.5707964, %v1965_v6  ;;  %v2052_v22 = vadd.f32 -0.14207031, %v2051_v50  ;;  %v345_v31 = vmul.f32 2.0, %v8192_v23  ;;  %v8231_v38 = vmul.f32 2.0, %v8198_v46 }
 0x21d   :  { %12707 = vst [vmem:[#allocation119_spill] sm:$0xff] %v8224_v5  ;;  %v2142_v17 = vadd.f32 -0.074975304, %v2141_v33  ;;  %v12709_v40 = vrot.slane %v8190_v60, 2  ;;  %v478_v30 = vrot.slane %v339_v32, 1  ;;  %vm12714_vm2 = vcmask 1046528  }
 0x21e   :  { %v1968_v15 = vsel %vm1966_vm7, %v1967_v62, %v1965_v6  ;;  %12708 = vst [vmem:[#allocation120_spill] sm:$0xff] %v8231_v38  ;;  %v2053_v9 = vmul.f32 %v2052_v22, %v8062_v24  ;;  %vm8245_vm7 = vmor %vm1976_vm0, %vm1977_vm8  ;;  %v12713_v22 = vrot.slane %v8196_v16, 1  ;;  %v8261_v27 = vfloor.f32 %v8217_v4  ;;  %v12715_v62 = vld [vmem:[#allocation81_spill] sm:$0xff] }
 0x21f   :  { %v1970_v50 = vsub.f32 3.1415927, %v1968_v15  ;;  %v8237_v55 = vsel %vm12710_vm10, %v212_v51, %v12709_v40  ;;  %v2143_v6 = vmul.f32 %v2142_v17, %v8147_v48  ;;  %v12020_v51 = vrot.slane %v8212_v10, 1  ;;  %vm1984_vm0 = vmand %vm1982_vm1, %vm1983_vm6 }
 0x220   :  { %v475_v33 = vsel %vm12714_vm2, %v473_v37, %v12713_v22  ;;  %v483_v40 = vrot.slane %v342_v61, 1  ;;  %v2054_v59 = vadd.f32 0.19993454, %v2053_v9  ;;  %v12019_v17 = vrot.slane %v8224_v5, 1  ;;  %vm12716_vm8 = vmmov %vm12714_vm2 }
 0x221   :  { %v1971_v32 = vsel %vm1969_vm12, %v1970_v50, %v1968_v15  ;;  %v2144_v22 = vadd.f32 0.1064488, %v2143_v6  ;;  %v488_v61 = vrot.slane %v345_v31, 1  ;;  %v288_v15 = vsub.f32 %v8150_v19, %v8206_v58  ;;  %vm12717_vm10 = vmmov %vm12714_vm2 }
 0x222   :  { %v1975_v37 = vsel %vm1974_vm3, %v8111_v45, %v1971_v32  ;;  %v2055_v25 = vmul.f32 %v2054_v59, %v8062_v24  ;;  %v8275_v50 = vsub.f32 %v8171_v11, %v8237_v55  ;;  %vm2060_vm12 = vcmp.gt.f32.partialorder %v7965_v28, %v7962_v18 }
 0x223   :  { %v1979_v47 = vsel %vm8245_vm7, nan, %v1975_v37  ;;  %v2145_v45 = vmul.f32 %v2144_v22, %v8147_v48  ;;  %v557_v31 = vadd.f32 %v475_v33, %v8125_v3  ;;  %v625_v6 = vmul.f32 2.0, %v12715_v62  ;;  %vm12719_vm7 = vmmov %vm12714_vm2 }
 0x224   :  { %v1985_v9 = vsel %vm1984_vm0, %v8121_v12, %v1979_v47  ;;  %v2056_v59 = vadd.f32 -0.33333147, %v2055_v25  ;;  %v2698_v37 = vadd.f32 9.0, %v8261_v27  ;;  %v480_v21 = vsel %vm12716_vm8, %v478_v30, %v12020_v51 }
 0x225   :  { %v1986_v32 = vand.u32 2147483647, %v1985_v9  ;;  %vm2070_vm1 = vcmp.ne.f32.partialorder %v7849_v2, %v7849_v2  ;;  %vm2071_vm6 = vcmp.ne.f32.partialorder %v7821_v14, %v7821_v14  ;;  %v2146_v12 = vadd.f32 -0.14207031, %v2145_v45 }
 0x226   :  { %vm2666_vm3 = vcmp.lt.f32.partialorder %v8261_v27, 0.0  ;;  %v485_v3 = vsel %vm12717_vm10, %v483_v40, %v12019_v17  ;;  %v12718_v33 = vrot.slane %v8231_v38, 1  ;;  %v12720_v47 = vand.u32 2147483648, %v7804_v7  ;;  %vm8368_vm8 = vmor %vm2070_vm1, %vm2071_vm6 }
 0x227   :  { %v2057_v25 = vmul.f32 %v2056_v59, %v8062_v24  ;;  %v627_v9 = vmul.f32 2.0, %v8221_v26  ;;  %v629_v45 = vmul.f32 2.0, %v288_v15  ;;  %v2147_v40 = vmul.f32 %v2146_v12, %v8147_v48  ;;  %v12724_v24 = vld [vmem:[#allocation80_spill] sm:$0xff] }
 0x228   :  { %v490_v22 = vsel %vm12719_vm7, %v488_v61, %v12718_v33  ;;  %v1988_v30 = vor.u32 %v12720_v47, %v1986_v32  ;;  %v12721_v17 = vrot.slane %v8198_v46, 2  ;;  %v12722_v61 = vrot.slane %v8192_v23, 2 }
 0x229   :  { %vm12723_vm10 = vcmask 1045504   ;;  %v593_v32 = vadd.f32 %v557_v31, %v8185_v1  ;;  %v657_v59 = vadd.f32 %v625_v6, %v12724_v24  ;;  %v2058_v33 = vmul.f32 %v2057_v25, %v8048_v36 }
 0x22a   :  { %v219_v7 = vsel %vm12723_vm10, %v12722_v61, %v12721_v17  ;;  %v8314_v47 = vmul.f32 2.864789, %v1988_v30  ;;  %v2730_v51 = vsel %vm2666_vm3, %v2698_v37, %v8261_v27  ;;  %v559_v12 = vadd.f32 %v480_v21, %v8150_v19 }
 0x22b   :  { %v2148_v38 = vadd.f32 0.19993454, %v2147_v40  ;;  %v561_v5 = vadd.f32 %v485_v3, %v8171_v11  ;;  %v563_v54 = vadd.f32 %v490_v22, %v8192_v23  ;;  %v631_v17 = vmul.f32 2.0, %v8275_v50  ;;  %v12725_v11 = vld [vmem:[#allocation82_spill] sm:$0xff] }
 0x22c   :  { %v2059_v1 = vadd.f32 %v2058_v33, %v8048_v36  ;;  %v8325_v31 = vfloor.f32 %v8314_v47  ;;  %v659_v6 = vadd.f32 %v627_v9, %v12715_v62  ;;  %v661_v30 = vadd.f32 %v629_v45, %v8221_v26 }
 0x22d   :  { %v2149_v37 = vmul.f32 %v2148_v38, %v8147_v48  ;;  %v4790_v25 = vadd.f32 -9.0, %v2730_v51  ;;  %v8331_v19 = vadd.f32 %v657_v59, %v8221_v26  ;;  %v8334_v21 = vsub.f32 %v12725_v11, %v593_v32 }
 0x22e   :  { %v2061_v3 = vsub.f32 1.5707964, %v2059_v1  ;;  %vm2668_vm7 = vcmp.lt.f32.partialorder %v8325_v31, 0.0  ;;  %v2700_v36 = vadd.f32 9.0, %v8325_v31  ;;  %vm2762_vm10 = vcmp.ge.f32.partialorder %v2730_v51, 9.0 }
 0x22f   :  { %v2150_v62 = vadd.f32 -0.33333147, %v2149_v37  ;;  %v292_v22 = vsub.f32 %v8192_v23, %v219_v7  ;;  %v595_v38 = vadd.f32 %v559_v12, %v8206_v58  ;;  %v663_v9 = vadd.f32 %v631_v17, %v288_v15 }
 0x230   :  { %v2062_v26 = vsel %vm2060_vm12, %v2061_v3, %v2059_v1  ;;  %v597_v45 = vadd.f32 %v561_v5, %v8237_v55  ;;  %v599_v40 = vadd.f32 %v563_v54, %v219_v7  ;;  %v8350_v61 = vadd.f32 %v659_v6, %v288_v15 }
 0x231   :  { %v2064_v24 = vsub.f32 3.1415927, %v2062_v26  ;;  %v2151_v23 = vmul.f32 %v2150_v62, %v8147_v48  ;;  %vm2157_vm2 = vcmp.lt.f32.partialorder %v8007_v43, 0.0  ;;  %v2732_v58 = vsel %vm2668_vm7, %v2700_v36, %v8325_v31 }
 0x232   :  { %v8360_v59 = vsel %vm2762_vm10, %v4790_v25, %v2730_v51  ;;  %vm8375_vm12 = vcmp.eq.f32.partialorder %v8217_v4, %v8261_v27  ;;  %v12729_v55 = vmov 0  ;;  %v8380_v48 = vadd.f32 %v661_v30, %v8275_v50  ;;  %v12735_v50 = vld [vmem:[#allocation83_spill] sm:$0xff] }
 0x233   :  { %12726 = vst [vmem:[#allocation81_spill] sm:$0xff] %v8360_v59  ;;  %v12730_v55 = vsel %vm8375_vm12, 4294967295, %v12729_v55  ;;  %v8383_v5 = vand.u32 2147483647, %v8334_v21  ;;  %v8386_v51 = vand.u32 2147483647, %v8331_v19  ;;  %v2152_v27 = vmul.f32 %v2151_v23, %v8123_v20 }
 0x234   :  { %12731 = vst [vmem:[#allocation80_spill] sm:$0xff] %v12730_v55  ;;  %vm12732_vm1 = vcmp.lt.f32.partialorder %v7849_v2, 0.0  ;;  %vm12733_vm6 = vcmp.eq.s32.totalorder %v7965_v28, inf  ;;  %vm12734_vm7 = vcmp.eq.s32.totalorder %v7962_v18, inf  ;;  %v8395_v4 = vadd.f32 %v663_v9, %v292_v22 }
 0x235   :  { %v2065_v15 = vsel %vm12732_vm1, %v2064_v24, %v2062_v26  ;;  %vm2078_vm10 = vmand %vm12734_vm7, %vm12733_vm6  ;;  %v8398_v7 = vsub.f32 %v12735_v50, %v595_v38  ;;  %vm12736_vm0 = vcmp.eq.f32.partialorder %v7821_v14, 0.0  ;;  %v4792_v12 = vadd.f32 -9.0, %v2732_v58 }
 0x236   :  { %v2069_v33 = vsel %vm12736_vm0, %v8135_v34, %v2065_v15  ;;  %vm2858_vm3 = vcmp.eq.f32.partialorder %v8360_v59, 0.0  ;;  %v8404_v2 = vsub.f32 %v593_v32, %v597_v45  ;;  %v2153_v28 = vadd.f32 %v2152_v27, %v8123_v20 }
 0x237   :  { %v2073_v18 = vsel %vm8368_vm8, nan, %v2069_v33  ;;  %vm2764_vm1 = vcmp.ge.f32.partialorder %v2732_v58, 9.0  ;;  %vm3370_vm6 = vcmp.eq.f32.partialorder %v8360_v59, 8.0  ;;  %v753_v1 = vmul.f32 %v8331_v19, %v8331_v19 }
 0x238   :  { %v2079_v17 = vsel %vm2078_vm10, %v8143_v49, %v2073_v18  ;;  %v755_v34 = vmul.f32 %v8350_v61, %v8350_v61  ;;  %v2180_v32 = vmax.f32 %v8383_v5, %v8386_v51  ;;  %v2155_v30 = vsub.f32 1.5707964, %v2153_v28 }
 0x239   :  { %v2080_v6 = vand.u32 2147483647, %v2079_v17  ;;  %v8418_v37 = vsel %vm2858_vm3, %v8078_v0, 0.0  ;;  %v757_v20 = vmul.f32 %v8380_v48, %v8380_v48  ;;  %v8423_v49 = vsel %vm2764_vm1, %v4792_v12, %v2732_v58 }
 0x23a   :  { %12737 = vst [vmem:[#allocation82_spill] sm:$0xff] %v8418_v37  ;;  %12738 = vst [vmem:[#allocation83_spill] sm:$0xff] %v8423_v49  ;;  %v8426_v25 = vsel %vm3370_vm6, %v8078_v0, 0.0  ;;  %v785_v11 = vmul.f32 %v8334_v21, %v8334_v21  ;;  %4909 = vrcp.f32 %v2180_v32  ;;  %v12740_v3 = vand.u32 2147483648, %v7821_v14 }
 0x23b   :  { %12739 = vst [vmem:[#allocation121_spill] sm:$0xff] %v8426_v25  ;;  %vm12741_vm8 = vcmp.gt.f32.partialorder %v8022_v41, %v8019_v57  ;;  %v787_v22 = vmul.f32 %v8398_v7, %v8398_v7  ;;  %v789_v9 = vmul.f32 %v8404_v2, %v8404_v2  ;;  %v2169_v45 = vsel %vm2157_vm2, 2.3561945, %v12689_v29 }
 0x23c   :  { %v2082_v36 = vor.u32 %v12740_v3, %v2080_v6  ;;  %v2156_v62 = vsel %vm12741_vm8, %v2155_v30, %v2153_v28  ;;  %v2175_v24 = vand.u32 2147483648, %v7986_v39  ;;  %v8443_v23 = vsub.f32 %v595_v38, %v599_v40 }
 0x23d   :  { %v2158_v26 = vsub.f32 3.1415927, %v2156_v62  ;;  %vm12742_vm3 = vcmp.ne.f32.partialorder %v7986_v39, %v7986_v39  ;;  %vm12743_vm7 = vcmp.ne.f32.partialorder %v8007_v43, %v8007_v43  ;;  %vm2860_vm1 = vcmp.eq.f32.partialorder %v8423_v49, 0.0 }
 0x23e   :  { %vm8451_vm10 = vmor %vm12743_vm7, %vm12742_vm3  ;;  %v2574_v58 = vmul.f32 2.864789, %v2082_v36  ;;  %vm3372_vm6 = vcmp.eq.f32.partialorder %v8423_v49, 8.0  ;;  %v759_v54 = vmul.f32 %v8395_v4, %v8395_v4  ;;  %vm12746_vm8 = vcmp.eq.s32.totalorder %v8022_v41, inf }
 0x23f   :  { %v2159_v38 = vsel %vm2157_vm2, %v2158_v26, %v2156_v62  ;;  %vm12747_vm0 = vcmp.eq.s32.totalorder %v8019_v57, inf  ;;  %v3434_v40 = vsel %vm8375_vm12, %v8418_v37, %v8426_v25  ;;  %v791_v15 = vmul.f32 %v8443_v23, %v8443_v23 }
 0x240   :  { %vm2172_vm15 = vmand %vm12747_vm0, %vm12746_vm8  ;;  %v8471_v27 = vadd.f32 %v785_v11, %v753_v1  ;;  %vm12748_vm3 = vcmp.eq.f32.partialorder %v7986_v39, 0.0  ;;  %v2606_v50 = vfloor.f32 %v2574_v58  ;;  %v8476_v33 = vadd.f32 %v787_v22, %v755_v34 }
 0x241   :  { %v2163_v43 = vsel %vm12748_vm3, %v8180_v42, %v2159_v38  ;;  %v8478_v41 = vadd.f32 %v789_v9, %v757_v20  ;;  %vm988_vm2 = vcmp.eq.f32.partialorder %v8027_v52, inf  ;;  %vm8485_vm0 = vcmp.eq.f32.partialorder %v8314_v47, %v8325_v31 }
 0x242   :  { %v2167_v57 = vsel %vm8451_vm10, nan, %v2163_v43  ;;  %v12749_v12 = vmov 0  ;;  %v8490_v18 = vsel %vm2860_vm1, %v8085_v56, 0.0  ;;  %v8493_v39 = vsel %vm3372_vm6, %v8085_v56, 0.0 }
 0x243   :  { %v12750_v12 = vsel %vm8485_vm0, 4294967295, %v12749_v12  ;;  %12752 = vst [vmem:[#allocation123_spill] sm:$0xff] %v8490_v18  ;;  %12753 = vst [vmem:[#allocation124_spill] sm:$0xff] %v8493_v39  ;;  %v2173_v42 = vsel %vm2172_vm15, %v2169_v45, %v2167_v57  ;;  %vm2670_vm7 = vcmp.lt.f32.partialorder %v2606_v50, 0.0  ;;  %v2702_v28 = vadd.f32 9.0, %v2606_v50 }
 0x244   :  { %12751 = vst [vmem:[#allocation122_spill] sm:$0xff] %v12750_v12  ;;  %v8496_v17 = vand.u32 2147483647, %v8398_v7  ;;  %v2174_v1 = vand.u32 2147483647, %v2173_v42  ;;  %v8498_v34 = vadd.f32 %v791_v15, %v759_v54  ;;  %4911 = vrsqrt.f32 %v8471_v27 }
 0x245   :  { %v8502_v47 = vand.u32 2147483647, %v8350_v61  ;;  %v987_v31 = vmul.f32 %v8154_v44, %v8027_v52  ;;  %v2734_v32 = vsel %vm2670_vm7, %v2702_v28, %v2606_v50  ;;  %v3436_v6 = vsel %vm8485_vm0, %v8490_v18, %v8493_v39 }
 0x246   :  { %4913 = vrsqrt.f32 %v8476_v33  ;;  %v2176_v30 = vor.u32 %v2175_v24, %v2174_v1  ;;  %vm2766_vm15 = vcmp.ge.f32.partialorder %v2734_v32, 9.0  ;;  %v4794_v20 = vadd.f32 -9.0, %v2734_v32 }
 0x247   :  { %v2179_v11 = vmin.f32 %v8383_v5, %v8386_v51  ;;  %v12754_v3 = vand.u32 2147483648, %v7940_v8  ;;  %vm12755_vm10 = vcmp.eq.f32.partialorder %v7940_v8, 0.0  ;;  %v3466_v36 = vadd.f32 %v3434_v40, %v8418_v37  ;;  %v4910_v45 = vpop.eup %4909 }
 0x248   :  { %4915 = vrsqrt.f32 %v8478_v41  ;;  %v2274_v62 = vmax.f32 %v8496_v17, %v8502_v47  ;;  %v2576_v22 = vmul.f32 2.864789, %v2176_v30  ;;  %v8524_v9 = vsel %vm2766_vm15, %v4794_v20, %v2734_v32 }
 0x249   :  { %v8518_v44 = vsel %vm12755_vm10, %v12754_v3, %v8094_v35  ;;  %12757 = vst [vmem:[#allocation126_spill] sm:$0xff] %v8524_v9  ;;  %v3468_v26 = vadd.f32 %v3436_v6, %v8490_v18  ;;  %4917 = vrsqrt.f32 %v8498_v34  ;;  %vm8528_vm1 = vcmp.eq.f32.partialorder %v2574_v58, %v2606_v50 }
 0x24a   :  { %12756 = vst [vmem:[#allocation125_spill] sm:$0xff] %v8518_v44  ;;  %v12758_v24 = vmov 0  ;;  %vm2862_vm6 = vcmp.eq.f32.partialorder %v8524_v9, 0.0  ;;  %vm3374_vm8 = vcmp.eq.f32.partialorder %v8524_v9, 8.0  ;;  %4919 = vrcp.f32 %v2274_v62 }
 0x24b   :  { %v12759_v24 = vsel %vm8528_vm1, 4294967295, %v12758_v24  ;;  %v2608_v8 = vfloor.f32 %v2576_v22  ;;  %v8535_v35 = vsel %vm2862_vm6, %v8518_v44, 0.0  ;;  %v8538_v14 = vsel %vm3374_vm8, %v8518_v44, 0.0 }
 0x24c   :  { %12760 = vst [vmem:[#allocation127_spill] sm:$0xff] %v12759_v24  ;;  %12761 = vst [vmem:[#allocation128_spill] sm:$0xff] %v8535_v35  ;;  %v8540_v54 = vmul.f32 %v4910_v45, %v2179_v11  ;;  %v991_v38 = vand.u32 2147483648, %v8027_v52  ;;  %v3438_v40 = vsel %vm8528_vm1, %v8535_v35, %v8538_v14  ;;  %v8548_v15 = vand.u32 2147483647, %v8404_v2 }
 0x24d   :  { %12762 = vst [vmem:[#allocation129_spill] sm:$0xff] %v8538_v14  ;;  %vm2672_vm3 = vcmp.lt.f32.partialorder %v2608_v8, 0.0  ;;  %v2704_v58 = vadd.f32 9.0, %v2608_v8  ;;  %v989_v43 = vsel %vm988_vm2, %v8027_v52, %v987_v31  ;;  %vm990_vm7 = vcmp.eq.f32.partialorder %v8027_v52, 0.0 }
 0x24e   :  { %v8556_v50 = vmul.f32 %v8540_v54, %v8540_v54  ;;  %v8559_v57 = vand.u32 2147483647, %v8380_v48  ;;  %v3486_v28 = vadd.f32 %v3468_v26, %v3466_v36  ;;  %v3470_v32 = vadd.f32 %v3438_v40, %v8535_v35  ;;  %v67_v35 = vld [vmem:[#allocation3 + $0x160] sm:$0x3] }
 0x24f   :  { %v2736_v42 = vsel %vm2672_vm3, %v2704_v58, %v2608_v8  ;;  %v8563_v30 = vsel %vm990_vm7, %v991_v38, %v989_v43  ;;  %vm995_vm2 = vcmp.eq.f32.partialorder %v8471_v27, inf  ;;  %v998_v52 = vand.u32 2147483648, %v8471_v27 }
 0x250   :  { %vm2768_vm15 = vcmp.ge.f32.partialorder %v2736_v42, 9.0  ;;  %v4796_v1 = vadd.f32 -9.0, %v2736_v42  ;;  %v2184_v6 = vmul.f32 0.002785687, %v8556_v50  ;;  %12763 = vst [vmem:[#allocation130_spill] sm:$0xff] %v8563_v30  ;;  %v2368_v31 = vmax.f32 %v8548_v15, %v8559_v57 }
 0x251   :  { %v4912_v20 = vpop.eup %4911  ;;  %vm8569_vm10 = vcmp.eq.f32.partialorder %v2576_v22, %v2608_v8  ;;  %v12764_v11 = vmov 0  ;;  %vm1009_vm6 = vcmp.eq.f32.partialorder %v8476_v33, inf  ;;  %v2273_v26 = vmin.f32 %v8496_v17, %v8502_v47 }
 0x252   :  { %v12765_v11 = vsel %vm8569_vm10, 4294967295, %v12764_v11  ;;  %v8573_v3 = vsel %vm2768_vm15, %v4796_v1, %v2736_v42  ;;  %v2185_v36 = vadd.f32 -0.015866, %v2184_v6  ;;  %4921 = vrcp.f32 %v2368_v31 }
 0x253   :  { %12766 = vst [vmem:[#allocation131_spill] sm:$0xff] %v12765_v11  ;;  %12767 = vst [vmem:[#allocation132_spill] sm:$0xff] %v8573_v3  ;;  %v4914_v62 = vpop.eup %4913  ;;  %vm2864_vm8 = vcmp.eq.f32.partialorder %v8573_v3, 0.0  ;;  %vm3376_vm3 = vcmp.eq.f32.partialorder %v8573_v3, 8.0  ;;  %v3494_v8 = vadd.f32 %v3486_v28, %v3470_v32  ;;  %v8594_v43 = vand.u32 2147483647, %v8443_v23 }
 0x254   :  { %v8582_v22 = vsel %vm2864_vm8, %v8563_v30, 0.0  ;;  %v8585_v45 = vsel %vm3376_vm3, %v8563_v30, 0.0  ;;  %v2186_v38 = vmul.f32 %v2185_v36, %v8556_v50  ;;  %v8597_v42 = vand.u32 2147483647, %v8395_v4 }
 0x255   :  { %12768 = vst [vmem:[#allocation133_spill] sm:$0xff] %v8582_v22  ;;  %12769 = vst [vmem:[#allocation134_spill] sm:$0xff] %v8585_v45  ;;  %v4916_v58 = vpop.eup %4915  ;;  %v3440_v40 = vsel %vm8569_vm10, %v8582_v22, %v8585_v45  ;;  %v1012_v28 = vand.u32 2147483648, %v8476_v33  ;;  %v994_v36 = vmul.f32 %v4912_v20, %v8471_v27  ;;  %v1008_v45 = vmul.f32 %v4914_v62, %v8476_v33 }
 0x256   :  { %v4918_v1 = vpop.eup %4917  ;;  %v3472_v6 = vadd.f32 %v3440_v40, %v8582_v22  ;;  %v2187_v32 = vadd.f32 0.04247222, %v2186_v38  ;;  %vm2207_vm3 = vcmp.lt.s32.totalorder %v8334_v21, 0  ;;  %v2462_v14 = vmax.f32 %v8594_v43, %v8597_v42 }
 0x257   :  { %v4920_v31 = vpop.eup %4919  ;;  %v1022_v25 = vmul.f32 %v4916_v58, %v8478_v41  ;;  %v1026_v38 = vand.u32 2147483648, %v8478_v41  ;;  %v1036_v20 = vmul.f32 %v4918_v1, %v8498_v34  ;;  %vm1037_vm7 = vcmp.eq.f32.partialorder %v8498_v34, inf }
 0x258   :  { %v3502_v39 = vadd.f32 %v3494_v8, %v3472_v6  ;;  %v2188_v40 = vmul.f32 %v2187_v32, %v8556_v50  ;;  %v8609_v11 = vmul.f32 %v4920_v31, %v2273_v26  ;;  %4923 = vrcp.f32 %v2462_v14 }
 0x259   :  { %v996_v26 = vsel %vm995_vm2, %v8471_v27, %v994_v36  ;;  %v1040_v58 = vand.u32 2147483648, %v8498_v34  ;;  %vm12040_vm15 = vcmp.lt.f32.partialorder %v8334_v21, 0.0  ;;  %v1010_v14 = vsel %vm1009_vm6, %v8476_v33, %v1008_v45 }
 0x25a   :  { %3510 = vst [vmem:[#allocation2 + $0x28] sm:$0xff] %v3502_v39  ;;  %v2189_v62 = vadd.f32 -0.074975304, %v2188_v40  ;;  %v8618_v8 = vmul.f32 %v8609_v11, %v8609_v11  ;;  %v8628_v39 = vsel %vm2207_vm3, 3.1415927, %v12687_v13  ;;  %vm12770_vm8 = vcmp.eq.f32.partialorder %v8478_v41, inf }
 0x25b   :  { %v1024_v1 = vsel %vm12770_vm8, %v8478_v41, %v1022_v25  ;;  %v1038_v31 = vsel %vm1037_vm7, %v8498_v34, %v1036_v20  ;;  %v8642_v36 = vsel %vm12040_vm15, 2.3561945, %v12689_v29  ;;  %vm2301_vm2 = vcmp.lt.s32.totalorder %v8398_v7, 0 }
 0x25c   :  { %v2190_v6 = vmul.f32 %v2189_v62, %v8556_v50  ;;  %v2278_v32 = vmul.f32 0.002785687, %v8618_v8  ;;  %v2367_v45 = vmin.f32 %v8548_v15, %v8559_v57  ;;  %vm12771_vm6 = vcmp.eq.f32.partialorder %v8471_v27, 0.0 }
 0x25d   :  { %v8649_v40 = vsel %vm12771_vm6, %v998_v52, %v996_v26  ;;  %vm2395_vm8 = vcmp.lt.s32.totalorder %v8404_v2, 0  ;;  %vm12773_vm7 = vcmp.eq.f32.partialorder %v8476_v33, 0.0  ;;  %vm12775_vm3 = vcmp.eq.f32.partialorder %v8478_v41, 0.0  ;;  %v70_v41 = vld [vmem:[#allocation3 + $0x178] sm:$0x3] }
 0x25e   :  { %12772 = vst [vmem:[#allocation135_spill] sm:$0xff] %v8649_v40  ;;  %v2191_v25 = vadd.f32 0.1064488, %v2190_v6  ;;  %v2279_v62 = vadd.f32 -0.015866, %v2278_v32  ;;  %v8654_v20 = vsel %vm12773_vm7, %v1012_v28, %v1010_v14  ;;  %v8658_v22 = vsel %vm12775_vm3, %v1026_v38, %v1024_v1 }
 0x25f   :  { %12774 = vst [vmem:[#allocation136_spill] sm:$0xff] %v8654_v20  ;;  %12776 = vst [vmem:[#allocation137_spill] sm:$0xff] %v8658_v22  ;;  %vm12066_vm15 = vcmp.lt.f32.partialorder %v8398_v7, 0.0  ;;  %v4922_v27 = vpop.eup %4921  ;;  %vm12777_vm6 = vcmp.eq.f32.partialorder %v8498_v34, 0.0  ;;  %v8669_v28 = vsel %vm2301_vm2, 3.1415927, %v12687_v13  ;;  %vm2201_vm3 = vcmp.gt.f32.partialorder %v8386_v51, %v8383_v5 }
 0x260   :  { %v8664_v52 = vsel %vm12777_vm6, %v1040_v58, %v1038_v31  ;;  %v2192_v26 = vmul.f32 %v2191_v25, %v8556_v50  ;;  %v2280_v33 = vmul.f32 %v2279_v62, %v8618_v8  ;;  %v73_v38 = vld [vmem:[#allocation3 + $0x190] sm:$0x3]  ;;  %v8674_v14 = vsel %vm12066_vm15, 2.3561945, %v12689_v29 }
 0x261   :  { %12778 = vst [vmem:[#allocation138_spill] sm:$0xff] %v8664_v52  ;;  %v8677_v6 = vmul.f32 %v4922_v27, %v2367_v45  ;;  %v8682_v34 = vsel %vm2395_vm8, 3.1415927, %v12687_v13  ;;  %vm12065_vm2 = vcmp.lt.f32.partialorder %v8404_v2, 0.0  ;;  %v338_v31 = vmul.f32 2.0, %v67_v35 }
 0x262   :  { %v2193_v58 = vadd.f32 -0.14207031, %v2192_v26  ;;  %v2281_v32 = vadd.f32 0.04247222, %v2280_v33  ;;  %v2461_v62 = vmin.f32 %v8594_v43, %v8597_v42  ;;  %v205_v1 = vrot.slane %v67_v35, 2 }
 0x263   :  { %v8687_v25 = vmul.f32 %v8677_v6, %v8677_v6  ;;  %v341_v45 = vmul.f32 2.0, %v70_v41  ;;  %v8696_v26 = vsel %vm12065_vm2, 2.3561945, %v12689_v29  ;;  %v76_v33 = vld [vmem:[#allocation3 + $0x1a8] sm:$0x3]  ;;  %v210_v12 = vrot.slane %v70_v41, 2 }
 0x264   :  { %v2194_v27 = vmul.f32 %v2193_v58, %v8556_v50  ;;  %v2282_v24 = vmul.f32 %v2281_v32, %v8618_v8  ;;  %12779 = vst [vmem:[#allocation139_spill] sm:$0xff] %v8696_v26  ;;  %v215_v37 = vrot.slane %v73_v38, 2  ;;  %v344_v30 = vmul.f32 2.0, %v73_v38 }
 0x265   :  { %v2372_v18 = vmul.f32 0.002785687, %v8687_v25  ;;  %v4924_v44 = vpop.eup %4923  ;;  %v220_v0 = vrot.slane %v76_v33, 2  ;;  %v476_v58 = vrot.slane %v338_v31, 1  ;;  %v12780_v9 = vrot.slane %v8127_v63, 2 }
 0x266   :  { %v2195_v35 = vadd.f32 0.19993454, %v2194_v27  ;;  %v2283_v56 = vadd.f32 -0.074975304, %v2282_v24  ;;  %v8700_v32 = vmul.f32 %v4924_v44, %v2461_v62  ;;  %vm12781_vm8 = vcmask 1045504  }
 0x267   :  { %v2373_v3 = vadd.f32 -0.015866, %v2372_v18  ;;  %v206_v49 = vsel %vm12781_vm8, %v12780_v9, %v205_v1  ;;  %v481_v59 = vrot.slane %v341_v45, 1  ;;  %v12782_v55 = vrot.slane %v8160_v53, 2  ;;  %vm12783_vm7 = vmmov %vm12781_vm8 }
 0x268   :  { %v2196_v41 = vmul.f32 %v2195_v35, %v8556_v50  ;;  %v2284_v52 = vmul.f32 %v2283_v56, %v8618_v8  ;;  %v347_v27 = vmul.f32 2.0, %v76_v33  ;;  %v8715_v44 = vmul.f32 %v8700_v32, %v8700_v32  ;;  %vm12785_vm6 = vmmov %vm12783_vm7 }
 0x269   :  { %v211_v38 = vsel %vm12783_vm7, %v12782_v55, %v210_v12  ;;  %v2374_v18 = vmul.f32 %v2373_v3, %v8687_v25  ;;  %v12784_v9 = vrot.slane %v8190_v60, 2  ;;  %v486_v56 = vrot.slane %v344_v30, 1 }
 0x26a   :  { %v2197_v1 = vadd.f32 -0.33333147, %v2196_v41  ;;  %v2285_v31 = vadd.f32 0.1064488, %v2284_v52  ;;  %v8723_v55 = vsub.f32 %v8127_v63, %v206_v49  ;;  %v12786_v12 = vrot.slane %v8196_v16, 1  ;;  %v12791_v41 = vld [vmem:[#allocation41_spill] sm:$0xff] }
 0x26b   :  { %v8720_v24 = vsel %vm12785_vm6, %v12784_v9, %v215_v37  ;;  %vm12787_vm8 = vcmask 1046528   ;;  %v2375_v3 = vadd.f32 0.04247222, %v2374_v18  ;;  %v2466_v37 = vmul.f32 0.002785687, %v8715_v44 }
 0x26c   :  { %v477_v62 = vsel %vm12787_vm8, %v12786_v12, %v476_v58  ;;  %v12788_v30 = vrot.slane %v8198_v46, 2  ;;  %v12789_v45 = vrot.slane %v8212_v10, 1  ;;  %vm12790_vm15 = vmmov %vm12787_vm8  ;;  %v2198_v33 = vmul.f32 %v2197_v1, %v8556_v50  ;;  %v12792_v12 = vld [vmem:[#allocation119_spill] sm:$0xff] }
 0x26d   :  { %vm2217_vm8 = vcmp.eq.s32.totalorder %v8383_v5, inf  ;;  %vm2218_vm7 = vcmp.eq.s32.totalorder %v8386_v51, inf  ;;  %v2286_v35 = vmul.f32 %v2285_v31, %v8618_v8  ;;  %v491_v58 = vrot.slane %v347_v27, 1 }
 0x26e   :  { %v8736_v52 = vsel %vm12785_vm6, %v12788_v30, %v220_v0  ;;  %v482_v16 = vsel %vm12790_vm15, %v12789_v45, %v481_v59  ;;  %v626_v18 = vmul.f32 2.0, %v12791_v41  ;;  %v2376_v0 = vmul.f32 %v2375_v3, %v8687_v25  ;;  %vm12794_vm6 = vmmov %vm12790_vm15 }
 0x26f   :  { %v2467_v9 = vadd.f32 -0.015866, %v2466_v37  ;;  %v12793_v10 = vrot.slane %v12792_v12, 1  ;;  %v558_v50 = vadd.f32 %v477_v62, %v8127_v63  ;;  %v2199_v1 = vmul.f32 %v2198_v33, %v8540_v54  ;;  %v12795_v62 = vld [vmem:[#allocation120_spill] sm:$0xff]  ;;  %vm12797_vm15 = vmmov %vm12794_vm6 }
 0x270   :  { %v2287_v30 = vadd.f32 -0.14207031, %v2286_v35  ;;  %v560_v45 = vadd.f32 %v482_v16, %v8160_v53  ;;  %v628_v27 = vmul.f32 2.0, %v8723_v55  ;;  %v2377_v31 = vadd.f32 -0.074975304, %v2376_v0  ;;  %v12798_v16 = vld [vmem:[#allocation77_spill] sm:$0xff] }
 0x271   :  { %v487_v59 = vsel %vm12794_vm6, %v12793_v10, %v486_v56  ;;  %v2468_v22 = vmul.f32 %v2467_v9, %v8715_v44  ;;  %v289_v20 = vsub.f32 %v8160_v53, %v211_v38  ;;  %v8759_v3 = vsub.f32 %v8190_v60, %v8720_v24 }
 0x272   :  { %v2200_v56 = vadd.f32 %v2199_v1, %v8540_v54  ;;  %v2288_v63 = vmul.f32 %v2287_v30, %v8618_v8  ;;  %v12796_v37 = vrot.slane %v12795_v62, 1  ;;  %v658_v35 = vadd.f32 %v626_v18, %v12798_v16 }
 0x273   :  { %v2378_v0 = vmul.f32 %v2377_v31, %v8687_v25  ;;  %v2469_v12 = vadd.f32 0.04247222, %v2468_v22  ;;  %v562_v9 = vadd.f32 %v487_v59, %v8190_v60  ;;  %v8769_v53 = vadd.f32 %v558_v50, %v206_v49  ;;  %v12799_v50 = vld [vmem:[#allocation42_spill] sm:$0xff] }
 0x274   :  { %v492_v33 = vsel %vm12797_vm15, %v12796_v37, %v491_v58  ;;  %v2202_v10 = vsub.f32 1.5707964, %v2200_v56  ;;  %v2289_v40 = vadd.f32 0.19993454, %v2288_v63  ;;  %v8771_v26 = vadd.f32 %v560_v45, %v211_v38 }
 0x275   :  { %v660_v54 = vadd.f32 %v628_v27, %v12791_v41  ;;  %v2379_v1 = vadd.f32 0.1064488, %v2378_v0  ;;  %v2470_v30 = vmul.f32 %v2469_v12, %v8715_v44  ;;  %v564_v58 = vadd.f32 %v492_v33, %v8198_v46 }
 0x276   :  { %v630_v62 = vmul.f32 2.0, %v289_v20  ;;  %v2203_v22 = vsel %vm2201_vm3, %v2202_v10, %v2200_v56  ;;  %v2290_v60 = vmul.f32 %v2289_v40, %v8618_v8  ;;  %v632_v49 = vmul.f32 2.0, %v8759_v3  ;;  %v12804_v56 = vld [vmem:[#allocation26_spill] sm:$0xff] }
 0x277   :  { %v8782_v18 = vadd.f32 %v658_v35, %v8723_v55  ;;  %v2205_v38 = vsub.f32 3.1415927, %v2203_v22  ;;  %v2380_v41 = vmul.f32 %v2379_v1, %v8687_v25  ;;  %v2471_v59 = vadd.f32 -0.074975304, %v2470_v30 }
 0x278   :  { %v8789_v45 = vsub.f32 %v12799_v50, %v8769_v53  ;;  %vm12800_vm3 = vcmp.ne.f32.partialorder %v8331_v19, %v8331_v19  ;;  %vm12801_vm15 = vcmp.ne.f32.partialorder %v8334_v21, %v8334_v21  ;;  %v2291_v27 = vadd.f32 -0.33333147, %v2290_v60 }
 0x279   :  { %vm8797_vm2 = vmor %vm12801_vm15, %vm12800_vm3  ;;  %v8801_v31 = vadd.f32 %v660_v54, %v289_v20  ;;  %v8805_v63 = vsub.f32 %v12804_v56, %v8771_v26  ;;  %v754_v37 = vmul.f32 %v8782_v18, %v8782_v18  ;;  %vm12805_vm6 = vcmp.lt.f32.partialorder %v8334_v21, 0.0 }
 0x27a   :  { %v2206_v33 = vsel %vm12805_vm6, %v2205_v38, %v2203_v22  ;;  %vm8815_vm3 = vmand %vm2217_vm8, %vm2218_vm7  ;;  %vm2306_vm10 = vcmp.ne.f32.partialorder %v8350_v61, %v8350_v61  ;;  %v2381_v35 = vadd.f32 -0.14207031, %v2380_v41  ;;  %v2472_v0 = vmul.f32 %v2471_v59, %v8715_v44 }
 0x27b   :  { %v786_v21 = vmul.f32 %v8789_v45, %v8789_v45  ;;  %vm12808_vm6 = vcmp.eq.f32.partialorder %v8331_v19, 0.0  ;;  %v2292_v51 = vmul.f32 %v2291_v27, %v8618_v8  ;;  %vm2312_vm8 = vcmp.eq.s32.totalorder %v8502_v47, inf }
 0x27c   :  { %v2210_v5 = vsel %vm12808_vm6, %v8628_v39, %v2206_v33  ;;  %v756_v12 = vmul.f32 %v8801_v31, %v8801_v31  ;;  %v788_v10 = vmul.f32 %v8805_v63, %v8805_v63  ;;  %v2382_v1 = vmul.f32 %v2381_v35, %v8687_v25 }
 0x27d   :  { %v2214_v54 = vsel %vm8797_vm2, nan, %v2210_v5  ;;  %v2473_v39 = vadd.f32 0.1064488, %v2472_v0  ;;  %v662_v8 = vadd.f32 %v630_v62, %v8723_v55  ;;  %v2293_v22 = vmul.f32 %v2292_v51, %v8609_v11 }
 0x27e   :  { %v2220_v30 = vsel %vm8815_vm3, %v8642_v36, %v2214_v54  ;;  %v293_v60 = vsub.f32 %v8198_v46, %v8736_v52  ;;  %v664_v38 = vadd.f32 %v632_v49, %v289_v20  ;;  %v2383_v59 = vadd.f32 0.19993454, %v2382_v1 }
 0x27f   :  { %v2221_v41 = vand.u32 2147483647, %v2220_v30  ;;  %v2474_v50 = vmul.f32 %v2473_v39, %v8715_v44  ;;  %v8849_v40 = vadd.f32 %v786_v21, %v754_v37  ;;  %v2294_v55 = vadd.f32 %v2293_v22, %v8609_v11 }
 0x280   :  { %v598_v62 = vadd.f32 %v562_v9, %v8720_v24  ;;  %v600_v36 = vadd.f32 %v564_v58, %v8736_v52  ;;  %v8854_v27 = vadd.f32 %v788_v10, %v756_v12  ;;  %v12809_v56 = vand.u32 2147483648, %v8331_v19 }
 0x281   :  { %v2384_v20 = vmul.f32 %v2383_v59, %v8687_v25  ;;  %v2475_v49 = vadd.f32 -0.14207031, %v2474_v50  ;;  %v8860_v33 = vadd.f32 %v662_v8, %v8759_v3  ;;  %v2296_v16 = vsub.f32 1.5707964, %v2294_v55 }
 0x282   :  { %v2223_v46 = vor.u32 %v12809_v56, %v2221_v41  ;;  %v8864_v11 = vadd.f32 %v664_v38, %v293_v60  ;;  %v8867_v24 = vand.u32 2147483647, %v8789_v45  ;;  %v8870_v52 = vand.u32 2147483647, %v8782_v18 }
 0x283   :  { %v2385_v19 = vadd.f32 -0.33333147, %v2384_v20  ;;  %v2476_v9 = vmul.f32 %v2475_v49, %v8715_v44  ;;  %4925 = vrsqrt.f32 %v8849_v40  ;;  %vm12810_vm6 = vcmp.gt.f32.partialorder %v8502_v47, %v8496_v17 }
 0x284   :  { %v8873_v58 = vmul.f32 2.864789, %v2223_v46  ;;  %v2297_v3 = vsel %vm12810_vm6, %v2296_v16, %v2294_v55  ;;  %v8885_v37 = vsub.f32 %v8769_v53, %v598_v62  ;;  %4927 = vrsqrt.f32 %v8854_v27 }
 0x285   :  { %v2227_v35 = vmax.f32 %v8867_v24, %v8870_v52  ;;  %v2299_v0 = vsub.f32 3.1415927, %v2297_v3  ;;  %v2386_v21 = vmul.f32 %v2385_v19, %v8687_v25  ;;  %v2477_v5 = vadd.f32 0.19993454, %v2476_v9 }
 0x286   :  { %v8894_v51 = vfloor.f32 %v8873_v58  ;;  %vm12811_vm2 = vcmp.ne.f32.partialorder %v8398_v7, %v8398_v7  ;;  %v8908_v25 = vsub.f32 %v8771_v26, %v600_v36  ;;  %v758_v12 = vmul.f32 %v8860_v33, %v8860_v33 }
 0x287   :  { %vm8902_vm15 = vmor %vm12811_vm2, %vm2306_vm10  ;;  %v760_v10 = vmul.f32 %v8864_v11, %v8864_v11  ;;  %4929 = vrcp.f32 %v2227_v35  ;;  %vm12814_vm6 = vcmp.lt.f32.partialorder %v8398_v7, 0.0  ;;  %vm12815_vm10 = vcmp.eq.s32.totalorder %v8496_v17, inf }
 0x288   :  { %v2300_v54 = vsel %vm12814_vm6, %v2299_v0, %v2297_v3  ;;  %vm2313_vm2 = vmand %vm12815_vm10, %vm2312_vm8  ;;  %v2387_v1 = vmul.f32 %v2386_v21, %v8677_v6  ;;  %v2478_v26 = vmul.f32 %v2477_v5, %v8715_v44  ;;  %v790_v39 = vmul.f32 %v8885_v37, %v8885_v37 }
 0x289   :  { %vm12816_vm7 = vcmp.eq.f32.partialorder %v8350_v61, 0.0  ;;  %vm2673_vm3 = vcmp.lt.f32.partialorder %v8894_v51, 0.0  ;;  %v2705_v7 = vadd.f32 9.0, %v8894_v51  ;;  %v792_v47 = vmul.f32 %v8908_v25, %v8908_v25 }
 0x28a   :  { %v2304_v8 = vsel %vm12816_vm7, %v8669_v28, %v2300_v54  ;;  %v2388_v30 = vadd.f32 %v2387_v1, %v8677_v6  ;;  %v2479_v22 = vadd.f32 -0.33333147, %v2478_v26  ;;  %vm12817_vm7 = vcmp.lt.s32.totalorder %v8443_v23, 0  ;;  %v12830_v1 = vld [vmem:[#allocation139_spill] sm:$0xff] }
 0x28b   :  { %v2308_v17 = vsel %vm8902_vm15, nan, %v2304_v8  ;;  %v8940_v28 = vsel %vm12817_vm7, 3.1415927, %v12687_v13  ;;  %v2737_v38 = vsel %vm2673_vm3, %v2705_v7, %v8894_v51  ;;  %v8946_v50 = vadd.f32 %v790_v39, %v758_v12 }
 0x28c   :  { %v2314_v60 = vsel %vm2313_vm2, %v8674_v14, %v2308_v17  ;;  %v2390_v59 = vsub.f32 1.5707964, %v2388_v30  ;;  %v2480_v6 = vmul.f32 %v2479_v22, %v8715_v44  ;;  %vm2769_vm2 = vcmp.ge.f32.partialorder %v2737_v38, 9.0  ;;  %v12839_v22 = vld [vmem:[#allocation135_spill] sm:$0xff] }
 0x28d   :  { %v2315_v41 = vand.u32 2147483647, %v2314_v60  ;;  %v4797_v14 = vadd.f32 -9.0, %v2737_v38  ;;  %v8951_v55 = vadd.f32 %v792_v47, %v760_v10  ;;  %v12818_v62 = vand.u32 2147483648, %v8350_v61 }
 0x28e   :  { %vm12819_vm3 = vcmp.gt.f32.partialorder %v8559_v57, %v8548_v15  ;;  %v2481_v44 = vmul.f32 %v2480_v6, %v8700_v32  ;;  %vm12820_vm7 = vcmp.lt.f32.partialorder %v8443_v23, 0.0  ;;  %v2504_v49 = vand.u32 2147483648, %v8395_v4 }
 0x28f   :  { %v2317_v36 = vor.u32 %v12818_v62, %v2315_v41  ;;  %v2391_v56 = vsel %vm12819_vm3, %v2390_v59, %v2388_v30  ;;  %v2498_v46 = vsel %vm12820_vm7, 2.3561945, %v12689_v29  ;;  %vm12821_vm10 = vcmp.ne.f32.partialorder %v8380_v48, %v8380_v48 }
 0x290   :  { %v2393_v20 = vsub.f32 3.1415927, %v2391_v56  ;;  %vm12822_vm8 = vcmp.ne.f32.partialorder %v8404_v2, %v8404_v2  ;;  %v2482_v16 = vadd.f32 %v2481_v44, %v8700_v32  ;;  %v8976_v9 = vsel %vm2769_vm2, %v4797_v14, %v2737_v38  ;;  %v4926_v3 = vpop.eup %4925 }
 0x291   :  { %vm8971_vm3 = vmor %vm12822_vm8, %vm12821_vm10  ;;  %v2579_v19 = vmul.f32 2.864789, %v2317_v36  ;;  %12825 = vst [vmem:[#allocation41_spill] sm:$0xff] %v8976_v9  ;;  %4931 = vrsqrt.f32 %v8946_v50  ;;  %vm12826_vm7 = vcmp.lt.f32.partialorder %v8404_v2, 0.0  ;;  %vm12827_vm15 = vcmp.eq.s32.totalorder %v8559_v57, inf  ;;  %v4928_v21 = vpop.eup %4927 }
 0x292   :  { %v2394_v35 = vsel %vm12826_vm7, %v2393_v20, %v2391_v56  ;;  %vm12828_vm6 = vcmp.eq.s32.totalorder %v8548_v15, inf  ;;  %v1005_v0 = vand.u32 2147483648, %v8849_v40  ;;  %v1019_v32 = vand.u32 2147483648, %v8854_v27 }
 0x293   :  { %vm2407_vm1 = vmand %vm12828_vm6, %vm12827_vm15  ;;  %4933 = vrsqrt.f32 %v8951_v55  ;;  %vm12829_vm10 = vcmp.eq.f32.partialorder %v8380_v48, 0.0  ;;  %v2484_v2 = vsub.f32 1.5707964, %v2482_v16  ;;  %v2611_v53 = vfloor.f32 %v2579_v19 }
 0x294   :  { %v2398_v5 = vsel %vm12829_vm10, %v8682_v34, %v2394_v35  ;;  %v2226_v57 = vmin.f32 %v8867_v24, %v8870_v52  ;;  %v1033_v12 = vand.u32 2147483648, %v8946_v50  ;;  %v1047_v10 = vand.u32 2147483648, %v8951_v55  ;;  %v4930_v54 = vpop.eup %4929 }
 0x295   :  { %v2402_v15 = vsel %vm8971_vm3, nan, %v2398_v5  ;;  %vm12831_vm15 = vcmp.gt.f32.partialorder %v8597_v42, %v8594_v43  ;;  %vm2675_vm2 = vcmp.lt.f32.partialorder %v2611_v53, 0.0  ;;  %v2707_v7 = vadd.f32 9.0, %v2611_v53 }
 0x296   :  { %v2408_v26 = vsel %vm2407_vm1, %v12830_v1, %v2402_v15  ;;  %v2485_v34 = vsel %vm12831_vm15, %v2484_v2, %v2482_v16  ;;  %v1001_v47 = vmul.f32 %v4926_v3, %v8849_v40  ;;  %vm12832_vm8 = vcmp.ne.f32.partialorder %v8395_v4, %v8395_v4  ;;  %v12852_v3 = vld [vmem:[#allocation136_spill] sm:$0xff] }
 0x297   :  { %v2409_v39 = vand.u32 2147483647, %v2408_v26  ;;  %v2487_v8 = vsub.f32 3.1415927, %v2485_v34  ;;  %vm12833_vm1 = vcmp.ne.f32.partialorder %v8443_v23, %v8443_v23  ;;  %vm9019_vm15 = vcmp.eq.f32.partialorder %v8873_v58, %v8894_v51 }
 0x298   :  { %vm9013_vm6 = vmor %vm12833_vm1, %vm12832_vm8  ;;  %v12836_v30 = vmov 0  ;;  %vm12840_vm3 = vcmp.eq.f32.partialorder %v8976_v9, 0.0  ;;  %v1015_v38 = vmul.f32 %v4928_v21, %v8854_v27  ;;  %v9029_v41 = vmul.f32 %v4930_v54, %v2226_v57 }
 0x299   :  { %v12837_v30 = vsel %vm9019_vm15, 4294967295, %v12836_v30  ;;  %v9026_v60 = vsel %vm12840_vm3, %v12839_v22, 0.0  ;;  %v12841_v59 = vand.u32 2147483648, %v8380_v48  ;;  %vm12842_vm8 = vcmp.lt.f32.partialorder %v8443_v23, 0.0 }
 0x29a   :  { %12838 = vst [vmem:[#allocation119_spill] sm:$0xff] %v12837_v30  ;;  %v2488_v14 = vsel %vm12842_vm8, %v2487_v8, %v2485_v34  ;;  %vm12843_vm1 = vcmp.eq.s32.totalorder %v8597_v42, inf  ;;  %vm12844_vm10 = vcmp.eq.s32.totalorder %v8594_v43, inf  ;;  %v2739_v58 = vsel %vm2675_vm2, %v2707_v7, %v2611_v53 }
 0x29b   :  { %v2411_v6 = vor.u32 %v12841_v59, %v2409_v39  ;;  %vm2501_vm7 = vmand %vm12844_vm10, %vm12843_vm1  ;;  %vm12845_vm3 = vcmp.eq.f32.partialorder %v8976_v9, 8.0  ;;  %vm12847_vm0 = vcmp.eq.f32.partialorder %v8395_v4, 0.0  ;;  %vm2771_vm12 = vcmp.ge.f32.partialorder %v2739_v58, 9.0 }
 0x29c   :  { %v9043_v51 = vsel %vm12845_vm3, %v12839_v22, 0.0  ;;  %v2492_v48 = vsel %vm12847_vm0, %v8940_v28, %v2488_v14  ;;  %v4799_v62 = vadd.f32 -9.0, %v2739_v58  ;;  %v9050_v23 = vmul.f32 %v9029_v41, %v9029_v41 }
 0x29d   :  { %12846 = vst [vmem:[#allocation120_spill] sm:$0xff] %v9043_v51  ;;  %v2496_v43 = vsel %vm9013_vm6, nan, %v2492_v48  ;;  %v2581_v42 = vmul.f32 2.864789, %v2411_v6  ;;  %vm9054_vm2 = vcmp.eq.f32.partialorder %v2579_v19, %v2611_v53  ;;  %v12848_v36 = vmov 0 }
 0x29e   :  { %v12849_v36 = vsel %vm9054_vm2, 4294967295, %v12848_v36  ;;  %vm1018_vm10 = vcmp.eq.f32.partialorder %v8854_v27, 0.0  ;;  %v9060_v56 = vand.u32 2147483647, %v8805_v63  ;;  %v2502_v28 = vsel %vm2501_vm7, %v2498_v46, %v2496_v43  ;;  %v4932_v2 = vpop.eup %4931  ;;  %v12862_v43 = vld [vmem:[#allocation137_spill] sm:$0xff] }
 0x29f   :  { %12850 = vst [vmem:[#allocation77_spill] sm:$0xff] %v12849_v36  ;;  %v9062_v44 = vsel %vm2771_vm12, %v4799_v62, %v2739_v58  ;;  %v2231_v20 = vmul.f32 0.002785687, %v9050_v23  ;;  %v9067_v61 = vand.u32 2147483647, %v8801_v31  ;;  %v2613_v19 = vfloor.f32 %v2581_v42  ;;  %v12945_v36 = vld [vmem:[#allocation66_spill] sm:$0xff] }
 0x2a0   :  { %12851 = vst [vmem:[#allocation42_spill] sm:$0xff] %v9062_v44  ;;  %v2503_v16 = vand.u32 2147483647, %v2502_v28  ;;  %vm2867_vm6 = vcmp.eq.f32.partialorder %v9062_v44, 0.0  ;;  %vm3379_vm8 = vcmp.eq.f32.partialorder %v9062_v44, 8.0  ;;  %vm12854_vm12 = vcmp.eq.f32.partialorder %v8849_v40, inf  ;;  %v4934_v15 = vpop.eup %4933 }
 0x2a1   :  { %v9072_v35 = vsel %vm2867_vm6, %v12852_v3, 0.0  ;;  %v9075_v46 = vsel %vm3379_vm8, %v12852_v3, 0.0  ;;  %v1003_v21 = vsel %vm12854_vm12, %v8849_v40, %v1001_v47  ;;  %v2232_v5 = vadd.f32 -0.015866, %v2231_v20 }
 0x2a2   :  { %12853 = vst [vmem:[#allocation26_spill] sm:$0xff] %v9075_v46  ;;  %v2505_v53 = vor.u32 %v2504_v49, %v2503_v16  ;;  %vm2677_vm1 = vcmp.lt.f32.partialorder %v2613_v19, 0.0  ;;  %v2709_v57 = vadd.f32 9.0, %v2613_v19  ;;  %vm2254_vm3 = vcmp.lt.s32.totalorder %v8789_v45, 0 }
 0x2a3   :  { %v3441_v54 = vsel %vm9019_vm15, %v9026_v60, %v9043_v51  ;;  %v3443_v1 = vsel %vm9054_vm2, %v9072_v35, %v9075_v46  ;;  %v2233_v26 = vmul.f32 %v2232_v5, %v9050_v23  ;;  %v2321_v4 = vmax.f32 %v9060_v56, %v9067_v61  ;;  %v12889_v51 = vld [vmem:[#allocation14_spill] sm:$0xff] }
 0x2a4   :  { %v2583_v49 = vmul.f32 2.864789, %v2505_v53  ;;  %v2741_v34 = vsel %vm2677_vm1, %v2709_v57, %v2613_v19  ;;  %vm12855_vm6 = vcmp.eq.f32.partialorder %v8849_v40, 0.0  ;;  %vm12857_vm8 = vcmp.eq.f32.partialorder %v8854_v27, inf }
 0x2a5   :  { %v9099_v39 = vsel %vm12855_vm6, %v1005_v0, %v1003_v21  ;;  %v1017_v8 = vsel %vm12857_vm8, %v8854_v27, %v1015_v38  ;;  %vm2773_vm12 = vcmp.ge.f32.partialorder %v2741_v34, 9.0  ;;  %v4801_v7 = vadd.f32 -9.0, %v2741_v34 }
 0x2a6   :  { %12856 = vst [vmem:[#allocation139_spill] sm:$0xff] %v9099_v39  ;;  %vm1032_vm7 = vcmp.eq.f32.partialorder %v8946_v50, 0.0  ;;  %v2234_v47 = vadd.f32 0.04247222, %v2233_v26  ;;  %4935 = vrcp.f32 %v2321_v4  ;;  %v2615_v17 = vfloor.f32 %v2583_v49 }
 0x2a7   :  { %v3473_v59 = vadd.f32 %v3441_v54, %v9026_v60  ;;  %v3475_v6 = vadd.f32 %v3443_v1, %v9072_v35  ;;  %v1029_v40 = vmul.f32 %v4932_v2, %v8946_v50  ;;  %v9109_v0 = vsel %vm2773_vm12, %v4801_v7, %v2741_v34  ;;  %v12872_v7 = vld [vmem:[#allocation138_spill] sm:$0xff] }
 0x2a8   :  { %12858 = vst [vmem:[#allocation140_spill] sm:$0xff] %v9109_v0  ;;  %v1043_v14 = vmul.f32 %v4934_v15, %v8951_v55  ;;  %v2235_v38 = vmul.f32 %v2234_v47, %v9050_v23  ;;  %v9117_v58 = vsel %vm2254_vm3, 3.1415927, %v12687_v13  ;;  %vm9119_vm6 = vcmp.eq.f32.partialorder %v2581_v42, %v2613_v19 }
 0x2a9   :  { %v12859_v48 = vmov 0  ;;  %vm2679_vm8 = vcmp.lt.f32.partialorder %v2615_v17, 0.0  ;;  %v2711_v62 = vadd.f32 9.0, %v2615_v17  ;;  %vm2869_vm12 = vcmp.eq.f32.partialorder %v9109_v0, 0.0 }
 0x2aa   :  { %v12860_v48 = vsel %vm9119_vm6, 4294967295, %v12859_v48  ;;  %v9125_v28 = vsel %vm2869_vm12, %v12862_v43, 0.0  ;;  %vm3381_vm0 = vcmp.eq.f32.partialorder %v9109_v0, 8.0  ;;  %v9132_v20 = vsel %vm1018_vm10, %v1019_v32, %v1017_v8 }
 0x2ab   :  { %12861 = vst [vmem:[#allocation141_spill] sm:$0xff] %v12860_v48  ;;  %12863 = vst [vmem:[#allocation142_spill] sm:$0xff] %v9125_v28  ;;  %v2236_v16 = vadd.f32 -0.074975304, %v2235_v38  ;;  %v2743_v42 = vsel %vm2679_vm8, %v2711_v62, %v2615_v17  ;;  %v9135_v19 = vsel %vm3381_vm0, %v12862_v43, 0.0  ;;  %v3487_v21 = vadd.f32 %v3475_v6, %v3473_v59 }
 0x2ac   :  { %12864 = vst [vmem:[#allocation143_spill] sm:$0xff] %v9132_v20  ;;  %12865 = vst [vmem:[#allocation144_spill] sm:$0xff] %v9135_v19  ;;  %vm12866_vm3 = vcmp.eq.f32.partialorder %v8946_v50, inf  ;;  %vm2775_vm12 = vcmp.ge.f32.partialorder %v2743_v42, 9.0  ;;  %v4803_v2 = vadd.f32 -9.0, %v2743_v42  ;;  %v3445_v53 = vsel %vm9119_vm6, %v9125_v28, %v9135_v19 }
 0x2ad   :  { %v1031_v5 = vsel %vm12866_vm3, %v8946_v50, %v1029_v40  ;;  %v2237_v27 = vmul.f32 %v2236_v16, %v9050_v23  ;;  %v3477_v32 = vadd.f32 %v3445_v53, %v9125_v28  ;;  %vm12867_vm10 = vcmp.eq.f32.partialorder %v8951_v55, inf  ;;  %v12901_v28 = vld [vmem:[#allocation12_spill] sm:$0xff] }
 0x2ae   :  { %v1045_v57 = vsel %vm12867_vm10, %v8951_v55, %v1043_v14  ;;  %v9150_v15 = vand.u32 2147483647, %v8885_v37  ;;  %v9153_v54 = vand.u32 2147483647, %v8860_v33  ;;  %vm9155_vm0 = vcmp.eq.f32.partialorder %v2583_v49, %v2615_v17 }
 0x2af   :  { %v12868_v1 = vmov 0  ;;  %v9159_v26 = vsel %vm2775_vm12, %v4803_v2, %v2743_v42  ;;  %v2238_v4 = vadd.f32 0.1064488, %v2237_v27  ;;  %vm2348_vm8 = vcmp.lt.s32.totalorder %v8805_v63, 0 }
 0x2b0   :  { %v12869_v1 = vsel %vm9155_vm0, 4294967295, %v12868_v1  ;;  %12871 = vst [vmem:[#allocation146_spill] sm:$0xff] %v9159_v26  ;;  %vm2871_vm3 = vcmp.eq.f32.partialorder %v9159_v26, 0.0  ;;  %vm3383_vm1 = vcmp.eq.f32.partialorder %v9159_v26, 8.0  ;;  %v3495_v34 = vadd.f32 %v3487_v21, %v3477_v32 }
 0x2b1   :  { %12870 = vst [vmem:[#allocation145_spill] sm:$0xff] %v12869_v1  ;;  %v2320_v8 = vmin.f32 %v9060_v56, %v9067_v61  ;;  %v9167_v47 = vsel %vm2871_vm3, %v12872_v7, 0.0  ;;  %v9170_v49 = vsel %vm3383_vm1, %v12872_v7, 0.0  ;;  %v2239_v17 = vmul.f32 %v2238_v4, %v9050_v23 }
 0x2b2   :  { %12873 = vst [vmem:[#allocation147_spill] sm:$0xff] %v9167_v47  ;;  %12874 = vst [vmem:[#allocation148_spill] sm:$0xff] %v9170_v49  ;;  %v2415_v59 = vmax.f32 %v9150_v15, %v9153_v54  ;;  %v3447_v6 = vsel %vm9155_vm0, %v9167_v47, %v9170_v49  ;;  %v9183_v40 = vsel %vm1032_vm7, %v1033_v12, %v1031_v5  ;;  %vm12876_vm1 = vcmp.eq.f32.partialorder %v8951_v55, 0.0  ;;  %v12880_v12 = vld [vmem:[#allocation29_spill] sm:$0xff] }
 0x2b3   :  { %12875 = vst [vmem:[#allocation149_spill] sm:$0xff] %v9183_v40  ;;  %v9189_v14 = vsel %vm12876_vm1, %v1047_v10, %v1045_v57  ;;  %vm12878_vm12 = vcmp.lt.f32.partialorder %v8789_v45, 0.0  ;;  %v3479_v62 = vadd.f32 %v3447_v6, %v9167_v47  ;;  %v2240_v16 = vadd.f32 -0.14207031, %v2239_v17  ;;  %v4936_v50 = vpop.eup %4935 }
 0x2b4   :  { %12877 = vst [vmem:[#allocation150_spill] sm:$0xff] %v9189_v14  ;;  %v9194_v38 = vsel %vm12878_vm12, 2.3561945, %v12689_v29  ;;  %vm12079_vm10 = vcmp.lt.f32.partialorder %v8805_v63, 0.0  ;;  %4937 = vrcp.f32 %v2415_v59  ;;  %v9202_v55 = vsel %vm2348_vm8, 3.1415927, %v12687_v13 }
 0x2b5   :  { %v9207_v10 = vsel %vm12079_vm10, 2.3561945, %v12689_v29  ;;  %vm2442_vm7 = vcmp.lt.s32.totalorder %v8885_v37, 0  ;;  %v3503_v42 = vadd.f32 %v3495_v34, %v3479_v62  ;;  %v2241_v21 = vmul.f32 %v2240_v16, %v9050_v23  ;;  %v12881_v16 = vld [vmem:[#allocation20_spill] sm:$0xff] }
 0x2b6   :  { %v9211_v5 = vmul.f32 %v4936_v50, %v2320_v8  ;;  %v9214_v2 = vand.u32 2147483647, %v8908_v25  ;;  %vm12078_vm8 = vcmp.lt.f32.partialorder %v8885_v37, 0.0  ;;  %v9219_v27 = vand.u32 2147483647, %v8864_v11 }
 0x2b7   :  { %vm2536_vm3 = vcmp.lt.s32.totalorder %v8908_v25, 0  ;;  %3511 = vst [vmem:[#allocation2 + $0x30] sm:$0xff] %v3503_v42  ;;  %v2242_v32 = vadd.f32 0.19993454, %v2241_v21  ;;  %v2414_v4 = vmin.f32 %v9150_v15, %v9153_v54  ;;  %v9229_v34 = vsel %vm2442_vm7, 3.1415927, %v12687_v13 }
 0x2b8   :  { %v9224_v57 = vmul.f32 %v9211_v5, %v9211_v5  ;;  %v9234_v8 = vsel %vm12078_vm8, 2.3561945, %v12689_v29  ;;  %v2509_v59 = vmax.f32 %v9214_v2, %v9219_v27  ;;  %vm12086_vm1 = vcmp.lt.f32.partialorder %v8908_v25, 0.0  ;;  %v12885_v21 = vld [vmem:[#allocation27_spill] sm:$0xff] }
 0x2b9   :  { %v2243_v6 = vmul.f32 %v2242_v32, %v9050_v23  ;;  %v9245_v50 = vsel %vm2536_vm3, 3.1415927, %v12687_v13  ;;  %v9252_v42 = vsel %vm12086_vm1, 2.3561945, %v12689_v29  ;;  %v12879_v32 = vld [vmem:[#allocation13_spill] sm:$0xff]  ;;  %vm2907_vm8 = vcmp.eq.f32.partialorder %v12880_v12, 1.0 }
 0x2ba   :  { %v2325_v62 = vmul.f32 0.002785687, %v9224_v57  ;;  %4939 = vrcp.f32 %v2509_v59  ;;  %vm2905_vm7 = vcmp.eq.f32.partialorder %v12879_v32, 1.0  ;;  %vm2909_vm3 = vcmp.eq.f32.partialorder %v12881_v16, 1.0  ;;  %v12882_v13 = vld [vmem:[#allocation34_spill] sm:$0xff]  ;;  %v12883_v29 = vld [vmem:[#allocation16_spill] sm:$0xff] }
 0x2bb   :  { %v2244_v17 = vadd.f32 -0.33333147, %v2243_v6  ;;  %vm2259_vm12 = vcmp.ne.f32.partialorder %v8782_v18, %v8782_v18  ;;  %vm2911_vm0 = vcmp.eq.f32.partialorder %v12882_v13, 1.0  ;;  %v9264_v59 = vsel %vm2905_vm7, %v12883_v29, 0.0  ;;  %v12887_v6 = vld [vmem:[#allocation22_spill] sm:$0xff]  ;;  %v12891_v13 = vld [vmem:[#allocation17_spill] sm:$0xff] }
 0x2bc   :  { %v2326_v53 = vadd.f32 -0.015866, %v2325_v62  ;;  %12884 = vst [vmem:[#allocation151_spill] sm:$0xff] %v9264_v59  ;;  %v9267_v49 = vsel %vm2907_vm8, %v12885_v21, 0.0  ;;  %v9270_v62 = vsel %vm2909_vm3, %v12887_v6, 0.0  ;;  %v9277_v16 = vsel %vm2911_vm0, %v12889_v51, 0.0 }
 0x2bd   :  { %12886 = vst [vmem:[#allocation152_spill] sm:$0xff] %v9267_v49  ;;  %12888 = vst [vmem:[#allocation153_spill] sm:$0xff] %v9270_v62  ;;  %v2245_v19 = vmul.f32 %v2244_v17, %v9050_v23  ;;  %v3513_v21 = vsel %vm5637_vm13, %v9264_v59, %v12891_v13  ;;  %v12893_v6 = vld [vmem:[#allocation23_spill] sm:$0xff]  ;;  %v12899_v51 = vld [vmem:[#allocation33_spill] sm:$0xff]  ;;  %vm2906_vm3 = vcmp.eq.f32.partialorder %v12901_v28, 1.0 }
 0x2be   :  { %v2327_v46 = vmul.f32 %v2326_v53, %v9224_v57  ;;  %12890 = vst [vmem:[#allocation154_spill] sm:$0xff] %v9277_v16  ;;  %v3515_v23 = vsel %vm5672_vm4, %v9267_v49, %v12893_v6  ;;  %v12895_v17 = vld [vmem:[#allocation15_spill] sm:$0xff]  ;;  %vm12900_vm0 = vnez %v12899_v51  ;;  %v3545_v29 = vadd.f32 %v3513_v21, %v9264_v59  ;;  %v12916_v59 = vld [vmem:[#allocation58_spill] sm:$0xff] }
 0x2bf   :  { %v12896_v12 = vld [vmem:[#allocation19_spill] sm:$0xff]  ;;  %v2246_v13 = vmul.f32 %v2245_v19, %v9029_v41  ;;  %v3547_v47 = vadd.f32 %v3515_v23, %v9267_v49  ;;  %v12904_v19 = vld [vmem:[#allocation57_spill] sm:$0xff] }
 0x2c0   :  { %vm12897_vm7 = vnez %v12896_v12  ;;  %v12898_v32 = vld [vmem:[#allocation35_spill] sm:$0xff]  ;;  %v2328_v1 = vadd.f32 0.04247222, %v2327_v46  ;;  %v12903_v12 = vld [vmem:[#allocation53_spill] sm:$0xff]  ;;  %vm2912_vm10 = vcmp.eq.f32.partialorder %v12904_v19, 1.0  ;;  %v12913_v19 = vld [vmem:[#allocation54_spill] sm:$0xff] }
 0x2c1   :  { %v3517_v53 = vsel %vm12897_vm7, %v9270_v62, %v12895_v17  ;;  %v3519_v40 = vsel %vm12900_vm0, %v9277_v16, %v12898_v32  ;;  %v4938_v6 = vpop.eup %4937  ;;  %v12902_v17 = vld [vmem:[#allocation49_spill] sm:$0xff]  ;;  %vm2910_vm1 = vcmp.eq.f32.partialorder %v12903_v12, 1.0  ;;  %v2247_v32 = vadd.f32 %v2246_v13, %v9029_v41  ;;  %v12907_v28 = vld [vmem:[#allocation39_spill] sm:$0xff] }
 0x2c2   :  { %v3549_v14 = vadd.f32 %v3517_v53, %v9270_v62  ;;  %v3551_v48 = vadd.f32 %v3519_v40, %v9277_v16  ;;  %vm2908_vm8 = vcmp.eq.f32.partialorder %v12902_v17, 1.0  ;;  %v2329_v21 = vmul.f32 %v2328_v1, %v9224_v57  ;;  %v12905_v23 = vld [vmem:[#allocation37_spill] sm:$0xff]  ;;  %v12906_v62 = vld [vmem:[#allocation38_spill] sm:$0xff] }
 0x2c3   :  { %v9306_v51 = vmul.f32 %v4938_v6, %v2414_v4  ;;  %v3577_v46 = vadd.f32 %v3547_v47, %v3545_v29  ;;  %v9310_v53 = vsel %vm2906_vm3, %v12905_v23, 0.0  ;;  %v9313_v40 = vsel %vm2908_vm8, %v12906_v62, 0.0  ;;  %v12908_v4 = vld [vmem:[#allocation40_spill] sm:$0xff]  ;;  %v12909_v29 = vld [vmem:[#allocation10_spill] sm:$0xff] }
 0x2c4   :  { %v9316_v16 = vsel %vm2910_vm1, %v12907_v28, 0.0  ;;  %v2249_v17 = vsub.f32 1.5707964, %v2247_v32  ;;  %v2330_v12 = vadd.f32 -0.074975304, %v2329_v21  ;;  %v9323_v47 = vsel %vm2912_vm10, %v12908_v4, 0.0 }
 0x2c5   :  { %v9320_v41 = vmul.f32 %v9306_v51, %v9306_v51  ;;  %v3585_v1 = vadd.f32 %v3577_v46, %v3549_v14  ;;  %v3514_v6 = vsel %vm6196_vm11, %v9310_v53, %v12909_v29  ;;  %v12911_v62 = vld [vmem:[#allocation50_spill] sm:$0xff]  ;;  %v3518_v49 = vsel %vm6257_vm5, %v9316_v16, %v12913_v19 }
 0x2c6   :  { %v3516_v28 = vsel %vm6227_vm14, %v9313_v40, %v12911_v62  ;;  %vm12915_vm1 = vcmp.gt.f32.partialorder %v8870_v52, %v8867_v24  ;;  %v2331_v46 = vmul.f32 %v2330_v12, %v9224_v57  ;;  %v3520_v62 = vsel %vm6288_vm9, %v9323_v47, %v12916_v59 }
 0x2c7   :  { %v2250_v14 = vsel %vm12915_vm1, %v2249_v17, %v2247_v32  ;;  %v2419_v4 = vmul.f32 0.002785687, %v9320_v41  ;;  %v3593_v13 = vadd.f32 %v3585_v1, %v3551_v48  ;;  %v3546_v23 = vadd.f32 %v3514_v6, %v9310_v53  ;;  %v4940_v19 = vpop.eup %4939 }
 0x2c8   :  { %v2252_v29 = vsub.f32 3.1415927, %v2250_v14  ;;  %v3548_v21 = vadd.f32 %v3516_v28, %v9313_v40  ;;  %vm12918_vm10 = vcmp.ne.f32.partialorder %v8789_v45, %v8789_v45  ;;  %v2332_v48 = vadd.f32 0.1064488, %v2331_v46 }
 0x2c9   :  { %vm9354_vm8 = vmor %vm12918_vm10, %vm2259_vm12  ;;  %v2420_v17 = vadd.f32 -0.015866, %v2419_v4  ;;  %3602 = vst [vmem:[#allocation2 + $0x40] sm:$0xff] %v3593_v13  ;;  %v3550_v59 = vadd.f32 %v3518_v49, %v9316_v16  ;;  %v3552_v32 = vadd.f32 %v3520_v62, %v9323_v47  ;;  %vm12921_vm3 = vcmp.lt.f32.partialorder %v8789_v45, 0.0  ;;  %v12925_v4 = vld [vmem:[#allocation44_spill] sm:$0xff] }
 0x2ca   :  { %v2253_v28 = vsel %vm12921_vm3, %v2252_v29, %v2250_v14  ;;  %vm12922_vm1 = vcmp.eq.s32.totalorder %v8870_v52, inf  ;;  %vm12923_vm9 = vcmp.eq.s32.totalorder %v8867_v24, inf  ;;  %v12924_v1 = vmin.f32 %v9214_v2, %v9219_v27  ;;  %v12927_v52 = vld [vmem:[#allocation25_spill] sm:$0xff] }
 0x2cb   :  { %vm2266_vm5 = vmand %vm12923_vm9, %vm12922_vm1  ;;  %v3578_v46 = vadd.f32 %v3548_v21, %v3546_v23  ;;  %vm2913_vm12 = vcmp.eq.f32.partialorder %v12925_v4, 1.0  ;;  %vm12926_vm10 = vcmp.eq.f32.partialorder %v8782_v18, 0.0  ;;  %v2333_v45 = vmul.f32 %v2332_v48, %v9224_v57  ;;  %v12928_v21 = vld [vmem:[#allocation64_spill] sm:$0xff]  ;;  %v12943_v4 = vld [vmem:[#allocation46_spill] sm:$0xff] }
 0x2cc   :  { %v9369_v6 = vmul.f32 %v4940_v19, %v12924_v1  ;;  %v2257_v49 = vsel %vm12926_vm10, %v9117_v58, %v2253_v28  ;;  %v2421_v13 = vmul.f32 %v2420_v17, %v9320_v41  ;;  %vm2915_vm3 = vcmp.eq.f32.partialorder %v12927_v52, 1.0  ;;  %v12929_v19 = vld [vmem:[#allocation70_spill] sm:$0xff]  ;;  %v12930_v1 = vld [vmem:[#allocation60_spill] sm:$0xff] }
 0x2cd   :  { %v2261_v24 = vsel %vm9354_vm8, nan, %v2257_v49  ;;  %v3586_v23 = vadd.f32 %v3578_v46, %v3550_v59  ;;  %vm2917_vm9 = vcmp.eq.f32.partialorder %v12928_v21, 1.0  ;;  %v2334_v62 = vadd.f32 -0.14207031, %v2333_v45  ;;  %v12932_v46 = vld [vmem:[#allocation61_spill] sm:$0xff] }
 0x2ce   :  { %v9382_v14 = vmul.f32 %v9369_v6, %v9369_v6  ;;  %v2267_v29 = vsel %vm2266_vm5, %v9194_v38, %v2261_v24  ;;  %v2422_v58 = vadd.f32 0.04247222, %v2421_v13  ;;  %vm2919_vm1 = vcmp.eq.f32.partialorder %v12929_v19, 1.0  ;;  %v12934_v38 = vld [vmem:[#allocation62_spill] sm:$0xff]  ;;  %v12940_v19 = vld [vmem:[#allocation45_spill] sm:$0xff] }
 0x2cf   :  { %v2268_v48 = vand.u32 2147483647, %v2267_v29  ;;  %v3594_v28 = vadd.f32 %v3586_v23, %v3552_v32  ;;  %v9391_v12 = vsel %vm2913_vm12, %v12930_v1, 0.0  ;;  %v2335_v49 = vmul.f32 %v2334_v62, %v9224_v57  ;;  %v12937_v32 = vld [vmem:[#allocation68_spill] sm:$0xff]  ;;  %v12939_v1 = vld [vmem:[#allocation30_spill] sm:$0xff] }
 0x2d0   :  { %v2513_v17 = vmul.f32 0.002785687, %v9382_v14  ;;  %12931 = vst [vmem:[#allocation17_spill] sm:$0xff] %v9391_v12  ;;  %v2423_v59 = vmul.f32 %v2422_v58, %v9320_v41  ;;  %v9396_v21 = vsel %vm2915_vm3, %v12932_v46, 0.0  ;;  %v9399_v45 = vsel %vm2917_vm9, %v12934_v38, 0.0  ;;  %v12942_v46 = vld [vmem:[#allocation31_spill] sm:$0xff] }
 0x2d1   :  { %12933 = vst [vmem:[#allocation23_spill] sm:$0xff] %v9396_v21  ;;  %12935 = vst [vmem:[#allocation15_spill] sm:$0xff] %v9399_v45  ;;  %v12936_v13 = vand.u32 2147483648, %v8782_v18  ;;  %v9404_v23 = vsel %vm2919_vm1, %v12937_v32, 0.0  ;;  %vm12941_vm5 = vnez %v12940_v19  ;;  %v2336_v58 = vadd.f32 0.19993454, %v2335_v49 }
 0x2d2   :  { %v2514_v29 = vadd.f32 -0.015866, %v2513_v17  ;;  %3603 = vst [vmem:[#allocation2 + $0x48] sm:$0xff] %v3594_v28  ;;  %12938 = vst [vmem:[#allocation35_spill] sm:$0xff] %v9404_v23  ;;  %v3521_v62 = vsel %vm12941_vm5, %v9391_v12, %v12939_v1  ;;  %v2424_v52 = vadd.f32 -0.074975304, %v2423_v59  ;;  %vm12944_vm8 = vnez %v12943_v4 }
 0x2d3   :  { %v2270_v24 = vor.u32 %v12936_v13, %v2268_v48  ;;  %v3523_v38 = vsel %vm12944_vm8, %v9396_v21, %v12942_v46  ;;  %v12946_v18 = vld [vmem:[#allocation65_spill] sm:$0xff]  ;;  %v12948_v13 = vld [vmem:[#allocation71_spill] sm:$0xff]  ;;  %v3553_v49 = vadd.f32 %v3521_v62, %v9391_v12  ;;  %v2337_v59 = vmul.f32 %v2336_v58, %v9224_v57 }
 0x2d4   :  { %vm12947_vm12 = vnez %v12946_v18  ;;  %v2515_v17 = vmul.f32 %v2514_v29, %v9382_v14  ;;  %v12949_v32 = vld [vmem:[#allocation69_spill] sm:$0xff]  ;;  %v2425_v4 = vmul.f32 %v2424_v52, %v9320_v41  ;;  %v3555_v46 = vadd.f32 %v3523_v38, %v9396_v21  ;;  %v12951_v18 = vld [vmem:[#allocation84_spill] sm:$0xff] }
 0x2d5   :  { %v3525_v48 = vsel %vm12947_vm12, %v9399_v45, %v12945_v36  ;;  %v2578_v28 = vmul.f32 2.864789, %v2270_v24  ;;  %vm12950_vm10 = vnez %v12949_v32  ;;  %v12952_v12 = vld [vmem:[#allocation85_spill] sm:$0xff]  ;;  %v12953_v38 = vmov 0 }
 0x2d6   :  { %v3527_v1 = vsel %vm12950_vm10, %v9404_v23, %v12948_v13  ;;  %v3557_v19 = vadd.f32 %v3525_v48, %v9399_v45  ;;  %v2516_v36 = vadd.f32 0.04247222, %v2515_v17  ;;  %v2338_v13 = vadd.f32 -0.33333147, %v2337_v59  ;;  %v12957_v59 = vld [vmem:[#allocation97_spill] sm:$0xff]  ;;  %v12977_v45 = vld [vmem:[#allocation96_spill] sm:$0xff] }
 0x2d7   :  { %v2610_v24 = vfloor.f32 %v2578_v28  ;;  %v3559_v29 = vadd.f32 %v3527_v1, %v9404_v23  ;;  %v2426_v32 = vadd.f32 0.1064488, %v2425_v4  ;;  %v3579_v62 = vadd.f32 %v3555_v46, %v3553_v49  ;;  %v12956_v1 = vld [vmem:[#allocation92_spill] sm:$0xff]  ;;  %v12958_v46 = vld [vmem:[#allocation73_spill] sm:$0xff] }
 0x2d8   :  { %v2517_v52 = vmul.f32 %v2516_v36, %v9382_v14  ;;  %v2339_v48 = vmul.f32 %v2338_v13, %v9224_v57  ;;  %vm2918_vm10 = vcmp.eq.f32.partialorder %v12956_v1, 1.0  ;;  %vm2920_vm5 = vcmp.eq.f32.partialorder %v12957_v59, 1.0 }
 0x2d9   :  { %vm9438_vm3 = vcmp.eq.f32.partialorder %v2578_v28, %v2610_v24  ;;  %vm2674_vm8 = vcmp.lt.f32.partialorder %v2610_v24, 0.0  ;;  %v2706_v58 = vadd.f32 9.0, %v2610_v24  ;;  %v2427_v4 = vmul.f32 %v2426_v32, %v9320_v41 }
 0x2da   :  { %v12954_v38 = vsel %vm9438_vm3, 4294967295, %v12953_v38  ;;  %v3587_v17 = vadd.f32 %v3579_v62, %v3557_v19  ;;  %v2518_v49 = vadd.f32 -0.074975304, %v2517_v52  ;;  %vm12959_vm14 = vcmp.eq.f32.partialorder %v12951_v18, 1.0  ;;  %v12960_v62 = vld [vmem:[#allocation74_spill] sm:$0xff] }
 0x2db   :  { %12955 = vst [vmem:[#allocation10_spill] sm:$0xff] %v12954_v38  ;;  %v2738_v28 = vsel %vm2674_vm8, %v2706_v58, %v2610_v24  ;;  %v9452_v36 = vsel %vm12959_vm14, %v12958_v46, 0.0  ;;  %v2340_v57 = vmul.f32 %v2339_v48, %v9211_v5  ;;  %v2428_v13 = vadd.f32 -0.14207031, %v2427_v4  ;;  %v12962_v24 = vld [vmem:[#allocation75_spill] sm:$0xff]  ;;  %v12964_v48 = vld [vmem:[#allocation76_spill] sm:$0xff] }
 0x2dc   :  { %vm2770_vm9 = vcmp.ge.f32.partialorder %v2738_v28, 9.0  ;;  %v4798_v23 = vadd.f32 -9.0, %v2738_v28  ;;  %v2519_v19 = vmul.f32 %v2518_v49, %v9382_v14  ;;  %v3595_v32 = vadd.f32 %v3587_v17, %v3559_v29  ;;  %v12965_v29 = vld [vmem:[#allocation88_spill] sm:$0xff]  ;;  %v12966_v17 = vld [vmem:[#allocation86_spill] sm:$0xff] }
 0x2dd   :  { %vm12961_vm12 = vcmp.eq.f32.partialorder %v12952_v12, 1.0  ;;  %v9462_v58 = vsel %vm2918_vm10, %v12962_v24, 0.0  ;;  %v2341_v59 = vadd.f32 %v2340_v57, %v9211_v5  ;;  %v2429_v46 = vmul.f32 %v2428_v13, %v9320_v41 }
 0x2de   :  { %v9459_v52 = vsel %vm12961_vm12, %v12960_v62, 0.0  ;;  %v9466_v1 = vsel %vm2770_vm9, %v4798_v23, %v2738_v28  ;;  %v9469_v4 = vsel %vm2920_vm5, %v12964_v48, 0.0  ;;  %v2520_v18 = vadd.f32 0.1064488, %v2519_v19  ;;  %3604 = vst [vmem:[#allocation2 + $0x50] sm:$0xff] %v3595_v32  ;;  %v12969_v19 = vld [vmem:[#allocation90_spill] sm:$0xff] }
 0x2df   :  { %12963 = vst [vmem:[#allocation50_spill] sm:$0xff] %v9466_v1  ;;  %vm2866_vm14 = vcmp.eq.f32.partialorder %v9466_v1, 0.0  ;;  %vm3378_vm8 = vcmp.eq.f32.partialorder %v9466_v1, 8.0  ;;  %vm12967_vm12 = vnez %v12966_v17  ;;  %v2343_v24 = vsub.f32 1.5707964, %v2341_v59  ;;  %v12970_v32 = vld [vmem:[#allocation87_spill] sm:$0xff] }
 0x2e0   :  { %v3522_v49 = vsel %vm12967_vm12, %v9452_v36, %v12965_v29  ;;  %v2430_v5 = vadd.f32 0.19993454, %v2429_v46  ;;  %v9478_v57 = vsel %vm2866_vm14, %v9099_v39, 0.0  ;;  %v9481_v23 = vsel %vm3378_vm8, %v9099_v39, 0.0  ;;  %v12972_v17 = vld [vmem:[#allocation94_spill] sm:$0xff]  ;;  %v12973_v46 = vld [vmem:[#allocation93_spill] sm:$0xff] }
 0x2e1   :  { %12968 = vst [vmem:[#allocation54_spill] sm:$0xff] %v9481_v23  ;;  %v2521_v28 = vmul.f32 %v2520_v18, %v9382_v14  ;;  %v3442_v13 = vsel %vm9438_vm3, %v9478_v57, %v9481_v23  ;;  %vm12971_vm5 = vnez %v12970_v32  ;;  %vm12974_vm10 = vnez %v12973_v46  ;;  %v12976_v23 = vld [vmem:[#allocation98_spill] sm:$0xff] }
 0x2e2   :  { %v3524_v29 = vsel %vm12971_vm5, %v9459_v52, %v12969_v19  ;;  %v3526_v48 = vsel %vm12974_vm10, %v9462_v58, %v12972_v17  ;;  %vm12975_vm9 = vcmp.gt.f32.partialorder %v9067_v61, %v9060_v56  ;;  %v2431_v18 = vmul.f32 %v2430_v5, %v9320_v41 }
 0x2e3   :  { %v2344_v62 = vsel %vm12975_vm9, %v2343_v24, %v2341_v59  ;;  %v9501_v12 = vadd.f32 %v3442_v13, %v9478_v57  ;;  %vm12978_vm14 = vnez %v12977_v45  ;;  %v2522_v46 = vadd.f32 -0.14207031, %v2521_v28  ;;  %v12983_v28 = vld [vmem:[#allocation78_spill] sm:$0xff]  ;;  %v13000_v13 = vld [vmem:[#allocation79_spill] sm:$0xff] }
 0x2e4   :  { %v3528_v32 = vsel %vm12978_vm14, %v9469_v4, %v12976_v23  ;;  %v2346_v19 = vsub.f32 3.1415927, %v2344_v62  ;;  %v3554_v17 = vadd.f32 %v3522_v49, %v9452_v36  ;;  %v3556_v21 = vadd.f32 %v3524_v29, %v9459_v52  ;;  %v12989_v29 = vld [vmem:[#allocation106_spill] sm:$0xff] }
 0x2e5   :  { %vm12979_vm9 = vcmp.ne.f32.partialorder %v8801_v31, %v8801_v31  ;;  %vm12980_vm1 = vcmp.ne.f32.partialorder %v8805_v63, %v8805_v63  ;;  %v2432_v24 = vadd.f32 -0.33333147, %v2431_v18  ;;  %v3558_v5 = vadd.f32 %v3526_v48, %v9462_v58  ;;  %v12996_v59 = vld [vmem:[#allocation102_spill] sm:$0xff] }
 0x2e6   :  { %vm9517_vm10 = vmor %vm12980_vm1, %vm12979_vm9  ;;  %v3560_v23 = vadd.f32 %v3528_v32, %v9469_v4  ;;  %vm12984_vm14 = vcmp.lt.f32.partialorder %v8805_v63, 0.0  ;;  %vm12985_vm5 = vcmp.eq.s32.totalorder %v9067_v61, inf  ;;  %vm12986_vm12 = vcmp.eq.s32.totalorder %v9060_v56, inf  ;;  %v12991_v61 = vld [vmem:[#allocation109_spill] sm:$0xff] }
 0x2e7   :  { %v2347_v49 = vsel %vm12984_vm14, %v2346_v19, %v2344_v62  ;;  %vm9530_vm11 = vmand %vm12986_vm12, %vm12985_vm5  ;;  %v2523_v48 = vmul.f32 %v2522_v46, %v9382_v14  ;;  %v3580_v32 = vadd.f32 %v3556_v21, %v3554_v17  ;;  %vm2923_vm8 = vcmp.eq.f32.partialorder %v12989_v29, 1.0  ;;  %v12992_v62 = vld [vmem:[#allocation114_spill] sm:$0xff]  ;;  %v12993_v19 = vld [vmem:[#allocation100_spill] sm:$0xff] }
 0x2e8   :  { %vm12990_vm14 = vcmp.eq.f32.partialorder %v8801_v31, 0.0  ;;  %v2433_v56 = vmul.f32 %v2432_v24, %v9320_v41  ;;  %vm2925_vm1 = vcmp.eq.f32.partialorder %v12991_v61, 1.0  ;;  %vm2927_vm0 = vcmp.eq.f32.partialorder %v12992_v62, 1.0  ;;  %v12995_v24 = vld [vmem:[#allocation101_spill] sm:$0xff] }
 0x2e9   :  { %v2351_v63 = vsel %vm12990_vm14, %v9202_v55, %v2347_v49  ;;  %v2524_v21 = vadd.f32 0.19993454, %v2523_v48  ;;  %v3588_v18 = vadd.f32 %v3580_v32, %v3558_v5  ;;  %vm12994_vm14 = vcmp.eq.f32.partialorder %v12983_v28, 1.0  ;;  %v12997_v32 = vld [vmem:[#allocation103_spill] sm:$0xff]  ;;  %v13010_v29 = vld [vmem:[#allocation113_spill] sm:$0xff] }
 0x2ea   :  { %v2355_v46 = vsel %vm9517_vm10, nan, %v2351_v63  ;;  %v9554_v55 = vsel %vm12994_vm14, %v12993_v19, 0.0  ;;  %v2434_v17 = vmul.f32 %v2433_v56, %v9306_v51  ;;  %v9561_v49 = vsel %vm2923_vm8, %v12995_v24, 0.0  ;;  %v13009_v24 = vld [vmem:[#allocation115_spill] sm:$0xff] }
 0x2eb   :  { %v2361_v41 = vsel %vm9530_vm11, %v9207_v10, %v2355_v46  ;;  %v9564_v63 = vsel %vm2925_vm1, %v12996_v59, 0.0  ;;  %v2525_v5 = vmul.f32 %v2524_v21, %v9382_v14  ;;  %v3596_v48 = vadd.f32 %v3588_v18, %v3560_v23  ;;  %v12999_v10 = vld [vmem:[#allocation43_spill] sm:$0xff]  ;;  %v13003_v59 = vld [vmem:[#allocation105_spill] sm:$0xff]  ;;  %v13006_v23 = vld [vmem:[#allocation110_spill] sm:$0xff] }
 0x2ec   :  { %v2362_v62 = vand.u32 2147483647, %v2361_v41  ;;  %v9568_v61 = vsel %vm2927_vm0, %v12997_v32, 0.0  ;;  %v2435_v19 = vadd.f32 %v2434_v17, %v9306_v51  ;;  %vm13001_vm10 = vnez %v13000_v13  ;;  %v13002_v46 = vld [vmem:[#allocation107_spill] sm:$0xff] }
 0x2ed   :  { %12998 = vst [vmem:[#allocation58_spill] sm:$0xff] %v9568_v61  ;;  %v3529_v56 = vsel %vm13001_vm10, %v9554_v55, %v12999_v10  ;;  %vm13004_vm8 = vnez %v13003_v59  ;;  %v13005_v21 = vld [vmem:[#allocation111_spill] sm:$0xff]  ;;  %vm13007_vm0 = vnez %v13006_v23  ;;  %v13008_v51 = vand.u32 2147483648, %v8801_v31  ;;  %3605 = vst [vmem:[#allocation2 + $0x58] sm:$0xff] %v3596_v48  ;;  %v13012_v48 = vld [vmem:[#allocation81_spill] sm:$0xff] }
 0x2ee   :  { %v3531_v41 = vsel %vm13004_vm8, %v9561_v49, %v13002_v46  ;;  %v3533_v18 = vsel %vm13007_vm0, %v9564_v63, %v13005_v21  ;;  %v2526_v32 = vadd.f32 -0.33333147, %v2525_v5  ;;  %vm13011_vm1 = vnez %v13010_v29 }
 0x2ef   :  { %v2364_v17 = vor.u32 %v13008_v51, %v2362_v62  ;;  %v3535_v10 = vsel %vm13011_vm1, %v9568_v61, %v13009_v24  ;;  %v3561_v13 = vadd.f32 %v3529_v56, %v9554_v55  ;;  %v2437_v28 = vsub.f32 1.5707964, %v2435_v19  ;;  %v13013_v56 = vld [vmem:[#allocation83_spill] sm:$0xff]  ;;  %v13016_v51 = vld [vmem:[#allocation132_spill] sm:$0xff] }
 0x2f0   :  { %v3563_v46 = vadd.f32 %v3531_v41, %v9561_v49  ;;  %v3565_v31 = vadd.f32 %v3533_v18, %v9564_v63  ;;  %v3567_v62 = vadd.f32 %v3535_v10, %v9568_v61  ;;  %v2527_v5 = vmul.f32 %v2526_v32, %v9382_v14  ;;  %v13015_v18 = vld [vmem:[#allocation126_spill] sm:$0xff]  ;;  %v13039_v61 = vld [vmem:[#allocation127_spill] sm:$0xff] }
 0x2f1   :  { %v2580_v24 = vmul.f32 2.864789, %v2364_v17  ;;  %vm2922_vm5 = vcmp.eq.f32.partialorder %v13012_v48, 1.0  ;;  %vm2924_vm14 = vcmp.eq.f32.partialorder %v13013_v56, 1.0  ;;  %vm13014_vm11 = vcmp.gt.f32.partialorder %v9153_v54, %v9150_v15  ;;  %v13017_v17 = vld [vmem:[#allocation117_spill] sm:$0xff] }
 0x2f2   :  { %v2438_v21 = vsel %vm13014_vm11, %v2437_v28, %v2435_v19  ;;  %v3581_v41 = vadd.f32 %v3563_v46, %v3561_v13  ;;  %vm2926_vm0 = vcmp.eq.f32.partialorder %v13015_v18, 1.0  ;;  %vm2928_vm8 = vcmp.eq.f32.partialorder %v13016_v51, 1.0  ;;  %v13022_v13 = vld [vmem:[#allocation118_spill] sm:$0xff]  ;;  %v13023_v51 = vld [vmem:[#allocation125_spill] sm:$0xff] }
 0x2f3   :  { %v2440_v14 = vsub.f32 3.1415927, %v2438_v21  ;;  %v2528_v32 = vmul.f32 %v2527_v5, %v9369_v6  ;;  %v2612_v10 = vfloor.f32 %v2580_v24  ;;  %v9612_v29 = vsel %vm2922_vm5, %v13017_v17, 0.0  ;;  %v13024_v18 = vld [vmem:[#allocation130_spill] sm:$0xff] }
 0x2f4   :  { %vm13018_vm9 = vcmp.ne.f32.partialorder %v8860_v33, %v8860_v33  ;;  %vm13019_vm11 = vcmp.ne.f32.partialorder %v8885_v37, %v8885_v37  ;;  %v3589_v19 = vadd.f32 %v3581_v41, %v3565_v31  ;;  %v9625_v46 = vsel %vm2924_vm14, %v13022_v13, 0.0  ;;  %v13038_v13 = vld [vmem:[#allocation128_spill] sm:$0xff] }
 0x2f5   :  { %vm9620_vm12 = vmor %vm13019_vm11, %vm13018_vm9  ;;  %v9628_v5 = vsel %vm2926_vm0, %v13023_v51, 0.0  ;;  %v9631_v17 = vsel %vm2928_vm8, %v13024_v18, 0.0  ;;  %vm13025_vm5 = vcmp.lt.f32.partialorder %v8885_v37, 0.0  ;;  %vm13026_vm1 = vcmp.eq.s32.totalorder %v9153_v54, inf  ;;  %v13032_v37 = vld [vmem:[#allocation82_spill] sm:$0xff] }
 0x2f6   :  { %v2441_v56 = vsel %vm13025_vm5, %v2440_v14, %v2438_v21  ;;  %vm13027_vm9 = vcmp.eq.s32.totalorder %v9150_v15, inf  ;;  %v2529_v48 = vadd.f32 %v2528_v32, %v9369_v6  ;;  %vm9640_vm10 = vcmp.eq.f32.partialorder %v2580_v24, %v2612_v10  ;;  %v13033_v21 = vld [vmem:[#allocation80_spill] sm:$0xff]  ;;  %v13035_v24 = vld [vmem:[#allocation123_spill] sm:$0xff]  ;;  %v13036_v14 = vld [vmem:[#allocation122_spill] sm:$0xff] }
 0x2f7   :  { %vm2454_vm11 = vmand %vm13027_vm9, %vm13026_vm1  ;;  %v13028_v31 = vmov 0  ;;  %vm2676_vm14 = vcmp.lt.f32.partialorder %v2612_v10, 0.0  ;;  %vm13031_vm0 = vcmp.eq.f32.partialorder %v8860_v33, 0.0  ;;  %v2708_v18 = vadd.f32 9.0, %v2612_v10 }
 0x2f8   :  { %v13029_v31 = vsel %vm9640_vm10, 4294967295, %v13028_v31  ;;  %v2445_v41 = vsel %vm13031_vm0, %v9229_v34, %v2441_v56  ;;  %v3597_v51 = vadd.f32 %v3589_v19, %v3567_v62  ;;  %vm13034_vm8 = vnez %v13033_v21  ;;  %v13041_v19 = vld [vmem:[#allocation133_spill] sm:$0xff] }
 0x2f9   :  { %13030 = vst [vmem:[#allocation30_spill] sm:$0xff] %v13029_v31  ;;  %v3530_v54 = vsel %vm13034_vm8, %v9612_v29, %v13032_v37  ;;  %v2449_v15 = vsel %vm9620_vm12, nan, %v2445_v41  ;;  %v2531_v6 = vsub.f32 1.5707964, %v2529_v48  ;;  %vm13037_vm1 = vnez %v13036_v14  ;;  %v13042_v37 = vld [vmem:[#allocation131_spill] sm:$0xff]  ;;  %v13077_v31 = vld [vmem:[#allocation29_spill] sm:$0xff] }
 0x2fa   :  { %v3532_v32 = vsel %vm13037_vm1, %v9625_v46, %v13035_v24  ;;  %vm13040_vm5 = vnez %v13039_v61  ;;  %v2455_v62 = vsel %vm2454_vm11, %v9234_v8, %v2449_v15  ;;  %v2740_v56 = vsel %vm2676_vm14, %v2708_v18, %v2612_v10  ;;  %3606 = vst [vmem:[#allocation2 + $0x60] sm:$0xff] %v3597_v51 }
 0x2fb   :  { %v3534_v34 = vsel %vm13040_vm5, %v9628_v5, %v13038_v13  ;;  %vm13043_vm9 = vnez %v13042_v37  ;;  %v3562_v41 = vadd.f32 %v3530_v54, %v9612_v29  ;;  %v2456_v21 = vand.u32 2147483647, %v2455_v62 }
 0x2fc   :  { %v3536_v28 = vsel %vm13043_vm9, %v9631_v17, %v13041_v19  ;;  %vm13044_vm12 = vcmp.gt.f32.partialorder %v9219_v27, %v9214_v2  ;;  %vm2772_vm0 = vcmp.ge.f32.partialorder %v2740_v56, 9.0  ;;  %v4800_v14 = vadd.f32 -9.0, %v2740_v56 }
 0x2fd   :  { %v2532_v24 = vsel %vm13044_vm12, %v2531_v6, %v2529_v48  ;;  %v3564_v13 = vadd.f32 %v3532_v32, %v9625_v46  ;;  %v3566_v8 = vadd.f32 %v3534_v34, %v9628_v5  ;;  %v3568_v18 = vadd.f32 %v3536_v28, %v9631_v17 }
 0x2fe   :  { %v2534_v61 = vsub.f32 3.1415927, %v2532_v24  ;;  %v13045_v51 = vand.u32 2147483648, %v8860_v33  ;;  %vm13046_vm11 = vcmp.ne.f32.partialorder %v8864_v11, %v8864_v11  ;;  %vm13047_vm14 = vcmp.ne.f32.partialorder %v8908_v25, %v8908_v25 }
 0x2ff   :  { %vm9681_vm9 = vmor %vm13047_vm14, %vm13046_vm11  ;;  %v9685_v54 = vsel %vm2772_vm0, %v4800_v14, %v2740_v56  ;;  %vm2929_vm12 = vcmp.eq.f32.partialorder %v8976_v9, 1.0  ;;  %vm2931_vm5 = vcmp.eq.f32.partialorder %v9062_v44, 1.0  ;;  %vm13051_vm1 = vcmp.lt.f32.partialorder %v8908_v25, 0.0 }
 0x300   :  { %v2458_v10 = vor.u32 %v13045_v51, %v2456_v21  ;;  %13050 = vst [vmem:[#allocation31_spill] sm:$0xff] %v9685_v54  ;;  %v2535_v33 = vsel %vm13051_vm1, %v2534_v61, %v2532_v24  ;;  %vm13052_vm8 = vcmp.eq.s32.totalorder %v9219_v27, inf  ;;  %vm13053_vm7 = vcmp.eq.s32.totalorder %v9214_v2, inf }
 0x301   :  { %vm2548_vm4 = vmand %vm13053_vm7, %vm13052_vm8  ;;  %vm2868_vm13 = vcmp.eq.f32.partialorder %v9685_v54, 0.0  ;;  %vm3380_vm11 = vcmp.eq.f32.partialorder %v9685_v54, 8.0  ;;  %v3582_v21 = vadd.f32 %v3564_v13, %v3562_v41  ;;  %vm13054_vm0 = vcmp.eq.f32.partialorder %v8864_v11, 0.0 }
 0x302   :  { %v2539_v15 = vsel %vm13054_vm0, %v9245_v50, %v2535_v33  ;;  %v2582_v6 = vmul.f32 2.864789, %v2458_v10  ;;  %v2900_v14 = vsel %vm2868_vm13, %v9132_v20, 0.0  ;;  %v9702_v25 = vsel %vm3380_vm11, %v9132_v20, 0.0 }
 0x303   :  { %13055 = vst [vmem:[#allocation66_spill] sm:$0xff] %v9702_v25  ;;  %v2543_v27 = vsel %vm9681_vm9, nan, %v2539_v15  ;;  %v3444_v2 = vsel %vm9640_vm10, %v2900_v14, %v9702_v25  ;;  %v3590_v61 = vadd.f32 %v3582_v21, %v3566_v8  ;;  %vm2933_vm7 = vcmp.eq.f32.partialorder %v9109_v0, 1.0 }
 0x304   :  { %v2549_v32 = vsel %vm2548_vm4, %v9252_v42, %v2543_v27  ;;  %v2614_v34 = vfloor.f32 %v2582_v6  ;;  %v3476_v50 = vadd.f32 %v3444_v2, %v2900_v14  ;;  %vm2935_vm8 = vcmp.eq.f32.partialorder %v9159_v26, 1.0  ;;  %v13064_v27 = vld [vmem:[#allocation145_spill] sm:$0xff] }
 0x305   :  { %v2550_v62 = vand.u32 2147483647, %v2549_v32  ;;  %v3598_v56 = vadd.f32 %v3590_v61, %v3568_v18  ;;  %v9715_v19 = vsel %vm2929_vm12, %v12839_v22, 0.0  ;;  %v9720_v28 = vsel %vm2931_vm5, %v12852_v3, 0.0 }
 0x306   :  { %vm9722_vm13 = vcmp.eq.f32.partialorder %v2582_v6, %v2614_v34  ;;  %v13056_v41 = vmov 0  ;;  %vm2678_vm4 = vcmp.lt.f32.partialorder %v2614_v34, 0.0  ;;  %v2710_v42 = vadd.f32 9.0, %v2614_v34  ;;  %v13063_v6 = vld [vmem:[#allocation147_spill] sm:$0xff] }
 0x307   :  { %v13057_v41 = vsel %vm9722_vm13, 4294967295, %v13056_v41  ;;  %v3488_v24 = vadd.f32 %v3476_v50, %v9501_v12  ;;  %v13059_v13 = vand.u32 2147483648, %v8864_v11  ;;  %3607 = vst [vmem:[#allocation2 + $0x68] sm:$0xff] %v3598_v56  ;;  %v9730_v18 = vsel %vm2933_vm7, %v12862_v43, 0.0  ;;  %v13061_v11 = vld [vmem:[#allocation142_spill] sm:$0xff]  ;;  %v13294_v33 = vld [vmem:[#allocation31_spill] sm:$0xff] }
 0x308   :  { %13058 = vst [vmem:[#allocation71_spill] sm:$0xff] %v13057_v41  ;;  %v9733_v51 = vsel %vm2935_vm8, %v12872_v7, 0.0  ;;  %v3537_v10 = vsel %vm9019_vm15, %v9715_v19, %v9026_v60  ;;  %v2742_v48 = vsel %vm2678_vm4, %v2710_v42, %v2614_v34  ;;  %v3539_v12 = vsel %vm9054_vm2, %v9720_v28, %v9072_v35 }
 0x309   :  { %v2552_v8 = vor.u32 %v13059_v13, %v2550_v62  ;;  %v3541_v15 = vsel %vm9119_vm6, %v9730_v18, %v13061_v11  ;;  %vm13065_vm1 = vnez %v13064_v27  ;;  %vm2774_vm5 = vcmp.ge.f32.partialorder %v2742_v48, 9.0  ;;  %v13200_v27 = vld [vmem:[#allocation34_spill] sm:$0xff] }
 0x30a   :  { %v3543_v2 = vsel %vm13065_vm1, %v9733_v51, %v13063_v6  ;;  %v4802_v32 = vadd.f32 -9.0, %v2742_v48  ;;  %v3569_v60 = vadd.f32 %v3537_v10, %v9715_v19  ;;  %v3571_v34 = vadd.f32 %v3539_v12, %v9720_v28 }
 0x30b   :  { %v2584_v61 = vmul.f32 2.864789, %v2552_v8  ;;  %v3573_v50 = vadd.f32 %v3541_v15, %v9730_v18  ;;  %v3575_v35 = vadd.f32 %v3543_v2, %v9733_v51  ;;  %vm2930_vm9 = vcmp.eq.f32.partialorder %v9466_v1, 1.0 }
 0x30c   :  { %v9756_v56 = vsel %vm2774_vm5, %v4802_v32, %v2742_v48  ;;  %vm2932_vm14 = vcmp.eq.f32.partialorder %v9685_v54, 1.0  ;;  %v9760_v42 = vsel %vm2930_vm9, %v9099_v39, 0.0  ;;  %v3583_v13 = vadd.f32 %v3571_v34, %v3569_v60  ;;  %v13071_v48 = vld [vmem:[#allocation149_spill] sm:$0xff] }
 0x30d   :  { %v2616_v62 = vfloor.f32 %v2584_v61  ;;  %13066 = vst [vmem:[#allocation88_spill] sm:$0xff] %v9756_v56  ;;  %13067 = vst [vmem:[#allocation90_spill] sm:$0xff] %v9760_v42  ;;  %vm2870_vm12 = vcmp.eq.f32.partialorder %v9756_v56, 0.0  ;;  %vm3382_vm11 = vcmp.eq.f32.partialorder %v9756_v56, 8.0  ;;  %vm2934_vm0 = vcmp.eq.f32.partialorder %v9756_v56, 1.0 }
 0x30e   :  { %v13068_v8 = vmov 0  ;;  %v2902_v12 = vsel %vm2870_vm12, %v13071_v48, 0.0  ;;  %v9771_v11 = vsel %vm3382_vm11, %v13071_v48, 0.0  ;;  %v3591_v15 = vadd.f32 %v3583_v13, %v3573_v50 }
 0x30f   :  { %vm9765_vm7 = vcmp.eq.f32.partialorder %v2584_v61, %v2616_v62  ;;  %vm2680_vm8 = vcmp.lt.f32.partialorder %v2616_v62, 0.0  ;;  %v2712_v10 = vadd.f32 9.0, %v2616_v62  ;;  %13072 = vst [vmem:[#allocation98_spill] sm:$0xff] %v9771_v11  ;;  %v9774_v6 = vsel %vm2932_vm14, %v9132_v20, 0.0 }
 0x310   :  { %v13069_v8 = vsel %vm9765_vm7, 4294967295, %v13068_v8  ;;  %13073 = vst [vmem:[#allocation43_spill] sm:$0xff] %v9774_v6  ;;  %v9777_v2 = vsel %vm2934_vm0, %v13071_v48, 0.0  ;;  %v3446_v61 = vsel %vm9722_vm13, %v2902_v12, %v9771_v11  ;;  %v3538_v60 = vsel %vm9438_vm3, %v9760_v42, %v9478_v57  ;;  %v13075_v48 = vld [vmem:[#allocation13_spill] sm:$0xff] }
 0x311   :  { %13070 = vst [vmem:[#allocation94_spill] sm:$0xff] %v13069_v8  ;;  %13074 = vst [vmem:[#allocation107_spill] sm:$0xff] %v9777_v2  ;;  %v2744_v32 = vsel %vm2680_vm8, %v2712_v10, %v2616_v62  ;;  %v3540_v34 = vsel %vm9640_vm10, %v9774_v6, %v2900_v14  ;;  %v3478_v13 = vadd.f32 %v3446_v61, %v2902_v12  ;;  %vm2969_vm5 = vcmp.eq.f32.partialorder %v13075_v48, 2.0  ;;  %v13086_v8 = vld [vmem:[#allocation14_spill] sm:$0xff] }
 0x312   :  { %vm2776_vm4 = vcmp.ge.f32.partialorder %v2744_v32, 9.0  ;;  %v4804_v50 = vadd.f32 -9.0, %v2744_v32  ;;  %v3599_v25 = vadd.f32 %v3591_v15, %v3575_v35  ;;  %v3542_v62 = vsel %vm9722_vm13, %v9777_v2, %v2902_v12  ;;  %v13078_v12 = vld [vmem:[#allocation150_spill] sm:$0xff] }
 0x313   :  { %v3570_v10 = vadd.f32 %v3538_v60, %v9760_v42  ;;  %v3572_v11 = vadd.f32 %v3540_v34, %v9774_v6  ;;  %v3496_v57 = vadd.f32 %v3488_v24, %v3478_v13  ;;  %v3574_v14 = vadd.f32 %v3542_v62, %v9777_v2  ;;  %v13083_v62 = vld [vmem:[#allocation16_spill] sm:$0xff]  ;;  %v13096_v6 = vld [vmem:[#allocation154_spill] sm:$0xff] }
 0x314   :  { %v9795_v38 = vsel %vm2776_vm4, %v4804_v50, %v2744_v32  ;;  %3608 = vst [vmem:[#allocation2 + $0x70] sm:$0xff] %v3599_v25  ;;  %vm2971_vm9 = vcmp.eq.f32.partialorder %v13077_v31, 2.0  ;;  %v13081_v25 = vld [vmem:[#allocation20_spill] sm:$0xff] }
 0x315   :  { %13076 = vst [vmem:[#allocation111_spill] sm:$0xff] %v9795_v38  ;;  %vm2872_vm14 = vcmp.eq.f32.partialorder %v9795_v38, 0.0  ;;  %vm3384_vm12 = vcmp.eq.f32.partialorder %v9795_v38, 8.0  ;;  %vm2936_vm11 = vcmp.eq.f32.partialorder %v9795_v38, 1.0  ;;  %v3584_v35 = vadd.f32 %v3572_v11, %v3570_v10  ;;  %v13082_v11 = vld [vmem:[#allocation34_spill] sm:$0xff] }
 0x316   :  { %v2904_v15 = vsel %vm2872_vm14, %v13078_v12, 0.0  ;;  %v9804_v61 = vsel %vm3384_vm12, %v13078_v12, 0.0  ;;  %v9807_v32 = vsel %vm2936_vm11, %v13078_v12, 0.0  ;;  %vm2973_vm0 = vcmp.eq.f32.partialorder %v13081_v25, 2.0  ;;  %v13084_v25 = vld [vmem:[#allocation27_spill] sm:$0xff] }
 0x317   :  { %13079 = vst [vmem:[#allocation115_spill] sm:$0xff] %v9804_v61  ;;  %13080 = vst [vmem:[#allocation82_spill] sm:$0xff] %v9807_v32  ;;  %v3448_v24 = vsel %vm9765_vm7, %v2904_v15, %v9804_v61  ;;  %v3544_v60 = vsel %vm9765_vm7, %v9807_v32, %v2904_v15  ;;  %v3592_v34 = vadd.f32 %v3584_v35, %v3574_v14  ;;  %vm2975_vm8 = vcmp.eq.f32.partialorder %v13082_v11, 2.0  ;;  %v13085_v61 = vld [vmem:[#allocation22_spill] sm:$0xff]  ;;  %v13087_v35 = vld [vmem:[#allocation151_spill] sm:$0xff] }
 0x318   :  { %v3480_v50 = vadd.f32 %v3448_v24, %v2904_v15  ;;  %v3576_v13 = vadd.f32 %v3544_v60, %v9807_v32  ;;  %v9821_v10 = vsel %vm2969_vm5, %v13083_v62, 0.0  ;;  %v9826_v41 = vsel %vm2971_vm9, %v13084_v25, 0.0  ;;  %v13088_v15 = vld [vmem:[#allocation21_spill] sm:$0xff]  ;;  %v13090_v60 = vld [vmem:[#allocation152_spill] sm:$0xff]  ;;  %v13091_v62 = vld [vmem:[#allocation18_spill] sm:$0xff] }
 0x319   :  { %v9829_v2 = vsel %vm2973_vm0, %v13085_v61, 0.0  ;;  %v9832_v14 = vsel %vm2975_vm8, %v13086_v8, 0.0  ;;  %vm13089_vm4 = vnez %v13088_v15  ;;  %vm13092_vm5 = vnez %v13091_v62  ;;  %v13093_v25 = vld [vmem:[#allocation153_spill] sm:$0xff]  ;;  %v13094_v32 = vld [vmem:[#allocation19_spill] sm:$0xff] }
 0x31a   :  { %v3610_v24 = vsel %vm13089_vm4, %v9821_v10, %v13087_v35  ;;  %v3612_v11 = vsel %vm13092_vm5, %v9826_v41, %v13090_v60  ;;  %v3504_v48 = vadd.f32 %v3496_v57, %v3480_v50  ;;  %v3600_v31 = vadd.f32 %v3592_v34, %v3576_v13  ;;  %v13097_v8 = vld [vmem:[#allocation33_spill] sm:$0xff]  ;;  %v13099_v57 = vld [vmem:[#allocation12_spill] sm:$0xff] }
 0x31b   :  { %vm13095_vm9 = vnez %v13094_v32  ;;  %vm13098_vm14 = vnez %v13097_v8  ;;  %v3642_v15 = vadd.f32 %v3610_v24, %v9821_v10  ;;  %v3644_v35 = vadd.f32 %v3612_v11, %v9826_v41  ;;  %v13100_v34 = vld [vmem:[#allocation49_spill] sm:$0xff]  ;;  %v13105_v24 = vld [vmem:[#allocation38_spill] sm:$0xff] }
 0x31c   :  { %v3614_v61 = vsel %vm13095_vm9, %v9829_v2, %v13093_v25  ;;  %v3616_v42 = vsel %vm13098_vm14, %v9832_v14, %v13096_v6  ;;  %3512 = vst [vmem:[#allocation2 + $0x38] sm:$0xff] %v3504_v48  ;;  %3609 = vst [vmem:[#allocation2 + $0x78] sm:$0xff] %v3600_v31  ;;  %vm2970_vm12 = vcmp.eq.f32.partialorder %v13099_v57, 2.0  ;;  %vm2972_vm11 = vcmp.eq.f32.partialorder %v13100_v34, 2.0  ;;  %v13101_v25 = vld [vmem:[#allocation53_spill] sm:$0xff]  ;;  %v13296_v30 = vld [vmem:[#allocation111_spill] sm:$0xff] }
 0x31d   :  { %v3646_v12 = vadd.f32 %v3614_v61, %v9829_v2  ;;  %v3648_v60 = vadd.f32 %v3616_v42, %v9832_v14  ;;  %vm2974_vm0 = vcmp.eq.f32.partialorder %v13101_v25, 2.0  ;;  %v13102_v50 = vld [vmem:[#allocation57_spill] sm:$0xff]  ;;  %v3674_v13 = vadd.f32 %v3644_v35, %v3642_v15  ;;  %v13107_v61 = vld [vmem:[#allocation39_spill] sm:$0xff]  ;;  %v13109_v42 = vld [vmem:[#allocation40_spill] sm:$0xff] }
 0x31e   :  { %vm2976_vm8 = vcmp.eq.f32.partialorder %v13102_v50, 2.0  ;;  %v13103_v6 = vld [vmem:[#allocation37_spill] sm:$0xff]  ;;  %v9862_v11 = vsel %vm2972_vm11, %v13105_v24, 0.0  ;;  %v9865_v32 = vsel %vm2974_vm0, %v13107_v61, 0.0  ;;  %v13113_v15 = vld [vmem:[#allocation48_spill] sm:$0xff] }
 0x31f   :  { %v9859_v8 = vsel %vm2970_vm12, %v13103_v6, 0.0  ;;  %13106 = vst [vmem:[#allocation128_spill] sm:$0xff] %v9862_v11  ;;  %13108 = vst [vmem:[#allocation133_spill] sm:$0xff] %v9865_v32  ;;  %v9868_v31 = vsel %vm2976_vm8, %v13109_v42, 0.0  ;;  %v13111_v48 = vld [vmem:[#allocation9_spill] sm:$0xff]  ;;  %vm13114_vm9 = vnez %v13113_v15  ;;  %v13115_v24 = vld [vmem:[#allocation52_spill] sm:$0xff]  ;;  %v3682_v61 = vadd.f32 %v3674_v13, %v3646_v12 }
 0x320   :  { %13104 = vst [vmem:[#allocation123_spill] sm:$0xff] %v9859_v8  ;;  %13110 = vst [vmem:[#allocation142_spill] sm:$0xff] %v9868_v31  ;;  %vm13112_vm14 = vnez %v13111_v48  ;;  %v3613_v35 = vsel %vm13114_vm9, %v9862_v11, %v9313_v40  ;;  %vm13116_vm12 = vnez %v13115_v24  ;;  %v13117_v42 = vld [vmem:[#allocation56_spill] sm:$0xff]  ;;  %v13120_v57 = vld [vmem:[#allocation25_spill] sm:$0xff] }
 0x321   :  { %v3611_v25 = vsel %vm13112_vm14, %v9859_v8, %v9310_v53  ;;  %v3615_v6 = vsel %vm13116_vm12, %v9865_v32, %v9316_v16  ;;  %vm13118_vm11 = vnez %v13117_v42  ;;  %v3645_v53 = vadd.f32 %v3613_v35, %v9862_v11  ;;  %v13119_v40 = vld [vmem:[#allocation44_spill] sm:$0xff]  ;;  %v13122_v13 = vld [vmem:[#allocation70_spill] sm:$0xff]  ;;  %v13142_v11 = vld [vmem:[#allocation97_spill] sm:$0xff] }
 0x322   :  { %v3617_v50 = vsel %vm13118_vm11, %v9868_v31, %v9323_v47  ;;  %v3643_v34 = vadd.f32 %v3611_v25, %v9859_v8  ;;  %v3647_v48 = vadd.f32 %v3615_v6, %v9865_v32  ;;  %vm2977_vm0 = vcmp.eq.f32.partialorder %v13119_v40, 2.0  ;;  %v13121_v12 = vld [vmem:[#allocation64_spill] sm:$0xff]  ;;  %v13124_v25 = vld [vmem:[#allocation61_spill] sm:$0xff]  ;;  %v13125_v35 = vld [vmem:[#allocation62_spill] sm:$0xff] }
 0x323   :  { %v3649_v15 = vadd.f32 %v3617_v50, %v9868_v31  ;;  %vm2979_vm8 = vcmp.eq.f32.partialorder %v13120_v57, 2.0  ;;  %v3690_v24 = vadd.f32 %v3682_v61, %v3648_v60  ;;  %vm2981_vm12 = vcmp.eq.f32.partialorder %v13121_v12, 2.0  ;;  %v13123_v42 = vld [vmem:[#allocation60_spill] sm:$0xff]  ;;  %v13127_v60 = vld [vmem:[#allocation17_spill] sm:$0xff]  ;;  %v13136_v40 = vld [vmem:[#allocation35_spill] sm:$0xff] }
 0x324   :  { %v3675_v16 = vadd.f32 %v3645_v53, %v3643_v34  ;;  %vm2983_vm9 = vcmp.eq.f32.partialorder %v13122_v13, 2.0  ;;  %v9895_v47 = vsel %vm2977_vm0, %v13123_v42, 0.0  ;;  %v9898_v8 = vsel %vm2979_vm8, %v13124_v25, 0.0  ;;  %v13126_v50 = vld [vmem:[#allocation68_spill] sm:$0xff]  ;;  %v13128_v34 = vld [vmem:[#allocation45_spill] sm:$0xff]  ;;  %v13130_v53 = vld [vmem:[#allocation23_spill] sm:$0xff] }
 0x325   :  { %v9901_v6 = vsel %vm2981_vm12, %v13125_v35, 0.0  ;;  %v9904_v31 = vsel %vm2983_vm9, %v13126_v50, 0.0  ;;  %3699 = vst [vmem:[#allocation2 + $0x80] sm:$0xff] %v3690_v24  ;;  %vm13129_vm11 = vnez %v13128_v34  ;;  %v13131_v42 = vld [vmem:[#allocation46_spill] sm:$0xff]  ;;  %v13133_v25 = vld [vmem:[#allocation15_spill] sm:$0xff]  ;;  %v13134_v12 = vld [vmem:[#allocation65_spill] sm:$0xff] }
 0x326   :  { %v3683_v57 = vadd.f32 %v3675_v16, %v3647_v48  ;;  %v3618_v61 = vsel %vm13129_vm11, %v9895_v47, %v13127_v60  ;;  %vm13132_vm0 = vnez %v13131_v42  ;;  %vm13135_vm12 = vnez %v13134_v12  ;;  %v13137_v50 = vld [vmem:[#allocation69_spill] sm:$0xff] }
 0x327   :  { %v3620_v13 = vsel %vm13132_vm0, %v9898_v8, %v13130_v53  ;;  %v3622_v35 = vsel %vm13135_vm12, %v9901_v6, %v13133_v25  ;;  %vm13138_vm9 = vnez %v13137_v50  ;;  %v3650_v48 = vadd.f32 %v3618_v61, %v9895_v47  ;;  %v13139_v53 = vld [vmem:[#allocation84_spill] sm:$0xff]  ;;  %v13140_v32 = vld [vmem:[#allocation85_spill] sm:$0xff]  ;;  %v13145_v61 = vld [vmem:[#allocation74_spill] sm:$0xff] }
 0x328   :  { %v3624_v24 = vsel %vm13138_vm9, %v9904_v31, %v13136_v40  ;;  %v3652_v16 = vadd.f32 %v3620_v13, %v9898_v8  ;;  %v3654_v60 = vadd.f32 %v3622_v35, %v9901_v6  ;;  %v3691_v34 = vadd.f32 %v3683_v57, %v3649_v15  ;;  %v13141_v25 = vld [vmem:[#allocation92_spill] sm:$0xff]  ;;  %v13143_v50 = vld [vmem:[#allocation73_spill] sm:$0xff]  ;;  %v13146_v35 = vld [vmem:[#allocation75_spill] sm:$0xff] }
 0x329   :  { %v3656_v42 = vadd.f32 %v3624_v24, %v9904_v31  ;;  %vm2978_vm8 = vcmp.eq.f32.partialorder %v13139_v53, 2.0  ;;  %vm2980_vm0 = vcmp.eq.f32.partialorder %v13140_v32, 2.0  ;;  %vm2982_vm12 = vcmp.eq.f32.partialorder %v13141_v25, 2.0  ;;  %v13147_v15 = vld [vmem:[#allocation76_spill] sm:$0xff]  ;;  %v13158_v32 = vld [vmem:[#allocation114_spill] sm:$0xff] }
 0x32a   :  { %v3676_v12 = vadd.f32 %v3652_v16, %v3650_v48  ;;  %vm2984_vm11 = vcmp.eq.f32.partialorder %v13142_v11, 2.0  ;;  %v9931_v40 = vsel %vm2978_vm8, %v13143_v50, 0.0  ;;  %3700 = vst [vmem:[#allocation2 + $0x88] sm:$0xff] %v3691_v34  ;;  %v9934_v13 = vsel %vm2980_vm0, %v13145_v61, 0.0  ;;  %v13148_v48 = vld [vmem:[#allocation86_spill] sm:$0xff]  ;;  %v13150_v50 = vld [vmem:[#allocation87_spill] sm:$0xff] }
 0x32b   :  { %13144 = vst [vmem:[#allocation147_spill] sm:$0xff] %v9931_v40  ;;  %v9937_v57 = vsel %vm2982_vm12, %v13146_v35, 0.0  ;;  %v9940_v24 = vsel %vm2984_vm11, %v13147_v15, 0.0  ;;  %vm13149_vm9 = vnez %v13148_v48  ;;  %vm13151_vm8 = vnez %v13150_v50  ;;  %v13152_v61 = vld [vmem:[#allocation93_spill] sm:$0xff]  ;;  %v13156_v48 = vld [vmem:[#allocation106_spill] sm:$0xff] }
 0x32c   :  { %v3619_v16 = vsel %vm13149_vm9, %v9931_v40, %v9452_v36  ;;  %v3684_v25 = vadd.f32 %v3676_v12, %v3654_v60  ;;  %v3621_v34 = vsel %vm13151_vm8, %v9934_v13, %v9459_v52  ;;  %vm13153_vm0 = vnez %v13152_v61  ;;  %v13155_v52 = vld [vmem:[#allocation78_spill] sm:$0xff]  ;;  %v13157_v61 = vld [vmem:[#allocation109_spill] sm:$0xff] }
 0x32d   :  { %v3623_v35 = vsel %vm13153_vm0, %v9937_v57, %v9462_v58  ;;  %vm13154_vm11 = vnez %v12977_v45  ;;  %v3651_v11 = vadd.f32 %v3619_v16, %v9931_v40  ;;  %v3653_v36 = vadd.f32 %v3621_v34, %v9934_v13  ;;  %v13159_v45 = vld [vmem:[#allocation100_spill] sm:$0xff]  ;;  %v13161_v16 = vld [vmem:[#allocation101_spill] sm:$0xff] }
 0x32e   :  { %v3625_v15 = vsel %vm13154_vm11, %v9940_v24, %v9469_v4  ;;  %v3655_v12 = vadd.f32 %v3623_v35, %v9937_v57  ;;  %v3692_v50 = vadd.f32 %v3684_v25, %v3656_v42  ;;  %vm2985_vm12 = vcmp.eq.f32.partialorder %v13155_v52, 2.0  ;;  %v13162_v35 = vld [vmem:[#allocation102_spill] sm:$0xff]  ;;  %v13163_v42 = vld [vmem:[#allocation103_spill] sm:$0xff] }
 0x32f   :  { %v3657_v60 = vadd.f32 %v3625_v15, %v9940_v24  ;;  %vm2987_vm8 = vcmp.eq.f32.partialorder %v13156_v48, 2.0  ;;  %vm2989_vm0 = vcmp.eq.f32.partialorder %v13157_v61, 2.0  ;;  %v3677_v58 = vadd.f32 %v3653_v36, %v3651_v11  ;;  %v13164_v15 = vld [vmem:[#allocation79_spill] sm:$0xff] }
 0x330   :  { %vm2991_vm9 = vcmp.eq.f32.partialorder %v13158_v32, 2.0  ;;  %v9967_v4 = vsel %vm2985_vm12, %v13159_v45, 0.0  ;;  %v9970_v40 = vsel %vm2987_vm8, %v13161_v16, 0.0  ;;  %3701 = vst [vmem:[#allocation2 + $0x90] sm:$0xff] %v3692_v50  ;;  %v9973_v34 = vsel %vm2989_vm0, %v13162_v35, 0.0  ;;  %v13168_v35 = vld [vmem:[#allocation58_spill] sm:$0xff] }
 0x331   :  { %13160 = vst [vmem:[#allocation151_spill] sm:$0xff] %v9967_v4  ;;  %v9976_v25 = vsel %vm2991_vm9, %v13163_v42, 0.0  ;;  %vm13165_vm11 = vnez %v13164_v15  ;;  %vm13166_vm12 = vnez %v13003_v59  ;;  %v3685_v45 = vadd.f32 %v3677_v58, %v3655_v12  ;;  %v13169_v42 = vld [vmem:[#allocation113_spill] sm:$0xff]  ;;  %v13172_v58 = vld [vmem:[#allocation83_spill] sm:$0xff] }
 0x332   :  { %v3626_v11 = vsel %vm13165_vm11, %v9967_v4, %v9554_v55  ;;  %v3628_v36 = vsel %vm13166_vm12, %v9970_v40, %v9561_v49  ;;  %vm13167_vm8 = vnez %v13006_v23  ;;  %vm13170_vm9 = vnez %v13169_v42  ;;  %v13171_v49 = vld [vmem:[#allocation81_spill] sm:$0xff]  ;;  %v13173_v23 = vld [vmem:[#allocation126_spill] sm:$0xff] }
 0x333   :  { %v3630_v50 = vsel %vm13167_vm8, %v9973_v34, %v9564_v63  ;;  %v3632_v16 = vsel %vm13170_vm9, %v9976_v25, %v13168_v35  ;;  %v3658_v32 = vadd.f32 %v3626_v11, %v9967_v4  ;;  %v3660_v55 = vadd.f32 %v3628_v36, %v9970_v40  ;;  %v13174_v63 = vld [vmem:[#allocation132_spill] sm:$0xff]  ;;  %v13175_v42 = vld [vmem:[#allocation117_spill] sm:$0xff]  ;;  %v13176_v11 = vld [vmem:[#allocation118_spill] sm:$0xff] }
 0x334   :  { %v3662_v15 = vadd.f32 %v3630_v50, %v9973_v34  ;;  %v3664_v59 = vadd.f32 %v3632_v16, %v9976_v25  ;;  %vm2986_vm0 = vcmp.eq.f32.partialorder %v13171_v49, 2.0  ;;  %v3693_v12 = vadd.f32 %v3685_v45, %v3657_v60  ;;  %v13177_v36 = vld [vmem:[#allocation125_spill] sm:$0xff]  ;;  %v13178_v16 = vld [vmem:[#allocation130_spill] sm:$0xff]  ;;  %v13179_v45 = vld [vmem:[#allocation80_spill] sm:$0xff] }
 0x335   :  { %vm2988_vm12 = vcmp.eq.f32.partialorder %v13172_v58, 2.0  ;;  %vm2990_vm8 = vcmp.eq.f32.partialorder %v13173_v23, 2.0  ;;  %vm2992_vm11 = vcmp.eq.f32.partialorder %v13174_v63, 2.0  ;;  %v3678_v61 = vadd.f32 %v3660_v55, %v3658_v32  ;;  %v13181_v32 = vld [vmem:[#allocation122_spill] sm:$0xff] }
 0x336   :  { %v10003_v35 = vsel %vm2986_vm0, %v13175_v42, 0.0  ;;  %v10006_v4 = vsel %vm2988_vm12, %v13176_v11, 0.0  ;;  %v10009_v50 = vsel %vm2990_vm8, %v13177_v36, 0.0  ;;  %3702 = vst [vmem:[#allocation2 + $0x98] sm:$0xff] %v3693_v12  ;;  %v10012_v49 = vsel %vm2992_vm11, %v13178_v16, 0.0  ;;  %v13183_v11 = vld [vmem:[#allocation127_spill] sm:$0xff] }
 0x337   :  { %vm13180_vm9 = vnez %v13179_v45  ;;  %vm13182_vm0 = vnez %v13181_v32  ;;  %vm13184_vm12 = vnez %v13183_v11  ;;  %v3686_v42 = vadd.f32 %v3678_v61, %v3662_v15 }
 0x338   :  { %v3627_v60 = vsel %vm13180_vm9, %v10003_v35, %v9612_v29  ;;  %v3629_v55 = vsel %vm13182_vm0, %v10006_v4, %v9625_v46  ;;  %v3631_v36 = vsel %vm13184_vm12, %v10009_v50, %v9628_v5  ;;  %vm13185_vm11 = vnez %v13042_v37  ;;  %v13515_v37 = vld [vmem:[#allocation111_spill] sm:$0xff] }
 0x339   :  { %v3633_v12 = vsel %vm13185_vm11, %v10012_v49, %v9631_v17  ;;  %v3659_v16 = vadd.f32 %v3627_v60, %v10003_v35  ;;  %v3661_v29 = vadd.f32 %v3629_v55, %v10006_v4  ;;  %v3663_v45 = vadd.f32 %v3631_v36, %v10009_v50 }
 0x33a   :  { %v3665_v32 = vadd.f32 %v3633_v12, %v10012_v49  ;;  %vm2993_vm8 = vcmp.eq.f32.partialorder %v8976_v9, 2.0  ;;  %vm2995_vm0 = vcmp.eq.f32.partialorder %v9062_v44, 2.0  ;;  %v3694_v46 = vadd.f32 %v3686_v42, %v3664_v59 }
 0x33b   :  { %v3679_v5 = vadd.f32 %v3661_v29, %v3659_v16  ;;  %vm2997_vm12 = vcmp.eq.f32.partialorder %v9109_v0, 2.0  ;;  %vm2999_vm9 = vcmp.eq.f32.partialorder %v9159_v26, 2.0  ;;  %v10039_v17 = vsel %vm2993_vm8, %v12839_v22, 0.0 }
 0x33c   :  { %v10042_v61 = vsel %vm2995_vm0, %v12852_v3, 0.0  ;;  %v10045_v15 = vsel %vm2997_vm12, %v12862_v43, 0.0  ;;  %v10048_v36 = vsel %vm2999_vm9, %v12872_v7, 0.0  ;;  %3703 = vst [vmem:[#allocation2 + $0xa0] sm:$0xff] %v3694_v46  ;;  %v3634_v59 = vsel %vm9019_vm15, %v10039_v17, %v9715_v19 }
 0x33d   :  { %v3687_v60 = vadd.f32 %v3679_v5, %v3663_v45  ;;  %v3636_v42 = vsel %vm9054_vm2, %v10042_v61, %v9720_v28  ;;  %v3638_v16 = vsel %vm9119_vm6, %v10045_v15, %v9730_v18  ;;  %v3640_v45 = vsel %vm13065_vm1, %v10048_v36, %v9733_v51  ;;  %v13187_v5 = vld [vmem:[#allocation149_spill] sm:$0xff] }
 0x33e   :  { %v3666_v55 = vadd.f32 %v3634_v59, %v10039_v17  ;;  %v3668_v12 = vadd.f32 %v3636_v42, %v10042_v61  ;;  %v3670_v19 = vadd.f32 %v3638_v16, %v10045_v15  ;;  %v3672_v46 = vadd.f32 %v3640_v45, %v10048_v36  ;;  %v13189_v42 = vld [vmem:[#allocation90_spill] sm:$0xff]  ;;  %v13198_v16 = vld [vmem:[#allocation29_spill] sm:$0xff] }
 0x33f   :  { %v3695_v29 = vadd.f32 %v3687_v60, %v3665_v32  ;;  %vm2994_vm9 = vcmp.eq.f32.partialorder %v9466_v1, 2.0  ;;  %vm2996_vm0 = vcmp.eq.f32.partialorder %v9685_v54, 2.0  ;;  %vm2998_vm12 = vcmp.eq.f32.partialorder %v9756_v56, 2.0  ;;  %v13188_v60 = vld [vmem:[#allocation150_spill] sm:$0xff] }
 0x340   :  { %v3680_v28 = vadd.f32 %v3668_v12, %v3666_v55  ;;  %vm3000_vm8 = vcmp.eq.f32.partialorder %v9795_v38, 2.0  ;;  %v10075_v18 = vsel %vm2994_vm9, %v9099_v39, 0.0  ;;  %v10078_v51 = vsel %vm2996_vm0, %v9132_v20, 0.0  ;;  %v13191_v12 = vld [vmem:[#allocation43_spill] sm:$0xff]  ;;  %v13195_v56 = vld [vmem:[#allocation82_spill] sm:$0xff]  ;;  %v13199_v20 = vld [vmem:[#allocation20_spill] sm:$0xff] }
 0x341   :  { %13186 = vst [vmem:[#allocation152_spill] sm:$0xff] %v10075_v18  ;;  %3704 = vst [vmem:[#allocation2 + $0xa8] sm:$0xff] %v3695_v29  ;;  %v10081_v32 = vsel %vm2998_vm12, %v13187_v5, 0.0  ;;  %v10084_v59 = vsel %vm3000_vm8, %v13188_v60, 0.0  ;;  %v3635_v45 = vsel %vm9438_vm3, %v10075_v18, %v13189_v42  ;;  %v3637_v29 = vsel %vm9640_vm10, %v10078_v51, %v13191_v12  ;;  %v13193_v38 = vld [vmem:[#allocation107_spill] sm:$0xff]  ;;  %v13197_v12 = vld [vmem:[#allocation13_spill] sm:$0xff] }
 0x342   :  { %v3688_v55 = vadd.f32 %v3680_v28, %v3670_v19  ;;  %v3639_v5 = vsel %vm9722_vm13, %v10081_v32, %v13193_v38  ;;  %v3641_v54 = vsel %vm9765_vm7, %v10084_v59, %v13195_v56  ;;  %v3667_v1 = vadd.f32 %v3635_v45, %v10075_v18  ;;  %v13201_v60 = vld [vmem:[#allocation16_spill] sm:$0xff]  ;;  %v13203_v45 = vld [vmem:[#allocation27_spill] sm:$0xff] }
 0x343   :  { %v3669_v42 = vadd.f32 %v3637_v29, %v10078_v51  ;;  %v3671_v19 = vadd.f32 %v3639_v5, %v10081_v32  ;;  %v3673_v28 = vadd.f32 %v3641_v54, %v10084_v59  ;;  %vm3033_vm9 = vcmp.eq.f32.partialorder %v13197_v12, 3.0  ;;  %v13205_v5 = vld [vmem:[#allocation22_spill] sm:$0xff] }
 0x344   :  { %v3696_v39 = vadd.f32 %v3688_v55, %v3672_v46  ;;  %vm3035_vm0 = vcmp.eq.f32.partialorder %v13198_v16, 3.0  ;;  %vm3037_vm12 = vcmp.eq.f32.partialorder %v13199_v20, 3.0  ;;  %vm3039_vm8 = vcmp.eq.f32.partialorder %v13200_v27, 3.0  ;;  %v13207_v54 = vld [vmem:[#allocation14_spill] sm:$0xff] }
 0x345   :  { %v3681_v38 = vadd.f32 %v3669_v42, %v3667_v1  ;;  %v10111_v56 = vsel %vm3033_vm9, %v13201_v60, 0.0  ;;  %v10114_v18 = vsel %vm3035_vm0, %v13203_v45, 0.0  ;;  %v10117_v29 = vsel %vm3037_vm12, %v13205_v5, 0.0 }
 0x346   :  { %13202 = vst [vmem:[#allocation153_spill] sm:$0xff] %v10111_v56  ;;  %13204 = vst [vmem:[#allocation154_spill] sm:$0xff] %v10114_v18  ;;  %v10120_v46 = vsel %vm3039_vm8, %v13207_v54, 0.0  ;;  %v3707_v1 = vsel %vm13089_vm4, %v10111_v56, %v9821_v10  ;;  %v3709_v42 = vsel %vm13092_vm5, %v10114_v18, %v9826_v41  ;;  %v13212_v54 = vld [vmem:[#allocation33_spill] sm:$0xff]  ;;  %v13214_v41 = vld [vmem:[#allocation12_spill] sm:$0xff] }
 0x347   :  { %3705 = vst [vmem:[#allocation2 + $0xb0] sm:$0xff] %v3696_v39  ;;  %13206 = vst [vmem:[#allocation17_spill] sm:$0xff] %v10117_v29  ;;  %v3689_v60 = vadd.f32 %v3681_v38, %v3671_v19  ;;  %v13210_v39 = vld [vmem:[#allocation19_spill] sm:$0xff]  ;;  %vm13213_vm0 = vnez %v13212_v54  ;;  %v3739_v27 = vadd.f32 %v3707_v1, %v10111_v56  ;;  %v3741_v10 = vadd.f32 %v3709_v42, %v10114_v18  ;;  %v13215_v38 = vld [vmem:[#allocation49_spill] sm:$0xff] }
 0x348   :  { %13208 = vst [vmem:[#allocation23_spill] sm:$0xff] %v10120_v46  ;;  %vm13211_vm9 = vnez %v13210_v39  ;;  %v3713_v45 = vsel %vm13213_vm0, %v10120_v46, %v9832_v14  ;;  %vm3034_vm12 = vcmp.eq.f32.partialorder %v13214_v41, 3.0  ;;  %vm3036_vm8 = vcmp.eq.f32.partialorder %v13215_v38, 3.0  ;;  %v13216_v39 = vld [vmem:[#allocation53_spill] sm:$0xff]  ;;  %v13220_v1 = vld [vmem:[#allocation38_spill] sm:$0xff]  ;;  %v13221_v42 = vld [vmem:[#allocation39_spill] sm:$0xff] }
 0x349   :  { %v3711_v5 = vsel %vm13211_vm9, %v10117_v29, %v9829_v2  ;;  %v3745_v62 = vadd.f32 %v3713_v45, %v10120_v46  ;;  %v3697_v19 = vadd.f32 %v3689_v60, %v3673_v28  ;;  %vm3038_vm9 = vcmp.eq.f32.partialorder %v13216_v39, 3.0  ;;  %v13217_v2 = vld [vmem:[#allocation57_spill] sm:$0xff]  ;;  %v13222_v45 = vld [vmem:[#allocation40_spill] sm:$0xff]  ;;  %v13224_v60 = vld [vmem:[#allocation123_spill] sm:$0xff] }
 0x34a   :  { %v3743_v55 = vadd.f32 %v3711_v5, %v10117_v29  ;;  %vm3040_vm5 = vcmp.eq.f32.partialorder %v13217_v2, 3.0  ;;  %v3771_v20 = vadd.f32 %v3741_v10, %v3739_v27  ;;  %v13218_v54 = vld [vmem:[#allocation37_spill] sm:$0xff]  ;;  %v10150_v56 = vsel %vm3036_vm8, %v13220_v1, 0.0  ;;  %v13226_v2 = vld [vmem:[#allocation128_spill] sm:$0xff] }
 0x34b   :  { %v10147_v14 = vsel %vm3034_vm12, %v13218_v54, 0.0  ;;  %v10153_v5 = vsel %vm3038_vm9, %v13221_v42, 0.0  ;;  %3706 = vst [vmem:[#allocation2 + $0xb8] sm:$0xff] %v3697_v19  ;;  %v10156_v41 = vsel %vm3040_vm5, %v13222_v45, 0.0  ;;  %v13227_v27 = vld [vmem:[#allocation48_spill] sm:$0xff]  ;;  %v13229_v54 = vld [vmem:[#allocation133_spill] sm:$0xff] }
 0x34c   :  { %13219 = vst [vmem:[#allocation15_spill] sm:$0xff] %v10147_v14  ;;  %13223 = vst [vmem:[#allocation35_spill] sm:$0xff] %v10156_v41  ;;  %v3708_v39 = vsel %vm13112_vm14, %v10147_v14, %v13224_v60  ;;  %vm13228_vm12 = vnez %v13227_v27  ;;  %v13230_v1 = vld [vmem:[#allocation52_spill] sm:$0xff]  ;;  %v3779_v38 = vadd.f32 %v3771_v20, %v3743_v55  ;;  %v13232_v19 = vld [vmem:[#allocation142_spill] sm:$0xff] }
 0x34d   :  { %v3710_v10 = vsel %vm13228_vm12, %v10150_v56, %v13226_v2  ;;  %vm13231_vm8 = vnez %v13230_v1  ;;  %v13233_v45 = vld [vmem:[#allocation56_spill] sm:$0xff]  ;;  %v3740_v29 = vadd.f32 %v3708_v39, %v10147_v14  ;;  %v13236_v18 = vld [vmem:[#allocation25_spill] sm:$0xff]  ;;  %v13238_v55 = vld [vmem:[#allocation70_spill] sm:$0xff] }
 0x34e   :  { %v3712_v42 = vsel %vm13231_vm8, %v10153_v5, %v13229_v54  ;;  %vm13234_vm5 = vnez %v13233_v45  ;;  %v3742_v60 = vadd.f32 %v3710_v10, %v10150_v56  ;;  %v13235_v2 = vld [vmem:[#allocation44_spill] sm:$0xff]  ;;  %vm3043_vm12 = vcmp.eq.f32.partialorder %v13236_v18, 3.0  ;;  %v13240_v39 = vld [vmem:[#allocation61_spill] sm:$0xff]  ;;  %v13241_v10 = vld [vmem:[#allocation62_spill] sm:$0xff] }
 0x34f   :  { %v3714_v46 = vsel %vm13234_vm5, %v10156_v41, %v13232_v19  ;;  %v3744_v28 = vadd.f32 %v3712_v42, %v10153_v5  ;;  %vm3041_vm9 = vcmp.eq.f32.partialorder %v13235_v2, 3.0  ;;  %v3787_v1 = vadd.f32 %v3779_v38, %v3745_v62  ;;  %v13237_v20 = vld [vmem:[#allocation64_spill] sm:$0xff]  ;;  %v13243_v62 = vld [vmem:[#allocation45_spill] sm:$0xff]  ;;  %v13245_v38 = vld [vmem:[#allocation46_spill] sm:$0xff] }
 0x350   :  { %v3746_v27 = vadd.f32 %v3714_v46, %v10156_v41  ;;  %v3772_v54 = vadd.f32 %v3742_v60, %v3740_v29  ;;  %vm3045_vm8 = vcmp.eq.f32.partialorder %v13237_v20, 3.0  ;;  %vm3047_vm14 = vcmp.eq.f32.partialorder %v13238_v55, 3.0  ;;  %v13239_v45 = vld [vmem:[#allocation60_spill] sm:$0xff] }
 0x351   :  { %v10183_v19 = vsel %vm3041_vm9, %v13239_v45, 0.0  ;;  %v10186_v14 = vsel %vm3043_vm12, %v13240_v39, 0.0  ;;  %v10189_v42 = vsel %vm3045_vm8, %v13241_v10, 0.0  ;;  %v13242_v46 = vld [vmem:[#allocation68_spill] sm:$0xff]  ;;  %3796 = vst [vmem:[#allocation2 + $0xc0] sm:$0xff] %v3787_v1  ;;  %vm13244_vm5 = vnez %v13243_v62  ;;  %v13247_v39 = vld [vmem:[#allocation65_spill] sm:$0xff] }
 0x352   :  { %v10192_v41 = vsel %vm3047_vm14, %v13242_v46, 0.0  ;;  %v3780_v18 = vadd.f32 %v3772_v54, %v3744_v28  ;;  %v3715_v29 = vsel %vm13244_vm5, %v10183_v19, %v9895_v47  ;;  %vm13246_vm9 = vnez %v13245_v38  ;;  %v13249_v46 = vld [vmem:[#allocation69_spill] sm:$0xff] }
 0x353   :  { %v3717_v60 = vsel %vm13246_vm9, %v10186_v14, %v9898_v8  ;;  %vm13248_vm12 = vnez %v13247_v39  ;;  %vm13250_vm14 = vnez %v13249_v46  ;;  %v3747_v28 = vadd.f32 %v3715_v29, %v10183_v19  ;;  %v13251_v8 = vld [vmem:[#allocation85_spill] sm:$0xff]  ;;  %v13255_v29 = vld [vmem:[#allocation74_spill] sm:$0xff] }
 0x354   :  { %v3719_v10 = vsel %vm13248_vm12, %v10189_v42, %v9901_v6  ;;  %v3721_v1 = vsel %vm13250_vm14, %v10192_v41, %v9904_v31  ;;  %v3749_v54 = vadd.f32 %v3717_v60, %v10186_v14  ;;  %v3788_v62 = vadd.f32 %v3780_v18, %v3746_v27  ;;  %v13252_v6 = vld [vmem:[#allocation92_spill] sm:$0xff]  ;;  %v13253_v45 = vld [vmem:[#allocation97_spill] sm:$0xff] }
 0x355   :  { %v3751_v47 = vadd.f32 %v3719_v10, %v10189_v42  ;;  %v3753_v38 = vadd.f32 %v3721_v1, %v10192_v41  ;;  %vm3042_vm8 = vcmp.eq.f32.partialorder %v13139_v53, 3.0  ;;  %vm3044_vm9 = vcmp.eq.f32.partialorder %v13251_v8, 3.0  ;;  %v13254_v46 = vld [vmem:[#allocation73_spill] sm:$0xff]  ;;  %v13256_v10 = vld [vmem:[#allocation75_spill] sm:$0xff]  ;;  %v13257_v27 = vld [vmem:[#allocation76_spill] sm:$0xff] }
 0x356   :  { %v3773_v39 = vadd.f32 %v3749_v54, %v3747_v28  ;;  %vm3046_vm12 = vcmp.eq.f32.partialorder %v13252_v6, 3.0  ;;  %vm3048_vm5 = vcmp.eq.f32.partialorder %v13253_v45, 3.0  ;;  %v10219_v31 = vsel %vm3042_vm8, %v13254_v46, 0.0  ;;  %3797 = vst [vmem:[#allocation2 + $0xc8] sm:$0xff] %v3788_v62  ;;  %v13258_v53 = vld [vmem:[#allocation147_spill] sm:$0xff]  ;;  %v13259_v28 = vld [vmem:[#allocation86_spill] sm:$0xff] }
 0x357   :  { %v10222_v60 = vsel %vm3044_vm9, %v13255_v29, 0.0  ;;  %v10225_v18 = vsel %vm3046_vm12, %v13256_v10, 0.0  ;;  %v10228_v1 = vsel %vm3048_vm5, %v13257_v27, 0.0  ;;  %vm13260_vm14 = vnez %v13259_v28  ;;  %v13261_v46 = vld [vmem:[#allocation87_spill] sm:$0xff]  ;;  %v13263_v29 = vld [vmem:[#allocation93_spill] sm:$0xff]  ;;  %v13265_v27 = vld [vmem:[#allocation96_spill] sm:$0xff] }
 0x358   :  { %v3716_v54 = vsel %vm13260_vm14, %v10219_v31, %v13258_v53  ;;  %v3781_v6 = vadd.f32 %v3773_v39, %v3751_v47  ;;  %vm13262_vm8 = vnez %v13261_v46  ;;  %vm13264_vm9 = vnez %v13263_v29  ;;  %v13268_v29 = vld [vmem:[#allocation114_spill] sm:$0xff] }
 0x359   :  { %v3718_v62 = vsel %vm13262_vm8, %v10222_v60, %v9934_v13  ;;  %v3720_v10 = vsel %vm13264_vm9, %v10225_v18, %v9937_v57  ;;  %vm13266_vm5 = vnez %v13265_v27  ;;  %v3748_v8 = vadd.f32 %v3716_v54, %v10219_v31  ;;  %v13267_v13 = vld [vmem:[#allocation109_spill] sm:$0xff]  ;;  %v13269_v27 = vld [vmem:[#allocation100_spill] sm:$0xff] }
 0x35a   :  { %v3722_v45 = vsel %vm13266_vm5, %v10228_v1, %v9940_v24  ;;  %v3750_v53 = vadd.f32 %v3718_v62, %v10222_v60  ;;  %v3752_v39 = vadd.f32 %v3720_v10, %v10225_v18  ;;  %v3789_v46 = vadd.f32 %v3781_v6, %v3753_v38  ;;  %v13270_v54 = vld [vmem:[#allocation101_spill] sm:$0xff]  ;;  %v13271_v10 = vld [vmem:[#allocation102_spill] sm:$0xff]  ;;  %v13273_v6 = vld [vmem:[#allocation151_spill] sm:$0xff] }
 0x35b   :  { %v3754_v47 = vadd.f32 %v3722_v45, %v10228_v1  ;;  %vm3049_vm12 = vcmp.eq.f32.partialorder %v13155_v52, 3.0  ;;  %vm3051_vm8 = vcmp.eq.f32.partialorder %v13156_v48, 3.0  ;;  %vm3053_vm9 = vcmp.eq.f32.partialorder %v13267_v13, 3.0  ;;  %v13272_v45 = vld [vmem:[#allocation103_spill] sm:$0xff] }
 0x35c   :  { %v3774_v57 = vadd.f32 %v3750_v53, %v3748_v8  ;;  %vm3055_vm14 = vcmp.eq.f32.partialorder %v13268_v29, 3.0  ;;  %v10255_v24 = vsel %vm3049_vm12, %v13269_v27, 0.0  ;;  %v10258_v28 = vsel %vm3051_vm8, %v13270_v54, 0.0  ;;  %3798 = vst [vmem:[#allocation2 + $0xd0] sm:$0xff] %v3789_v46  ;;  %v13274_v48 = vld [vmem:[#allocation79_spill] sm:$0xff]  ;;  %v13276_v53 = vld [vmem:[#allocation105_spill] sm:$0xff] }
 0x35d   :  { %v10261_v62 = vsel %vm3053_vm9, %v13271_v10, 0.0  ;;  %v10264_v38 = vsel %vm3055_vm14, %v13272_v45, 0.0  ;;  %vm13275_vm5 = vnez %v13274_v48  ;;  %vm13277_vm12 = vnez %v13276_v53  ;;  %v13278_v46 = vld [vmem:[#allocation110_spill] sm:$0xff]  ;;  %v13280_v45 = vld [vmem:[#allocation113_spill] sm:$0xff] }
 0x35e   :  { %v3723_v8 = vsel %vm13275_vm5, %v10255_v24, %v13273_v6  ;;  %v3725_v27 = vsel %vm13277_vm12, %v10258_v28, %v9970_v40  ;;  %v3782_v29 = vadd.f32 %v3774_v57, %v3752_v39  ;;  %vm13279_vm8 = vnez %v13278_v46  ;;  %v13282_v40 = vld [vmem:[#allocation81_spill] sm:$0xff] }
 0x35f   :  { %v3727_v10 = vsel %vm13279_vm8, %v10261_v62, %v9973_v34  ;;  %vm13281_vm14 = vnez %v13280_v45  ;;  %v3755_v13 = vadd.f32 %v3723_v8, %v10255_v24  ;;  %v3757_v6 = vadd.f32 %v3725_v27, %v10258_v28  ;;  %v13283_v57 = vld [vmem:[#allocation117_spill] sm:$0xff]  ;;  %v13284_v8 = vld [vmem:[#allocation118_spill] sm:$0xff] }
 0x360   :  { %v3729_v54 = vsel %vm13281_vm14, %v10264_v38, %v9976_v25  ;;  %v3759_v48 = vadd.f32 %v3727_v10, %v10261_v62  ;;  %vm3050_vm9 = vcmp.eq.f32.partialorder %v13282_v40, 3.0  ;;  %v3790_v39 = vadd.f32 %v3782_v29, %v3754_v47  ;;  %v13285_v27 = vld [vmem:[#allocation125_spill] sm:$0xff]  ;;  %v13287_v29 = vld [vmem:[#allocation80_spill] sm:$0xff] }
 0x361   :  { %v3761_v53 = vadd.f32 %v3729_v54, %v10264_v38  ;;  %vm3052_vm12 = vcmp.eq.f32.partialorder %v13172_v58, 3.0  ;;  %vm3054_vm8 = vcmp.eq.f32.partialorder %v13173_v23, 3.0  ;;  %vm3056_vm5 = vcmp.eq.f32.partialorder %v13174_v63, 3.0  ;;  %v13286_v54 = vld [vmem:[#allocation130_spill] sm:$0xff] }
 0x362   :  { %v3775_v34 = vadd.f32 %v3757_v6, %v3755_v13  ;;  %v10291_v25 = vsel %vm3050_vm9, %v13283_v57, 0.0  ;;  %v10294_v45 = vsel %vm3052_vm12, %v13284_v8, 0.0  ;;  %v10297_v10 = vsel %vm3054_vm8, %v13285_v27, 0.0  ;;  %3799 = vst [vmem:[#allocation2 + $0xd8] sm:$0xff] %v3790_v39  ;;  %v13289_v13 = vld [vmem:[#allocation122_spill] sm:$0xff] }
 0x363   :  { %v10300_v40 = vsel %vm3056_vm5, %v13286_v54, 0.0  ;;  %vm13288_vm14 = vnez %v13287_v29  ;;  %vm13290_vm9 = vnez %v13289_v13  ;;  %vm13291_vm12 = vnez %v13183_v11 }
 0x364   :  { %v3724_v47 = vsel %vm13288_vm14, %v10291_v25, %v10003_v35  ;;  %v3726_v6 = vsel %vm13290_vm9, %v10294_v45, %v10006_v4  ;;  %v3728_v27 = vsel %vm13291_vm12, %v10297_v10, %v10009_v50  ;;  %v3783_v8 = vadd.f32 %v3775_v34, %v3759_v48 }
 0x365   :  { %v3730_v39 = vsel %vm13185_vm11, %v10300_v40, %v10012_v49  ;;  %v3756_v54 = vadd.f32 %v3724_v47, %v10291_v25  ;;  %v3758_v35 = vadd.f32 %v3726_v6, %v10294_v45  ;;  %v3760_v29 = vadd.f32 %v3728_v27, %v10297_v10  ;;  %v13297_v6 = vld [vmem:[#allocation139_spill] sm:$0xff] }
 0x366   :  { %v3762_v13 = vadd.f32 %v3730_v39, %v10300_v40  ;;  %vm3057_vm5 = vcmp.eq.f32.partialorder %v8976_v9, 3.0  ;;  %vm3059_vm8 = vcmp.eq.f32.partialorder %v9062_v44, 3.0  ;;  %v3791_v4 = vadd.f32 %v3783_v8, %v3761_v53 }
 0x367   :  { %v3776_v50 = vadd.f32 %v3758_v35, %v3756_v54  ;;  %vm3061_vm12 = vcmp.eq.f32.partialorder %v9109_v0, 3.0  ;;  %vm3063_vm9 = vcmp.eq.f32.partialorder %v9159_v26, 3.0  ;;  %v10327_v48 = vsel %vm3057_vm5, %v12839_v22, 0.0 }
 0x368   :  { %v10330_v49 = vsel %vm3059_vm8, %v12852_v3, 0.0  ;;  %v10333_v34 = vsel %vm3061_vm12, %v12862_v43, 0.0  ;;  %v10336_v27 = vsel %vm3063_vm9, %v12872_v7, 0.0  ;;  %3800 = vst [vmem:[#allocation2 + $0xe0] sm:$0xff] %v3791_v4  ;;  %v3731_v53 = vsel %vm9019_vm15, %v10327_v48, %v10039_v17 }
 0x369   :  { %v3784_v47 = vadd.f32 %v3776_v50, %v3760_v29  ;;  %v3733_v8 = vsel %vm9054_vm2, %v10330_v49, %v10042_v61  ;;  %v3735_v54 = vsel %vm9119_vm6, %v10333_v34, %v10045_v15  ;;  %v3737_v29 = vsel %vm13065_vm1, %v10336_v27, %v10048_v36  ;;  %v13293_v61 = vld [vmem:[#allocation50_spill] sm:$0xff]  ;;  %v13295_v15 = vld [vmem:[#allocation88_spill] sm:$0xff] }
 0x36a   :  { %v3763_v39 = vadd.f32 %v3731_v53, %v10327_v48  ;;  %v3765_v35 = vadd.f32 %v3733_v8, %v10330_v49  ;;  %v3767_v17 = vadd.f32 %v3735_v54, %v10333_v34  ;;  %v3769_v50 = vadd.f32 %v3737_v29, %v10336_v27  ;;  %v13298_v53 = vld [vmem:[#allocation143_spill] sm:$0xff]  ;;  %v13300_v54 = vld [vmem:[#allocation149_spill] sm:$0xff] }
 0x36b   :  { %v3792_v4 = vadd.f32 %v3784_v47, %v3762_v13  ;;  %vm3058_vm9 = vcmp.eq.f32.partialorder %v13293_v61, 3.0  ;;  %vm3060_vm12 = vcmp.eq.f32.partialorder %v13294_v33, 3.0  ;;  %vm3062_vm5 = vcmp.eq.f32.partialorder %v13295_v15, 3.0  ;;  %v13302_v47 = vld [vmem:[#allocation150_spill] sm:$0xff]  ;;  %v13304_v61 = vld [vmem:[#allocation152_spill] sm:$0xff] }
 0x36c   :  { %v3777_v21 = vadd.f32 %v3765_v35, %v3763_v39  ;;  %vm3064_vm8 = vcmp.eq.f32.partialorder %v13296_v30, 3.0  ;;  %v10363_v36 = vsel %vm3058_vm9, %v13297_v6, 0.0  ;;  %v10366_v8 = vsel %vm3060_vm12, %v13298_v53, 0.0  ;;  %v13310_v53 = vld [vmem:[#allocation34_spill] sm:$0xff] }
 0x36d   :  { %3801 = vst [vmem:[#allocation2 + $0xe8] sm:$0xff] %v3792_v4  ;;  %13299 = vst [vmem:[#allocation78_spill] sm:$0xff] %v10366_v8  ;;  %v10369_v13 = vsel %vm3062_vm5, %v13300_v54, 0.0  ;;  %v10372_v29 = vsel %vm3064_vm8, %v13302_v47, 0.0  ;;  %v3732_v35 = vsel %vm9438_vm3, %v10363_v36, %v13304_v61  ;;  %v3734_v4 = vsel %vm9640_vm10, %v10366_v8, %v10078_v51  ;;  %v13309_v51 = vld [vmem:[#allocation20_spill] sm:$0xff] }
 0x36e   :  { %13301 = vst [vmem:[#allocation58_spill] sm:$0xff] %v10369_v13  ;;  %13303 = vst [vmem:[#allocation83_spill] sm:$0xff] %v10372_v29  ;;  %v3785_v15 = vadd.f32 %v3777_v21, %v3767_v17  ;;  %v3736_v54 = vsel %vm9722_vm13, %v10369_v13, %v10081_v32  ;;  %v3738_v30 = vsel %vm9765_vm7, %v10372_v29, %v10084_v59  ;;  %vm3097_vm9 = vcmp.eq.f32.partialorder %v13197_v12, 4.0  ;;  %v13311_v47 = vld [vmem:[#allocation16_spill] sm:$0xff]  ;;  %v13324_v12 = vld [vmem:[#allocation23_spill] sm:$0xff] }
 0x36f   :  { %v3764_v33 = vadd.f32 %v3732_v35, %v10363_v36  ;;  %v3766_v61 = vadd.f32 %v3734_v4, %v10366_v8  ;;  %v3768_v21 = vadd.f32 %v3736_v54, %v10369_v13  ;;  %v3770_v17 = vadd.f32 %v3738_v30, %v10372_v29  ;;  %v13313_v35 = vld [vmem:[#allocation27_spill] sm:$0xff]  ;;  %v13314_v54 = vld [vmem:[#allocation22_spill] sm:$0xff] }
 0x370   :  { %v3793_v6 = vadd.f32 %v3785_v15, %v3769_v50  ;;  %vm3099_vm12 = vcmp.eq.f32.partialorder %v13198_v16, 4.0  ;;  %vm3101_vm5 = vcmp.eq.f32.partialorder %v13309_v51, 4.0  ;;  %vm3103_vm8 = vcmp.eq.f32.partialorder %v13310_v53, 4.0  ;;  %v13315_v30 = vld [vmem:[#allocation14_spill] sm:$0xff]  ;;  %v13316_v15 = vld [vmem:[#allocation153_spill] sm:$0xff] }
 0x371   :  { %v3778_v32 = vadd.f32 %v3766_v61, %v3764_v33  ;;  %v10399_v59 = vsel %vm3097_vm9, %v13311_v47, 0.0  ;;  %v10402_v39 = vsel %vm3099_vm12, %v13313_v35, 0.0  ;;  %v10405_v4 = vsel %vm3101_vm5, %v13314_v54, 0.0  ;;  %v13318_v61 = vld [vmem:[#allocation154_spill] sm:$0xff]  ;;  %v13321_v35 = vld [vmem:[#allocation17_spill] sm:$0xff] }
 0x372   :  { %13312 = vst [vmem:[#allocation126_spill] sm:$0xff] %v10399_v59  ;;  %3802 = vst [vmem:[#allocation2 + $0xf0] sm:$0xff] %v3793_v6  ;;  %v10408_v50 = vsel %vm3103_vm8, %v13315_v30, 0.0  ;;  %v3804_v33 = vsel %vm13089_vm4, %v10399_v59, %v13316_v15  ;;  %v13319_v53 = vld [vmem:[#allocation18_spill] sm:$0xff]  ;;  %v13322_v6 = vld [vmem:[#allocation19_spill] sm:$0xff] }
 0x373   :  { %vm13320_vm9 = vnez %v13319_v53  ;;  %v3786_v51 = vadd.f32 %v3778_v32, %v3768_v21  ;;  %vm13323_vm12 = vnez %v13322_v6  ;;  %v3810_v29 = vsel %vm13213_vm0, %v10408_v50, %v13324_v12  ;;  %v13327_v32 = vld [vmem:[#allocation49_spill] sm:$0xff] }
 0x374   :  { %v3806_v47 = vsel %vm13320_vm9, %v10402_v39, %v13318_v61  ;;  %v3808_v54 = vsel %vm13323_vm12, %v10405_v4, %v13321_v35  ;;  %v3836_v13 = vadd.f32 %v3804_v33, %v10399_v59  ;;  %v3842_v53 = vadd.f32 %v3810_v29, %v10408_v50  ;;  %v13326_v61 = vld [vmem:[#allocation12_spill] sm:$0xff]  ;;  %v13328_v6 = vld [vmem:[#allocation53_spill] sm:$0xff]  ;;  %v13331_v33 = vld [vmem:[#allocation38_spill] sm:$0xff] }
 0x375   :  { %v3838_v15 = vadd.f32 %v3806_v47, %v10402_v39  ;;  %v3840_v16 = vadd.f32 %v3808_v54, %v10405_v4  ;;  %vm3098_vm5 = vcmp.eq.f32.partialorder %v13326_v61, 4.0  ;;  %v3794_v21 = vadd.f32 %v3786_v51, %v3770_v17  ;;  %v13329_v35 = vld [vmem:[#allocation57_spill] sm:$0xff]  ;;  %v13332_v47 = vld [vmem:[#allocation39_spill] sm:$0xff]  ;;  %v13333_v29 = vld [vmem:[#allocation40_spill] sm:$0xff] }
 0x376   :  { %vm3100_vm8 = vcmp.eq.f32.partialorder %v13327_v32, 4.0  ;;  %vm3102_vm12 = vcmp.eq.f32.partialorder %v13328_v6, 4.0  ;;  %vm3104_vm9 = vcmp.eq.f32.partialorder %v13329_v35, 4.0  ;;  %v13330_v30 = vld [vmem:[#allocation37_spill] sm:$0xff]  ;;  %v13334_v17 = vld [vmem:[#allocation15_spill] sm:$0xff] }
 0x377   :  { %v3868_v8 = vadd.f32 %v3838_v15, %v3836_v13  ;;  %v10435_v12 = vsel %vm3098_vm5, %v13330_v30, 0.0  ;;  %v10438_v59 = vsel %vm3100_vm8, %v13331_v33, 0.0  ;;  %v10441_v54 = vsel %vm3102_vm12, %v13332_v47, 0.0  ;;  %3803 = vst [vmem:[#allocation2 + $0xf8] sm:$0xff] %v3794_v21  ;;  %v13335_v51 = vld [vmem:[#allocation9_spill] sm:$0xff]  ;;  %v13337_v13 = vld [vmem:[#allocation48_spill] sm:$0xff] }
 0x378   :  { %v10444_v61 = vsel %vm3104_vm9, %v13333_v29, 0.0  ;;  %vm13336_vm0 = vnez %v13335_v51  ;;  %vm13338_vm5 = vnez %v13337_v13  ;;  %v13339_v33 = vld [vmem:[#allocation52_spill] sm:$0xff]  ;;  %v13341_v21 = vld [vmem:[#allocation35_spill] sm:$0xff]  ;;  %vm3105_vm12 = vcmp.eq.f32.partialorder %v13235_v2, 4.0 }
 0x379   :  { %v3805_v6 = vsel %vm13336_vm0, %v10435_v12, %v13334_v17  ;;  %v3807_v15 = vsel %vm13338_vm5, %v10438_v59, %v10150_v56  ;;  %vm13340_vm8 = vnez %v13339_v33  ;;  %v3876_v30 = vadd.f32 %v3868_v8, %v3840_v16  ;;  %v13342_v29 = vld [vmem:[#allocation56_spill] sm:$0xff]  ;;  %v13344_v56 = vld [vmem:[#allocation25_spill] sm:$0xff] }
 0x37a   :  { %v3809_v47 = vsel %vm13340_vm8, %v10441_v54, %v10153_v5  ;;  %vm13343_vm9 = vnez %v13342_v29  ;;  %v3837_v32 = vadd.f32 %v3805_v6, %v10435_v12  ;;  %v3839_v17 = vadd.f32 %v3807_v15, %v10438_v59  ;;  %v13345_v16 = vld [vmem:[#allocation60_spill] sm:$0xff]  ;;  %v13346_v6 = vld [vmem:[#allocation61_spill] sm:$0xff]  ;;  %v13347_v15 = vld [vmem:[#allocation62_spill] sm:$0xff] }
 0x37b   :  { %v3811_v35 = vsel %vm13343_vm9, %v10444_v61, %v13341_v21  ;;  %v3841_v51 = vadd.f32 %v3809_v47, %v10441_v54  ;;  %vm3107_vm5 = vcmp.eq.f32.partialorder %v13344_v56, 4.0  ;;  %v3884_v33 = vadd.f32 %v3876_v30, %v3842_v53  ;;  %v13349_v53 = vld [vmem:[#allocation45_spill] sm:$0xff] }
 0x37c   :  { %v3843_v13 = vadd.f32 %v3811_v35, %v10444_v61  ;;  %v3869_v5 = vadd.f32 %v3839_v17, %v3837_v32  ;;  %vm3109_vm8 = vcmp.eq.f32.partialorder %v13237_v20, 4.0  ;;  %vm3111_vm0 = vcmp.eq.f32.partialorder %v13238_v55, 4.0  ;;  %v13348_v35 = vld [vmem:[#allocation68_spill] sm:$0xff]  ;;  %v13351_v32 = vld [vmem:[#allocation46_spill] sm:$0xff]  ;;  %v13360_v55 = vld [vmem:[#allocation97_spill] sm:$0xff] }
 0x37d   :  { %v10471_v8 = vsel %vm3105_vm12, %v13345_v16, 0.0  ;;  %v10474_v21 = vsel %vm3107_vm5, %v13346_v6, 0.0  ;;  %v10477_v47 = vsel %vm3109_vm8, %v13347_v15, 0.0  ;;  %v10480_v29 = vsel %vm3111_vm0, %v13348_v35, 0.0  ;;  %3893 = vst [vmem:[#allocation2 + $0x100] sm:$0xff] %v3884_v33  ;;  %v13353_v6 = vld [vmem:[#allocation65_spill] sm:$0xff] }
 0x37e   :  { %v3877_v56 = vadd.f32 %v3869_v5, %v3841_v51  ;;  %vm13350_vm9 = vnez %v13349_v53  ;;  %vm13352_vm12 = vnez %v13351_v32  ;;  %vm13354_vm5 = vnez %v13353_v6  ;;  %v13355_v35 = vld [vmem:[#allocation69_spill] sm:$0xff] }
 0x37f   :  { %v3812_v30 = vsel %vm13350_vm9, %v10471_v8, %v10183_v19  ;;  %v3814_v17 = vsel %vm13352_vm12, %v10474_v21, %v10186_v14  ;;  %v3816_v15 = vsel %vm13354_vm5, %v10477_v47, %v10189_v42  ;;  %vm13356_vm0 = vnez %v13355_v35  ;;  %v13357_v14 = vld [vmem:[#allocation84_spill] sm:$0xff]  ;;  %v13358_v16 = vld [vmem:[#allocation85_spill] sm:$0xff] }
 0x380   :  { %v3818_v33 = vsel %vm13356_vm0, %v10480_v29, %v10192_v41  ;;  %v3844_v51 = vadd.f32 %v3812_v30, %v10471_v8  ;;  %v3846_v5 = vadd.f32 %v3814_v17, %v10474_v21  ;;  %v3848_v19 = vadd.f32 %v3816_v15, %v10477_v47  ;;  %v13359_v42 = vld [vmem:[#allocation92_spill] sm:$0xff]  ;;  %v13361_v35 = vld [vmem:[#allocation73_spill] sm:$0xff]  ;;  %v13363_v30 = vld [vmem:[#allocation74_spill] sm:$0xff] }
 0x381   :  { %v3885_v53 = vadd.f32 %v3877_v56, %v3843_v13  ;;  %v3850_v32 = vadd.f32 %v3818_v33, %v10480_v29  ;;  %vm3106_vm8 = vcmp.eq.f32.partialorder %v13357_v14, 4.0  ;;  %vm3108_vm12 = vcmp.eq.f32.partialorder %v13358_v16, 4.0  ;;  %v13364_v15 = vld [vmem:[#allocation75_spill] sm:$0xff]  ;;  %v13365_v56 = vld [vmem:[#allocation76_spill] sm:$0xff] }
 0x382   :  { %v3870_v6 = vadd.f32 %v3846_v5, %v3844_v51  ;;  %vm3110_vm5 = vcmp.eq.f32.partialorder %v13359_v42, 4.0  ;;  %vm3112_vm9 = vcmp.eq.f32.partialorder %v13360_v55, 4.0  ;;  %v10507_v41 = vsel %vm3106_vm8, %v13361_v35, 0.0  ;;  %v13366_v51 = vld [vmem:[#allocation86_spill] sm:$0xff]  ;;  %v13368_v35 = vld [vmem:[#allocation87_spill] sm:$0xff] }
 0x383   :  { %13362 = vst [vmem:[#allocation90_spill] sm:$0xff] %v10507_v41  ;;  %3894 = vst [vmem:[#allocation2 + $0x108] sm:$0xff] %v3885_v53  ;;  %v10510_v17 = vsel %vm3108_vm12, %v13363_v30, 0.0  ;;  %v10513_v13 = vsel %vm3110_vm5, %v13364_v15, 0.0  ;;  %v10516_v33 = vsel %vm3112_vm9, %v13365_v56, 0.0  ;;  %vm13367_vm0 = vnez %v13366_v51  ;;  %v13370_v30 = vld [vmem:[#allocation93_spill] sm:$0xff] }
 0x384   :  { %v3813_v5 = vsel %vm13367_vm0, %v10507_v41, %v10219_v31  ;;  %v3878_v42 = vadd.f32 %v3870_v6, %v3848_v19  ;;  %vm13369_vm8 = vnez %v13368_v35  ;;  %vm13371_vm12 = vnez %v13370_v30  ;;  %v13372_v56 = vld [vmem:[#allocation96_spill] sm:$0xff]  ;;  %v13375_v30 = vld [vmem:[#allocation109_spill] sm:$0xff]  ;;  %v13376_v51 = vld [vmem:[#allocation114_spill] sm:$0xff] }
 0x385   :  { %v3815_v53 = vsel %vm13369_vm8, %v10510_v17, %v10222_v60  ;;  %v3817_v15 = vsel %vm13371_vm12, %v10513_v13, %v10225_v18  ;;  %vm13373_vm9 = vnez %v13372_v56  ;;  %v3845_v16 = vadd.f32 %v3813_v5, %v10507_v41  ;;  %v13374_v60 = vld [vmem:[#allocation106_spill] sm:$0xff]  ;;  %v13377_v56 = vld [vmem:[#allocation100_spill] sm:$0xff]  ;;  %v13378_v5 = vld [vmem:[#allocation101_spill] sm:$0xff] }
 0x386   :  { %v3819_v55 = vsel %vm13373_vm9, %v10516_v33, %v10228_v1  ;;  %v3847_v31 = vadd.f32 %v3815_v53, %v10510_v17  ;;  %v3849_v6 = vadd.f32 %v3817_v15, %v10513_v13  ;;  %v3886_v35 = vadd.f32 %v3878_v42, %v3850_v32  ;;  %v13379_v15 = vld [vmem:[#allocation102_spill] sm:$0xff]  ;;  %v13381_v42 = vld [vmem:[#allocation79_spill] sm:$0xff] }
 0x387   :  { %v3851_v19 = vadd.f32 %v3819_v55, %v10516_v33  ;;  %vm3113_vm5 = vcmp.eq.f32.partialorder %v13155_v52, 4.0  ;;  %vm3115_vm8 = vcmp.eq.f32.partialorder %v13374_v60, 4.0  ;;  %vm3117_vm12 = vcmp.eq.f32.partialorder %v13375_v30, 4.0  ;;  %v13380_v55 = vld [vmem:[#allocation103_spill] sm:$0xff] }
 0x388   :  { %v3871_v18 = vadd.f32 %v3847_v31, %v3845_v16  ;;  %vm3119_vm0 = vcmp.eq.f32.partialorder %v13376_v51, 4.0  ;;  %v10543_v1 = vsel %vm3113_vm5, %v13377_v56, 0.0  ;;  %v10546_v41 = vsel %vm3115_vm8, %v13378_v5, 0.0  ;;  %3895 = vst [vmem:[#allocation2 + $0x110] sm:$0xff] %v3886_v35  ;;  %v13383_v31 = vld [vmem:[#allocation105_spill] sm:$0xff] }
 0x389   :  { %v10549_v53 = vsel %vm3117_vm12, %v13379_v15, 0.0  ;;  %v10552_v32 = vsel %vm3119_vm0, %v13380_v55, 0.0  ;;  %vm13382_vm9 = vnez %v13381_v42  ;;  %vm13384_vm5 = vnez %v13383_v31  ;;  %v13386_v55 = vld [vmem:[#allocation113_spill] sm:$0xff] }
 0x38a   :  { %v3820_v16 = vsel %vm13382_vm9, %v10543_v1, %v10255_v24  ;;  %v3822_v56 = vsel %vm13384_vm5, %v10546_v41, %v10258_v28  ;;  %v3879_v51 = vadd.f32 %v3871_v18, %v3849_v6  ;;  %vm13385_vm8 = vnez %v13278_v46  ;;  %v13388_v28 = vld [vmem:[#allocation81_spill] sm:$0xff]  ;;  %v13389_v18 = vld [vmem:[#allocation118_spill] sm:$0xff] }
 0x38b   :  { %v3824_v35 = vsel %vm13385_vm8, %v10549_v53, %v10261_v62  ;;  %vm13387_vm0 = vnez %v13386_v55  ;;  %v3852_v5 = vadd.f32 %v3820_v16, %v10543_v1  ;;  %v3854_v24 = vadd.f32 %v3822_v56, %v10546_v41  ;;  %v13390_v56 = vld [vmem:[#allocation125_spill] sm:$0xff]  ;;  %v13784_v55 = vld [vmem:[#allocation122_spill] sm:$0xff] }
 0x38c   :  { %v3826_v15 = vsel %vm13387_vm0, %v10552_v32, %v10264_v38  ;;  %v3856_v42 = vadd.f32 %v3824_v35, %v10549_v53  ;;  %vm3114_vm12 = vcmp.eq.f32.partialorder %v13388_v28, 4.0  ;;  %v3887_v6 = vadd.f32 %v3879_v51, %v3851_v19 }
 0x38d   :  { %v3858_v31 = vadd.f32 %v3826_v15, %v10552_v32  ;;  %vm3116_vm5 = vcmp.eq.f32.partialorder %v13172_v58, 4.0  ;;  %vm3118_vm8 = vcmp.eq.f32.partialorder %v13173_v23, 4.0  ;;  %vm3120_vm9 = vcmp.eq.f32.partialorder %v13174_v63, 4.0  ;;  %v13391_v15 = vld [vmem:[#allocation130_spill] sm:$0xff] }
 0x38e   :  { %v3872_v62 = vadd.f32 %v3854_v24, %v3852_v5  ;;  %v10579_v38 = vsel %vm3114_vm12, %v13283_v57, 0.0  ;;  %v10582_v16 = vsel %vm3116_vm5, %v13389_v18, 0.0  ;;  %v10585_v35 = vsel %vm3118_vm8, %v13390_v56, 0.0  ;;  %3896 = vst [vmem:[#allocation2 + $0x118] sm:$0xff] %v3887_v6  ;;  %v13393_v5 = vld [vmem:[#allocation122_spill] sm:$0xff] }
 0x38f   :  { %v10588_v28 = vsel %vm3120_vm9, %v13391_v15, 0.0  ;;  %v3821_v19 = vsel %vm13288_vm14, %v10579_v38, %v10291_v25  ;;  %vm13394_vm12 = vnez %v13393_v5  ;;  %vm13395_vm5 = vnez %v13183_v11 }
 0x390   :  { %v3823_v24 = vsel %vm13394_vm12, %v10582_v16, %v10294_v45  ;;  %v3825_v56 = vsel %vm13395_vm5, %v10585_v35, %v10297_v10  ;;  %v3880_v18 = vadd.f32 %v3872_v62, %v3856_v42  ;;  %v3827_v6 = vsel %vm13185_vm11, %v10588_v28, %v10300_v40 }
 0x391   :  { %v3853_v15 = vadd.f32 %v3821_v19, %v10579_v38  ;;  %v3855_v25 = vadd.f32 %v3823_v24, %v10582_v16  ;;  %v3857_v51 = vadd.f32 %v3825_v56, %v10585_v35  ;;  %v3859_v5 = vadd.f32 %v3827_v6, %v10588_v28 }
 0x392   :  { %vm3121_vm9 = vcmp.eq.f32.partialorder %v8976_v9, 4.0  ;;  %vm3123_vm8 = vcmp.eq.f32.partialorder %v9062_v44, 4.0  ;;  %v3888_v45 = vadd.f32 %v3880_v18, %v3858_v31  ;;  %vm3125_vm5 = vcmp.eq.f32.partialorder %v9109_v0, 4.0 }
 0x393   :  { %v3873_v10 = vadd.f32 %v3855_v25, %v3853_v15  ;;  %vm3127_vm12 = vcmp.eq.f32.partialorder %v9159_v26, 4.0  ;;  %v10615_v40 = vsel %vm3121_vm9, %v12839_v22, 0.0  ;;  %v10618_v42 = vsel %vm3123_vm8, %v12852_v3, 0.0  ;;  %v13406_v3 = vld [vmem:[#allocation111_spill] sm:$0xff] }
 0x394   :  { %13396 = vst [vmem:[#allocation43_spill] sm:$0xff] %v10618_v42  ;;  %v10621_v62 = vsel %vm3125_vm5, %v12862_v43, 0.0  ;;  %v10624_v56 = vsel %vm3127_vm12, %v12872_v7, 0.0  ;;  %3897 = vst [vmem:[#allocation2 + $0x120] sm:$0xff] %v3888_v45  ;;  %v3828_v18 = vsel %vm9019_vm15, %v10615_v40, %v10327_v48  ;;  %v3830_v24 = vsel %vm9054_vm2, %v10618_v42, %v10330_v49  ;;  %v13403_v49 = vld [vmem:[#allocation50_spill] sm:$0xff]  ;;  %v13404_v43 = vld [vmem:[#allocation31_spill] sm:$0xff] }
 0x395   :  { %13397 = vst [vmem:[#allocation107_spill] sm:$0xff] %v10621_v62  ;;  %13398 = vst [vmem:[#allocation82_spill] sm:$0xff] %v10624_v56  ;;  %v3881_v19 = vadd.f32 %v3873_v10, %v3857_v51  ;;  %v3832_v25 = vsel %vm9119_vm6, %v10621_v62, %v10333_v34  ;;  %v3834_v51 = vsel %vm13065_vm1, %v10624_v56, %v10336_v27  ;;  %vm3122_vm12 = vcmp.eq.f32.partialorder %v13403_v49, 4.0  ;;  %v13405_v34 = vld [vmem:[#allocation88_spill] sm:$0xff]  ;;  %v13407_v7 = vld [vmem:[#allocation139_spill] sm:$0xff] }
 0x396   :  { %v3860_v45 = vadd.f32 %v3828_v18, %v10615_v40  ;;  %v3862_v10 = vadd.f32 %v3830_v24, %v10618_v42  ;;  %v3864_v48 = vadd.f32 %v3832_v25, %v10621_v62  ;;  %v3866_v15 = vadd.f32 %v3834_v51, %v10624_v56  ;;  %v13409_v18 = vld [vmem:[#allocation143_spill] sm:$0xff]  ;;  %v13410_v25 = vld [vmem:[#allocation149_spill] sm:$0xff]  ;;  %v13422_v42 = vld [vmem:[#allocation34_spill] sm:$0xff] }
 0x397   :  { %v3889_v31 = vadd.f32 %v3881_v19, %v3859_v5  ;;  %vm3124_vm5 = vcmp.eq.f32.partialorder %v13404_v43, 4.0  ;;  %vm3126_vm9 = vcmp.eq.f32.partialorder %v13405_v34, 4.0  ;;  %vm3128_vm8 = vcmp.eq.f32.partialorder %v13406_v3, 4.0  ;;  %v13411_v19 = vld [vmem:[#allocation150_spill] sm:$0xff]  ;;  %v13417_v49 = vld [vmem:[#allocation83_spill] sm:$0xff] }
 0x398   :  { %v3874_v6 = vadd.f32 %v3862_v10, %v3860_v45  ;;  %v10651_v27 = vsel %vm3122_vm12, %v13407_v7, 0.0  ;;  %v10654_v24 = vsel %vm3124_vm5, %v13409_v18, 0.0  ;;  %v10657_v5 = vsel %vm3126_vm9, %v13410_v25, 0.0  ;;  %v13413_v3 = vld [vmem:[#allocation78_spill] sm:$0xff]  ;;  %v13420_v45 = vld [vmem:[#allocation29_spill] sm:$0xff]  ;;  %v13421_v18 = vld [vmem:[#allocation20_spill] sm:$0xff] }
 0x399   :  { %13408 = vst [vmem:[#allocation123_spill] sm:$0xff] %v10651_v27  ;;  %3898 = vst [vmem:[#allocation2 + $0x128] sm:$0xff] %v3889_v31  ;;  %v10660_v51 = vsel %vm3128_vm8, %v13411_v19, 0.0  ;;  %v3829_v10 = vsel %vm9438_vm3, %v10651_v27, %v10363_v36  ;;  %v3831_v31 = vsel %vm9640_vm10, %v10654_v24, %v13413_v3  ;;  %v13415_v43 = vld [vmem:[#allocation58_spill] sm:$0xff]  ;;  %v13419_v3 = vld [vmem:[#allocation13_spill] sm:$0xff]  ;;  %vm3163_vm5 = vcmp.eq.f32.partialorder %v13420_v45, 5.0 }
 0x39a   :  { %v3882_v34 = vadd.f32 %v3874_v6, %v3864_v48  ;;  %v3833_v25 = vsel %vm9722_vm13, %v10657_v5, %v13415_v43  ;;  %v3835_v56 = vsel %vm9765_vm7, %v10660_v51, %v13417_v49  ;;  %v3861_v62 = vadd.f32 %v3829_v10, %v10651_v27  ;;  %v13423_v19 = vld [vmem:[#allocation16_spill] sm:$0xff]  ;;  %v13425_v10 = vld [vmem:[#allocation27_spill] sm:$0xff] }
 0x39b   :  { %v3863_v36 = vadd.f32 %v3831_v31, %v10654_v24  ;;  %v3865_v6 = vadd.f32 %v3833_v25, %v10657_v5  ;;  %v3867_v48 = vadd.f32 %v3835_v56, %v10660_v51  ;;  %vm3161_vm12 = vcmp.eq.f32.partialorder %v13419_v3, 5.0  ;;  %v13426_v25 = vld [vmem:[#allocation22_spill] sm:$0xff] }
 0x39c   :  { %v3890_v7 = vadd.f32 %v3882_v34, %v3866_v15  ;;  %vm3165_vm9 = vcmp.eq.f32.partialorder %v13421_v18, 5.0  ;;  %vm3167_vm8 = vcmp.eq.f32.partialorder %v13422_v42, 5.0  ;;  %v10687_v49 = vsel %vm3161_vm12, %v13423_v19, 0.0  ;;  %v13427_v56 = vld [vmem:[#allocation14_spill] sm:$0xff] }
 0x39d   :  { %v3875_v43 = vadd.f32 %v3863_v36, %v3861_v62  ;;  %13424 = vst [vmem:[#allocation128_spill] sm:$0xff] %v10687_v49  ;;  %v10690_v27 = vsel %vm3163_vm5, %v13425_v10, 0.0  ;;  %v10693_v31 = vsel %vm3165_vm9, %v13426_v25, 0.0  ;;  %v10696_v15 = vsel %vm3167_vm8, %v13427_v56, 0.0  ;;  %v13428_v34 = vld [vmem:[#allocation126_spill] sm:$0xff]  ;;  %v13434_v56 = vld [vmem:[#allocation33_spill] sm:$0xff] }
 0x39e   :  { %3899 = vst [vmem:[#allocation2 + $0x130] sm:$0xff] %v3890_v7  ;;  %v3901_v62 = vsel %vm13089_vm4, %v10687_v49, %v13428_v34  ;;  %v13430_v36 = vld [vmem:[#allocation18_spill] sm:$0xff]  ;;  %v13432_v7 = vld [vmem:[#allocation19_spill] sm:$0xff]  ;;  %vm13435_vm9 = vnez %v13434_v56  ;;  %v13440_v56 = vld [vmem:[#allocation37_spill] sm:$0xff] }
 0x39f   :  { %vm13431_vm12 = vnez %v13430_v36  ;;  %v3883_v42 = vadd.f32 %v3875_v43, %v3865_v6  ;;  %vm13433_vm5 = vnez %v13432_v7  ;;  %v3907_v10 = vsel %vm13435_vm9, %v10696_v15, %v10408_v50  ;;  %v13437_v43 = vld [vmem:[#allocation49_spill] sm:$0xff] }
 0x3a0   :  { %v3903_v19 = vsel %vm13431_vm12, %v10690_v27, %v10402_v39  ;;  %v3905_v25 = vsel %vm13433_vm5, %v10693_v31, %v10405_v4  ;;  %v3933_v18 = vadd.f32 %v3901_v62, %v10687_v49  ;;  %v3939_v36 = vadd.f32 %v3907_v10, %v10696_v15  ;;  %v13436_v39 = vld [vmem:[#allocation12_spill] sm:$0xff]  ;;  %v13438_v7 = vld [vmem:[#allocation53_spill] sm:$0xff]  ;;  %v13441_v62 = vld [vmem:[#allocation38_spill] sm:$0xff] }
 0x3a1   :  { %v3935_v34 = vadd.f32 %v3903_v19, %v10690_v27  ;;  %v3937_v45 = vadd.f32 %v3905_v25, %v10693_v31  ;;  %vm3162_vm8 = vcmp.eq.f32.partialorder %v13436_v39, 5.0  ;;  %v3891_v6 = vadd.f32 %v3883_v42, %v3867_v48  ;;  %v13439_v4 = vld [vmem:[#allocation57_spill] sm:$0xff]  ;;  %v13442_v19 = vld [vmem:[#allocation39_spill] sm:$0xff]  ;;  %v13443_v10 = vld [vmem:[#allocation40_spill] sm:$0xff] }
 0x3a2   :  { %vm3164_vm12 = vcmp.eq.f32.partialorder %v13437_v43, 5.0  ;;  %vm3166_vm5 = vcmp.eq.f32.partialorder %v13438_v7, 5.0  ;;  %vm3168_vm4 = vcmp.eq.f32.partialorder %v13439_v4, 5.0  ;;  %v10723_v50 = vsel %vm3162_vm8, %v13440_v56, 0.0  ;;  %v13445_v42 = vld [vmem:[#allocation9_spill] sm:$0xff] }
 0x3a3   :  { %v3965_v3 = vadd.f32 %v3935_v34, %v3933_v18  ;;  %v10726_v49 = vsel %vm3164_vm12, %v13441_v62, 0.0  ;;  %v10729_v25 = vsel %vm3166_vm5, %v13442_v19, 0.0  ;;  %3900 = vst [vmem:[#allocation2 + $0x138] sm:$0xff] %v3891_v6  ;;  %v10732_v39 = vsel %vm3168_vm4, %v13443_v10, 0.0  ;;  %v13447_v18 = vld [vmem:[#allocation48_spill] sm:$0xff] }
 0x3a4   :  { %13444 = vst [vmem:[#allocation133_spill] sm:$0xff] %v10732_v39  ;;  %vm13446_vm9 = vnez %v13445_v42  ;;  %vm13448_vm8 = vnez %v13447_v18  ;;  %v13449_v62 = vld [vmem:[#allocation52_spill] sm:$0xff]  ;;  %vm3169_vm5 = vcmp.eq.f32.partialorder %v13235_v2, 5.0 }
 0x3a5   :  { %v3902_v48 = vsel %vm13446_vm9, %v10723_v50, %v10435_v12  ;;  %v3904_v34 = vsel %vm13448_vm8, %v10726_v49, %v10438_v59  ;;  %vm13450_vm12 = vnez %v13449_v62  ;;  %v3973_v56 = vadd.f32 %v3965_v3, %v3937_v45  ;;  %v13451_v6 = vld [vmem:[#allocation56_spill] sm:$0xff]  ;;  %v13453_v59 = vld [vmem:[#allocation25_spill] sm:$0xff]  ;;  %v13454_v45 = vld [vmem:[#allocation70_spill] sm:$0xff] }
 0x3a6   :  { %v3906_v19 = vsel %vm13450_vm12, %v10729_v25, %v10441_v54  ;;  %vm13452_vm4 = vnez %v13451_v6  ;;  %v3934_v4 = vadd.f32 %v3902_v48, %v10723_v50  ;;  %v3936_v12 = vadd.f32 %v3904_v34, %v10726_v49  ;;  %v13455_v3 = vld [vmem:[#allocation60_spill] sm:$0xff]  ;;  %v13456_v48 = vld [vmem:[#allocation61_spill] sm:$0xff]  ;;  %v13457_v34 = vld [vmem:[#allocation62_spill] sm:$0xff] }
 0x3a7   :  { %v3908_v10 = vsel %vm13452_vm4, %v10732_v39, %v10444_v61  ;;  %v3938_v42 = vadd.f32 %v3906_v19, %v10729_v25  ;;  %vm3171_vm8 = vcmp.eq.f32.partialorder %v13453_v59, 5.0  ;;  %v3981_v62 = vadd.f32 %v3973_v56, %v3939_v36  ;;  %v13459_v56 = vld [vmem:[#allocation45_spill] sm:$0xff] }
 0x3a8   :  { %v3940_v18 = vadd.f32 %v3908_v10, %v10732_v39  ;;  %v3966_v54 = vadd.f32 %v3936_v12, %v3934_v4  ;;  %vm3173_vm12 = vcmp.eq.f32.partialorder %v13237_v20, 5.0  ;;  %vm3175_vm9 = vcmp.eq.f32.partialorder %v13454_v45, 5.0  ;;  %v13458_v10 = vld [vmem:[#allocation68_spill] sm:$0xff]  ;;  %v13461_v4 = vld [vmem:[#allocation46_spill] sm:$0xff] }
 0x3a9   :  { %v10759_v61 = vsel %vm3169_vm5, %v13455_v3, 0.0  ;;  %v10762_v6 = vsel %vm3171_vm8, %v13456_v48, 0.0  ;;  %v10765_v19 = vsel %vm3173_vm12, %v13457_v34, 0.0  ;;  %v10768_v39 = vsel %vm3175_vm9, %v13458_v10, 0.0  ;;  %3990 = vst [vmem:[#allocation2 + $0x140] sm:$0xff] %v3981_v62  ;;  %v13463_v48 = vld [vmem:[#allocation65_spill] sm:$0xff] }
 0x3aa   :  { %v3974_v59 = vadd.f32 %v3966_v54, %v3938_v42  ;;  %vm13460_vm4 = vnez %v13459_v56  ;;  %vm13462_vm5 = vnez %v13461_v4  ;;  %vm13464_vm8 = vnez %v13463_v48  ;;  %v13465_v10 = vld [vmem:[#allocation69_spill] sm:$0xff] }
 0x3ab   :  { %v3909_v36 = vsel %vm13460_vm4, %v10759_v61, %v10471_v8  ;;  %v3911_v12 = vsel %vm13462_vm5, %v10762_v6, %v10474_v21  ;;  %v3913_v34 = vsel %vm13464_vm8, %v10765_v19, %v10477_v47  ;;  %vm13466_vm9 = vnez %v13465_v10  ;;  %v13467_v21 = vld [vmem:[#allocation85_spill] sm:$0xff]  ;;  %v13468_v47 = vld [vmem:[#allocation92_spill] sm:$0xff] }
 0x3ac   :  { %v3915_v62 = vsel %vm13466_vm9, %v10768_v39, %v10480_v29  ;;  %v3941_v42 = vadd.f32 %v3909_v36, %v10759_v61  ;;  %v3943_v54 = vadd.f32 %v3911_v12, %v10762_v6  ;;  %v3945_v8 = vadd.f32 %v3913_v34, %v10765_v19  ;;  %v13469_v3 = vld [vmem:[#allocation97_spill] sm:$0xff]  ;;  %v13471_v36 = vld [vmem:[#allocation74_spill] sm:$0xff]  ;;  %v13472_v34 = vld [vmem:[#allocation75_spill] sm:$0xff] }
 0x3ad   :  { %v3982_v56 = vadd.f32 %v3974_v59, %v3940_v18  ;;  %v3947_v4 = vadd.f32 %v3915_v62, %v10768_v39  ;;  %vm3170_vm12 = vcmp.eq.f32.partialorder %v13357_v14, 5.0  ;;  %vm3172_vm5 = vcmp.eq.f32.partialorder %v13467_v21, 5.0  ;;  %v13470_v10 = vld [vmem:[#allocation73_spill] sm:$0xff]  ;;  %v13473_v59 = vld [vmem:[#allocation76_spill] sm:$0xff]  ;;  %v13474_v14 = vld [vmem:[#allocation90_spill] sm:$0xff] }
 0x3ae   :  { %v3967_v48 = vadd.f32 %v3943_v54, %v3941_v42  ;;  %vm3174_vm8 = vcmp.eq.f32.partialorder %v13468_v47, 5.0  ;;  %vm3176_vm4 = vcmp.eq.f32.partialorder %v13469_v3, 5.0  ;;  %v10795_v29 = vsel %vm3170_vm12, %v13470_v10, 0.0  ;;  %v13475_v42 = vld [vmem:[#allocation86_spill] sm:$0xff]  ;;  %v13477_v10 = vld [vmem:[#allocation87_spill] sm:$0xff] }
 0x3af   :  { %3991 = vst [vmem:[#allocation2 + $0x148] sm:$0xff] %v3982_v56  ;;  %v10798_v12 = vsel %vm3172_vm5, %v13471_v36, 0.0  ;;  %v10801_v18 = vsel %vm3174_vm8, %v13472_v34, 0.0  ;;  %v10804_v62 = vsel %vm3176_vm4, %v13473_v59, 0.0  ;;  %vm13476_vm9 = vnez %v13475_v42  ;;  %v13479_v36 = vld [vmem:[#allocation93_spill] sm:$0xff]  ;;  %v13481_v59 = vld [vmem:[#allocation96_spill] sm:$0xff] }
 0x3b0   :  { %v3910_v54 = vsel %vm13476_vm9, %v10795_v29, %v13474_v14  ;;  %v3975_v47 = vadd.f32 %v3967_v48, %v3945_v8  ;;  %vm13478_vm12 = vnez %v13477_v10  ;;  %vm13480_vm5 = vnez %v13479_v36 }
 0x3b1   :  { %v3912_v56 = vsel %vm13478_vm12, %v10798_v12, %v10510_v17  ;;  %v3914_v34 = vsel %vm13480_vm5, %v10801_v18, %v10513_v13  ;;  %vm13482_vm4 = vnez %v13481_v59  ;;  %v3942_v21 = vadd.f32 %v3910_v54, %v10795_v29  ;;  %v13483_v13 = vld [vmem:[#allocation114_spill] sm:$0xff]  ;;  %v13484_v59 = vld [vmem:[#allocation100_spill] sm:$0xff]  ;;  %v13485_v54 = vld [vmem:[#allocation101_spill] sm:$0xff] }
 0x3b2   :  { %v3916_v3 = vsel %vm13482_vm4, %v10804_v62, %v10516_v33  ;;  %v3944_v14 = vadd.f32 %v3912_v56, %v10798_v12  ;;  %v3946_v48 = vadd.f32 %v3914_v34, %v10801_v18  ;;  %v3983_v10 = vadd.f32 %v3975_v47, %v3947_v4  ;;  %v13486_v34 = vld [vmem:[#allocation102_spill] sm:$0xff]  ;;  %v13488_v47 = vld [vmem:[#allocation79_spill] sm:$0xff] }
 0x3b3   :  { %v3948_v8 = vadd.f32 %v3916_v3, %v10804_v62  ;;  %vm3177_vm8 = vcmp.eq.f32.partialorder %v13155_v52, 5.0  ;;  %vm3179_vm12 = vcmp.eq.f32.partialorder %v13374_v60, 5.0  ;;  %vm3181_vm5 = vcmp.eq.f32.partialorder %v13375_v30, 5.0  ;;  %v13487_v3 = vld [vmem:[#allocation103_spill] sm:$0xff] }
 0x3b4   :  { %v3968_v17 = vadd.f32 %v3944_v14, %v3942_v21  ;;  %vm3183_vm9 = vcmp.eq.f32.partialorder %v13483_v13, 5.0  ;;  %v10831_v33 = vsel %vm3177_vm8, %v13484_v59, 0.0  ;;  %v10834_v36 = vsel %vm3179_vm12, %v13485_v54, 0.0  ;;  %3992 = vst [vmem:[#allocation2 + $0x150] sm:$0xff] %v3983_v10  ;;  %v13490_v14 = vld [vmem:[#allocation105_spill] sm:$0xff] }
 0x3b5   :  { %v10837_v56 = vsel %vm3181_vm5, %v13486_v34, 0.0  ;;  %v10840_v4 = vsel %vm3183_vm9, %v13487_v3, 0.0  ;;  %vm13489_vm4 = vnez %v13488_v47  ;;  %vm13491_vm8 = vnez %v13490_v14 }
 0x3b6   :  { %v3917_v21 = vsel %vm13489_vm4, %v10831_v33, %v10543_v1  ;;  %v3919_v59 = vsel %vm13491_vm8, %v10834_v36, %v10546_v41  ;;  %v3976_v13 = vadd.f32 %v3968_v17, %v3946_v48  ;;  %vm13492_vm12 = vnez %v13278_v46  ;;  %v13493_v41 = vld [vmem:[#allocation81_spill] sm:$0xff]  ;;  %v13494_v17 = vld [vmem:[#allocation118_spill] sm:$0xff] }
 0x3b7   :  { %v3921_v10 = vsel %vm13492_vm12, %v10837_v56, %v10549_v53  ;;  %v3923_v3 = vsel %vm13387_vm0, %v10840_v4, %v10552_v32  ;;  %v3949_v34 = vadd.f32 %v3917_v21, %v10831_v33  ;;  %v3951_v1 = vadd.f32 %v3919_v59, %v10834_v36  ;;  %v13495_v59 = vld [vmem:[#allocation125_spill] sm:$0xff] }
 0x3b8   :  { %v3953_v47 = vadd.f32 %v3921_v10, %v10837_v56  ;;  %v3955_v14 = vadd.f32 %v3923_v3, %v10840_v4  ;;  %vm3178_vm9 = vcmp.eq.f32.partialorder %v13493_v41, 5.0  ;;  %v3984_v48 = vadd.f32 %v3976_v13, %v3948_v8  ;;  %v13496_v3 = vld [vmem:[#allocation130_spill] sm:$0xff] }
 0x3b9   :  { %vm3180_vm5 = vcmp.eq.f32.partialorder %v13172_v58, 5.0  ;;  %vm3182_vm12 = vcmp.eq.f32.partialorder %v13173_v23, 5.0  ;;  %vm3184_vm8 = vcmp.eq.f32.partialorder %v13174_v63, 5.0  ;;  %v3969_v53 = vadd.f32 %v3951_v1, %v3949_v34  ;;  %v13498_v34 = vld [vmem:[#allocation122_spill] sm:$0xff] }
 0x3ba   :  { %v10867_v32 = vsel %vm3178_vm9, %v13283_v57, 0.0  ;;  %v10870_v21 = vsel %vm3180_vm5, %v13494_v17, 0.0  ;;  %v10873_v10 = vsel %vm3182_vm12, %v13495_v59, 0.0  ;;  %3993 = vst [vmem:[#allocation2 + $0x158] sm:$0xff] %v3984_v48  ;;  %v10876_v41 = vsel %vm3184_vm8, %v13496_v3, 0.0 }
 0x3bb   :  { %v3918_v13 = vsel %vm13288_vm14, %v10867_v32, %v10579_v38  ;;  %vm13499_vm9 = vnez %v13498_v34  ;;  %vm13500_vm5 = vnez %v13183_v11  ;;  %v3977_v17 = vadd.f32 %v3969_v53, %v3953_v47  ;;  %v13501_v47 = vld [vmem:[#allocation136_spill] sm:$0xff] }
 0x3bc   :  { %v3920_v1 = vsel %vm13499_vm9, %v10870_v21, %v10582_v16  ;;  %v3922_v59 = vsel %vm13500_vm5, %v10873_v10, %v10585_v35  ;;  %v3924_v48 = vsel %vm13185_vm11, %v10876_v41, %v10588_v28  ;;  %v3950_v3 = vadd.f32 %v3918_v13, %v10867_v32  ;;  %v13502_v13 = vld [vmem:[#allocation137_spill] sm:$0xff] }
 0x3bd   :  { %v3952_v38 = vadd.f32 %v3920_v1, %v10870_v21  ;;  %v3954_v8 = vadd.f32 %v3922_v59, %v10873_v10  ;;  %v3956_v34 = vadd.f32 %v3924_v48, %v10876_v41  ;;  %vm3185_vm8 = vcmp.eq.f32.partialorder %v8976_v9, 5.0  ;;  %v13503_v1 = vld [vmem:[#allocation138_spill] sm:$0xff]  ;;  %v13513_v9 = vld [vmem:[#allocation31_spill] sm:$0xff] }
 0x3be   :  { %vm3187_vm12 = vcmp.eq.f32.partialorder %v9062_v44, 5.0  ;;  %v3985_v16 = vadd.f32 %v3977_v17, %v3955_v14  ;;  %vm3189_vm5 = vcmp.eq.f32.partialorder %v9109_v0, 5.0  ;;  %vm3191_vm9 = vcmp.eq.f32.partialorder %v9159_v26, 5.0  ;;  %v13510_v0 = vld [vmem:[#allocation82_spill] sm:$0xff] }
 0x3bf   :  { %v3970_v35 = vadd.f32 %v3952_v38, %v3950_v3  ;;  %v10903_v28 = vsel %vm3185_vm8, %v12839_v22, 0.0  ;;  %v10906_v53 = vsel %vm3187_vm12, %v13501_v47, 0.0  ;;  %v10909_v59 = vsel %vm3189_vm5, %v13502_v13, 0.0  ;;  %v13506_v3 = vld [vmem:[#allocation43_spill] sm:$0xff] }
 0x3c0   :  { %v10912_v48 = vsel %vm3191_vm9, %v13503_v1, 0.0  ;;  %3994 = vst [vmem:[#allocation2 + $0x160] sm:$0xff] %v3985_v16  ;;  %v3925_v17 = vsel %vm9019_vm15, %v10903_v28, %v10615_v40  ;;  %v3927_v22 = vsel %vm9054_vm2, %v10906_v53, %v13506_v3  ;;  %v13508_v47 = vld [vmem:[#allocation107_spill] sm:$0xff]  ;;  %v13512_v3 = vld [vmem:[#allocation50_spill] sm:$0xff]  ;;  %vm3188_vm5 = vcmp.eq.f32.partialorder %v13513_v9, 5.0 }
 0x3c1   :  { %13504 = vst [vmem:[#allocation142_spill] sm:$0xff] %v10912_v48  ;;  %v3978_v44 = vadd.f32 %v3970_v35, %v3954_v8  ;;  %v3929_v13 = vsel %vm9119_vm6, %v10909_v59, %v13508_v47  ;;  %v3931_v8 = vsel %vm13065_vm1, %v10912_v48, %v13510_v0  ;;  %v3957_v16 = vadd.f32 %v3925_v17, %v10903_v28  ;;  %v13514_v47 = vld [vmem:[#allocation88_spill] sm:$0xff]  ;;  %v13516_v1 = vld [vmem:[#allocation139_spill] sm:$0xff] }
 0x3c2   :  { %v3959_v35 = vadd.f32 %v3927_v22, %v10906_v53  ;;  %v3961_v40 = vadd.f32 %v3929_v13, %v10909_v59  ;;  %v3963_v38 = vadd.f32 %v3931_v8, %v10912_v48  ;;  %vm3186_vm9 = vcmp.eq.f32.partialorder %v13512_v3, 5.0  ;;  %v13518_v17 = vld [vmem:[#allocation143_spill] sm:$0xff]  ;;  %v13519_v13 = vld [vmem:[#allocation149_spill] sm:$0xff]  ;;  %v13529_v48 = vld [vmem:[#allocation34_spill] sm:$0xff] }
 0x3c3   :  { %v3986_v14 = vadd.f32 %v3978_v44, %v3956_v34  ;;  %vm3190_vm8 = vcmp.eq.f32.partialorder %v13514_v47, 5.0  ;;  %vm3192_vm12 = vcmp.eq.f32.partialorder %v13515_v37, 5.0  ;;  %v10939_v0 = vsel %vm3186_vm9, %v13516_v1, 0.0  ;;  %v13520_v34 = vld [vmem:[#allocation150_spill] sm:$0xff]  ;;  %v13521_v3 = vld [vmem:[#allocation123_spill] sm:$0xff] }
 0x3c4   :  { %v3971_v26 = vadd.f32 %v3959_v35, %v3957_v16  ;;  %13517 = vst [vmem:[#allocation44_spill] sm:$0xff] %v10939_v0  ;;  %v10942_v22 = vsel %vm3188_vm5, %v13518_v17, 0.0  ;;  %v10945_v44 = vsel %vm3190_vm8, %v13519_v13, 0.0  ;;  %v10948_v8 = vsel %vm3192_vm12, %v13520_v34, 0.0  ;;  %v13527_v16 = vld [vmem:[#allocation29_spill] sm:$0xff]  ;;  %v13528_v17 = vld [vmem:[#allocation20_spill] sm:$0xff] }
 0x3c5   :  { %3995 = vst [vmem:[#allocation2 + $0x168] sm:$0xff] %v3986_v14  ;;  %v3926_v35 = vsel %vm9438_vm3, %v10939_v0, %v13521_v3  ;;  %v3928_v14 = vsel %vm9640_vm10, %v10942_v22, %v10654_v24  ;;  %v3930_v13 = vsel %vm9722_vm13, %v10945_v44, %v10657_v5  ;;  %v3932_v37 = vsel %vm9765_vm7, %v10948_v8, %v10660_v51  ;;  %v13526_v24 = vld [vmem:[#allocation13_spill] sm:$0xff]  ;;  %v13530_v34 = vld [vmem:[#allocation16_spill] sm:$0xff] }
 0x3c6   :  { %v3979_v47 = vadd.f32 %v3971_v26, %v3961_v40  ;;  %v3958_v9 = vadd.f32 %v3926_v35, %v10939_v0  ;;  %v3960_v3 = vadd.f32 %v3928_v14, %v10942_v22  ;;  %v3962_v26 = vadd.f32 %v3930_v13, %v10945_v44  ;;  %v13531_v35 = vld [vmem:[#allocation27_spill] sm:$0xff]  ;;  %v13532_v13 = vld [vmem:[#allocation22_spill] sm:$0xff] }
 0x3c7   :  { %v3964_v40 = vadd.f32 %v3932_v37, %v10948_v8  ;;  %vm3225_vm9 = vcmp.eq.f32.partialorder %v13526_v24, 6.0  ;;  %vm3227_vm5 = vcmp.eq.f32.partialorder %v13527_v16, 6.0  ;;  %vm3229_vm8 = vcmp.eq.f32.partialorder %v13528_v17, 6.0  ;;  %v13533_v37 = vld [vmem:[#allocation14_spill] sm:$0xff]  ;;  %v13535_v16 = vld [vmem:[#allocation21_spill] sm:$0xff] }
 0x3c8   :  { %v3987_v1 = vadd.f32 %v3979_v47, %v3963_v38  ;;  %v3972_v5 = vadd.f32 %v3960_v3, %v3958_v9  ;;  %vm3231_vm12 = vcmp.eq.f32.partialorder %v13529_v48, 6.0  ;;  %v10975_v51 = vsel %vm3225_vm9, %v13530_v34, 0.0  ;;  %v13534_v47 = vld [vmem:[#allocation128_spill] sm:$0xff]  ;;  %v13537_v3 = vld [vmem:[#allocation18_spill] sm:$0xff] }
 0x3c9   :  { %v10978_v0 = vsel %vm3227_vm5, %v13531_v35, 0.0  ;;  %v10981_v14 = vsel %vm3229_vm8, %v13532_v13, 0.0  ;;  %v10984_v38 = vsel %vm3231_vm12, %v13533_v37, 0.0  ;;  %vm13536_vm7 = vnez %v13535_v16  ;;  %v13541_v37 = vld [vmem:[#allocation33_spill] sm:$0xff] }
 0x3ca   :  { %3996 = vst [vmem:[#allocation2 + $0x170] sm:$0xff] %v3987_v1  ;;  %v3998_v9 = vsel %vm13536_vm7, %v10975_v51, %v13534_v47  ;;  %vm13538_vm9 = vnez %v13537_v3  ;;  %v3980_v48 = vadd.f32 %v3972_v5, %v3962_v26  ;;  %v13539_v1 = vld [vmem:[#allocation19_spill] sm:$0xff]  ;;  %vm13542_vm8 = vnez %v13541_v37  ;;  %v13545_v37 = vld [vmem:[#allocation37_spill] sm:$0xff] }
 0x3cb   :  { %v4000_v34 = vsel %vm13538_vm9, %v10978_v0, %v10690_v27  ;;  %vm13540_vm5 = vnez %v13539_v1  ;;  %v4004_v35 = vsel %vm13542_vm8, %v10984_v38, %v10696_v15  ;;  %v4030_v17 = vadd.f32 %v3998_v9, %v10975_v51  ;;  %v13543_v27 = vld [vmem:[#allocation12_spill] sm:$0xff]  ;;  %v13546_v9 = vld [vmem:[#allocation38_spill] sm:$0xff] }
 0x3cc   :  { %v4002_v13 = vsel %vm13540_vm5, %v10981_v14, %v10693_v31  ;;  %v4032_v47 = vadd.f32 %v4000_v34, %v10978_v0  ;;  %v4036_v3 = vadd.f32 %v4004_v35, %v10984_v38  ;;  %vm3226_vm12 = vcmp.eq.f32.partialorder %v13543_v27, 6.0  ;;  %v13544_v31 = vld [vmem:[#allocation57_spill] sm:$0xff]  ;;  %v13547_v34 = vld [vmem:[#allocation39_spill] sm:$0xff]  ;;  %v13548_v35 = vld [vmem:[#allocation40_spill] sm:$0xff] }
 0x3cd   :  { %v4034_v16 = vadd.f32 %v4002_v13, %v10981_v14  ;;  %v3988_v26 = vadd.f32 %v3980_v48, %v3964_v40  ;;  %vm3228_vm9 = vcmp.eq.f32.partialorder %v13437_v43, 6.0  ;;  %vm3230_vm5 = vcmp.eq.f32.partialorder %v13438_v7, 6.0  ;;  %v13549_v48 = vld [vmem:[#allocation9_spill] sm:$0xff] }
 0x3ce   :  { %vm3232_vm7 = vcmp.eq.f32.partialorder %v13544_v31, 6.0  ;;  %v4062_v5 = vadd.f32 %v4032_v47, %v4030_v17  ;;  %v11011_v15 = vsel %vm3226_vm12, %v13545_v37, 0.0  ;;  %v11014_v1 = vsel %vm3228_vm9, %v13546_v9, 0.0  ;;  %v13551_v17 = vld [vmem:[#allocation48_spill] sm:$0xff] }
 0x3cf   :  { %v11017_v13 = vsel %vm3230_vm5, %v13547_v34, 0.0  ;;  %3997 = vst [vmem:[#allocation2 + $0x178] sm:$0xff] %v3988_v26  ;;  %v11020_v27 = vsel %vm3232_vm7, %v13548_v35, 0.0  ;;  %vm13550_vm8 = vnez %v13549_v48  ;;  %vm13552_vm12 = vnez %v13551_v17  ;;  %v13553_v9 = vld [vmem:[#allocation52_spill] sm:$0xff]  ;;  %v13555_v26 = vld [vmem:[#allocation133_spill] sm:$0xff] }
 0x3d0   :  { %v3999_v40 = vsel %vm13550_vm8, %v11011_v15, %v10723_v50  ;;  %v4001_v47 = vsel %vm13552_vm12, %v11014_v1, %v10726_v49  ;;  %vm13554_vm9 = vnez %v13553_v9  ;;  %v4070_v37 = vadd.f32 %v4062_v5, %v4034_v16  ;;  %v13556_v35 = vld [vmem:[#allocation56_spill] sm:$0xff]  ;;  %v13558_v49 = vld [vmem:[#allocation25_spill] sm:$0xff] }
 0x3d1   :  { %v4003_v34 = vsel %vm13554_vm9, %v11017_v13, %v10729_v25  ;;  %vm13557_vm7 = vnez %v13556_v35  ;;  %v4031_v7 = vadd.f32 %v3999_v40, %v11011_v15  ;;  %v4033_v50 = vadd.f32 %v4001_v47, %v11014_v1  ;;  %v13559_v16 = vld [vmem:[#allocation60_spill] sm:$0xff]  ;;  %v13560_v40 = vld [vmem:[#allocation61_spill] sm:$0xff]  ;;  %v13561_v47 = vld [vmem:[#allocation62_spill] sm:$0xff] }
 0x3d2   :  { %v4005_v31 = vsel %vm13557_vm7, %v11020_v27, %v13555_v26  ;;  %v4035_v48 = vadd.f32 %v4003_v34, %v11017_v13  ;;  %vm3233_vm5 = vcmp.eq.f32.partialorder %v13235_v2, 6.0  ;;  %vm3235_vm12 = vcmp.eq.f32.partialorder %v13558_v49, 6.0 }
 0x3d3   :  { %v4037_v17 = vadd.f32 %v4005_v31, %v11020_v27  ;;  %v4078_v9 = vadd.f32 %v4070_v37, %v4036_v3  ;;  %v4063_v25 = vadd.f32 %v4033_v50, %v4031_v7  ;;  %vm3237_vm9 = vcmp.eq.f32.partialorder %v13237_v20, 6.0  ;;  %v13562_v31 = vld [vmem:[#allocation68_spill] sm:$0xff]  ;;  %v13563_v7 = vld [vmem:[#allocation45_spill] sm:$0xff]  ;;  %v13565_v3 = vld [vmem:[#allocation46_spill] sm:$0xff] }
 0x3d4   :  { %vm3239_vm8 = vcmp.eq.f32.partialorder %v13454_v45, 6.0  ;;  %v11047_v5 = vsel %vm3233_vm5, %v13559_v16, 0.0  ;;  %v11050_v26 = vsel %vm3235_vm12, %v13560_v40, 0.0  ;;  %v11053_v34 = vsel %vm3237_vm9, %v13561_v47, 0.0  ;;  %v13567_v40 = vld [vmem:[#allocation65_spill] sm:$0xff] }
 0x3d5   :  { %v11056_v35 = vsel %vm3239_vm8, %v13562_v31, 0.0  ;;  %4087 = vst [vmem:[#allocation2 + $0x180] sm:$0xff] %v4078_v9  ;;  %v4071_v49 = vadd.f32 %v4063_v25, %v4035_v48  ;;  %vm13564_vm7 = vnez %v13563_v7  ;;  %vm13566_vm5 = vnez %v13565_v3  ;;  %v13569_v31 = vld [vmem:[#allocation69_spill] sm:$0xff] }
 0x3d6   :  { %v4006_v37 = vsel %vm13564_vm7, %v11047_v5, %v10759_v61  ;;  %v4008_v50 = vsel %vm13566_vm5, %v11050_v26, %v10762_v6  ;;  %vm13568_vm12 = vnez %v13567_v40  ;;  %vm13570_vm8 = vnez %v13569_v31  ;;  %v13571_v6 = vld [vmem:[#allocation84_spill] sm:$0xff]  ;;  %v13572_v16 = vld [vmem:[#allocation85_spill] sm:$0xff] }
 0x3d7   :  { %v4010_v47 = vsel %vm13568_vm12, %v11053_v34, %v10765_v19  ;;  %v4012_v9 = vsel %vm13570_vm8, %v11056_v35, %v10768_v39  ;;  %v4038_v48 = vadd.f32 %v4006_v37, %v11047_v5  ;;  %v4040_v25 = vadd.f32 %v4008_v50, %v11050_v26  ;;  %v13573_v19 = vld [vmem:[#allocation92_spill] sm:$0xff]  ;;  %v13574_v45 = vld [vmem:[#allocation97_spill] sm:$0xff]  ;;  %v13576_v37 = vld [vmem:[#allocation74_spill] sm:$0xff] }
 0x3d8   :  { %v4042_v61 = vadd.f32 %v4010_v47, %v11053_v34  ;;  %v4079_v7 = vadd.f32 %v4071_v49, %v4037_v17  ;;  %v4044_v3 = vadd.f32 %v4012_v9, %v11056_v35  ;;  %vm3234_vm9 = vcmp.eq.f32.partialorder %v13571_v6, 6.0  ;;  %v13575_v31 = vld [vmem:[#allocation73_spill] sm:$0xff]  ;;  %v13577_v47 = vld [vmem:[#allocation75_spill] sm:$0xff]  ;;  %v13578_v49 = vld [vmem:[#allocation76_spill] sm:$0xff] }
 0x3d9   :  { %vm3236_vm5 = vcmp.eq.f32.partialorder %v13572_v16, 6.0  ;;  %v4064_v40 = vadd.f32 %v4040_v25, %v4038_v48  ;;  %vm3238_vm12 = vcmp.eq.f32.partialorder %v13573_v19, 6.0  ;;  %vm3240_vm7 = vcmp.eq.f32.partialorder %v13574_v45, 6.0 }
 0x3da   :  { %v11083_v39 = vsel %vm3234_vm9, %v13575_v31, 0.0  ;;  %4088 = vst [vmem:[#allocation2 + $0x188] sm:$0xff] %v4079_v7  ;;  %v11086_v50 = vsel %vm3236_vm5, %v13576_v37, 0.0  ;;  %v11089_v17 = vsel %vm3238_vm12, %v13577_v47, 0.0  ;;  %v11092_v9 = vsel %vm3240_vm7, %v13578_v49, 0.0  ;;  %v13580_v31 = vld [vmem:[#allocation87_spill] sm:$0xff] }
 0x3db   :  { %vm13579_vm8 = vnez %v13475_v42  ;;  %v4072_v25 = vadd.f32 %v4064_v40, %v4042_v61  ;;  %vm13581_vm9 = vnez %v13580_v31  ;;  %v13582_v37 = vld [vmem:[#allocation93_spill] sm:$0xff]  ;;  %v13584_v49 = vld [vmem:[#allocation96_spill] sm:$0xff]  ;;  %vm3241_vm12 = vcmp.eq.f32.partialorder %v13155_v52, 6.0 }
 0x3dc   :  { %v4007_v48 = vsel %vm13579_vm8, %v11083_v39, %v10795_v29  ;;  %v4009_v7 = vsel %vm13581_vm9, %v11086_v50, %v10798_v12  ;;  %vm13583_vm5 = vnez %v13582_v37  ;;  %vm13585_vm7 = vnez %v13584_v49  ;;  %v13587_v49 = vld [vmem:[#allocation100_spill] sm:$0xff] }
 0x3dd   :  { %v4011_v47 = vsel %vm13583_vm5, %v11089_v17, %v10801_v18  ;;  %v4013_v45 = vsel %vm13585_vm7, %v11092_v9, %v10804_v62  ;;  %v4039_v19 = vadd.f32 %v4007_v48, %v11083_v39  ;;  %v4041_v29 = vadd.f32 %v4009_v7, %v11086_v50  ;;  %v13586_v18 = vld [vmem:[#allocation114_spill] sm:$0xff] }
 0x3de   :  { %v4043_v40 = vadd.f32 %v4011_v47, %v11089_v17  ;;  %v4045_v61 = vadd.f32 %v4013_v45, %v11092_v9  ;;  %v4080_v31 = vadd.f32 %v4072_v25, %v4044_v3  ;;  %vm3243_vm9 = vcmp.eq.f32.partialorder %v13374_v60, 6.0  ;;  %v13588_v47 = vld [vmem:[#allocation102_spill] sm:$0xff]  ;;  %v13589_v45 = vld [vmem:[#allocation103_spill] sm:$0xff] }
 0x3df   :  { %vm3245_vm5 = vcmp.eq.f32.partialorder %v13375_v30, 6.0  ;;  %v4065_v12 = vadd.f32 %v4041_v29, %v4039_v19  ;;  %vm3247_vm8 = vcmp.eq.f32.partialorder %v13586_v18, 6.0  ;;  %v11119_v62 = vsel %vm3241_vm12, %v13587_v49, 0.0  ;;  %v13591_v29 = vld [vmem:[#allocation105_spill] sm:$0xff] }
 0x3e0   :  { %v11122_v48 = vsel %vm3243_vm9, %v13485_v54, 0.0  ;;  %4089 = vst [vmem:[#allocation2 + $0x190] sm:$0xff] %v4080_v31  ;;  %v11125_v7 = vsel %vm3245_vm5, %v13588_v47, 0.0  ;;  %v11128_v3 = vsel %vm3247_vm8, %v13589_v45, 0.0  ;;  %v4014_v19 = vsel %vm13489_vm4, %v11119_v62, %v10831_v33 }
 0x3e1   :  { %vm13592_vm12 = vnez %v13591_v29  ;;  %v4073_v18 = vadd.f32 %v4065_v12, %v4043_v40  ;;  %vm13593_vm9 = vnez %v13278_v46  ;;  %v4020_v45 = vsel %vm13387_vm0, %v11128_v3, %v10840_v4  ;;  %v13596_v12 = vld [vmem:[#allocation118_spill] sm:$0xff] }
 0x3e2   :  { %v4016_v49 = vsel %vm13592_vm12, %v11122_v48, %v10834_v36  ;;  %v4018_v31 = vsel %vm13593_vm9, %v11125_v7, %v10837_v56  ;;  %v4046_v47 = vadd.f32 %v4014_v19, %v11119_v62  ;;  %v4052_v29 = vadd.f32 %v4020_v45, %v11128_v3  ;;  %v13594_v36 = vld [vmem:[#allocation81_spill] sm:$0xff]  ;;  %v13598_v45 = vld [vmem:[#allocation130_spill] sm:$0xff] }
 0x3e3   :  { %v4048_v33 = vadd.f32 %v4016_v49, %v11122_v48  ;;  %v4050_v25 = vadd.f32 %v4018_v31, %v11125_v7  ;;  %vm3242_vm8 = vcmp.eq.f32.partialorder %v13594_v36, 6.0  ;;  %v4081_v40 = vadd.f32 %v4073_v18, %v4045_v61  ;;  %v13597_v49 = vld [vmem:[#allocation125_spill] sm:$0xff] }
 0x3e4   :  { %vm3244_vm5 = vcmp.eq.f32.partialorder %v13172_v58, 6.0  ;;  %vm3246_vm9 = vcmp.eq.f32.partialorder %v13173_v23, 6.0  ;;  %vm3248_vm12 = vcmp.eq.f32.partialorder %v13174_v63, 6.0  ;;  %v11155_v4 = vsel %vm3242_vm8, %v13283_v57, 0.0  ;;  %v13606_v63 = vld [vmem:[#allocation42_spill] sm:$0xff] }
 0x3e5   :  { %v4066_v56 = vadd.f32 %v4048_v33, %v4046_v47  ;;  %13595 = vst [vmem:[#allocation64_spill] sm:$0xff] %v11155_v4  ;;  %v11158_v19 = vsel %vm3244_vm5, %v13596_v12, 0.0  ;;  %v11161_v31 = vsel %vm3246_vm9, %v13597_v49, 0.0  ;;  %4090 = vst [vmem:[#allocation2 + $0x198] sm:$0xff] %v4081_v40  ;;  %v11164_v36 = vsel %vm3248_vm12, %v13598_v45, 0.0  ;;  %v13601_v47 = vld [vmem:[#allocation122_spill] sm:$0xff] }
 0x3e6   :  { %13599 = vst [vmem:[#allocation147_spill] sm:$0xff] %v11164_v36  ;;  %v4015_v18 = vsel %vm13288_vm14, %v11155_v4, %v10867_v32  ;;  %vm13602_vm8 = vnez %v13601_v47  ;;  %vm13603_vm5 = vnez %v13183_v11  ;;  %v4021_v45 = vsel %vm13185_vm11, %v11164_v36, %v10876_v41  ;;  %v13609_v40 = vld [vmem:[#allocation135_spill] sm:$0xff] }
 0x3e7   :  { %v4017_v33 = vsel %vm13602_vm8, %v11158_v19, %v10870_v21  ;;  %v4019_v49 = vsel %vm13603_vm5, %v11161_v31, %v10873_v10  ;;  %v4074_v12 = vadd.f32 %v4066_v56, %v4050_v25  ;;  %v4047_v57 = vadd.f32 %v4015_v18, %v11155_v4  ;;  %v13605_v21 = vld [vmem:[#allocation41_spill] sm:$0xff]  ;;  %v13607_v25 = vld [vmem:[#allocation140_spill] sm:$0xff]  ;;  %v13608_v56 = vld [vmem:[#allocation146_spill] sm:$0xff] }
 0x3e8   :  { %v4049_v32 = vadd.f32 %v4017_v33, %v11158_v19  ;;  %v4051_v61 = vadd.f32 %v4019_v49, %v11161_v31  ;;  %v4053_v47 = vadd.f32 %v4021_v45, %v11164_v36  ;;  %vm3249_vm12 = vcmp.eq.f32.partialorder %v13605_v21, 6.0  ;;  %v13610_v18 = vld [vmem:[#allocation136_spill] sm:$0xff]  ;;  %v13611_v33 = vld [vmem:[#allocation137_spill] sm:$0xff]  ;;  %v13612_v45 = vld [vmem:[#allocation138_spill] sm:$0xff] }
 0x3e9   :  { %vm3251_vm9 = vcmp.eq.f32.partialorder %v13606_v63, 6.0  ;;  %v4082_v11 = vadd.f32 %v4074_v12, %v4052_v29  ;;  %vm3253_vm5 = vcmp.eq.f32.partialorder %v13607_v25, 6.0  ;;  %vm3255_vm8 = vcmp.eq.f32.partialorder %v13608_v56, 6.0  ;;  %v13619_v56 = vld [vmem:[#allocation31_spill] sm:$0xff] }
 0x3ea   :  { %v4067_v10 = vadd.f32 %v4049_v32, %v4047_v57  ;;  %v11191_v41 = vsel %vm3249_vm12, %v13609_v40, 0.0  ;;  %v11194_v4 = vsel %vm3251_vm9, %v13610_v18, 0.0  ;;  %v11197_v49 = vsel %vm3253_vm5, %v13611_v33, 0.0  ;;  %v13616_v40 = vld [vmem:[#allocation142_spill] sm:$0xff]  ;;  %v13621_v25 = vld [vmem:[#allocation111_spill] sm:$0xff] }
 0x3eb   :  { %v11200_v36 = vsel %vm3255_vm8, %v13612_v45, 0.0  ;;  %4091 = vst [vmem:[#allocation2 + $0x1a0] sm:$0xff] %v4082_v11  ;;  %v4022_v29 = vsel %vm9019_vm15, %v11191_v41, %v10903_v28  ;;  %v4024_v32 = vsel %vm9054_vm2, %v11194_v4, %v10906_v53  ;;  %v4026_v33 = vsel %vm9119_vm6, %v11197_v49, %v10909_v59  ;;  %v13618_v53 = vld [vmem:[#allocation50_spill] sm:$0xff]  ;;  %v13620_v59 = vld [vmem:[#allocation88_spill] sm:$0xff]  ;;  %v13622_v45 = vld [vmem:[#allocation139_spill] sm:$0xff] }
 0x3ec   :  { %v4075_v63 = vadd.f32 %v4067_v10, %v4051_v61  ;;  %v4028_v11 = vsel %vm13065_vm1, %v11200_v36, %v13616_v40  ;;  %v4054_v61 = vadd.f32 %v4022_v29, %v11191_v41  ;;  %v4056_v10 = vadd.f32 %v4024_v32, %v11194_v4  ;;  %v13624_v29 = vld [vmem:[#allocation143_spill] sm:$0xff] }
 0x3ed   :  { %v4058_v28 = vadd.f32 %v4026_v33, %v11197_v49  ;;  %v4060_v12 = vadd.f32 %v4028_v11, %v11200_v36  ;;  %vm3250_vm8 = vcmp.eq.f32.partialorder %v13618_v53, 6.0  ;;  %vm3252_vm5 = vcmp.eq.f32.partialorder %v13619_v56, 6.0  ;;  %v13625_v33 = vld [vmem:[#allocation149_spill] sm:$0xff]  ;;  %v13627_v53 = vld [vmem:[#allocation44_spill] sm:$0xff] }
 0x3ee   :  { %v4083_v57 = vadd.f32 %v4075_v63, %v4053_v47  ;;  %v4068_v18 = vadd.f32 %v4056_v10, %v4054_v61  ;;  %vm3254_vm12 = vcmp.eq.f32.partialorder %v13620_v59, 6.0  ;;  %vm3256_vm9 = vcmp.eq.f32.partialorder %v13621_v25, 6.0  ;;  %v13626_v47 = vld [vmem:[#allocation150_spill] sm:$0xff] }
 0x3ef   :  { %v11227_v40 = vsel %vm3250_vm8, %v13622_v45, 0.0  ;;  %v11230_v32 = vsel %vm3252_vm5, %v13624_v29, 0.0  ;;  %v11233_v63 = vsel %vm3254_vm12, %v13625_v33, 0.0  ;;  %v11236_v11 = vsel %vm3256_vm9, %v13626_v47, 0.0  ;;  %v13631_v47 = vld [vmem:[#allocation94_spill] sm:$0xff]  ;;  %v13634_v29 = vld [vmem:[#allocation20_spill] sm:$0xff] }
 0x3f0   :  { %13623 = vst [vmem:[#allocation151_spill] sm:$0xff] %v11227_v40  ;;  %4092 = vst [vmem:[#allocation2 + $0x1a8] sm:$0xff] %v4083_v57  ;;  %v4023_v10 = vsel %vm9438_vm3, %v11227_v40, %v13627_v53  ;;  %v4076_v59 = vadd.f32 %v4068_v18, %v4058_v28  ;;  %v4025_v57 = vsel %vm9640_vm10, %v11230_v32, %v10942_v22  ;;  %vm13632_vm8 = vnez %v13631_v47  ;;  %v13633_v22 = vld [vmem:[#allocation29_spill] sm:$0xff]  ;;  %v13635_v61 = vld [vmem:[#allocation34_spill] sm:$0xff] }
 0x3f1   :  { %v4027_v33 = vsel %vm9722_vm13, %v11233_v63, %v10945_v44  ;;  %v4029_v25 = vsel %vm13632_vm8, %v11236_v11, %v10948_v8  ;;  %v4055_v56 = vadd.f32 %v4023_v10, %v11227_v40  ;;  %v4057_v53 = vadd.f32 %v4025_v57, %v11230_v32  ;;  %v13636_v47 = vld [vmem:[#allocation16_spill] sm:$0xff]  ;;  %v13637_v10 = vld [vmem:[#allocation27_spill] sm:$0xff] }
 0x3f2   :  { %v4059_v18 = vadd.f32 %v4027_v33, %v11233_v63  ;;  %v4061_v28 = vadd.f32 %v4029_v25, %v11236_v11  ;;  %v4084_v45 = vadd.f32 %v4076_v59, %v4060_v12  ;;  %vm3289_vm5 = vcmp.eq.f32.partialorder %v13526_v24, 7.0  ;;  %v13638_v33 = vld [vmem:[#allocation22_spill] sm:$0xff]  ;;  %v13640_v24 = vld [vmem:[#allocation21_spill] sm:$0xff] }
 0x3f3   :  { %vm3291_vm12 = vcmp.eq.f32.partialorder %v13633_v22, 7.0  ;;  %vm3293_vm9 = vcmp.eq.f32.partialorder %v13634_v29, 7.0  ;;  %v4069_v44 = vadd.f32 %v4057_v53, %v4055_v56  ;;  %vm3295_vm13 = vcmp.eq.f32.partialorder %v13635_v61, 7.0  ;;  %v13639_v25 = vld [vmem:[#allocation14_spill] sm:$0xff]  ;;  %v13646_v53 = vld [vmem:[#allocation33_spill] sm:$0xff] }
 0x3f4   :  { %v11263_v8 = vsel %vm3289_vm5, %v13636_v47, 0.0  ;;  %v11266_v40 = vsel %vm3291_vm12, %v13637_v10, 0.0  ;;  %4093 = vst [vmem:[#allocation2 + $0x1b0] sm:$0xff] %v4084_v45  ;;  %v11269_v57 = vsel %vm3293_vm9, %v13638_v33, 0.0  ;;  %v11272_v12 = vsel %vm3295_vm13, %v13639_v25, 0.0  ;;  %v13642_v59 = vld [vmem:[#allocation18_spill] sm:$0xff] }
 0x3f5   :  { %vm13641_vm8 = vnez %v13640_v24  ;;  %vm13643_vm5 = vnez %v13642_v59  ;;  %v4077_v47 = vadd.f32 %v4069_v44, %v4059_v18  ;;  %v13644_v45 = vld [vmem:[#allocation19_spill] sm:$0xff]  ;;  %vm13647_vm13 = vnez %v13646_v53  ;;  %v13649_v44 = vld [vmem:[#allocation53_spill] sm:$0xff] }
 0x3f6   :  { %v4095_v56 = vsel %vm13641_vm8, %v11263_v8, %v10975_v51  ;;  %v4097_v29 = vsel %vm13643_vm5, %v11266_v40, %v10978_v0  ;;  %vm13645_vm12 = vnez %v13644_v45  ;;  %v4101_v22 = vsel %vm13647_vm13, %v11272_v12, %v10984_v38  ;;  %v13648_v0 = vld [vmem:[#allocation12_spill] sm:$0xff]  ;;  %v13651_v53 = vld [vmem:[#allocation37_spill] sm:$0xff] }
 0x3f7   :  { %v4099_v61 = vsel %vm13645_vm12, %v11269_v57, %v10981_v14  ;;  %v4127_v10 = vadd.f32 %v4095_v56, %v11263_v8  ;;  %v4129_v51 = vadd.f32 %v4097_v29, %v11266_v40  ;;  %v4133_v25 = vadd.f32 %v4101_v22, %v11272_v12  ;;  %v13650_v14 = vld [vmem:[#allocation57_spill] sm:$0xff]  ;;  %v13652_v56 = vld [vmem:[#allocation38_spill] sm:$0xff]  ;;  %v13653_v29 = vld [vmem:[#allocation39_spill] sm:$0xff] }
 0x3f8   :  { %v4131_v33 = vadd.f32 %v4099_v61, %v11269_v57  ;;  %vm3290_vm9 = vcmp.eq.f32.partialorder %v13648_v0, 7.0  ;;  %v4085_v18 = vadd.f32 %v4077_v47, %v4061_v28  ;;  %vm3292_vm5 = vcmp.eq.f32.partialorder %v13437_v43, 7.0  ;;  %v13654_v22 = vld [vmem:[#allocation40_spill] sm:$0xff]  ;;  %v13656_v43 = vld [vmem:[#allocation9_spill] sm:$0xff] }
 0x3f9   :  { %vm3294_vm12 = vcmp.eq.f32.partialorder %v13649_v44, 7.0  ;;  %vm3296_vm8 = vcmp.eq.f32.partialorder %v13650_v14, 7.0  ;;  %v4159_v45 = vadd.f32 %v4129_v51, %v4127_v10  ;;  %v11299_v38 = vsel %vm3290_vm9, %v13651_v53, 0.0  ;;  %v13658_v47 = vld [vmem:[#allocation48_spill] sm:$0xff] }
 0x3fa   :  { %v11302_v59 = vsel %vm3292_vm5, %v13652_v56, 0.0  ;;  %v11305_v61 = vsel %vm3294_vm12, %v13653_v29, 0.0  ;;  %4094 = vst [vmem:[#allocation2 + $0x1b8] sm:$0xff] %v4085_v18  ;;  %v11308_v0 = vsel %vm3296_vm8, %v13654_v22, 0.0  ;;  %vm13657_vm13 = vnez %v13656_v43  ;;  %v13660_v10 = vld [vmem:[#allocation52_spill] sm:$0xff] }
 0x3fb   :  { %13655 = vst [vmem:[#allocation110_spill] sm:$0xff] %v11308_v0  ;;  %v4096_v28 = vsel %vm13657_vm13, %v11299_v38, %v11011_v15  ;;  %vm13659_vm9 = vnez %v13658_v47  ;;  %vm13661_vm5 = vnez %v13660_v10  ;;  %v4167_v44 = vadd.f32 %v4159_v45, %v4131_v33  ;;  %v13662_v18 = vld [vmem:[#allocation56_spill] sm:$0xff]  ;;  %v13665_v45 = vld [vmem:[#allocation70_spill] sm:$0xff] }
 0x3fc   :  { %v4098_v53 = vsel %vm13659_vm9, %v11302_v59, %v11014_v1  ;;  %v4100_v51 = vsel %vm13661_vm5, %v11305_v61, %v11017_v13  ;;  %vm13663_vm8 = vnez %v13662_v18  ;;  %v4128_v56 = vadd.f32 %v4096_v28, %v11299_v38  ;;  %v13664_v1 = vld [vmem:[#allocation25_spill] sm:$0xff]  ;;  %v13666_v33 = vld [vmem:[#allocation60_spill] sm:$0xff] }
 0x3fd   :  { %v4102_v14 = vsel %vm13663_vm8, %v11308_v0, %v11020_v27  ;;  %v4130_v15 = vadd.f32 %v4098_v53, %v11302_v59  ;;  %v4132_v29 = vadd.f32 %v4100_v51, %v11305_v61  ;;  %vm3297_vm12 = vcmp.eq.f32.partialorder %v13235_v2, 7.0  ;;  %v13667_v28 = vld [vmem:[#allocation61_spill] sm:$0xff]  ;;  %v13668_v53 = vld [vmem:[#allocation62_spill] sm:$0xff] }
 0x3fe   :  { %v4134_v22 = vadd.f32 %v4102_v14, %v11308_v0  ;;  %vm3299_vm9 = vcmp.eq.f32.partialorder %v13664_v1, 7.0  ;;  %v4175_v10 = vadd.f32 %v4167_v44, %v4133_v25  ;;  %vm3301_vm5 = vcmp.eq.f32.partialorder %v13237_v20, 7.0  ;;  %v13669_v14 = vld [vmem:[#allocation68_spill] sm:$0xff]  ;;  %v13670_v25 = vld [vmem:[#allocation45_spill] sm:$0xff]  ;;  %v13672_v44 = vld [vmem:[#allocation46_spill] sm:$0xff] }
 0x3ff   :  { %v4160_v13 = vadd.f32 %v4130_v15, %v4128_v56  ;;  %vm3303_vm13 = vcmp.eq.f32.partialorder %v13665_v45, 7.0  ;;  %v11335_v27 = vsel %vm3297_vm12, %v13666_v33, 0.0  ;;  %v11338_v18 = vsel %vm3299_vm9, %v13667_v28, 0.0  ;;  %v13674_v15 = vld [vmem:[#allocation65_spill] sm:$0xff] }
 0x400   :  { %v11341_v51 = vsel %vm3301_vm5, %v13668_v53, 0.0  ;;  %v11344_v0 = vsel %vm3303_vm13, %v13669_v14, 0.0  ;;  %4184 = vst [vmem:[#allocation2 + $0x1c0] sm:$0xff] %v4175_v10  ;;  %vm13671_vm8 = vnez %v13670_v25  ;;  %vm13673_vm12 = vnez %v13672_v44  ;;  %v13676_v45 = vld [vmem:[#allocation69_spill] sm:$0xff] }
 0x401   :  { %v4168_v2 = vadd.f32 %v4160_v13, %v4132_v29  ;;  %v4103_v20 = vsel %vm13671_vm8, %v11335_v27, %v11047_v5  ;;  %v4105_v56 = vsel %vm13673_vm12, %v11338_v18, %v11050_v26  ;;  %vm13675_vm9 = vnez %v13674_v15  ;;  %v13679_v53 = vld [vmem:[#allocation97_spill] sm:$0xff] }
 0x402   :  { %v4107_v1 = vsel %vm13675_vm9, %v11341_v51, %v11053_v34  ;;  %vm13677_vm13 = vnez %v13676_v45  ;;  %v4135_v29 = vadd.f32 %v4103_v20, %v11335_v27  ;;  %v4137_v13 = vadd.f32 %v4105_v56, %v11338_v18  ;;  %v13678_v34 = vld [vmem:[#allocation92_spill] sm:$0xff]  ;;  %v13680_v14 = vld [vmem:[#allocation73_spill] sm:$0xff]  ;;  %v13681_v20 = vld [vmem:[#allocation74_spill] sm:$0xff] }
 0x403   :  { %v4109_v10 = vsel %vm13677_vm13, %v11344_v0, %v11056_v35  ;;  %v4139_v5 = vadd.f32 %v4107_v1, %v11341_v51  ;;  %v4176_v33 = vadd.f32 %v4168_v2, %v4134_v22  ;;  %vm3298_vm5 = vcmp.eq.f32.partialorder %v13571_v6, 7.0  ;;  %v13682_v1 = vld [vmem:[#allocation75_spill] sm:$0xff]  ;;  %v13683_v2 = vld [vmem:[#allocation76_spill] sm:$0xff] }
 0x404   :  { %v4141_v28 = vadd.f32 %v4109_v10, %v11344_v0  ;;  %vm3300_vm12 = vcmp.eq.f32.partialorder %v13572_v16, 7.0  ;;  %v4161_v26 = vadd.f32 %v4137_v13, %v4135_v29  ;;  %vm3302_vm9 = vcmp.eq.f32.partialorder %v13678_v34, 7.0  ;;  %v13685_v29 = vld [vmem:[#allocation87_spill] sm:$0xff]  ;;  %v13778_v34 = vld [vmem:[#allocation112_spill] sm:$0xff] }
 0x405   :  { %vm3304_vm8 = vcmp.eq.f32.partialorder %v13679_v53, 7.0  ;;  %v11371_v35 = vsel %vm3298_vm5, %v13680_v14, 0.0  ;;  %4185 = vst [vmem:[#allocation2 + $0x1c8] sm:$0xff] %v4176_v33  ;;  %v11374_v56 = vsel %vm3300_vm12, %v13681_v20, 0.0  ;;  %v11377_v22 = vsel %vm3302_vm9, %v13682_v1, 0.0  ;;  %v13690_v1 = vld [vmem:[#allocation100_spill] sm:$0xff] }
 0x406   :  { %v11380_v10 = vsel %vm3304_vm8, %v13683_v2, 0.0  ;;  %vm13684_vm13 = vnez %v13475_v42  ;;  %v4169_v6 = vadd.f32 %v4161_v26, %v4139_v5  ;;  %vm13686_vm5 = vnez %v13685_v29 }
 0x407   :  { %v4104_v16 = vsel %vm13684_vm13, %v11371_v35, %v11083_v39  ;;  %v4106_v13 = vsel %vm13686_vm5, %v11374_v56, %v11086_v50  ;;  %vm13687_vm12 = vnez %v13582_v37  ;;  %v4110_v53 = vsel %vm13585_vm7, %v11380_v10, %v11092_v9 }
 0x408   :  { %v4108_v33 = vsel %vm13687_vm12, %v11377_v22, %v11089_v17  ;;  %v4136_v14 = vadd.f32 %v4104_v16, %v11371_v35  ;;  %v4138_v39 = vadd.f32 %v4106_v13, %v11374_v56  ;;  %v4142_v26 = vadd.f32 %v4110_v53, %v11380_v10  ;;  %v13689_v17 = vld [vmem:[#allocation114_spill] sm:$0xff] }
 0x409   :  { %v4140_v5 = vadd.f32 %v4108_v33, %v11377_v22  ;;  %v4177_v20 = vadd.f32 %v4169_v6, %v4141_v28  ;;  %vm3305_vm8 = vcmp.eq.f32.partialorder %v13155_v52, 7.0  ;;  %vm3307_vm9 = vcmp.eq.f32.partialorder %v13374_v60, 7.0  ;;  %v13691_v16 = vld [vmem:[#allocation102_spill] sm:$0xff]  ;;  %v13692_v28 = vld [vmem:[#allocation103_spill] sm:$0xff]  ;;  %v13694_v60 = vld [vmem:[#allocation105_spill] sm:$0xff] }
 0x40a   :  { %vm3309_vm12 = vcmp.eq.f32.partialorder %v13375_v30, 7.0  ;;  %v4162_v50 = vadd.f32 %v4138_v39, %v4136_v14  ;;  %vm3311_vm5 = vcmp.eq.f32.partialorder %v13689_v17, 7.0  ;;  %v11407_v9 = vsel %vm3305_vm8, %v13690_v1, 0.0  ;;  %v13699_v1 = vld [vmem:[#allocation117_spill] sm:$0xff] }
 0x40b   :  { %v11410_v2 = vsel %vm3307_vm9, %v13485_v54, 0.0  ;;  %4186 = vst [vmem:[#allocation2 + $0x1d0] sm:$0xff] %v4177_v20  ;;  %v11413_v13 = vsel %vm3309_vm12, %v13691_v16, 0.0  ;;  %v11416_v6 = vsel %vm3311_vm5, %v13692_v28, 0.0  ;;  %v4111_v30 = vsel %vm13489_vm4, %v11407_v9, %v11119_v62  ;;  %v13700_v16 = vld [vmem:[#allocation118_spill] sm:$0xff] }
 0x40c   :  { %vm13695_vm8 = vnez %v13694_v60  ;;  %v4170_v53 = vadd.f32 %v4162_v50, %v4140_v5  ;;  %vm13696_vm9 = vnez %v13278_v46  ;;  %v4117_v14 = vsel %vm13387_vm0, %v11416_v6, %v11128_v3 }
 0x40d   :  { %v4113_v33 = vsel %vm13695_vm8, %v11410_v2, %v11122_v48  ;;  %v4115_v54 = vsel %vm13696_vm9, %v11413_v13, %v11125_v7  ;;  %v4143_v39 = vadd.f32 %v4111_v30, %v11407_v9  ;;  %v4149_v17 = vadd.f32 %v4117_v14, %v11416_v6  ;;  %v13697_v48 = vld [vmem:[#allocation81_spill] sm:$0xff]  ;;  %v13698_v7 = vld [vmem:[#allocation132_spill] sm:$0xff] }
 0x40e   :  { %v4145_v62 = vadd.f32 %v4113_v33, %v11410_v2  ;;  %v4147_v20 = vadd.f32 %v4115_v54, %v11413_v13  ;;  %vm3306_vm5 = vcmp.eq.f32.partialorder %v13697_v48, 7.0  ;;  %v4178_v5 = vadd.f32 %v4170_v53, %v4142_v26  ;;  %v13701_v30 = vld [vmem:[#allocation125_spill] sm:$0xff]  ;;  %v13702_v54 = vld [vmem:[#allocation130_spill] sm:$0xff]  ;;  %v13704_v26 = vld [vmem:[#allocation64_spill] sm:$0xff] }
 0x40f   :  { %vm3308_vm12 = vcmp.eq.f32.partialorder %v13172_v58, 7.0  ;;  %vm3310_vm9 = vcmp.eq.f32.partialorder %v13173_v23, 7.0  ;;  %vm3312_vm8 = vcmp.eq.f32.partialorder %v13698_v7, 7.0  ;;  %v11443_v3 = vsel %vm3306_vm5, %v13699_v1, 0.0  ;;  %v13706_v53 = vld [vmem:[#allocation122_spill] sm:$0xff]  ;;  %v13715_v1 = vld [vmem:[#allocation135_spill] sm:$0xff] }
 0x410   :  { %v4163_v50 = vadd.f32 %v4145_v62, %v4143_v39  ;;  %v11446_v28 = vsel %vm3308_vm12, %v13700_v16, 0.0  ;;  %v11449_v33 = vsel %vm3310_vm9, %v13701_v30, 0.0  ;;  %4187 = vst [vmem:[#allocation2 + $0x1d8] sm:$0xff] %v4178_v5  ;;  %v11452_v14 = vsel %vm3312_vm8, %v13702_v54, 0.0  ;;  %v13708_v62 = vld [vmem:[#allocation127_spill] sm:$0xff] }
 0x411   :  { %13703 = vst [vmem:[#allocation152_spill] sm:$0xff] %v11452_v14  ;;  %v4112_v23 = vsel %vm13288_vm14, %v11443_v3, %v13704_v26  ;;  %vm13707_vm5 = vnez %v13706_v53  ;;  %vm13709_vm12 = vnez %v13708_v62  ;;  %v13710_v5 = vld [vmem:[#allocation147_spill] sm:$0xff]  ;;  %vm3313_vm8 = vcmp.eq.f32.partialorder %v13605_v21, 7.0 }
 0x412   :  { %v4114_v39 = vsel %vm13707_vm5, %v11446_v28, %v11158_v19  ;;  %v4116_v48 = vsel %vm13709_vm12, %v11449_v33, %v11161_v31  ;;  %v4171_v7 = vadd.f32 %v4163_v50, %v4147_v20  ;;  %v4118_v16 = vsel %vm13185_vm11, %v11452_v14, %v13710_v5  ;;  %v13712_v19 = vld [vmem:[#allocation42_spill] sm:$0xff]  ;;  %v13713_v20 = vld [vmem:[#allocation140_spill] sm:$0xff] }
 0x413   :  { %v4144_v30 = vadd.f32 %v4112_v23, %v11443_v3  ;;  %v4146_v54 = vadd.f32 %v4114_v39, %v11446_v28  ;;  %v4148_v26 = vadd.f32 %v4116_v48, %v11449_v33  ;;  %v4150_v53 = vadd.f32 %v4118_v16, %v11452_v14  ;;  %v13714_v50 = vld [vmem:[#allocation146_spill] sm:$0xff]  ;;  %v13716_v23 = vld [vmem:[#allocation136_spill] sm:$0xff]  ;;  %v13717_v39 = vld [vmem:[#allocation137_spill] sm:$0xff] }
 0x414   :  { %vm3315_vm9 = vcmp.eq.f32.partialorder %v13712_v19, 7.0  ;;  %v4179_v62 = vadd.f32 %v4171_v7, %v4149_v17  ;;  %vm3317_vm12 = vcmp.eq.f32.partialorder %v13713_v20, 7.0  ;;  %vm3319_vm5 = vcmp.eq.f32.partialorder %v13714_v50, 7.0  ;;  %v13718_v16 = vld [vmem:[#allocation138_spill] sm:$0xff]  ;;  %v13727_v20 = vld [vmem:[#allocation139_spill] sm:$0xff] }
 0x415   :  { %v4164_v31 = vadd.f32 %v4146_v54, %v4144_v30  ;;  %v11479_v5 = vsel %vm3313_vm8, %v13715_v1, 0.0  ;;  %v11482_v58 = vsel %vm3315_vm9, %v13716_v23, 0.0  ;;  %v11485_v48 = vsel %vm3317_vm12, %v13717_v39, 0.0  ;;  %v13724_v39 = vld [vmem:[#allocation31_spill] sm:$0xff] }
 0x416   :  { %v11488_v14 = vsel %vm3319_vm5, %v13718_v16, 0.0  ;;  %4188 = vst [vmem:[#allocation2 + $0x1e0] sm:$0xff] %v4179_v62  ;;  %v4119_v7 = vsel %vm9019_vm15, %v11479_v5, %v11191_v41  ;;  %v4121_v30 = vsel %vm9054_vm2, %v11482_v58, %v11194_v4  ;;  %v4123_v19 = vsel %vm9119_vm6, %v11485_v48, %v11197_v49  ;;  %v13723_v4 = vld [vmem:[#allocation50_spill] sm:$0xff]  ;;  %v13725_v49 = vld [vmem:[#allocation88_spill] sm:$0xff]  ;;  %v13726_v54 = vld [vmem:[#allocation111_spill] sm:$0xff] }
 0x417   :  { %v4172_v21 = vadd.f32 %v4164_v31, %v4148_v26  ;;  %v4125_v62 = vsel %vm13065_vm1, %v11488_v14, %v11200_v36  ;;  %v4151_v26 = vadd.f32 %v4119_v7, %v11479_v5  ;;  %v4153_v31 = vadd.f32 %v4121_v30, %v11482_v58  ;;  %v13728_v7 = vld [vmem:[#allocation143_spill] sm:$0xff]  ;;  %v4293_v1 = vld [vmem:[#allocation2 + $0x20] ss:$4 sm:$0xf] }
 0x418   :  { %v4155_v41 = vadd.f32 %v4123_v19, %v11485_v48  ;;  %v4157_v23 = vadd.f32 %v4125_v62, %v11488_v14  ;;  %vm3314_vm5 = vcmp.eq.f32.partialorder %v13723_v4, 7.0  ;;  %vm3316_vm12 = vcmp.eq.f32.partialorder %v13724_v39, 7.0  ;;  %v13730_v19 = vld [vmem:[#allocation149_spill] sm:$0xff]  ;;  %v13732_v4 = vld [vmem:[#allocation151_spill] sm:$0xff] }
 0x419   :  { %v4180_v50 = vadd.f32 %v4172_v21, %v4150_v53  ;;  %v4165_v16 = vadd.f32 %v4153_v31, %v4151_v26  ;;  %vm3318_vm8 = vcmp.eq.f32.partialorder %v13725_v49, 7.0  ;;  %vm3320_vm9 = vcmp.eq.f32.partialorder %v13726_v54, 7.0  ;;  %v13731_v21 = vld [vmem:[#allocation150_spill] sm:$0xff] }
 0x41a   :  { %v11515_v36 = vsel %vm3314_vm5, %v13727_v20, 0.0  ;;  %v11518_v30 = vsel %vm3316_vm12, %v13728_v7, 0.0  ;;  %v11521_v53 = vsel %vm3318_vm8, %v13730_v19, 0.0  ;;  %v11524_v62 = vsel %vm3320_vm9, %v13731_v21, 0.0  ;;  %v13737_v7 = vld [vmem:[#allocation94_spill] sm:$0xff] }
 0x41b   :  { %4189 = vst [vmem:[#allocation2 + $0x1e8] sm:$0xff] %v4180_v50  ;;  %13729 = vst [vmem:[#allocation153_spill] sm:$0xff] %v11518_v30  ;;  %v4120_v31 = vsel %vm9438_vm3, %v11515_v36, %v13732_v4  ;;  %v4173_v39 = vadd.f32 %v4165_v16, %v4155_v41  ;;  %v4122_v20 = vsel %vm9640_vm10, %v11518_v30, %v11230_v32  ;;  %v13735_v50 = vld [vmem:[#allocation71_spill] sm:$0xff]  ;;  %vm13738_vm12 = vnez %v13737_v7  ;;  %v13739_v32 = vld [vmem:[#allocation28_spill] sm:$0xff] }
 0x41c   :  { %vm13736_vm5 = vnez %v13735_v50  ;;  %v4126_v19 = vsel %vm13738_vm12, %v11524_v62, %v11236_v11  ;;  %v4152_v21 = vadd.f32 %v4120_v31, %v11515_v36  ;;  %v4154_v4 = vadd.f32 %v4122_v20, %v11518_v30  ;;  %v13742_v26 = vld [vmem:[#allocation18_spill] sm:$0xff]  ;;  %v13744_v11 = vld [vmem:[#allocation32_spill] sm:$0xff]  ;;  %v13745_v31 = vld [vmem:[#allocation19_spill] sm:$0xff] }
 0x41d   :  { %v4124_v49 = vsel %vm13736_vm5, %v11521_v53, %v11233_v63  ;;  %v4158_v16 = vadd.f32 %v4126_v19, %v11524_v62  ;;  %v4181_v54 = vadd.f32 %v4173_v39, %v4157_v23  ;;  %vm13740_vm8 = vnez %v13640_v24  ;;  %v13741_v63 = vld [vmem:[#allocation24_spill] sm:$0xff]  ;;  %v13748_v19 = vld [vmem:[#allocation33_spill] sm:$0xff] }
 0x41e   :  { %v4156_v41 = vadd.f32 %v4124_v49, %v11521_v53  ;;  %v4192_v50 = vsel %vm13740_vm8, %v13739_v32, %v11263_v8  ;;  %vm13743_vm9 = vnez %v13742_v26  ;;  %vm13746_vm12 = vnez %v13745_v31  ;;  %v13747_v49 = vld [vmem:[#allocation36_spill] sm:$0xff]  ;;  %v13750_v26 = vld [vmem:[#allocation11_spill] sm:$0xff] }
 0x41f   :  { %v4194_v7 = vsel %vm13743_vm9, %v13741_v63, %v11266_v40  ;;  %v4196_v20 = vsel %vm13746_vm12, %v13744_v11, %v11269_v57  ;;  %v4166_v30 = vadd.f32 %v4154_v4, %v4152_v21  ;;  %vm13749_vm5 = vnez %v13748_v19  ;;  %4190 = vst [vmem:[#allocation2 + $0x1f0] sm:$0xff] %v4181_v54  ;;  %v13752_v21 = vld [vmem:[#allocation51_spill] sm:$0xff] }
 0x420   :  { %v4198_v23 = vsel %vm13749_vm5, %v13747_v49, %v11272_v12  ;;  %v4224_v39 = vadd.f32 %v4192_v50, %v13739_v32  ;;  %v4226_v8 = vadd.f32 %v4194_v7, %v13741_v63  ;;  %v4228_v24 = vadd.f32 %v4196_v20, %v13744_v11  ;;  %v13754_v50 = vld [vmem:[#allocation55_spill] sm:$0xff]  ;;  %v13755_v7 = vld [vmem:[#allocation52_spill] sm:$0xff]  ;;  %v13757_v32 = vld [vmem:[#allocation110_spill] sm:$0xff] }
 0x421   :  { %v4230_v40 = vadd.f32 %v4198_v23, %v13747_v49  ;;  %vm13751_vm8 = vnez %v13656_v43  ;;  %vm13753_vm12 = vnez %v13658_v47  ;;  %v4174_v12 = vadd.f32 %v4166_v30, %v4156_v41  ;;  %v13758_v63 = vld [vmem:[#allocation59_spill] sm:$0xff]  ;;  %v13759_v11 = vld [vmem:[#allocation56_spill] sm:$0xff] }
 0x422   :  { %v4193_v57 = vsel %vm13751_vm8, %v13750_v26, %v11299_v38  ;;  %v4195_v4 = vsel %vm13753_vm12, %v13752_v21, %v11302_v59  ;;  %v4256_v31 = vadd.f32 %v4226_v8, %v4224_v39  ;;  %vm13756_vm5 = vnez %v13755_v7  ;;  %v13761_v41 = vld [vmem:[#allocation47_spill] sm:$0xff] }
 0x423   :  { %v4197_v54 = vsel %vm13756_vm5, %v13754_v50, %v11305_v61  ;;  %vm13760_vm9 = vnez %v13759_v11  ;;  %v4225_v43 = vadd.f32 %v4193_v57, %v13750_v26  ;;  %v4227_v38 = vadd.f32 %v4195_v4, %v13752_v21  ;;  %v13763_v19 = vld [vmem:[#allocation63_spill] sm:$0xff]  ;;  %v13767_v57 = vld [vmem:[#allocation72_spill] sm:$0xff]  ;;  %v13769_v4 = vld [vmem:[#allocation89_spill] sm:$0xff] }
 0x424   :  { %v4199_v20 = vsel %vm13760_vm9, %v13758_v63, %v13757_v32  ;;  %v4229_v49 = vadd.f32 %v4197_v54, %v13754_v50  ;;  %v4182_v47 = vadd.f32 %v4174_v12, %v4158_v16  ;;  %v4264_v30 = vadd.f32 %v4256_v31, %v4228_v24  ;;  %v13765_v8 = vld [vmem:[#allocation67_spill] sm:$0xff]  ;;  %v13775_v54 = vld [vmem:[#allocation104_spill] sm:$0xff] }
 0x425   :  { %v4231_v59 = vadd.f32 %v4199_v20, %v13758_v63  ;;  %vm13762_vm8 = vnez %v13670_v25  ;;  %vm13764_vm12 = vnez %v13672_v44  ;;  %v4257_v39 = vadd.f32 %v4227_v38, %v4225_v43  ;;  %v13774_v31 = vld [vmem:[#allocation99_spill] sm:$0xff]  ;;  %v13776_v63 = vld [vmem:[#allocation108_spill] sm:$0xff] }
 0x426   :  { %v4200_v61 = vsel %vm13762_vm8, %v13761_v41, %v11335_v27  ;;  %v4202_v23 = vsel %vm13764_vm12, %v13763_v19, %v11338_v18  ;;  %vm13766_vm5 = vnez %v13674_v15  ;;  %vm13768_vm9 = vnez %v13676_v45  ;;  %4191 = vst [vmem:[#allocation2 + $0x1f8] sm:$0xff] %v4182_v47  ;;  %v13770_v15 = vld [vmem:[#allocation91_spill] sm:$0xff]  ;;  %v13780_v20 = vld [vmem:[#allocation116_spill] sm:$0xff] }
 0x427   :  { %v4204_v26 = vsel %vm13766_vm5, %v13765_v8, %v11341_v51  ;;  %v4206_v16 = vsel %vm13768_vm9, %v13767_v57, %v11344_v0  ;;  %v4232_v24 = vadd.f32 %v4200_v61, %v13761_v41  ;;  %v4272_v27 = vadd.f32 %v4264_v30, %v4230_v40  ;;  %v13772_v45 = vld [vmem:[#allocation95_spill] sm:$0xff]  ;;  %v13783_v30 = vld [vmem:[#allocation124_spill] sm:$0xff]  ;;  %v13786_v41 = vld [vmem:[#allocation129_spill] sm:$0xff] }
 0x428   :  { %v4234_v25 = vadd.f32 %v4202_v23, %v13763_v19  ;;  %v4236_v44 = vadd.f32 %v4204_v26, %v13765_v8  ;;  %v4238_v18 = vadd.f32 %v4206_v16, %v13767_v57  ;;  %v4265_v21 = vadd.f32 %v4257_v39, %v4229_v49  ;;  %v13787_v61 = vld [vmem:[#allocation127_spill] sm:$0xff]  ;;  %v13789_v23 = vld [vmem:[#allocation152_spill] sm:$0xff]  ;;  %v13790_v39 = vld [vmem:[#allocation134_spill] sm:$0xff] }
 0x429   :  { %v4201_v51 = vsel %vm13684_vm13, %v13769_v4, %v11371_v35  ;;  %vm13771_vm8 = vnez %v13685_v29  ;;  %vm13773_vm12 = vnez %v13582_v37  ;;  %4281 = vst [vmem:[#allocation2 + $0x200] sm:$0xff] %v4272_v27  ;;  %v4207_v50 = vsel %vm13585_vm7, %v13774_v31, %v11380_v10 }
 0x42a   :  { %v4203_v0 = vsel %vm13771_vm8, %v13770_v15, %v11374_v56  ;;  %v4205_v40 = vsel %vm13773_vm12, %v13772_v45, %v11377_v22  ;;  %v4258_v12 = vadd.f32 %v4234_v25, %v4232_v24  ;;  %v4233_v42 = vadd.f32 %v4201_v51, %v13769_v4  ;;  %v13792_v25 = vld [vmem:[#allocation120_spill] sm:$0xff]  ;;  %v4361_v4 = vld [vmem:[#allocation2 + $0x1] ss:$4 sm:$0xf] }
 0x42b   :  { %v4235_v35 = vadd.f32 %v4203_v0, %v13770_v15  ;;  %v4273_v7 = vadd.f32 %v4265_v21, %v4231_v59  ;;  %v4237_v29 = vadd.f32 %v4205_v40, %v13772_v45  ;;  %v4239_v56 = vadd.f32 %v4207_v50, %v13774_v31  ;;  %v13781_v59 = vld [vmem:[#allocation121_spill] sm:$0xff]  ;;  %v13794_v15 = vld [vmem:[#allocation144_spill] sm:$0xff] }
 0x42c   :  { %v4208_v37 = vsel %vm13489_vm4, %v13775_v54, %v11407_v9  ;;  %v4266_v22 = vadd.f32 %v4258_v12, %v4236_v44  ;;  %vm13777_vm7 = vnez %v13694_v60  ;;  %vm13779_vm13 = vnez %v13278_v46  ;;  %v13793_v44 = vld [vmem:[#allocation26_spill] sm:$0xff]  ;;  %v13796_v40 = vld [vmem:[#allocation148_spill] sm:$0xff] }
 0x42d   :  { %v4259_v32 = vadd.f32 %v4235_v35, %v4233_v42  ;;  %v4210_v10 = vsel %vm13777_vm7, %v13776_v63, %v11410_v2  ;;  %v4212_v11 = vsel %vm13779_vm13, %v13778_v34, %v11413_v13  ;;  %4282 = vst [vmem:[#allocation2 + $0x208] sm:$0xff] %v4273_v7  ;;  %v4214_v43 = vsel %vm13387_vm0, %v13780_v20, %v11416_v6  ;;  %v4289_v21 = vld [vmem:[#allocation2] ss:$4 sm:$0xf] }
 0x42e   :  { %v4240_v9 = vadd.f32 %v4208_v37, %v13775_v54  ;;  %v4242_v52 = vadd.f32 %v4210_v10, %v13776_v63  ;;  %v4244_v38 = vadd.f32 %v4212_v11, %v13778_v34  ;;  %v4274_v49 = vadd.f32 %v4266_v22, %v4238_v18  ;;  %v4291_v31 = vld [vmem:[#allocation2 + $0x10] ss:$4 sm:$0xf]  ;;  %v4363_v50 = vld [vmem:[#allocation2 + $0x11] ss:$4 sm:$0xf] }
 0x42f   :  { %v4267_v60 = vadd.f32 %v4259_v32, %v4237_v29  ;;  %v4246_v2 = vadd.f32 %v4214_v43, %v13780_v20  ;;  %v4209_v13 = vsel %vm13288_vm14, %v13781_v59, %v11443_v3  ;;  %vm13785_vm0 = vnez %v13784_v55  ;;  %v13798_v37 = vld [vmem:[#allocation54_spill] sm:$0xff]  ;;  %v13800_v32 = vld [vmem:[#allocation153_spill] sm:$0xff]  ;;  %v13804_v20 = vld [vmem:[#allocation71_spill] sm:$0xff] }
 0x430   :  { %v4260_v47 = vadd.f32 %v4242_v52, %v4240_v9  ;;  %v4211_v6 = vsel %vm13785_vm0, %v13783_v30, %v11446_v28  ;;  %vm13788_vm4 = vnez %v13787_v61  ;;  %v4215_v26 = vsel %vm13185_vm11, %v13790_v39, %v13789_v23  ;;  %4283 = vst [vmem:[#allocation2 + $0x210] sm:$0xff] %v4274_v49  ;;  %v13801_v63 = vld [vmem:[#allocation66_spill] sm:$0xff]  ;;  %v13806_v49 = vld [vmem:[#allocation115_spill] sm:$0xff] }
 0x431   :  { %v4213_v19 = vsel %vm13788_vm4, %v13786_v41, %v11449_v33  ;;  %v4275_v57 = vadd.f32 %v4267_v60, %v4239_v56  ;;  %v4241_v3 = vadd.f32 %v4209_v13, %v13781_v59  ;;  %v4243_v16 = vadd.f32 %v4211_v6, %v13783_v30  ;;  %v4295_v56 = vld [vmem:[#allocation2 + $0x30] ss:$4 sm:$0xf]  ;;  %v13803_v11 = vld [vmem:[#allocation98_spill] sm:$0xff] }
 0x432   :  { %v4245_v24 = vadd.f32 %v4213_v19, %v13786_v41  ;;  %v4268_v27 = vadd.f32 %v4260_v47, %v4244_v38  ;;  %v4247_v28 = vadd.f32 %v4215_v26, %v13790_v39  ;;  %v4216_v33 = vsel %vm9019_vm15, %v13792_v25, %v11479_v5  ;;  %v4297_v9 = vld [vmem:[#allocation2 + $0x40] ss:$4 sm:$0xf]  ;;  %v4369_v52 = vld [vmem:[#allocation2 + $0x41] ss:$4 sm:$0xf] }
 0x433   :  { %v4218_v18 = vsel %vm9054_vm2, %v13793_v44, %v11482_v58  ;;  %4284 = vst [vmem:[#allocation2 + $0x218] sm:$0xff] %v4275_v57  ;;  %v4261_v51 = vadd.f32 %v4243_v16, %v4241_v3  ;;  %v4220_v45 = vsel %vm9119_vm6, %v13794_v15, %v11485_v48  ;;  %v4222_v17 = vsel %vm13065_vm1, %v13796_v40, %v11488_v14  ;;  %v4365_v58 = vld [vmem:[#allocation2 + $0x21] ss:$4 sm:$0xf] }
 0x434   :  { %v4248_v5 = vadd.f32 %v4216_v33, %v13792_v25  ;;  %v4276_v42 = vadd.f32 %v4268_v27, %v4246_v2  ;;  %v4250_v35 = vadd.f32 %v4218_v18, %v13793_v44  ;;  %v4252_v7 = vadd.f32 %v4220_v45, %v13794_v15  ;;  %v4367_v48 = vld [vmem:[#allocation2 + $0x31] ss:$4 sm:$0xf]  ;;  %v13807_v60 = vld [vmem:[#allocation94_spill] sm:$0xff] }
 0x435   :  { %v4254_v29 = vadd.f32 %v4222_v17, %v13796_v40  ;;  %v4269_v54 = vadd.f32 %v4261_v51, %v4245_v24  ;;  %v4217_v14 = vsel %vm9438_vm3, %v13798_v37, %v11515_v36  ;;  %v4219_v34 = vsel %vm9640_vm10, %v13801_v63, %v13800_v32  ;;  %v4469_v46 = vld [vmem:[#allocation2 + $0x2] ss:$4 sm:$0xf]  ;;  %v4299_v13 = vld [vmem:[#allocation2 + $0x50] ss:$4 sm:$0xf] }
 0x436   :  { %vm13805_vm15 = vnez %v13804_v20  ;;  %4285 = vst [vmem:[#allocation2 + $0x220] sm:$0xff] %v4276_v42  ;;  %v4262_v38 = vadd.f32 %v4250_v35, %v4248_v5  ;;  %vm13808_vm2 = vnez %v13807_v60  ;;  %v4249_v36 = vadd.f32 %v4217_v14, %v13798_v37  ;;  %v4371_v47 = vld [vmem:[#allocation2 + $0x51] ss:$4 sm:$0xf] }
 0x437   :  { %v4221_v43 = vsel %vm13805_vm15, %v13803_v11, %v11521_v53  ;;  %v4223_v2 = vsel %vm13808_vm2, %v13806_v49, %v11524_v62  ;;  %v4251_v59 = vadd.f32 %v4219_v34, %v13801_v63  ;;  %v4277_v30 = vadd.f32 %v4269_v54, %v4247_v28  ;;  %v4471_v41 = vld [vmem:[#allocation2 + $0x12] ss:$4 sm:$0xf]  ;;  %v4473_v61 = vld [vmem:[#allocation2 + $0x22] ss:$4 sm:$0xf] }
 0x438   :  { %v4253_v55 = vadd.f32 %v4221_v43, %v13803_v11  ;;  %v4255_v53 = vadd.f32 %v4223_v2, %v13806_v49  ;;  %v4432_v6 = vadd.f32 %v4361_v4, %v4289_v21  ;;  %v4270_v19 = vadd.f32 %v4262_v38, %v4252_v7  ;;  %v4577_v39 = vld [vmem:[#allocation2 + $0x3] ss:$4 sm:$0xf]  ;;  %v4475_v26 = vld [vmem:[#allocation2 + $0x32] ss:$4 sm:$0xf] }
 0x439   :  { %v4263_v23 = vadd.f32 %v4251_v59, %v4249_v36  ;;  %v4433_v8 = vadd.f32 %v4363_v50, %v4291_v31  ;;  %v4434_v62 = vadd.f32 %v4365_v58, %v4293_v1  ;;  %v4477_v57 = vld [vmem:[#allocation2 + $0x42] ss:$4 sm:$0xf]  ;;  %v4479_v3 = vld [vmem:[#allocation2 + $0x52] ss:$4 sm:$0xf]  ;;  %v4435_v33 = vadd.f32 %v4367_v48, %v4295_v56 }
 0x43a   :  { %v4301_v16 = vld [vmem:[#allocation2 + $0x60] ss:$4 sm:$0xf]  ;;  %v4373_v24 = vld [vmem:[#allocation2 + $0x61] ss:$4 sm:$0xf]  ;;  %v4540_v27 = vadd.f32 %v4469_v46, %v4432_v6  ;;  %v4436_v44 = vadd.f32 %v4369_v52, %v4297_v9  ;;  %v4437_v18 = vadd.f32 %v4371_v47, %v4299_v13  ;;  %v4278_v51 = vadd.f32 %v4270_v19, %v4254_v29 }
 0x43b   :  { %4286 = vst [vmem:[#allocation2 + $0x228] sm:$0xff] %v4277_v30  ;;  %v4579_v28 = vld [vmem:[#allocation2 + $0x13] ss:$4 sm:$0xf]  ;;  %v4271_v15 = vadd.f32 %v4263_v23, %v4253_v55  ;;  %v4541_v0 = vadd.f32 %v4471_v41, %v4433_v8  ;;  %v4542_v45 = vadd.f32 %v4473_v61, %v4434_v62  ;;  %v4543_v1 = vadd.f32 %v4475_v26, %v4435_v33 }
 0x43c   :  { %v4581_v25 = vld [vmem:[#allocation2 + $0x23] ss:$4 sm:$0xf]  ;;  %v4303_v21 = vld [vmem:[#allocation2 + $0x70] ss:$4 sm:$0xf]  ;;  %v4648_v50 = vadd.f32 %v4577_v39, %v4540_v27  ;;  %v4544_v58 = vadd.f32 %v4477_v57, %v4436_v44  ;;  %v4545_v42 = vadd.f32 %v4479_v3, %v4437_v18  ;;  %v4438_v14 = vadd.f32 %v4373_v24, %v4301_v16 }
 0x43d   :  { %v4375_v4 = vld [vmem:[#allocation2 + $0x71] ss:$4 sm:$0xf]  ;;  %v4583_v40 = vld [vmem:[#allocation2 + $0x33] ss:$4 sm:$0xf]  ;;  %v4279_v37 = vadd.f32 %v4271_v15, %v4255_v53  ;;  %v4649_v29 = vadd.f32 %v4579_v28, %v4541_v0  ;;  %v4650_v22 = vadd.f32 %v4581_v25, %v4542_v45 }
 0x43e   :  { %v4585_v12 = vld [vmem:[#allocation2 + $0x43] ss:$4 sm:$0xf]  ;;  %v4587_v17 = vld [vmem:[#allocation2 + $0x53] ss:$4 sm:$0xf]  ;;  %v4651_v20 = vadd.f32 %v4583_v40, %v4543_v1  ;;  %v4439_v59 = vadd.f32 %v4375_v4, %v4303_v21 }
 0x43f   :  { %v4305_v5 = vld [vmem:[#allocation2 + $0x80] ss:$4 sm:$0xf]  ;;  %v4377_v31 = vld [vmem:[#allocation2 + $0x81] ss:$4 sm:$0xf]  ;;  %v4652_v43 = vadd.f32 %v4585_v12, %v4544_v58  ;;  %v4653_v9 = vadd.f32 %v4587_v17, %v4545_v42 }
 0x440   :  { %v4481_v35 = vld [vmem:[#allocation2 + $0x62] ss:$4 sm:$0xf]  ;;  %v4307_v7 = vld [vmem:[#allocation2 + $0x90] ss:$4 sm:$0xf]  ;;  %v4440_v6 = vadd.f32 %v4377_v31, %v4305_v5 }
 0x441   :  { %v4379_v56 = vld [vmem:[#allocation2 + $0x91] ss:$4 sm:$0xf]  ;;  %v4309_v48 = vld [vmem:[#allocation2 + $0xa0] ss:$4 sm:$0xf]  ;;  %v4546_v36 = vadd.f32 %v4481_v35, %v4438_v14 }
 0x442   :  { %v4381_v54 = vld [vmem:[#allocation2 + $0xa1] ss:$4 sm:$0xf]  ;;  %4287 = vst [vmem:[#allocation2 + $0x230] sm:$0xff] %v4278_v51  ;;  %v4684_v11 = vmul.f32 0.0625, %v4648_v50  ;;  %4288 = vst [vmem:[#allocation2 + $0x238] sm:$0xff] %v4279_v37  ;;  %v4441_v8 = vadd.f32 %v4379_v56, %v4307_v7 }
 0x443   :  { %v4311_v32 = vld [vmem:[#allocation2 + $0xb0] ss:$4 sm:$0xf]  ;;  %v4383_v63 = vld [vmem:[#allocation2 + $0xb1] ss:$4 sm:$0xf]  ;;  %v4442_v62 = vadd.f32 %v4381_v54, %v4309_v48 }
 0x444   :  { %v4313_v10 = vld [vmem:[#allocation2 + $0xc0] ss:$4 sm:$0xf]  ;;  %v4385_v34 = vld [vmem:[#allocation2 + $0xc1] ss:$4 sm:$0xf]  ;;  %v4443_v33 = vadd.f32 %v4383_v63, %v4311_v32 }
 0x445   :  { %v4589_v52 = vld [vmem:[#allocation2 + $0x63] ss:$4 sm:$0xf]  ;;  %v4483_v38 = vld [vmem:[#allocation2 + $0x72] ss:$4 sm:$0xf]  ;;  %v4444_v44 = vadd.f32 %v4385_v34, %v4313_v10 }
 0x446   :  { %v4315_v49 = vld [vmem:[#allocation2 + $0xd0] ss:$4 sm:$0xf]  ;;  %v4685_v60 = vmul.f32 0.0625, %v4649_v29  ;;  %v4686_v2 = vmul.f32 0.0625, %v4650_v22  ;;  %v4687_v47 = vmul.f32 0.0625, %v4651_v20  ;;  %v4654_v19 = vadd.f32 %v4589_v52, %v4546_v36 }
 0x447   :  { %v4485_v46 = vld [vmem:[#allocation2 + $0x82] ss:$4 sm:$0xf]  ;;  %v4387_v13 = vld [vmem:[#allocation2 + $0xd1] ss:$4 sm:$0xf]  ;;  %v4547_v23 = vadd.f32 %v4483_v38, %v4439_v59 }
 0x448   :  { %4720 = vst [vmem:[#allocation6] sm:$0xf] %v4684_v11  ;;  %v4688_v30 = vmul.f32 0.0625, %v4652_v43  ;;  %v4689_v55 = vmul.f32 0.0625, %v4653_v9  ;;  %4721 = vst [vmem:[#allocation6 + $0x4] sm:$0xf] %v4685_v60  ;;  %v4548_v27 = vadd.f32 %v4485_v46, %v4440_v6  ;;  %v4445_v18 = vadd.f32 %v4387_v13, %v4315_v49 }
 0x449   :  { %v4591_v53 = vld [vmem:[#allocation2 + $0x73] ss:$4 sm:$0xf]  ;;  %v4487_v41 = vld [vmem:[#allocation2 + $0x92] ss:$4 sm:$0xf] }
 0x44a   :  { %v4489_v61 = vld [vmem:[#allocation2 + $0xa2] ss:$4 sm:$0xf]  ;;  %4722 = vst [vmem:[#allocation6 + $0x8] sm:$0xf] %v4686_v2  ;;  %v4690_v51 = vmul.f32 0.0625, %v4654_v19  ;;  %v4655_v15 = vadd.f32 %v4591_v53, %v4547_v23  ;;  %v4549_v0 = vadd.f32 %v4487_v41, %v4441_v8 }
 0x44b   :  { %v4593_v39 = vld [vmem:[#allocation2 + $0x83] ss:$4 sm:$0xf]  ;;  %v4491_v26 = vld [vmem:[#allocation2 + $0xb2] ss:$4 sm:$0xf]  ;;  %v4550_v45 = vadd.f32 %v4489_v61, %v4442_v62 }
 0x44c   :  { %v4493_v57 = vld [vmem:[#allocation2 + $0xc2] ss:$4 sm:$0xf]  ;;  %v4495_v3 = vld [vmem:[#allocation2 + $0xd2] ss:$4 sm:$0xf]  ;;  %v4656_v50 = vadd.f32 %v4593_v39, %v4548_v27  ;;  %v4551_v1 = vadd.f32 %v4491_v26, %v4443_v33 }
 0x44d   :  { %v4317_v16 = vld [vmem:[#allocation2 + $0xe0] ss:$4 sm:$0xf]  ;;  %v4389_v24 = vld [vmem:[#allocation2 + $0xe1] ss:$4 sm:$0xf]  ;;  %v4552_v58 = vadd.f32 %v4493_v57, %v4444_v44  ;;  %v4553_v42 = vadd.f32 %v4495_v3, %v4445_v18 }
 0x44e   :  { %4723 = vst [vmem:[#allocation6 + $0xc] sm:$0xf] %v4687_v47  ;;  %4724 = vst [vmem:[#allocation6 + $0x10] sm:$0xf] %v4688_v30  ;;  %v4691_v37 = vmul.f32 0.0625, %v4655_v15  ;;  %v4446_v14 = vadd.f32 %v4389_v24, %v4317_v16  ;;  %v4692_v11 = vmul.f32 0.0625, %v4656_v50 }
 0x44f   :  { %4725 = vst [vmem:[#allocation6 + $0x14] sm:$0xf] %v4689_v55  ;;  %v4595_v28 = vld [vmem:[#allocation2 + $0x93] ss:$4 sm:$0xf] }
 0x450   :  { %v4597_v25 = vld [vmem:[#allocation2 + $0xa3] ss:$4 sm:$0xf]  ;;  %v4319_v21 = vld [vmem:[#allocation2 + $0xf0] ss:$4 sm:$0xf]  ;;  %v4657_v29 = vadd.f32 %v4595_v28, %v4549_v0 }
 0x451   :  { %v4391_v4 = vld [vmem:[#allocation2 + $0xf1] ss:$4 sm:$0xf]  ;;  %v4599_v40 = vld [vmem:[#allocation2 + $0xb3] ss:$4 sm:$0xf]  ;;  %v4658_v22 = vadd.f32 %v4597_v25, %v4550_v45 }
 0x452   :  { %v4601_v12 = vld [vmem:[#allocation2 + $0xc3] ss:$4 sm:$0xf]  ;;  %v4603_v17 = vld [vmem:[#allocation2 + $0xd3] ss:$4 sm:$0xf]  ;;  %v4659_v20 = vadd.f32 %v4599_v40, %v4551_v1  ;;  %v4447_v59 = vadd.f32 %v4391_v4, %v4319_v21 }
 0x453   :  { %v4321_v5 = vld [vmem:[#allocation2 + $0x100] ss:$4 sm:$0xf]  ;;  %v4393_v31 = vld [vmem:[#allocation2 + $0x101] ss:$4 sm:$0xf]  ;;  %v4660_v43 = vadd.f32 %v4601_v12, %v4552_v58  ;;  %v4661_v9 = vadd.f32 %v4603_v17, %v4553_v42 }
 0x454   :  { %v4497_v35 = vld [vmem:[#allocation2 + $0xe2] ss:$4 sm:$0xf]  ;;  %v4323_v7 = vld [vmem:[#allocation2 + $0x110] ss:$4 sm:$0xf]  ;;  %v4448_v6 = vadd.f32 %v4393_v31, %v4321_v5 }
 0x455   :  { %v4395_v56 = vld [vmem:[#allocation2 + $0x111] ss:$4 sm:$0xf]  ;;  %v4325_v48 = vld [vmem:[#allocation2 + $0x120] ss:$4 sm:$0xf]  ;;  %v4554_v36 = vadd.f32 %v4497_v35, %v4446_v14 }
 0x456   :  { %v4397_v54 = vld [vmem:[#allocation2 + $0x121] ss:$4 sm:$0xf]  ;;  %4726 = vst [vmem:[#allocation6 + $0x18] sm:$0xf] %v4690_v51  ;;  %v4693_v60 = vmul.f32 0.0625, %v4657_v29  ;;  %v4449_v8 = vadd.f32 %v4395_v56, %v4323_v7 }
 0x457   :  { %v4327_v32 = vld [vmem:[#allocation2 + $0x130] ss:$4 sm:$0xf]  ;;  %v4399_v63 = vld [vmem:[#allocation2 + $0x131] ss:$4 sm:$0xf]  ;;  %v4450_v62 = vadd.f32 %v4397_v54, %v4325_v48 }
 0x458   :  { %v4329_v10 = vld [vmem:[#allocation2 + $0x140] ss:$4 sm:$0xf]  ;;  %v4401_v34 = vld [vmem:[#allocation2 + $0x141] ss:$4 sm:$0xf]  ;;  %v4451_v33 = vadd.f32 %v4399_v63, %v4327_v32 }
 0x459   :  { %v4605_v52 = vld [vmem:[#allocation2 + $0xe3] ss:$4 sm:$0xf]  ;;  %v4499_v38 = vld [vmem:[#allocation2 + $0xf2] ss:$4 sm:$0xf]  ;;  %v4452_v44 = vadd.f32 %v4401_v34, %v4329_v10 }
 0x45a   :  { %v4331_v49 = vld [vmem:[#allocation2 + $0x150] ss:$4 sm:$0xf]  ;;  %4727 = vst [vmem:[#allocation6 + $0x1c] sm:$0xf] %v4691_v37  ;;  %v4694_v2 = vmul.f32 0.0625, %v4658_v22  ;;  %v4662_v19 = vadd.f32 %v4605_v52, %v4554_v36  ;;  %v4555_v23 = vadd.f32 %v4499_v38, %v4447_v59 }
 0x45b   :  { %v4501_v46 = vld [vmem:[#allocation2 + $0x102] ss:$4 sm:$0xf]  ;;  %v4403_v13 = vld [vmem:[#allocation2 + $0x151] ss:$4 sm:$0xf] }
 0x45c   :  { %4728 = vst [vmem:[#allocation6 + $0x20] sm:$0xf] %v4692_v11  ;;  %v4695_v47 = vmul.f32 0.0625, %v4659_v20  ;;  %v4696_v30 = vmul.f32 0.0625, %v4660_v43  ;;  %v4697_v55 = vmul.f32 0.0625, %v4661_v9  ;;  %v4556_v27 = vadd.f32 %v4501_v46, %v4448_v6 }
 0x45d   :  { %v4607_v53 = vld [vmem:[#allocation2 + $0xf3] ss:$4 sm:$0xf]  ;;  %v4503_v41 = vld [vmem:[#allocation2 + $0x112] ss:$4 sm:$0xf]  ;;  %v4453_v18 = vadd.f32 %v4403_v13, %v4331_v49 }
 0x45e   :  { %v4505_v61 = vld [vmem:[#allocation2 + $0x122] ss:$4 sm:$0xf]  ;;  %4729 = vst [vmem:[#allocation6 + $0x24] sm:$0xf] %v4693_v60  ;;  %v4698_v51 = vmul.f32 0.0625, %v4662_v19  ;;  %v4663_v15 = vadd.f32 %v4607_v53, %v4555_v23  ;;  %v4557_v0 = vadd.f32 %v4503_v41, %v4449_v8 }
 0x45f   :  { %4730 = vst [vmem:[#allocation6 + $0x28] sm:$0xf] %v4694_v2  ;;  %v4609_v39 = vld [vmem:[#allocation2 + $0x103] ss:$4 sm:$0xf]  ;;  %v4558_v45 = vadd.f32 %v4505_v61, %v4450_v62 }
 0x460   :  { %v4507_v26 = vld [vmem:[#allocation2 + $0x132] ss:$4 sm:$0xf]  ;;  %v4509_v57 = vld [vmem:[#allocation2 + $0x142] ss:$4 sm:$0xf]  ;;  %v4664_v50 = vadd.f32 %v4609_v39, %v4556_v27 }
 0x461   :  { %v4511_v3 = vld [vmem:[#allocation2 + $0x152] ss:$4 sm:$0xf]  ;;  %v4333_v16 = vld [vmem:[#allocation2 + $0x160] ss:$4 sm:$0xf]  ;;  %v4559_v1 = vadd.f32 %v4507_v26, %v4451_v33  ;;  %v4560_v58 = vadd.f32 %v4509_v57, %v4452_v44 }
 0x462   :  { %v4405_v24 = vld [vmem:[#allocation2 + $0x161] ss:$4 sm:$0xf]  ;;  %4731 = vst [vmem:[#allocation6 + $0x2c] sm:$0xf] %v4695_v47  ;;  %v4561_v42 = vadd.f32 %v4511_v3, %v4453_v18  ;;  %v4699_v37 = vmul.f32 0.0625, %v4663_v15 }
 0x463   :  { %4732 = vst [vmem:[#allocation6 + $0x30] sm:$0xf] %v4696_v30  ;;  %4733 = vst [vmem:[#allocation6 + $0x34] sm:$0xf] %v4697_v55  ;;  %v4454_v14 = vadd.f32 %v4405_v24, %v4333_v16  ;;  %v4700_v11 = vmul.f32 0.0625, %v4664_v50 }
 0x464   :  { %v4611_v28 = vld [vmem:[#allocation2 + $0x113] ss:$4 sm:$0xf]  ;;  %v4613_v25 = vld [vmem:[#allocation2 + $0x123] ss:$4 sm:$0xf] }
 0x465   :  { %v4335_v21 = vld [vmem:[#allocation2 + $0x170] ss:$4 sm:$0xf]  ;;  %v4407_v4 = vld [vmem:[#allocation2 + $0x171] ss:$4 sm:$0xf]  ;;  %v4665_v29 = vadd.f32 %v4611_v28, %v4557_v0  ;;  %v4666_v22 = vadd.f32 %v4613_v25, %v4558_v45 }
 0x466   :  { %v4615_v40 = vld [vmem:[#allocation2 + $0x133] ss:$4 sm:$0xf]  ;;  %v4617_v12 = vld [vmem:[#allocation2 + $0x143] ss:$4 sm:$0xf]  ;;  %v4455_v59 = vadd.f32 %v4407_v4, %v4335_v21 }
 0x467   :  { %v4619_v17 = vld [vmem:[#allocation2 + $0x153] ss:$4 sm:$0xf]  ;;  %v4337_v5 = vld [vmem:[#allocation2 + $0x180] ss:$4 sm:$0xf]  ;;  %v4667_v20 = vadd.f32 %v4615_v40, %v4559_v1  ;;  %v4668_v43 = vadd.f32 %v4617_v12, %v4560_v58 }
 0x468   :  { %v4409_v31 = vld [vmem:[#allocation2 + $0x181] ss:$4 sm:$0xf]  ;;  %v4513_v35 = vld [vmem:[#allocation2 + $0x162] ss:$4 sm:$0xf]  ;;  %v4669_v9 = vadd.f32 %v4619_v17, %v4561_v42 }
 0x469   :  { %v4339_v7 = vld [vmem:[#allocation2 + $0x190] ss:$4 sm:$0xf]  ;;  %v4411_v56 = vld [vmem:[#allocation2 + $0x191] ss:$4 sm:$0xf]  ;;  %v4562_v36 = vadd.f32 %v4513_v35, %v4454_v14  ;;  %v4456_v6 = vadd.f32 %v4409_v31, %v4337_v5 }
 0x46a   :  { %v4341_v48 = vld [vmem:[#allocation2 + $0x1a0] ss:$4 sm:$0xf]  ;;  %v4413_v54 = vld [vmem:[#allocation2 + $0x1a1] ss:$4 sm:$0xf]  ;;  %v4457_v8 = vadd.f32 %v4411_v56, %v4339_v7 }
 0x46b   :  { %4734 = vst [vmem:[#allocation6 + $0x38] sm:$0xf] %v4698_v51  ;;  %v4343_v32 = vld [vmem:[#allocation2 + $0x1b0] ss:$4 sm:$0xf]  ;;  %v4701_v60 = vmul.f32 0.0625, %v4665_v29  ;;  %v4458_v62 = vadd.f32 %v4413_v54, %v4341_v48 }
 0x46c   :  { %v4415_v63 = vld [vmem:[#allocation2 + $0x1b1] ss:$4 sm:$0xf]  ;;  %v4345_v10 = vld [vmem:[#allocation2 + $0x1c0] ss:$4 sm:$0xf] }
 0x46d   :  { %v4417_v34 = vld [vmem:[#allocation2 + $0x1c1] ss:$4 sm:$0xf]  ;;  %v4621_v52 = vld [vmem:[#allocation2 + $0x163] ss:$4 sm:$0xf]  ;;  %v4459_v33 = vadd.f32 %v4415_v63, %v4343_v32 }
 0x46e   :  { %v4515_v38 = vld [vmem:[#allocation2 + $0x172] ss:$4 sm:$0xf]  ;;  %v4347_v49 = vld [vmem:[#allocation2 + $0x1d0] ss:$4 sm:$0xf]  ;;  %v4670_v19 = vadd.f32 %v4621_v52, %v4562_v36  ;;  %v4460_v44 = vadd.f32 %v4417_v34, %v4345_v10 }
 0x46f   :  { %4735 = vst [vmem:[#allocation6 + $0x3c] sm:$0xf] %v4699_v37  ;;  %v4702_v2 = vmul.f32 0.0625, %v4666_v22  ;;  %v4517_v46 = vld [vmem:[#allocation2 + $0x182] ss:$4 sm:$0xf]  ;;  %v4563_v23 = vadd.f32 %v4515_v38, %v4455_v59 }
 0x470   :  { %v4419_v13 = vld [vmem:[#allocation2 + $0x1d1] ss:$4 sm:$0xf]  ;;  %4736 = vst [vmem:[#allocation6 + $0x40] sm:$0xf] %v4700_v11  ;;  %v4703_v47 = vmul.f32 0.0625, %v4667_v20  ;;  %v4564_v27 = vadd.f32 %v4517_v46, %v4456_v6 }
 0x471   :  { %v4704_v30 = vmul.f32 0.0625, %v4668_v43  ;;  %v4705_v55 = vmul.f32 0.0625, %v4669_v9  ;;  %v4623_v53 = vld [vmem:[#allocation2 + $0x173] ss:$4 sm:$0xf]  ;;  %v4461_v18 = vadd.f32 %v4419_v13, %v4347_v49  ;;  %v4706_v51 = vmul.f32 0.0625, %v4670_v19 }
 0x472   :  { %v4519_v41 = vld [vmem:[#allocation2 + $0x192] ss:$4 sm:$0xf]  ;;  %v4521_v61 = vld [vmem:[#allocation2 + $0x1a2] ss:$4 sm:$0xf]  ;;  %v4671_v15 = vadd.f32 %v4623_v53, %v4563_v23 }
 0x473   :  { %4737 = vst [vmem:[#allocation6 + $0x44] sm:$0xf] %v4701_v60  ;;  %4738 = vst [vmem:[#allocation6 + $0x48] sm:$0xf] %v4702_v2  ;;  %v4565_v0 = vadd.f32 %v4519_v41, %v4457_v8  ;;  %v4566_v45 = vadd.f32 %v4521_v61, %v4458_v62 }
 0x474   :  { %v4625_v39 = vld [vmem:[#allocation2 + $0x183] ss:$4 sm:$0xf]  ;;  %v4523_v26 = vld [vmem:[#allocation2 + $0x1b2] ss:$4 sm:$0xf] }
 0x475   :  { %v4525_v57 = vld [vmem:[#allocation2 + $0x1c2] ss:$4 sm:$0xf]  ;;  %v4527_v3 = vld [vmem:[#allocation2 + $0x1d2] ss:$4 sm:$0xf]  ;;  %v4672_v50 = vadd.f32 %v4625_v39, %v4564_v27  ;;  %v4567_v1 = vadd.f32 %v4523_v26, %v4459_v33 }
 0x476   :  { %v4349_v16 = vld [vmem:[#allocation2 + $0x1e0] ss:$4 sm:$0xf]  ;;  %v4421_v24 = vld [vmem:[#allocation2 + $0x1e1] ss:$4 sm:$0xf]  ;;  %v4568_v58 = vadd.f32 %v4525_v57, %v4460_v44  ;;  %v4569_v42 = vadd.f32 %v4527_v3, %v4461_v18 }
 0x477   :  { %4739 = vst [vmem:[#allocation6 + $0x4c] sm:$0xf] %v4703_v47  ;;  %4740 = vst [vmem:[#allocation6 + $0x50] sm:$0xf] %v4704_v30  ;;  %v4707_v54 = vmul.f32 0.0625, %v4671_v15  ;;  %v4462_v22 = vadd.f32 %v4421_v24, %v4349_v16  ;;  %v4708_v32 = vmul.f32 0.0625, %v4672_v50 }
 0x478   :  { %4741 = vst [vmem:[#allocation6 + $0x54] sm:$0xf] %v4705_v55  ;;  %v4627_v28 = vld [vmem:[#allocation2 + $0x193] ss:$4 sm:$0xf] }
 0x479   :  { %v4629_v25 = vld [vmem:[#allocation2 + $0x1a3] ss:$4 sm:$0xf]  ;;  %v4351_v21 = vld [vmem:[#allocation2 + $0x1f0] ss:$4 sm:$0xf]  ;;  %v4673_v37 = vadd.f32 %v4627_v28, %v4565_v0 }
 0x47a   :  { %v4423_v4 = vld [vmem:[#allocation2 + $0x1f1] ss:$4 sm:$0xf]  ;;  %v4631_v40 = vld [vmem:[#allocation2 + $0x1b3] ss:$4 sm:$0xf]  ;;  %v4674_v29 = vadd.f32 %v4629_v25, %v4566_v45 }
 0x47b   :  { %v4633_v12 = vld [vmem:[#allocation2 + $0x1c3] ss:$4 sm:$0xf]  ;;  %v4635_v17 = vld [vmem:[#allocation2 + $0x1d3] ss:$4 sm:$0xf]  ;;  %v4675_v63 = vadd.f32 %v4631_v40, %v4567_v1  ;;  %v4463_v49 = vadd.f32 %v4423_v4, %v4351_v21 }
 0x47c   :  { %v4353_v5 = vld [vmem:[#allocation2 + $0x200] ss:$4 sm:$0xf]  ;;  %v4425_v31 = vld [vmem:[#allocation2 + $0x201] ss:$4 sm:$0xf]  ;;  %v4676_v10 = vadd.f32 %v4633_v12, %v4568_v58  ;;  %v4677_v34 = vadd.f32 %v4635_v17, %v4569_v42 }
 0x47d   :  { %v4529_v35 = vld [vmem:[#allocation2 + $0x1e2] ss:$4 sm:$0xf]  ;;  %v4355_v7 = vld [vmem:[#allocation2 + $0x210] ss:$4 sm:$0xf]  ;;  %v4464_v13 = vadd.f32 %v4425_v31, %v4353_v5 }
 0x47e   :  { %v4427_v56 = vld [vmem:[#allocation2 + $0x211] ss:$4 sm:$0xf]  ;;  %v4357_v48 = vld [vmem:[#allocation2 + $0x220] ss:$4 sm:$0xf]  ;;  %v4570_v38 = vadd.f32 %v4529_v35, %v4462_v22 }
 0x47f   :  { %4742 = vst [vmem:[#allocation6 + $0x58] sm:$0xf] %v4706_v51  ;;  %v4429_v14 = vld [vmem:[#allocation2 + $0x221] ss:$4 sm:$0xf]  ;;  %v4709_v9 = vmul.f32 0.0625, %v4673_v37  ;;  %v4465_v6 = vadd.f32 %v4427_v56, %v4355_v7 }
 0x480   :  { %v4637_v11 = vld [vmem:[#allocation2 + $0x1e3] ss:$4 sm:$0xf]  ;;  %v4531_v20 = vld [vmem:[#allocation2 + $0x1f2] ss:$4 sm:$0xf]  ;;  %v4466_v41 = vadd.f32 %v4429_v14, %v4357_v48 }
 0x481   :  { %v4359_v43 = vld [vmem:[#allocation2 + $0x230] ss:$4 sm:$0xf]  ;;  %4743 = vst [vmem:[#allocation6 + $0x5c] sm:$0xf] %v4707_v54  ;;  %v4710_v52 = vmul.f32 0.0625, %v4674_v29  ;;  %v4678_v47 = vadd.f32 %v4637_v11, %v4570_v38  ;;  %v4571_v30 = vadd.f32 %v4531_v20, %v4463_v49 }
 0x482   :  { %v4431_v60 = vld [vmem:[#allocation2 + $0x231] ss:$4 sm:$0xf]  ;;  %4744 = vst [vmem:[#allocation6 + $0x60] sm:$0xf] %v4708_v32  ;;  %v4711_v2 = vmul.f32 0.0625, %v4675_v63 }
 0x483   :  { %v4712_v36 = vmul.f32 0.0625, %v4676_v10  ;;  %v4713_v59 = vmul.f32 0.0625, %v4677_v34  ;;  %v4639_v46 = vld [vmem:[#allocation2 + $0x1f3] ss:$4 sm:$0xf]  ;;  %v4467_v39 = vadd.f32 %v4431_v60, %v4359_v43  ;;  %v4714_v8 = vmul.f32 0.0625, %v4678_v47 }
 0x484   :  { %4745 = vst [vmem:[#allocation6 + $0x64] sm:$0xf] %v4709_v9  ;;  %4746 = vst [vmem:[#allocation6 + $0x68] sm:$0xf] %v4710_v52  ;;  %v4679_v62 = vadd.f32 %v4639_v46, %v4571_v30 }
 0x485   :  { %v4533_v55 = vld [vmem:[#allocation2 + $0x202] ss:$4 sm:$0xf]  ;;  %v4641_v53 = vld [vmem:[#allocation2 + $0x203] ss:$4 sm:$0xf] }
 0x486   :  { %4747 = vst [vmem:[#allocation6 + $0x6c] sm:$0xf] %v4711_v2  ;;  %4748 = vst [vmem:[#allocation6 + $0x70] sm:$0xf] %v4712_v36  ;;  %v4572_v61 = vadd.f32 %v4533_v55, %v4464_v13  ;;  %v4715_v25 = vmul.f32 0.0625, %v4679_v62 }
 0x487   :  { %4749 = vst [vmem:[#allocation6 + $0x74] sm:$0xf] %v4713_v59  ;;  %v4535_v19 = vld [vmem:[#allocation2 + $0x212] ss:$4 sm:$0xf] }
 0x488   :  { %v4537_v23 = vld [vmem:[#allocation2 + $0x222] ss:$4 sm:$0xf]  ;;  %v4573_v26 = vadd.f32 %v4535_v19, %v4465_v6  ;;  %v4539_v3 = vld [vmem:[#allocation2 + $0x232] ss:$4 sm:$0xf]  ;;  %v4680_v16 = vadd.f32 %v4641_v53, %v4572_v61 }
 0x489   :  { %v4574_v57 = vadd.f32 %v4537_v23, %v4466_v41  ;;  %v4643_v24 = vld [vmem:[#allocation2 + $0x213] ss:$4 sm:$0xf]  ;;  %v4645_v27 = vld [vmem:[#allocation2 + $0x223] ss:$4 sm:$0xf]  ;;  %v4575_v28 = vadd.f32 %v4539_v3, %v4467_v39 }
 0x48a   :  { %4750 = vst [vmem:[#allocation6 + $0x78] sm:$0xf] %v4714_v8  ;;  %v4681_v33 = vadd.f32 %v4643_v24, %v4573_v26  ;;  %v4647_v18 = vld [vmem:[#allocation2 + $0x233] ss:$4 sm:$0xf]  ;;  %v4716_v21 = vmul.f32 0.0625, %v4680_v16 }
 0x48b   :  { %v4682_v44 = vadd.f32 %v4645_v27, %v4574_v57  ;;  %v4683_v4 = vadd.f32 %v4647_v18, %v4575_v28  ;;  %4751 = vst [vmem:[#allocation6 + $0x7c] sm:$0xf] %v4715_v25 }
 0x48c   :  { %v4717_v51 = vmul.f32 0.0625, %v4681_v33  ;;  %4752 = vst [vmem:[#allocation6 + $0x80] sm:$0xf] %v4716_v21 }
 0x48d   :  { %v4718_v15 = vmul.f32 0.0625, %v4682_v44  ;;  %v4719_v0 = vmul.f32 0.0625, %v4683_v4 }
 0x48e   :  { %4753 = vst [vmem:[#allocation6 + $0x84] sm:$0xf] %v4717_v51 }
 0x48f   :  { %4754 = vst [vmem:[#allocation6 + $0x88] sm:$0xf] %v4718_v15  ;;  %4755 = vst [vmem:[#allocation6 + $0x8c] sm:$0xf] %v4719_v0 }
 0x490   :  { %4972 = shalt.err (!%p4969_p9)
}
 0x491   :  { %s4991_s15 = smov 64   ;;  %s4992_s16 = smov 4  }
 0x492   :  { %4767 = dma.vmem_to_hbm [thread:$0]  %s4762_s13, 2304, %s11710_s1, [#allocation5], %s4991_s15, %s4991_s15, %s4992_s16  }
 0x493   :  { %4983 = dma.done.wait [#allocation5], 2304  }
 0x494   :  { %4984 = vsyncadd [#allocation5], 4294964992 }
 0x495   :  { %4771 = vsyncpa [#allocation4], 1 }
 0x496   :  { %4772 = vsyncpa [#allocation5], 1 }

</bundles_post_ra>
